<compile_context>
chip_gen: v6e
topology: v6e:2x2x1
jax: 0.10.0
libtpu: 0.0.40
codegen_flags: <defaults>
</compile_context>

<pallas_src>
import functools

import jax
import jax.numpy as jnp
from jax.experimental import pallas as pl
from jax.experimental.pallas import tpu as pltpu

BN_EPS = 0.001
LANE = 128


def _pad128(n):
    return ((n + LANE - 1) // LANE) * LANE


# ----------------------------------------------------------------------------
# Pallas kernels
# ----------------------------------------------------------------------------
def _conv3x3_kernel(x_ref, w_ref, b_ref, o_ref, *, act):
    """Fused 3x3 conv (+folded BN) (+SiLU) on one NHWC image tile.

    x_ref: (1, H+2, W+2, Cin)   zero-padded input tile (VMEM resident)
    w_ref: (9, Cin, Coutp)      tap-major folded weights, Coutp lane-padded
    b_ref: (1, Coutp)           folded bias (zero in padded lanes)
    o_ref: (1, H*W, Coutp)      lane-dense output (spatial flattened)
    """
    Hp, Wp, cin = x_ref.shape[1], x_ref.shape[2], x_ref.shape[3]
    H, W = Hp - 2, Wp - 2
    coutp = o_ref.shape[-1]
    acc = jnp.zeros((H * W, coutp), jnp.float32)
    # Window extraction fused into the kernel: 9 shifted MXU accumulations.
    for dy in range(3):
        for dx in range(3):
            win = x_ref[0, dy:dy + H, dx:dx + W, :].reshape(H * W, cin)
            acc = acc + jnp.dot(win, w_ref[dy * 3 + dx],
                                preferred_element_type=jnp.float32)
    z = acc + b_ref[...]
    if act:
        # SiLU: the divide goes to the EUP slot via approx reciprocal.
        z = z * pl.reciprocal(1.0 + jnp.exp(-z), approx=True)
    o_ref[0] = z.astype(o_ref.dtype)


def _conv1x1_kernel(x_ref, w_ref, b_ref, o_ref, *, act):
    """(TM, Cin) @ (Cin, Coutp) + bias (+ optional SiLU)."""
    z = jnp.dot(x_ref[...], w_ref[...], preferred_element_type=jnp.float32)
    z = z + b_ref[...]
    if act:
        z = z * pl.reciprocal(1.0 + jnp.exp(-z), approx=True)
    o_ref[...] = z.astype(o_ref.dtype)


def _decode_kernel(y_ref, anch_ref, strd_ref, o_ref, *, ch, nc):
    """DFL + box decode + class sigmoid for one batch element.

    y_ref:    (1, A, 4*ch + nc)  [box distribution logits | class logits]
    anch_ref: (A, 2)             anchor centers (x, y)
    strd_ref: (A, 1)             per-anchor stride
    o_ref:    (1, A, 4 + nc)     [cx, cy, w, h (pixels) | class probabilities]
    """
    reg = 4 * ch
    y = y_ref[0]
    box = y[:, :reg]
    cls = y[:, reg:]

    # DFL: softmax over each of the 4 groups of `ch` bins, then expectation
    # E[bin index].  A per-row (per-anchor) max shift is shared by all groups,
    # so the grouped softmax stays exact.  The grouped sums are expressed as
    # matmuls against block-diagonal constants (MXU, no lane-dim reshape).
    m = jnp.max(box, axis=-1, keepdims=True)
    e = jnp.exp(box - m)                                          # (A, reg)
    rows = jax.lax.broadcasted_iota(jnp.int32, (reg, 4), 0)
    cols = jax.lax.broadcasted_iota(jnp.int32, (reg, 4), 1)
    grp = (rows // ch) == cols
    g_sum = grp.astype(jnp.float32)                               # group sums
    g_exp = jnp.where(grp, (rows % ch).astype(jnp.float32), 0.0)  # bin index
    den = jnp.dot(e, g_sum, preferred_element_type=jnp.float32)   # (A, 4)
    num = jnp.dot(e, g_exp, preferred_element_type=jnp.float32)   # (A, 4)
    dist = num / den                                              # (l, t, r, b)

    anch = anch_ref[...]                                          # (A, 2)
    lt = anch - dist[:, :2]
    rb = anch + dist[:, 2:]
    xy = (lt + rb) * 0.5
    wh = rb - lt
    boxes = jnp.concatenate([xy, wh], axis=-1) * strd_ref[...]
    probs = pl.reciprocal(1.0 + jnp.exp(-cls), approx=True)       # sigmoid
    o_ref[0] = jnp.concatenate([boxes, probs], axis=-1).astype(o_ref.dtype)


# ----------------------------------------------------------------------------
# Kernel wrappers
# ----------------------------------------------------------------------------
_MOSAIC = pltpu.CompilerParams(dimension_semantics=("parallel",),
                               vmem_limit_bytes=32 * 1024 * 1024)


def conv3x3_bn_silu(p, x):
    """x: (N, H, W, Cin) -> (N, H, W, Coutp), Coutp lane-padded to 128."""
    N, H, W, cin = x.shape
    xp = jnp.pad(x, ((0, 0), (1, 1), (1, 1), (0, 0)))
    coutp = p["w"].shape[-1]
    out = pl.pallas_call(
        functools.partial(_conv3x3_kernel, act=True),
        out_shape=jax.ShapeDtypeStruct((N, H * W, coutp), jnp.float32),
        grid=(N,),
        in_specs=[
            pl.BlockSpec((1, H + 2, W + 2, cin), lambda n: (n, 0, 0, 0)),
            pl.BlockSpec((9, cin, coutp), lambda n: (0, 0, 0)),
            pl.BlockSpec((1, coutp), lambda n: (0, 0)),
        ],
        out_specs=pl.BlockSpec((1, H * W, coutp), lambda n: (n, 0, 0)),
        compiler_params=_MOSAIC,
    )(xp, p["w"], p["b"])
    return out.reshape(N, H, W, coutp)


def conv1x1(p, x, act=False):
    """1x1 conv over NHWC x -> (N, H*W, Coutp) as a flat matmul, TM <= 1024."""
    N, H, W, cin = x.shape
    M = N * H * W
    xm = x.reshape(M, cin)                     # free view (channels-last)
    coutp = p["w"].shape[-1]
    TM = M if M <= 1024 else 1024
    Mp = pl.cdiv(M, TM) * TM
    if Mp != M:
        xm = jnp.pad(xm, ((0, Mp - M), (0, 0)))
    out = pl.pallas_call(
        functools.partial(_conv1x1_kernel, act=act),
        out_shape=jax.ShapeDtypeStruct((Mp, coutp), jnp.float32),
        grid=(Mp // TM,),
        in_specs=[
            pl.BlockSpec((TM, cin), lambda i: (i, 0)),
            pl.BlockSpec((cin, coutp), lambda i: (0, 0)),
            pl.BlockSpec((1, coutp), lambda i: (0, 0)),
        ],
        out_specs=pl.BlockSpec((TM, coutp), lambda i: (i, 0)),
        compiler_params=_MOSAIC,
    )(xm, p["w"], p["b"])
    return out[:M].reshape(N, H * W, coutp)


# ----------------------------------------------------------------------------
# Parameter init (deterministic, synthetic) -- BN folded, Cout lane-padded.
# ----------------------------------------------------------------------------
def init_conv_bn(key, cin, cin_pad, cout):
    """Conv(3x3, no bias) + BatchNorm(eps=0.001) + SiLU, BN folded (eval)."""
    kw, kg, kb, km, kv = jax.random.split(key, 5)
    w = 0.1 * jax.random.normal(kw, (3, 3, cin, cout), jnp.float32)   # HWIO
    gamma = 1.0 + 0.1 * jax.random.normal(kg, (cout,), jnp.float32)
    beta = 0.1 * jax.random.normal(kb, (cout,), jnp.float32)
    mean = 0.1 * jax.random.normal(km, (cout,), jnp.float32)
    var = 1.0 + 0.1 * jnp.abs(jax.random.normal(kv, (cout,), jnp.float32))
    scale = gamma / jnp.sqrt(var + BN_EPS)
    w_fold = (w * scale).reshape(9, cin, cout)     # tap-major (ky, kx)
    b_fold = beta - mean * scale
    coutp = _pad128(cout)
    # Zero pad-lanes: padded output channels stay exactly 0 after SiLU, so the
    # padding chains through the branch without corrections.
    wk = jnp.zeros((9, cin_pad, coutp), jnp.float32).at[:, :cin, :cout].set(w_fold)
    bk = jnp.zeros((1, coutp), jnp.float32).at[:, :cout].set(b_fold)
    return {"w": wk, "b": bk, "cout": cout}


def init_conv1x1(key, cin, cin_pad, cout):
    """Plain Conv2d(cin, cout, 1) with bias (no BN / activation)."""
    kw, kb = jax.random.split(key)
    w = 0.1 * jax.random.normal(kw, (cin, cout), jnp.float32)
    b = 0.1 * jax.random.normal(kb, (cout,), jnp.float32)
    coutp = _pad128(cout)
    wk = jnp.zeros((cin_pad, coutp), jnp.float32).at[:cin, :cout].set(w)
    bk = jnp.zeros((1, coutp), jnp.float32).at[:, :cout].set(b)
    return {"w": wk, "b": bk, "cout": cout}


def init_head(key, nc, filters, ch=16):
    c1 = max(filters[0], nc)
    c2 = max(filters[0] // 4, ch * 4)
    keys = jax.random.split(key, 6 * len(filters))
    box_b, cls_b = [], []
    for i, f in enumerate(filters):
        k0, k1, k2, k3, k4, k5 = keys[6 * i:6 * i + 6]
        box_b.append({
            "c0": init_conv_bn(k0, f, f, c2),
            "c1": init_conv_bn(k1, c2, _pad128(c2), c2),
            "c2": init_conv1x1(k2, c2, _pad128(c2), 4 * ch),
        })
        cls_b.append({
            "c0": init_conv_bn(k3, f, f, c1),
            "c1": init_conv_bn(k4, c1, _pad128(c1), c1),
            "c2": init_conv1x1(k5, c1, _pad128(c1), nc),
        })
    return {"box": box_b, "cls": cls_b, "nc": nc, "ch": ch}


# ----------------------------------------------------------------------------
# Forward pass (inference decode, matching Head.forward eval path)
# ----------------------------------------------------------------------------
def head_forward(params, feats_nchw, strides):
    nc, ch = params["nc"], params["ch"]
    reg = 4 * ch
    per_level, anchor_pts, stride_vals = [], [], []
    for i, x_nchw in enumerate(feats_nchw):
        x = jnp.transpose(x_nchw, (0, 2, 3, 1))               # NCHW -> NHWC
        N, H, W, _ = x.shape
        bp, cp = params["box"][i], params["cls"][i]
        # box branch: Conv3 -> Conv3 -> Conv2d(1x1, 4*ch)
        b = conv3x3_bn_silu(bp["c0"], x)
        b = conv3x3_bn_silu(bp["c1"], b)
        b = conv1x1(bp["c2"], b)[..., :reg]                   # (N, H*W, 64)
        # cls branch: Conv3 -> Conv3 -> Conv2d(1x1, nc)
        c = conv3x3_bn_silu(cp["c0"], x)
        c = conv3x3_bn_silu(cp["c1"], c)
        c = conv1x1(cp["c2"], c)[..., :nc]                    # (N, H*W, nc)
        per_level.append(jnp.concatenate([b, c], axis=-1))    # (N, H*W, no)
        # make_anchors(offset=0.5) for this level
        sx = jnp.arange(W, dtype=jnp.float32) + 0.5
        sy = jnp.arange(H, dtype=jnp.float32) + 0.5
        syg, sxg = jnp.meshgrid(sy, sx, indexing="ij")
        anchor_pts.append(jnp.stack([sxg, syg], axis=-1).reshape(-1, 2))
        stride_vals.append(jnp.full((H * W, 1), strides[i], jnp.float32))

    y = jnp.concatenate(per_level, axis=1)                    # (N, A, no)
    anchors = jnp.concatenate(anchor_pts, axis=0)             # (A, 2)
    strd = jnp.concatenate(stride_vals, axis=0)               # (A, 1)
    N, A, no = y.shape

    out = pl.pallas_call(
        functools.partial(_decode_kernel, ch=ch, nc=nc),
        out_shape=jax.ShapeDtypeStruct((N, A, 4 + nc), jnp.float32),
        grid=(N,),
        in_specs=[
            pl.BlockSpec((1, A, no), lambda n: (n, 0, 0)),
            pl.BlockSpec((A, 2), lambda n: (0, 0)),
            pl.BlockSpec((A, 1), lambda n: (0, 0)),
        ],
        out_specs=pl.BlockSpec((1, A, 4 + nc), lambda n: (n, 0, 0)),
        compiler_params=pltpu.CompilerParams(dimension_semantics=("parallel",)),
    )(y, anchors, strd)
    return jnp.transpose(out, (0, 2, 1))                      # (N, 4+nc, A)


# ----------------------------------------------------------------------------
if __name__ == "__main__":
    key = jax.random.PRNGKey(0)
    nc = 80
    filters = (16, 32, 64)            # channels of the P3/P4/P5 feature maps

    k_par, k1, k2, k3 = jax.random.split(key, 4)
    params = init_head(k_par, nc, filters)

    # P3 / P4 / P5 feature maps in NCHW, as the PyTorch Head expects.
    feats = [
        jax.random.normal(k1, (2, filters[0], 32, 32), jnp.float32),
        jax.random.normal(k2, (2, filters[1], 16, 16), jnp.float32),
        jax.random.normal(k3, (2, filters[2], 8, 8), jnp.float32),
    ]

    out = head_forward(params, feats, strides=(8.0, 16.0, 32.0))
    jax.block_until_ready(out)

    A = 32 * 32 + 16 * 16 + 8 * 8
    assert out.shape == (2, 4 + nc, A), out.shape
    assert bool(jnp.isfinite(out).all()), "non-finite values in head output"
    print("KERNEL_OK")
</pallas_src>

<mosaic_0001>
module attributes {stable_mosaic.version = 11 : i64} {
  func.func @_conv3x3_kernel(%arg0: i32, %arg1: memref<1x34x34x16xf32, #tpu.memory_space<vmem>>, %arg2: memref<9x16x128xf32, #tpu.memory_space<vmem>>, %arg3: memref<1x128xf32, #tpu.memory_space<vmem>>, %arg4: memref<1x1024x128xf32, #tpu.memory_space<vmem>>) attributes {dimension_semantics = [#tpu.dimension_semantics<parallel>], iteration_bounds = array<i64: 2>, scalar_prefetch = 0 : i64, scratch_operands = 0 : i64, tpu.core_type = #tpu.core_type<tc>, window_params = [{transform_indices = @transform_0, window_bounds = array<i64: 1, 34, 34, 16>}, {pipeline_mode = #tpu.pipeline_mode<synchronous>, transform_indices = @transform_1, window_bounds = array<i64: 9, 16, 128>}, {pipeline_mode = #tpu.pipeline_mode<synchronous>, transform_indices = @transform_2, window_bounds = array<i64: 1, 128>}, {transform_indices = @transform_3, window_bounds = array<i64: 1, 1024, 128>}]} {
    %cst = arith.constant 0.000000e+00 : f32
    %0 = vector.broadcast %cst : f32 to vector<1024x128xf32>
    %c0 = arith.constant 0 : index
    %c0_0 = arith.constant 0 : index
    %c0_1 = arith.constant 0 : index
    %c0_2 = arith.constant 0 : index
    %1 = vector.load %arg1[%c0, %c0_0, %c0_1, %c0_2] : memref<1x34x34x16xf32, #tpu.memory_space<vmem>>, vector<1x32x32x16xf32>
    %2 = vector.shape_cast %1 : vector<1x32x32x16xf32> to vector<32x32x16xf32>
    %3 = vector.shape_cast %2 : vector<32x32x16xf32> to vector<1024x16xf32>
    %c0_3 = arith.constant 0 : index
    %c0_4 = arith.constant 0 : index
    %c0_5 = arith.constant 0 : index
    %4 = vector.load %arg2[%c0_3, %c0_4, %c0_5] : memref<9x16x128xf32, #tpu.memory_space<vmem>>, vector<1x16x128xf32>
    %5 = vector.shape_cast %4 : vector<1x16x128xf32> to vector<16x128xf32>
    %cst_6 = arith.constant dense<0.000000e+00> : vector<1024x128xf32>
    %6 = tpu.matmul %3, %5, %cst_6 {dimension_numbers = #tpu.dot_dimension_numbers<[1], [0], [0], [1], [0, 0, 1, 1], [], []>} : vector<1024x16xf32>, vector<16x128xf32>, vector<1024x128xf32> -> vector<1024x128xf32>
    %7 = arith.addf %0, %6 : vector<1024x128xf32>
    %c0_7 = arith.constant 0 : index
    %c0_8 = arith.constant 0 : index
    %c1 = arith.constant 1 : index
    %c0_9 = arith.constant 0 : index
    %8 = vector.load %arg1[%c0_7, %c0_8, %c1, %c0_9] : memref<1x34x34x16xf32, #tpu.memory_space<vmem>>, vector<1x32x32x16xf32>
    %9 = vector.shape_cast %8 : vector<1x32x32x16xf32> to vector<32x32x16xf32>
    %10 = vector.shape_cast %9 : vector<32x32x16xf32> to vector<1024x16xf32>
    %c1_10 = arith.constant 1 : index
    %c0_11 = arith.constant 0 : index
    %c0_12 = arith.constant 0 : index
    %11 = vector.load %arg2[%c1_10, %c0_11, %c0_12] : memref<9x16x128xf32, #tpu.memory_space<vmem>>, vector<1x16x128xf32>
    %12 = vector.shape_cast %11 : vector<1x16x128xf32> to vector<16x128xf32>
    %cst_13 = arith.constant dense<0.000000e+00> : vector<1024x128xf32>
    %13 = tpu.matmul %10, %12, %cst_13 {dimension_numbers = #tpu.dot_dimension_numbers<[1], [0], [0], [1], [0, 0, 1, 1], [], []>} : vector<1024x16xf32>, vector<16x128xf32>, vector<1024x128xf32> -> vector<1024x128xf32>
    %14 = arith.addf %7, %13 : vector<1024x128xf32>
    %c0_14 = arith.constant 0 : index
    %c0_15 = arith.constant 0 : index
    %c2 = arith.constant 2 : index
    %c0_16 = arith.constant 0 : index
    %15 = vector.load %arg1[%c0_14, %c0_15, %c2, %c0_16] : memref<1x34x34x16xf32, #tpu.memory_space<vmem>>, vector<1x32x32x16xf32>
    %16 = vector.shape_cast %15 : vector<1x32x32x16xf32> to vector<32x32x16xf32>
    %17 = vector.shape_cast %16 : vector<32x32x16xf32> to vector<1024x16xf32>
    %c2_17 = arith.constant 2 : index
    %c0_18 = arith.constant 0 : index
    %c0_19 = arith.constant 0 : index
    %18 = vector.load %arg2[%c2_17, %c0_18, %c0_19] : memref<9x16x128xf32, #tpu.memory_space<vmem>>, vector<1x16x128xf32>
    %19 = vector.shape_cast %18 : vector<1x16x128xf32> to vector<16x128xf32>
    %cst_20 = arith.constant dense<0.000000e+00> : vector<1024x128xf32>
    %20 = tpu.matmul %17, %19, %cst_20 {dimension_numbers = #tpu.dot_dimension_numbers<[1], [0], [0], [1], [0, 0, 1, 1], [], []>} : vector<1024x16xf32>, vector<16x128xf32>, vector<1024x128xf32> -> vector<1024x128xf32>
    %21 = arith.addf %14, %20 : vector<1024x128xf32>
    %c0_21 = arith.constant 0 : index
    %c1_22 = arith.constant 1 : index
    %c0_23 = arith.constant 0 : index
    %c0_24 = arith.constant 0 : index
    %22 = vector.load %arg1[%c0_21, %c1_22, %c0_23, %c0_24] : memref<1x34x34x16xf32, #tpu.memory_space<vmem>>, vector<1x32x32x16xf32>
    %23 = vector.shape_cast %22 : vector<1x32x32x16xf32> to vector<32x32x16xf32>
    %24 = vector.shape_cast %23 : vector<32x32x16xf32> to vector<1024x16xf32>
    %c3 = arith.constant 3 : index
    %c0_25 = arith.constant 0 : index
    %c0_26 = arith.constant 0 : index
    %25 = vector.load %arg2[%c3, %c0_25, %c0_26] : memref<9x16x128xf32, #tpu.memory_space<vmem>>, vector<1x16x128xf32>
    %26 = vector.shape_cast %25 : vector<1x16x128xf32> to vector<16x128xf32>
    %cst_27 = arith.constant dense<0.000000e+00> : vector<1024x128xf32>
    %27 = tpu.matmul %24, %26, %cst_27 {dimension_numbers = #tpu.dot_dimension_numbers<[1], [0], [0], [1], [0, 0, 1, 1], [], []>} : vector<1024x16xf32>, vector<16x128xf32>, vector<1024x128xf32> -> vector<1024x128xf32>
    %28 = arith.addf %21, %27 : vector<1024x128xf32>
    %c0_28 = arith.constant 0 : index
    %c1_29 = arith.constant 1 : index
    %c1_30 = arith.constant 1 : index
    %c0_31 = arith.constant 0 : index
    %29 = vector.load %arg1[%c0_28, %c1_29, %c1_30, %c0_31] : memref<1x34x34x16xf32, #tpu.memory_space<vmem>>, vector<1x32x32x16xf32>
    %30 = vector.shape_cast %29 : vector<1x32x32x16xf32> to vector<32x32x16xf32>
    %31 = vector.shape_cast %30 : vector<32x32x16xf32> to vector<1024x16xf32>
    %c4 = arith.constant 4 : index
    %c0_32 = arith.constant 0 : index
    %c0_33 = arith.constant 0 : index
    %32 = vector.load %arg2[%c4, %c0_32, %c0_33] : memref<9x16x128xf32, #tpu.memory_space<vmem>>, vector<1x16x128xf32>
    %33 = vector.shape_cast %32 : vector<1x16x128xf32> to vector<16x128xf32>
    %cst_34 = arith.constant dense<0.000000e+00> : vector<1024x128xf32>
    %34 = tpu.matmul %31, %33, %cst_34 {dimension_numbers = #tpu.dot_dimension_numbers<[1], [0], [0], [1], [0, 0, 1, 1], [], []>} : vector<1024x16xf32>, vector<16x128xf32>, vector<1024x128xf32> -> vector<1024x128xf32>
    %35 = arith.addf %28, %34 : vector<1024x128xf32>
    %c0_35 = arith.constant 0 : index
    %c1_36 = arith.constant 1 : index
    %c2_37 = arith.constant 2 : index
    %c0_38 = arith.constant 0 : index
    %36 = vector.load %arg1[%c0_35, %c1_36, %c2_37, %c0_38] : memref<1x34x34x16xf32, #tpu.memory_space<vmem>>, vector<1x32x32x16xf32>
    %37 = vector.shape_cast %36 : vector<1x32x32x16xf32> to vector<32x32x16xf32>
    %38 = vector.shape_cast %37 : vector<32x32x16xf32> to vector<1024x16xf32>
    %c5 = arith.constant 5 : index
    %c0_39 = arith.constant 0 : index
    %c0_40 = arith.constant 0 : index
    %39 = vector.load %arg2[%c5, %c0_39, %c0_40] : memref<9x16x128xf32, #tpu.memory_space<vmem>>, vector<1x16x128xf32>
    %40 = vector.shape_cast %39 : vector<1x16x128xf32> to vector<16x128xf32>
    %cst_41 = arith.constant dense<0.000000e+00> : vector<1024x128xf32>
    %41 = tpu.matmul %38, %40, %cst_41 {dimension_numbers = #tpu.dot_dimension_numbers<[1], [0], [0], [1], [0, 0, 1, 1], [], []>} : vector<1024x16xf32>, vector<16x128xf32>, vector<1024x128xf32> -> vector<1024x128xf32>
    %42 = arith.addf %35, %41 : vector<1024x128xf32>
    %c0_42 = arith.constant 0 : index
    %c2_43 = arith.constant 2 : index
    %c0_44 = arith.constant 0 : index
    %c0_45 = arith.constant 0 : index
    %43 = vector.load %arg1[%c0_42, %c2_43, %c0_44, %c0_45] : memref<1x34x34x16xf32, #tpu.memory_space<vmem>>, vector<1x32x32x16xf32>
    %44 = vector.shape_cast %43 : vector<1x32x32x16xf32> to vector<32x32x16xf32>
    %45 = vector.shape_cast %44 : vector<32x32x16xf32> to vector<1024x16xf32>
    %c6 = arith.constant 6 : index
    %c0_46 = arith.constant 0 : index
    %c0_47 = arith.constant 0 : index
    %46 = vector.load %arg2[%c6, %c0_46, %c0_47] : memref<9x16x128xf32, #tpu.memory_space<vmem>>, vector<1x16x128xf32>
    %47 = vector.shape_cast %46 : vector<1x16x128xf32> to vector<16x128xf32>
    %cst_48 = arith.constant dense<0.000000e+00> : vector<1024x128xf32>
    %48 = tpu.matmul %45, %47, %cst_48 {dimension_numbers = #tpu.dot_dimension_numbers<[1], [0], [0], [1], [0, 0, 1, 1], [], []>} : vector<1024x16xf32>, vector<16x128xf32>, vector<1024x128xf32> -> vector<1024x128xf32>
    %49 = arith.addf %42, %48 : vector<1024x128xf32>
    %c0_49 = arith.constant 0 : index
    %c2_50 = arith.constant 2 : index
    %c1_51 = arith.constant 1 : index
    %c0_52 = arith.constant 0 : index
    %50 = vector.load %arg1[%c0_49, %c2_50, %c1_51, %c0_52] : memref<1x34x34x16xf32, #tpu.memory_space<vmem>>, vector<1x32x32x16xf32>
    %51 = vector.shape_cast %50 : vector<1x32x32x16xf32> to vector<32x32x16xf32>
    %52 = vector.shape_cast %51 : vector<32x32x16xf32> to vector<1024x16xf32>
    %c7 = arith.constant 7 : index
    %c0_53 = arith.constant 0 : index
    %c0_54 = arith.constant 0 : index
    %53 = vector.load %arg2[%c7, %c0_53, %c0_54] : memref<9x16x128xf32, #tpu.memory_space<vmem>>, vector<1x16x128xf32>
    %54 = vector.shape_cast %53 : vector<1x16x128xf32> to vector<16x128xf32>
    %cst_55 = arith.constant dense<0.000000e+00> : vector<1024x128xf32>
    %55 = tpu.matmul %52, %54, %cst_55 {dimension_numbers = #tpu.dot_dimension_numbers<[1], [0], [0], [1], [0, 0, 1, 1], [], []>} : vector<1024x16xf32>, vector<16x128xf32>, vector<1024x128xf32> -> vector<1024x128xf32>
    %56 = arith.addf %49, %55 : vector<1024x128xf32>
    %c0_56 = arith.constant 0 : index
    %c2_57 = arith.constant 2 : index
    %c2_58 = arith.constant 2 : index
    %c0_59 = arith.constant 0 : index
    %57 = vector.load %arg1[%c0_56, %c2_57, %c2_58, %c0_59] : memref<1x34x34x16xf32, #tpu.memory_space<vmem>>, vector<1x32x32x16xf32>
    %58 = vector.shape_cast %57 : vector<1x32x32x16xf32> to vector<32x32x16xf32>
    %59 = vector.shape_cast %58 : vector<32x32x16xf32> to vector<1024x16xf32>
    %c8 = arith.constant 8 : index
    %c0_60 = arith.constant 0 : index
    %c0_61 = arith.constant 0 : index
    %60 = vector.load %arg2[%c8, %c0_60, %c0_61] : memref<9x16x128xf32, #tpu.memory_space<vmem>>, vector<1x16x128xf32>
    %61 = vector.shape_cast %60 : vector<1x16x128xf32> to vector<16x128xf32>
    %cst_62 = arith.constant dense<0.000000e+00> : vector<1024x128xf32>
    %62 = tpu.matmul %59, %61, %cst_62 {dimension_numbers = #tpu.dot_dimension_numbers<[1], [0], [0], [1], [0, 0, 1, 1], [], []>} : vector<1024x16xf32>, vector<16x128xf32>, vector<1024x128xf32> -> vector<1024x128xf32>
    %63 = arith.addf %56, %62 : vector<1024x128xf32>
    %c0_63 = arith.constant 0 : index
    %c0_64 = arith.constant 0 : index
    %64 = vector.load %arg3[%c0_63, %c0_64] : memref<1x128xf32, #tpu.memory_space<vmem>>, vector<1x128xf32>
    %65 = vector.broadcast %64 : vector<1x128xf32> to vector<1024x128xf32>
    %66 = arith.addf %63, %65 : vector<1024x128xf32>
    %cst_65 = arith.constant 0.000000e+00 : f32
    %67 = vector.broadcast %cst_65 : f32 to vector<1024x128xf32>
    %68 = arith.subf %67, %66 : vector<1024x128xf32>
    %69 = math.exp %68 : vector<1024x128xf32>
    %cst_66 = arith.constant 1.000000e+00 : f32
    %70 = vector.broadcast %cst_66 : f32 to vector<1024x128xf32>
    %71 = arith.addf %70, %69 : vector<1024x128xf32>
    %72 = tpu.reciprocal %71 {approx = true} : vector<1024x128xf32> -> vector<1024x128xf32>
    %73 = arith.mulf %66, %72 : vector<1024x128xf32>
    %c0_67 = arith.constant 0 : index
    %c0_68 = arith.constant 0 : index
    %c0_69 = arith.constant 0 : index
    %74 = vector.load %arg4[%c0_67, %c0_68, %c0_69] : memref<1x1024x128xf32, #tpu.memory_space<vmem>>, vector<1x1024x128xf32>
    %75 = vector.shape_cast %74 : vector<1x1024x128xf32> to vector<1024x128xf32>
    %76 = vector.shape_cast %73 : vector<1024x128xf32> to vector<1x1024x128xf32>
    tpu.vector_store %arg4[%c0_67, %c0_68, %c0_69], %76 {strides = array<i32>} : memref<1x1024x128xf32, #tpu.memory_space<vmem>>, vector<1x1024x128xf32>,
    return
  }
  func.func @transform_0(%arg0: i32) -> (i32, i32, i32, i32) {
    %c0_i32 = arith.constant 0 : i32
    %c0_i32_0 = arith.constant 0 : i32
    %c0_i32_1 = arith.constant 0 : i32
    %c0_i32_2 = arith.constant 0 : i32
    return %arg0, %c0_i32, %c0_i32_0, %c0_i32_1 : i32, i32, i32, i32
  }
  func.func @transform_1(%arg0: i32) -> (i32, i32, i32) {
    %c0_i32 = arith.constant 0 : i32
    %c0_i32_0 = arith.constant 0 : i32
    %c0_i32_1 = arith.constant 0 : i32
    %c0_i32_2 = arith.constant 0 : i32
    return %c0_i32, %c0_i32_0, %c0_i32_1 : i32, i32, i32
  }
  func.func @transform_2(%arg0: i32) -> (i32, i32) {
    %c0_i32 = arith.constant 0 : i32
    %c0_i32_0 = arith.constant 0 : i32
    %c0_i32_1 = arith.constant 0 : i32
    return %c0_i32, %c0_i32_0 : i32, i32
  }
  func.func @transform_3(%arg0: i32) -> (i32, i32, i32) {
    %c0_i32 = arith.constant 0 : i32
    %c0_i32_0 = arith.constant 0 : i32
    %c0_i32_1 = arith.constant 0 : i32
    return %arg0, %c0_i32, %c0_i32_0 : i32, i32, i32
  }
}

</mosaic_0001>

<bundles_post_ra>
// kernel: tpu_custom_call.1
= control target key start
LH: loop header
LB: loop body
LE: loop exit
PB: predicated region body
PF: predicated region fallthrough
CT: control target
= control target key end

     0   :  { %8 = vsyncpa [#allocation3], 0  ;;  %s23974_s0 = inlined_call_operand.vmem [shape: f32[2,34,34,16], index: 0, kind: input, shape index: {}]   ;;  %s23975_s1 = inlined_call_operand.vmem [shape: f32[9,16,128], index: 1, kind: input, shape index: {}]   ;;  %s23976_s2 = inlined_call_operand.vmem [shape: f32[1,128], index: 2, kind: input, shape index: {}]   ;;  %s23977_s3 = inlined_call_operand.hbm [shape: f32[2,1024,128], index: 3, kind: output, shape index: {}]  }
   0x1   :  { %10 = vsyncpa [#allocation3 + $0x1], 0  ;;  %s18684_s12 = smov 0   ;;  %s18686_s13 = smov 0  }
   0x2   :  { %s18688_s14 = smov 0   ;;  %s18690_s15 = smov 0  }
   0x3 LB: > { %s18705_s16 = sadd.s32 4294967295, %s18659_s15   ;;  %s13154_s17 = sadd.s32 4294967294, %s18659_s15   ;;  %s18659_s15 = sphi %s18690_s15, %s24637_s15   ;;  %s18655_s14 = sphi %s18688_s14, %s24636_s14   ;;  %s18651_s13 = sphi %s18686_s13, %s24635_s13   ;;  %s18647_s12 = sphi %s18684_s12, %s24634_s12  }
   0x4   : > { %s18709_s18 = sadd.s32 1, %s18659_s15   ;;  %s91_s19 = sadd.s32 1, %s18655_s14 }
   0x5   : > { %s88_s20 = ssub.s32 %s18659_s15, %s18709_s18  ;;  %p101_p0 = scmp.ne.s32.totalorder %s18655_s14, %s18651_s13 }
   0x6   : > { %p89_p1 = scmp.eq.s32.totalorder %s88_s20, 0  ;;  %p102_p2 = scmp.eq.s32.totalorder %s18705_s16, 1 }
   0x7   : > { %p107_p3 = scmp.ne.s32.totalorder %s18651_s13, %s18647_s12  ;;  %p108_p4 = scmp.eq.s32.totalorder %s13154_s17, 1 }
   0x8   : > { %s18720_s21 = scalar_select %p89_p1, %s18655_s14, %s91_s19  }
   0x9   : > { %p18722_p5 = por %p102_p2, %p101_p0  ;;  %p18726_p6 = por %p108_p4, %p107_p3 }
   0xa   : > { %p13157_p7 = scmp.ge.s32.totalorder %s18659_s15, 1  ;;  %p140_p8 = scmp.lt.s32.totalorder %s18659_s15, 3 }
   0xc   : > { %p141_p9 = pnand %p13157_p7, %p140_p8 }
   0xe   : > { %144 = sbr.rel (%p141_p9) target bundleno = 1458 (0x5b2), region = 32 }
  0x13   : > { %v13161_v0 = vld [vmem:[%s23975_s1 + $0x18] sm:$0xff]  ;;  %v13160_v1 = vld [vmem:[%s23975_s1 + $0x10] sm:$0xff]  ;;  %p164_p10 = scmp.lt.s32.totalorder %s18705_s16, 1  ;;  %v298_v2 = vld [vmem:[%s23975_s1 + $0x8] sm:$0xff]  ;;  %vm430_vm0 = vcmask 130048   ;;  %s161_s7 = sand.u32 1, %s18651_s13  }
  0x14   : > { %18037 = vmatprep.subr.mxu1 %v13161_v0  ;;  %16273 = vmatprep.subr.mxu0 %v13161_v0  ;;  %v13419_v3 = vld [vmem:[%s23975_s1 + $0x28] sm:$0xff]  ;;  %v297_v10 = vld [vmem:[%s23975_s1] sm:$0xff]  ;;  %v18778_v16 = vld [vmem:[%s23975_s1 + $0x38] sm:$0xff]  ;;  %s22571_s8 = sshll.u32 %s161_s7, 10  ;;  %s15102_s25 = sshll.u32 %s18705_s16, 14 }
  0x15   : > { %18039 = vmatpush3.msra.mxu1 %v13161_v0  ;;  %16274 = vmatpush3.msra.mxu0 %v13161_v0  ;;  %s165_s28 = scalar_select %p164_p10, %s18705_s16, 1  ;;  %v13418_v11 = vld [vmem:[%s23975_s1 + $0x20] sm:$0xff]  ;;  %v18862_v57 = vld [vmem:[%s23975_s1 + $0x48] sm:$0xff] }
  0x16   : > { %18038 = vmatprep.subr.mxu1 %v13160_v1  ;;  %16275 = vmatprep.subr.mxu0 %v13160_v1  ;;  %s22603_s10 = scalar_lea.vmem [#allocation2], %s22571_s8  ;;  %s23926_s29 = scalar_lea.hbm %s23977_s3, %s15102_s25 }
  0x17   : > { %18040 = vmatpush3.msra.mxu1 %v13160_v1  ;;  %16276 = vmatpush3.msra.mxu0 %v13160_v1  ;;  %s18041_s6 = smul.u32 1360, %s165_s28  ;;  %s13092_s26 = sshll.u32 %s22603_s10, 4  ;;  %s23928_s26 = int_to_ptr.vmem [resolvable:$true] %s13092_s26 }
  0x18   : > { %16469 = vmatprep.subr.mxu1 %v298_v2  ;;  %16665 = vmatprep.subr.mxu0 %v13419_v3  ;;  %s23934_s30 = scalar_lea.sflag [#allocation3], %s161_s7  ;;  %s18599_s16 = scalar_lea.vmem %s23928_s26, 16384 }
  0x19   : > { %s18749_s9 = scalar_lea.vmem %s23974_s0, %s18041_s6  ;;  %p18600_p11 = scmp.ne.s32.totalorder %s23928_s26, %s18599_s16 }
  0x1a   : > { %v299_v4 = vld [vmem:[%s18749_s9 + $0x1] sm:$0xff]  ;;  %v300_v6 = vld [vmem:[%s18749_s9 + $0x9] sm:$0xff]  ;;  %v301_v8 = vld [vmem:[%s18749_s9 + $0x11] sm:$0xff]  ;;  %s18661_s4 = smov [#allocation2]  }
  0x1b   : > { %v363_v5 = vld [vmem:[%s18749_s9 + $0x281] sm:$0xff]  ;;  %16277 = vmatprep.mubr.msk.f32.mxu0 %vm430_vm0, %v299_v4  ;;  %v364_v7 = vld [vmem:[%s18749_s9 + $0x289] sm:$0xff]  ;;  %v365_v9 = vld [vmem:[%s18749_s9 + $0x291] sm:$0xff]  ;;  %p18601_p12 = pnand %p18600_p11, %p18722_p5  ;;  %s18603_s5 = sshll.u32 %s18661_s4, 4  ;;  %s18604_s5 = int_to_ptr.vmem [resolvable:$false] %s18603_s5 }
  0x1c   : > { %16373 = vmatprep.mubr.msk.f32.mxu1 %vm430_vm0, %v363_v5  ;;  %16278 = vmatmul.mubr.msk.f32.vlgmr.msra.gmra.mxu0 %vm430_vm0, %v300_v6  ;;  %v302_v12 = vld [vmem:[%s18749_s9 + $0x19] sm:$0xff]  ;;  %v303_v14 = vld [vmem:[%s18749_s9 + $0x29] sm:$0xff]  ;;  %v304_v17 = vld [vmem:[%s18749_s9 + $0x31] sm:$0xff]  ;;  %s18605_s6 = scalar_lea.vmem %s18604_s5, 32768  ;;  %p18606_p0 = scmp.lt.s32.totalorder %s23928_s26, %s18604_s5 }
  0x1d   : > { %16374 = vmatmul.mubr.msk.f32.vlgmr.msra.gmra.mxu1 %vm430_vm0, %v364_v7  ;;  %16666 = vmatpush3.msra.mxu0 %v13419_v3  ;;  %v366_v13 = vld [vmem:[%s18749_s9 + $0x299] sm:$0xff]  ;;  %v367_v15 = vld [vmem:[%s18749_s9 + $0x2a9] sm:$0xff]  ;;  %v368_v18 = vld [vmem:[%s18749_s9 + $0x2b1] sm:$0xff]  ;;  %p18602_p13 = pneg %p18601_p12  ;;  %p18607_p1 = scmp.lt.s32.totalorder %s18605_s6, %s18599_s16 }
  0x1e   : > { %16470 = vmatpush3.msra.mxu1 %v298_v2  ;;  %16280 = vmatprep.mubr.msk.f32.mxu0 %vm430_vm0, %v301_v8  ;;  %v305_v19 = vld [vmem:[%s18749_s9 + $0x39] sm:$0xff]  ;;  %v306_v21 = vld [vmem:[%s18749_s9 + $0x41] sm:$0xff]  ;;  %v307_v23 = vld [vmem:[%s18749_s9 + $0x51] sm:$0xff] }
  0x1f   : > { %16376 = vmatprep.mubr.msk.f32.mxu1 %vm430_vm0, %v365_v9  ;;  %16471 = vmatprep.subr.mxu1 %v297_v10  ;;  %v369_v20 = vld [vmem:[%s18749_s9 + $0x2b9] sm:$0xff]  ;;  %v370_v22 = vld [vmem:[%s18749_s9 + $0x2c1] sm:$0xff]  ;;  %v371_v24 = vld [vmem:[%s18749_s9 + $0x2d1] sm:$0xff]  ;;  %p18608_p2 = por %p18607_p1, %p18606_p0 }
  0x20   : > { %16667 = vmatprep.subr.mxu0 %v13418_v11  ;;  %16281 = vmatmul.mubr.msk.f32.gmra.mxu0 %vm430_vm0, %v302_v12  ;;  %v308_v25 = vld [vmem:[%s18749_s9 + $0x59] sm:$0xff]  ;;  %v309_v27 = vld [vmem:[%s18749_s9 + $0x61] sm:$0xff]  ;;  %v310_v29 = vld [vmem:[%s18749_s9 + $0x69] sm:$0xff] }
  0x21   : > { %16377 = vmatmul.mubr.msk.f32.gmra.mxu1 %vm430_vm0, %v366_v13  ;;  %16283 = vmatprep.mubr.msk.f32.mxu0 %vm430_vm0, %v303_v14  ;;  %v372_v26 = vld [vmem:[%s18749_s9 + $0x2d9] sm:$0xff]  ;;  %v373_v28 = vld [vmem:[%s18749_s9 + $0x2e1] sm:$0xff]  ;;  %v374_v30 = vld [vmem:[%s18749_s9 + $0x2e9] sm:$0xff]  ;;  %p18609_p3 = pnand %p18608_p2, %p18602_p13 }
  0x22   : > { %16379 = vmatprep.mubr.msk.f32.mxu1 %vm430_vm0, %v367_v15  ;;  %16472 = vmatpush3.msra.mxu1 %v297_v10  ;;  %v311_v31 = vld [vmem:[%s18749_s9 + $0x79] sm:$0xff]  ;;  %v312_v33 = vld [vmem:[%s18749_s9 + $0x81] sm:$0xff]  ;;  %v313_v35 = vld [vmem:[%s18749_s9 + $0x89] sm:$0xff] }
  0x23   : > { %16668 = vmatpush3.msra.mxu0 %v13418_v11  ;;  %16861 = vmatprep.subr.mxu1 %v18778_v16  ;;  %v375_v32 = vld [vmem:[%s18749_s9 + $0x2f9] sm:$0xff]  ;;  %v376_v34 = vld [vmem:[%s18749_s9 + $0x301] sm:$0xff]  ;;  %v377_v36 = vld [vmem:[%s18749_s9 + $0x309] sm:$0xff] }
  0x24   : > { %16284 = vmatmul.mubr.msk.f32.gmra.mxu0 %vm430_vm0, %v304_v17  ;;  %v314_v37 = vld [vmem:[%s18749_s9 + $0x91] sm:$0xff]  ;;  %v315_v39 = vld [vmem:[%s18749_s9 + $0xa1] sm:$0xff]  ;;  %v316_v41 = vld [vmem:[%s18749_s9 + $0xa9] sm:$0xff]  ;;  %17057 = vmatprep.subr.mxu0 %v18862_v57 }
  0x25   : > { %16380 = vmatmul.mubr.msk.f32.gmra.mxu1 %vm430_vm0, %v368_v18  ;;  %16286 = vmatprep.mubr.msk.f32.mxu0 %vm430_vm0, %v305_v19  ;;  %v378_v38 = vld [vmem:[%s18749_s9 + $0x311] sm:$0xff]  ;;  %v379_v40 = vld [vmem:[%s18749_s9 + $0x321] sm:$0xff]  ;;  %v380_v42 = vld [vmem:[%s18749_s9 + $0x329] sm:$0xff] }
  0x26   : > { %16382 = vmatprep.mubr.msk.f32.mxu1 %vm430_vm0, %v369_v20  ;;  %v317_v43 = vld [vmem:[%s18749_s9 + $0xb1] sm:$0xff]  ;;  %v318_v45 = vld [vmem:[%s18749_s9 + $0xb9] sm:$0xff]  ;;  %v319_v47 = vld [vmem:[%s18749_s9 + $0xc9] sm:$0xff] }
  0x27   : > { %v381_v44 = vld [vmem:[%s18749_s9 + $0x331] sm:$0xff]  ;;  %v382_v46 = vld [vmem:[%s18749_s9 + $0x339] sm:$0xff]  ;;  %v383_v48 = vld [vmem:[%s18749_s9 + $0x349] sm:$0xff] }
  0x28   : > { %16287 = vmatmul.mubr.msk.f32.gmra.mxu0 %vm430_vm0, %v306_v21  ;;  %v320_v49 = vld [vmem:[%s18749_s9 + $0xd1] sm:$0xff]  ;;  %v321_v51 = vld [vmem:[%s18749_s9 + $0xd9] sm:$0xff]  ;;  %v322_v53 = vld [vmem:[%s18749_s9 + $0xe1] sm:$0xff] }
  0x29   : > { %16383 = vmatmul.mubr.msk.f32.gmra.mxu1 %vm430_vm0, %v370_v22  ;;  %16289 = vmatprep.mubr.msk.f32.mxu0 %vm430_vm0, %v307_v23  ;;  %v384_v50 = vld [vmem:[%s18749_s9 + $0x351] sm:$0xff]  ;;  %v385_v52 = vld [vmem:[%s18749_s9 + $0x359] sm:$0xff]  ;;  %v386_v54 = vld [vmem:[%s18749_s9 + $0x361] sm:$0xff] }
  0x2a   : > { %16385 = vmatprep.mubr.msk.f32.mxu1 %vm430_vm0, %v371_v24  ;;  %v323_v55 = vld [vmem:[%s18749_s9 + $0xf1] sm:$0xff]  ;;  %v324_v58 = vld [vmem:[%s18749_s9 + $0xf9] sm:$0xff]  ;;  %v325_v60 = vld [vmem:[%s18749_s9 + $0x101] sm:$0xff] }
  0x2b   : > { %v387_v56 = vld [vmem:[%s18749_s9 + $0x371] sm:$0xff]  ;;  %v388_v59 = vld [vmem:[%s18749_s9 + $0x379] sm:$0xff]  ;;  %v389_v61 = vld [vmem:[%s18749_s9 + $0x381] sm:$0xff] }
  0x2c   : > { %16290 = vmatmul.mubr.msk.f32.gmra.mxu0 %vm430_vm0, %v308_v25  ;;  %v326_v62 = vld [vmem:[%s18749_s9 + $0x109] sm:$0xff]  ;;  %v327_v0 = vld [vmem:[%s18749_s9 + $0x119] sm:$0xff]  ;;  %v328_v2 = vld [vmem:[%s18749_s9 + $0x121] sm:$0xff] }
  0x2d   : > { %16386 = vmatmul.mubr.msk.f32.gmra.mxu1 %vm430_vm0, %v372_v26  ;;  %16292 = vmatprep.mubr.msk.f32.mxu0 %vm430_vm0, %v309_v27  ;;  %v390_v63 = vld [vmem:[%s18749_s9 + $0x389] sm:$0xff]  ;;  %v391_v1 = vld [vmem:[%s18749_s9 + $0x399] sm:$0xff]  ;;  %v392_v3 = vld [vmem:[%s18749_s9 + $0x3a1] sm:$0xff] }
  0x2e   : > { %16388 = vmatprep.mubr.msk.f32.mxu1 %vm430_vm0, %v373_v28  ;;  %v329_v4 = vld [vmem:[%s18749_s9 + $0x129] sm:$0xff]  ;;  %v330_v6 = vld [vmem:[%s18749_s9 + $0x131] sm:$0xff]  ;;  %v331_v8 = vld [vmem:[%s18749_s9 + $0x141] sm:$0xff] }
  0x2f   : > { %v393_v5 = vld [vmem:[%s18749_s9 + $0x3a9] sm:$0xff]  ;;  %v394_v7 = vld [vmem:[%s18749_s9 + $0x3b1] sm:$0xff]  ;;  %v395_v9 = vld [vmem:[%s18749_s9 + $0x3c1] sm:$0xff] }
  0x30   : > { %16293 = vmatmul.mubr.msk.f32.gmra.mxu0 %vm430_vm0, %v310_v29  ;;  %v332_v10 = vld [vmem:[%s18749_s9 + $0x149] sm:$0xff]  ;;  %v333_v12 = vld [vmem:[%s18749_s9 + $0x151] sm:$0xff]  ;;  %v334_v14 = vld [vmem:[%s18749_s9 + $0x159] sm:$0xff] }
  0x31   : > { %16389 = vmatmul.mubr.msk.f32.gmra.mxu1 %vm430_vm0, %v374_v30  ;;  %16295 = vmatprep.mubr.msk.f32.mxu0 %vm430_vm0, %v311_v31  ;;  %v396_v11 = vld [vmem:[%s18749_s9 + $0x3c9] sm:$0xff]  ;;  %v397_v13 = vld [vmem:[%s18749_s9 + $0x3d1] sm:$0xff]  ;;  %v398_v15 = vld [vmem:[%s18749_s9 + $0x3d9] sm:$0xff] }
  0x32   : > { %16391 = vmatprep.mubr.msk.f32.mxu1 %vm430_vm0, %v375_v32  ;;  %v335_v17 = vld [vmem:[%s18749_s9 + $0x169] sm:$0xff]  ;;  %v336_v19 = vld [vmem:[%s18749_s9 + $0x171] sm:$0xff]  ;;  %v337_v21 = vld [vmem:[%s18749_s9 + $0x179] sm:$0xff] }
  0x33   : > { %v399_v18 = vld [vmem:[%s18749_s9 + $0x3e9] sm:$0xff]  ;;  %v400_v20 = vld [vmem:[%s18749_s9 + $0x3f1] sm:$0xff]  ;;  %v401_v22 = vld [vmem:[%s18749_s9 + $0x3f9] sm:$0xff] }
  0x34   : > { %16296 = vmatmul.mubr.msk.f32.gmra.mxu0 %vm430_vm0, %v312_v33  ;;  %v338_v23 = vld [vmem:[%s18749_s9 + $0x181] sm:$0xff]  ;;  %v339_v25 = vld [vmem:[%s18749_s9 + $0x191] sm:$0xff]  ;;  %v340_v27 = vld [vmem:[%s18749_s9 + $0x199] sm:$0xff] }
  0x35   : > { %16392 = vmatmul.mubr.msk.f32.gmra.mxu1 %vm430_vm0, %v376_v34  ;;  %16298 = vmatprep.mubr.msk.f32.mxu0 %vm430_vm0, %v313_v35  ;;  %v402_v24 = vld [vmem:[%s18749_s9 + $0x401] sm:$0xff]  ;;  %v403_v26 = vld [vmem:[%s18749_s9 + $0x411] sm:$0xff]  ;;  %v404_v28 = vld [vmem:[%s18749_s9 + $0x419] sm:$0xff] }
  0x36   : > { %16394 = vmatprep.mubr.msk.f32.mxu1 %vm430_vm0, %v377_v36  ;;  %v341_v29 = vld [vmem:[%s18749_s9 + $0x1a1] sm:$0xff]  ;;  %v342_v31 = vld [vmem:[%s18749_s9 + $0x1a9] sm:$0xff]  ;;  %v343_v33 = vld [vmem:[%s18749_s9 + $0x1b9] sm:$0xff] }
  0x37   : > { %v405_v30 = vld [vmem:[%s18749_s9 + $0x421] sm:$0xff]  ;;  %v406_v32 = vld [vmem:[%s18749_s9 + $0x429] sm:$0xff]  ;;  %v407_v34 = vld [vmem:[%s18749_s9 + $0x439] sm:$0xff] }
  0x38   : > { %16299 = vmatmul.mubr.msk.f32.gmra.mxu0 %vm430_vm0, %v314_v37  ;;  %v344_v35 = vld [vmem:[%s18749_s9 + $0x1c1] sm:$0xff]  ;;  %v345_v37 = vld [vmem:[%s18749_s9 + $0x1c9] sm:$0xff] }
  0x39   : > { %16395 = vmatmul.mubr.msk.f32.gmra.mxu1 %vm430_vm0, %v378_v38  ;;  %16301 = vmatprep.mubr.msk.f32.mxu0 %vm430_vm0, %v315_v39  ;;  %v408_v36 = vld [vmem:[%s18749_s9 + $0x441] sm:$0xff]  ;;  %v409_v38 = vld [vmem:[%s18749_s9 + $0x449] sm:$0xff]  ;;  %v346_v39 = vld [vmem:[%s18749_s9 + $0x1d1] sm:$0xff] }
  0x3a   : > { %16397 = vmatprep.mubr.msk.f32.mxu1 %vm430_vm0, %v379_v40  ;;  %v410_v40 = vld [vmem:[%s18749_s9 + $0x451] sm:$0xff] }
  0x3c   : > { %16302 = vmatmul.mubr.msk.f32.gmra.mxu0 %vm430_vm0, %v316_v41  ;;  %v347_v41 = vld [vmem:[%s18749_s9 + $0x1e1] sm:$0xff] }
  0x3d   : > { %16398 = vmatmul.mubr.msk.f32.gmra.mxu1 %vm430_vm0, %v380_v42  ;;  %16304 = vmatprep.mubr.msk.f32.mxu0 %vm430_vm0, %v317_v43  ;;  %v411_v42 = vld [vmem:[%s18749_s9 + $0x461] sm:$0xff]  ;;  %v348_v43 = vld [vmem:[%s18749_s9 + $0x1e9] sm:$0xff] }
  0x3e   : > { %16400 = vmatprep.mubr.msk.f32.mxu1 %vm430_vm0, %v381_v44  ;;  %v412_v44 = vld [vmem:[%s18749_s9 + $0x469] sm:$0xff] }
  0x40   : > { %16305 = vmatmul.mubr.msk.f32.gmra.mxu0 %vm430_vm0, %v318_v45  ;;  %v349_v45 = vld [vmem:[%s18749_s9 + $0x1f1] sm:$0xff] }
  0x41   : > { %16401 = vmatmul.mubr.msk.f32.gmra.mxu1 %vm430_vm0, %v382_v46  ;;  %16307 = vmatprep.mubr.msk.f32.mxu0 %vm430_vm0, %v319_v47  ;;  %v413_v46 = vld [vmem:[%s18749_s9 + $0x471] sm:$0xff]  ;;  %v350_v47 = vld [vmem:[%s18749_s9 + $0x1f9] sm:$0xff] }
  0x42   : > { %16403 = vmatprep.mubr.msk.f32.mxu1 %vm430_vm0, %v383_v48  ;;  %v414_v48 = vld [vmem:[%s18749_s9 + $0x479] sm:$0xff] }
  0x44   : > { %16308 = vmatmul.mubr.msk.f32.gmra.mxu0 %vm430_vm0, %v320_v49  ;;  %v351_v49 = vld [vmem:[%s18749_s9 + $0x209] sm:$0xff] }
  0x45   : > { %16404 = vmatmul.mubr.msk.f32.gmra.mxu1 %vm430_vm0, %v384_v50  ;;  %16310 = vmatprep.mubr.msk.f32.mxu0 %vm430_vm0, %v321_v51  ;;  %v415_v50 = vld [vmem:[%s18749_s9 + $0x489] sm:$0xff]  ;;  %v352_v51 = vld [vmem:[%s18749_s9 + $0x211] sm:$0xff] }
  0x46   : > { %16406 = vmatprep.mubr.msk.f32.mxu1 %vm430_vm0, %v385_v52  ;;  %v416_v52 = vld [vmem:[%s18749_s9 + $0x491] sm:$0xff] }
  0x48   : > { %16311 = vmatmul.mubr.msk.f32.gmra.mxu0 %vm430_vm0, %v322_v53  ;;  %v353_v53 = vld [vmem:[%s18749_s9 + $0x219] sm:$0xff] }
  0x49   : > { %16407 = vmatmul.mubr.msk.f32.gmra.mxu1 %vm430_vm0, %v386_v54  ;;  %16313 = vmatprep.mubr.msk.f32.mxu0 %vm430_vm0, %v323_v55  ;;  %v417_v54 = vld [vmem:[%s18749_s9 + $0x499] sm:$0xff]  ;;  %v354_v55 = vld [vmem:[%s18749_s9 + $0x221] sm:$0xff] }
  0x4a   : > { %16409 = vmatprep.mubr.msk.f32.mxu1 %vm430_vm0, %v387_v56  ;;  %v418_v56 = vld [vmem:[%s18749_s9 + $0x4a1] sm:$0xff] }
  0x4c   : > { %16314 = vmatmul.mubr.msk.f32.gmra.mxu0 %vm430_vm0, %v324_v58  ;;  %v355_v58 = vld [vmem:[%s18749_s9 + $0x231] sm:$0xff] }
  0x4d   : > { %16410 = vmatmul.mubr.msk.f32.gmra.mxu1 %vm430_vm0, %v388_v59  ;;  %16316 = vmatprep.mubr.msk.f32.mxu0 %vm430_vm0, %v325_v60  ;;  %v419_v59 = vld [vmem:[%s18749_s9 + $0x4b1] sm:$0xff]  ;;  %v356_v60 = vld [vmem:[%s18749_s9 + $0x239] sm:$0xff] }
  0x4e   : > { %16412 = vmatprep.mubr.msk.f32.mxu1 %vm430_vm0, %v389_v61  ;;  %v420_v61 = vld [vmem:[%s18749_s9 + $0x4b9] sm:$0xff] }
  0x50   : > { %16317 = vmatmul.mubr.msk.f32.gmra.mxu0 %vm430_vm0, %v326_v62  ;;  %v357_v62 = vld [vmem:[%s18749_s9 + $0x241] sm:$0xff] }
  0x51   : > { %16413 = vmatmul.mubr.msk.f32.gmra.mxu1 %vm430_vm0, %v390_v63  ;;  %16319 = vmatprep.mubr.msk.f32.mxu0 %vm430_vm0, %v327_v0  ;;  %v421_v63 = vld [vmem:[%s18749_s9 + $0x4c1] sm:$0xff]  ;;  %v358_v0 = vld [vmem:[%s18749_s9 + $0x249] sm:$0xff] }
  0x52   : > { %16415 = vmatprep.mubr.msk.f32.mxu1 %vm430_vm0, %v391_v1  ;;  %v422_v1 = vld [vmem:[%s18749_s9 + $0x4c9] sm:$0xff] }
  0x54   : > { %16320 = vmatmul.mubr.msk.f32.gmra.mxu0 %vm430_vm0, %v328_v2  ;;  %v359_v2 = vld [vmem:[%s18749_s9 + $0x259] sm:$0xff] }
  0x55   : > { %16416 = vmatmul.mubr.msk.f32.gmra.mxu1 %vm430_vm0, %v392_v3  ;;  %16322 = vmatprep.mubr.msk.f32.mxu0 %vm430_vm0, %v329_v4  ;;  %v423_v3 = vld [vmem:[%s18749_s9 + $0x4d9] sm:$0xff]  ;;  %v360_v4 = vld [vmem:[%s18749_s9 + $0x261] sm:$0xff] }
  0x56   : > { %16418 = vmatprep.mubr.msk.f32.mxu1 %vm430_vm0, %v393_v5  ;;  %v424_v5 = vld [vmem:[%s18749_s9 + $0x4e1] sm:$0xff] }
  0x58   : > { %16323 = vmatmul.mubr.msk.f32.gmra.mxu0 %vm430_vm0, %v330_v6  ;;  %v361_v6 = vld [vmem:[%s18749_s9 + $0x269] sm:$0xff] }
  0x59   : > { %16419 = vmatmul.mubr.msk.f32.gmra.mxu1 %vm430_vm0, %v394_v7  ;;  %16325 = vmatprep.mubr.msk.f32.mxu0 %vm430_vm0, %v331_v8  ;;  %v425_v7 = vld [vmem:[%s18749_s9 + $0x4e9] sm:$0xff]  ;;  %v362_v8 = vld [vmem:[%s18749_s9 + $0x271] sm:$0xff] }
  0x5a   : > { %16421 = vmatprep.mubr.msk.f32.mxu1 %vm430_vm0, %v395_v9  ;;  %v426_v9 = vld [vmem:[%s18749_s9 + $0x4f1] sm:$0xff] }
  0x5c   : > { %16326 = vmatmul.mubr.msk.f32.gmra.mxu0 %vm430_vm0, %v332_v10  ;;  %v169_v10 = vld [vmem:[%s18749_s9] sm:$0xff] }
  0x5d   : > { %16422 = vmatmul.mubr.msk.f32.gmra.mxu1 %vm430_vm0, %v396_v11  ;;  %16328 = vmatprep.mubr.msk.f32.mxu0 %vm430_vm0, %v333_v12  ;;  %v2609_v11 = vld [vmem:[%s18749_s9 + $0x2] sm:$0xff] }
  0x5e   : > { %16424 = vmatprep.mubr.msk.f32.mxu1 %vm430_vm0, %v397_v13  ;;  %v170_v12 = vld [vmem:[%s18749_s9 + $0x8] sm:$0xff] }
  0x5f   : > { %v2610_v13 = vld [vmem:[%s18749_s9 + $0xa] sm:$0xff] }
  0x60   : > { %16329 = vmatmul.mubr.msk.f32.gmra.mxu0 %vm430_vm0, %v334_v14  ;;  %v171_v14 = vld [vmem:[%s18749_s9 + $0x10] sm:$0xff] }
  0x61   : > { %16425 = vmatmul.mubr.msk.f32.gmra.mxu1 %vm430_vm0, %v398_v15  ;;  %16331 = vmatprep.mubr.msk.f32.mxu0 %vm430_vm0, %v335_v17  ;;  %v2611_v15 = vld [vmem:[%s18749_s9 + $0x12] sm:$0xff] }
  0x62   : > { %16427 = vmatprep.mubr.msk.f32.mxu1 %vm430_vm0, %v399_v18  ;;  %v13676_v17 = vld [vmem:[%s23975_s1 + $0x30] sm:$0xff]  ;;  %v13934_v18 = vld [vmem:[%s23975_s1 + $0x40] sm:$0xff] }
  0x64   : > { %16332 = vmatmul.mubr.msk.f32.gmra.mxu0 %vm430_vm0, %v336_v19  ;;  %v172_v19 = vld [vmem:[%s18749_s9 + $0x18] sm:$0xff] }
  0x65   : > { %16428 = vmatmul.mubr.msk.f32.gmra.mxu1 %vm430_vm0, %v400_v20  ;;  %16334 = vmatprep.mubr.msk.f32.mxu0 %vm430_vm0, %v337_v21  ;;  %v2612_v20 = vld [vmem:[%s18749_s9 + $0x1a] sm:$0xff]  ;;  %v173_v21 = vld [vmem:[%s18749_s9 + $0x28] sm:$0xff] }
  0x66   : > { %16430 = vmatprep.mubr.msk.f32.mxu1 %vm430_vm0, %v401_v22  ;;  %v2613_v22 = vld [vmem:[%s18749_s9 + $0x2a] sm:$0xff] }
  0x68   : > { %16335 = vmatmul.mubr.msk.f32.gmra.mxu0 %vm430_vm0, %v338_v23  ;;  %v175_v23 = vld [vmem:[%s18749_s9 + $0x38] sm:$0xff] }
  0x69   : > { %16431 = vmatmul.mubr.msk.f32.gmra.mxu1 %vm430_vm0, %v402_v24  ;;  %16337 = vmatprep.mubr.msk.f32.mxu0 %vm430_vm0, %v339_v25  ;;  %v2615_v24 = vld [vmem:[%s18749_s9 + $0x3a] sm:$0xff] }
  0x6a   : > { %16433 = vmatprep.mubr.msk.f32.mxu1 %vm430_vm0, %v403_v26  ;;  %v176_v25 = vld [vmem:[%s18749_s9 + $0x40] sm:$0xff] }
  0x6b   : > { %v2616_v26 = vld [vmem:[%s18749_s9 + $0x42] sm:$0xff] }
  0x6c   : > { %16338 = vmatmul.mubr.msk.f32.gmra.mxu0 %vm430_vm0, %v340_v27  ;;  %v177_v27 = vld [vmem:[%s18749_s9 + $0x50] sm:$0xff] }
  0x6d   : > { %16434 = vmatmul.mubr.msk.f32.gmra.mxu1 %vm430_vm0, %v404_v28  ;;  %16340 = vmatprep.mubr.msk.f32.mxu0 %vm430_vm0, %v341_v29  ;;  %v2617_v28 = vld [vmem:[%s18749_s9 + $0x52] sm:$0xff] }
  0x6e   : > { %16436 = vmatprep.mubr.msk.f32.mxu1 %vm430_vm0, %v405_v30  ;;  %v178_v29 = vld [vmem:[%s18749_s9 + $0x58] sm:$0xff] }
  0x6f   : > { %v2618_v30 = vld [vmem:[%s18749_s9 + $0x5a] sm:$0xff] }
  0x70   : > { %16341 = vmatmul.mubr.msk.f32.gmra.mxu0 %vm430_vm0, %v342_v31  ;;  %v179_v31 = vld [vmem:[%s18749_s9 + $0x60] sm:$0xff] }
  0x71   : > { %16437 = vmatmul.mubr.msk.f32.gmra.mxu1 %vm430_vm0, %v406_v32  ;;  %16343 = vmatprep.mubr.msk.f32.mxu0 %vm430_vm0, %v343_v33  ;;  %v2619_v32 = vld [vmem:[%s18749_s9 + $0x62] sm:$0xff] }
  0x72   : > { %16439 = vmatprep.mubr.msk.f32.mxu1 %vm430_vm0, %v407_v34  ;;  %v180_v33 = vld [vmem:[%s18749_s9 + $0x68] sm:$0xff] }
  0x73   : > { %v2620_v34 = vld [vmem:[%s18749_s9 + $0x6a] sm:$0xff] }
  0x74   : > { %16344 = vmatmul.mubr.msk.f32.gmra.mxu0 %vm430_vm0, %v344_v35  ;;  %v181_v35 = vld [vmem:[%s18749_s9 + $0x78] sm:$0xff] }
  0x75   : > { %16440 = vmatmul.mubr.msk.f32.gmra.mxu1 %vm430_vm0, %v408_v36  ;;  %16346 = vmatprep.mubr.msk.f32.mxu0 %vm430_vm0, %v345_v37  ;;  %v2621_v36 = vld [vmem:[%s18749_s9 + $0x7a] sm:$0xff] }
  0x76   : > { %16442 = vmatprep.mubr.msk.f32.mxu1 %vm430_vm0, %v409_v38  ;;  %v182_v37 = vld [vmem:[%s18749_s9 + $0x80] sm:$0xff] }
  0x77   : > { %v2622_v38 = vld [vmem:[%s18749_s9 + $0x82] sm:$0xff] }
  0x78   : > { %16347 = vmatmul.mubr.msk.f32.gmra.mxu0 %vm430_vm0, %v346_v39  ;;  %v183_v39 = vld [vmem:[%s18749_s9 + $0x88] sm:$0xff] }
  0x79   : > { %16443 = vmatmul.mubr.msk.f32.gmra.mxu1 %vm430_vm0, %v410_v40  ;;  %16349 = vmatprep.mubr.msk.f32.mxu0 %vm430_vm0, %v347_v41  ;;  %v2623_v40 = vld [vmem:[%s18749_s9 + $0x8a] sm:$0xff] }
  0x7a   : > { %16445 = vmatprep.mubr.msk.f32.mxu1 %vm430_vm0, %v411_v42  ;;  %v184_v41 = vld [vmem:[%s18749_s9 + $0x90] sm:$0xff] }
  0x7b   : > { %v2624_v42 = vld [vmem:[%s18749_s9 + $0x92] sm:$0xff] }
  0x7c   : > { %16350 = vmatmul.mubr.msk.f32.gmra.mxu0 %vm430_vm0, %v348_v43  ;;  %v185_v43 = vld [vmem:[%s18749_s9 + $0xa0] sm:$0xff] }
  0x7d   : > { %16446 = vmatmul.mubr.msk.f32.gmra.mxu1 %vm430_vm0, %v412_v44  ;;  %16352 = vmatprep.mubr.msk.f32.mxu0 %vm430_vm0, %v349_v45  ;;  %v2625_v44 = vld [vmem:[%s18749_s9 + $0xa2] sm:$0xff] }
  0x7e   : > { %16448 = vmatprep.mubr.msk.f32.mxu1 %vm430_vm0, %v413_v46  ;;  %v186_v45 = vld [vmem:[%s18749_s9 + $0xa8] sm:$0xff] }
  0x7f   : > { %v2626_v46 = vld [vmem:[%s18749_s9 + $0xaa] sm:$0xff] }
  0x80   : > { %16353 = vmatmul.mubr.msk.f32.gmra.mxu0 %vm430_vm0, %v350_v47  ;;  %v187_v47 = vld [vmem:[%s18749_s9 + $0xb0] sm:$0xff] }
  0x81   : > { %16449 = vmatmul.mubr.msk.f32.gmra.mxu1 %vm430_vm0, %v414_v48  ;;  %16355 = vmatprep.mubr.msk.f32.mxu0 %vm430_vm0, %v351_v49  ;;  %v2627_v48 = vld [vmem:[%s18749_s9 + $0xb2] sm:$0xff] }
  0x82   : > { %16451 = vmatprep.mubr.msk.f32.mxu1 %vm430_vm0, %v415_v50  ;;  %v188_v49 = vld [vmem:[%s18749_s9 + $0xb8] sm:$0xff] }
  0x83   : > { %v2628_v50 = vld [vmem:[%s18749_s9 + $0xba] sm:$0xff] }
  0x84   : > { %16356 = vmatmul.mubr.msk.f32.gmra.mxu0 %vm430_vm0, %v352_v51  ;;  %v189_v51 = vld [vmem:[%s18749_s9 + $0xc8] sm:$0xff] }
  0x85   : > { %16452 = vmatmul.mubr.msk.f32.gmra.mxu1 %vm430_vm0, %v416_v52  ;;  %16358 = vmatprep.mubr.msk.f32.mxu0 %vm430_vm0, %v353_v53  ;;  %v2629_v52 = vld [vmem:[%s18749_s9 + $0xca] sm:$0xff] }
  0x86   : > { %16454 = vmatprep.mubr.msk.f32.mxu1 %vm430_vm0, %v417_v54  ;;  %v190_v53 = vld [vmem:[%s18749_s9 + $0xd0] sm:$0xff] }
  0x87   : > { %v2630_v54 = vld [vmem:[%s18749_s9 + $0xd2] sm:$0xff] }
  0x88   : > { %16359 = vmatmul.mubr.msk.f32.gmra.mxu0 %vm430_vm0, %v354_v55  ;;  %v191_v55 = vld [vmem:[%s18749_s9 + $0xd8] sm:$0xff] }
  0x89   : > { %16455 = vmatmul.mubr.msk.f32.gmra.mxu1 %vm430_vm0, %v418_v56  ;;  %16361 = vmatprep.mubr.msk.f32.mxu0 %vm430_vm0, %v355_v58  ;;  %v2631_v56 = vld [vmem:[%s18749_s9 + $0xda] sm:$0xff] }
  0x8a   : > { %16457 = vmatprep.mubr.msk.f32.mxu1 %vm430_vm0, %v419_v59  ;;  %v192_v58 = vld [vmem:[%s18749_s9 + $0xe0] sm:$0xff] }
  0x8b   : > { %v2632_v59 = vld [vmem:[%s18749_s9 + $0xe2] sm:$0xff] }
  0x8c   : > { %16362 = vmatmul.mubr.msk.f32.gmra.mxu0 %vm430_vm0, %v356_v60  ;;  %v193_v60 = vld [vmem:[%s18749_s9 + $0xf0] sm:$0xff] }
  0x8d   : > { %16458 = vmatmul.mubr.msk.f32.gmra.mxu1 %vm430_vm0, %v420_v61  ;;  %16364 = vmatprep.mubr.msk.f32.mxu0 %vm430_vm0, %v357_v62  ;;  %v2633_v61 = vld [vmem:[%s18749_s9 + $0xf2] sm:$0xff] }
  0x8e   : > { %16460 = vmatprep.mubr.msk.f32.mxu1 %vm430_vm0, %v421_v63  ;;  %v194_v62 = vld [vmem:[%s18749_s9 + $0xf8] sm:$0xff] }
  0x8f   : > { %v2634_v63 = vld [vmem:[%s18749_s9 + $0xfa] sm:$0xff] }
  0x90   : > { %16365 = vmatmul.mubr.msk.f32.gmra.mxu0 %vm430_vm0, %v358_v0  ;;  %v195_v0 = vld [vmem:[%s18749_s9 + $0x100] sm:$0xff] }
  0x91   : > { %16461 = vmatmul.mubr.msk.f32.gmra.mxu1 %vm430_vm0, %v422_v1  ;;  %16367 = vmatprep.mubr.msk.f32.mxu0 %vm430_vm0, %v359_v2  ;;  %v2635_v1 = vld [vmem:[%s18749_s9 + $0x102] sm:$0xff] }
  0x92   : > { %16463 = vmatprep.mubr.msk.f32.mxu1 %vm430_vm0, %v423_v3  ;;  %v196_v2 = vld [vmem:[%s18749_s9 + $0x108] sm:$0xff] }
  0x93   : > { %v2636_v3 = vld [vmem:[%s18749_s9 + $0x10a] sm:$0xff] }
  0x94   : > { %16368 = vmatmul.mubr.msk.f32.gmra.mxu0 %vm430_vm0, %v360_v4  ;;  %v197_v4 = vld [vmem:[%s18749_s9 + $0x118] sm:$0xff] }
  0x95   : > { %16464 = vmatmul.mubr.msk.f32.gmra.mxu1 %vm430_vm0, %v424_v5  ;;  %16370 = vmatprep.mubr.msk.f32.mxu0 %vm430_vm0, %v361_v6  ;;  %v2637_v5 = vld [vmem:[%s18749_s9 + $0x11a] sm:$0xff] }
  0x96   : > { %16466 = vmatprep.mubr.msk.f32.mxu1 %vm430_vm0, %v425_v7  ;;  %v198_v6 = vld [vmem:[%s18749_s9 + $0x120] sm:$0xff] }
  0x97   : > { %v2638_v7 = vld [vmem:[%s18749_s9 + $0x122] sm:$0xff] }
  0x98   : > { %16371 = vmatmul.mubr.msk.f32.gmra.mxu0 %vm430_vm0, %v362_v8  ;;  %v199_v8 = vld [vmem:[%s18749_s9 + $0x128] sm:$0xff] }
  0x99   : > { %16467 = vmatmul.mubr.msk.f32.gmra.mxu1 %vm430_vm0, %v426_v9  ;;  %16669 = vmatprep.mubr.msk.f32.mxu0 %vm430_vm0, %v2609_v11  ;;  %v2639_v9 = vld [vmem:[%s18749_s9 + $0x12a] sm:$0xff]  ;;  %v2640_v11 = vld [vmem:[%s18749_s9 + $0x132] sm:$0xff] }
  0x9a   : > { %16473 = vmatprep.mubr.msk.f32.mxu1 %vm430_vm0, %v169_v10  ;;  %v200_v10 = vld [vmem:[%s18749_s9 + $0x130] sm:$0xff] }
  0x9c   : > { %16670 = vmatmul.mubr.msk.f32.vlgmr.msra.gmra.mxu0 %vm430_vm0, %v2610_v13  ;;  %v2641_v13 = vld [vmem:[%s18749_s9 + $0x142] sm:$0xff] }
  0x9d   : > { %16474 = vmatmul.mubr.msk.f32.vlgmr.msra.gmra.mxu1 %vm430_vm0, %v170_v12  ;;  %17058 = vmatpush3.msra.mxu0 %v18862_v57  ;;  %v2614_v57 = vld [vmem:[%s18749_s9 + $0x32] sm:$0xff]  ;;  %v201_v12 = vld [vmem:[%s18749_s9 + $0x140] sm:$0xff] }
  0x9e   : > { %16862 = vmatpush3.msra.mxu1 %v18778_v16  ;;  %16476 = vmatprep.mubr.msk.f32.mxu1 %vm430_vm0, %v171_v14  ;;  %v174_v16 = vld [vmem:[%s18749_s9 + $0x30] sm:$0xff]  ;;  %v202_v14 = vld [vmem:[%s18749_s9 + $0x148] sm:$0xff] }
  0x9f   : > { %16672 = vmatprep.mubr.msk.f32.mxu0 %vm430_vm0, %v2611_v15  ;;  %16863 = vmatprep.subr.mxu1 %v13676_v17  ;;  %v2642_v15 = vld [vmem:[%s18749_s9 + $0x14a] sm:$0xff] }
  0xa0   : > { %17059 = vmatprep.subr.mxu0 %v13934_v18  ;;  %16673 = vmatmul.mubr.msk.f32.gmra.mxu0 %vm430_vm0, %v2612_v20 }
  0xa1   : > { %16477 = vmatmul.mubr.msk.f32.gmra.mxu1 %vm430_vm0, %v172_v19  ;;  %16675 = vmatprep.mubr.msk.f32.mxu0 %vm430_vm0, %v2613_v22  ;;  %v2644_v22 = vld [vmem:[%s18749_s9 + $0x15a] sm:$0xff] }
  0xa2   : > { %16479 = vmatprep.mubr.msk.f32.mxu1 %vm430_vm0, %v173_v21  ;;  %16864 = vmatpush3.msra.mxu1 %v13676_v17  ;;  %v203_v17 = vld [vmem:[%s18749_s9 + $0x150] sm:$0xff]  ;;  %v204_v21 = vld [vmem:[%s18749_s9 + $0x158] sm:$0xff] }
  0xa3   : > { %17060 = vmatpush3.msra.mxu0 %v13934_v18  ;;  %v2643_v18 = vld [vmem:[%s18749_s9 + $0x152] sm:$0xff] }
  0xa4   : > { %16676 = vmatmul.mubr.msk.f32.gmra.mxu0 %vm430_vm0, %v2614_v57 }
  0xa5   : > { %16480 = vmatmul.mubr.msk.f32.gmra.mxu1 %vm430_vm0, %v174_v16  ;;  %16678 = vmatprep.mubr.msk.f32.mxu0 %vm430_vm0, %v2615_v24  ;;  %v2645_v24 = vld [vmem:[%s18749_s9 + $0x16a] sm:$0xff] }
  0xa6   : > { %16482 = vmatprep.mubr.msk.f32.mxu1 %vm430_vm0, %v175_v23  ;;  %v205_v23 = vld [vmem:[%s18749_s9 + $0x168] sm:$0xff] }
  0xa8   : > { %16679 = vmatmul.mubr.msk.f32.gmra.mxu0 %vm430_vm0, %v2616_v26 }
  0xa9   : > { %16483 = vmatmul.mubr.msk.f32.gmra.mxu1 %vm430_vm0, %v176_v25  ;;  %16681 = vmatprep.mubr.msk.f32.mxu0 %vm430_vm0, %v2617_v28  ;;  %v2646_v28 = vld [vmem:[%s18749_s9 + $0x172] sm:$0xff] }
  0xaa   : > { %16485 = vmatprep.mubr.msk.f32.mxu1 %vm430_vm0, %v177_v27  ;;  %v206_v27 = vld [vmem:[%s18749_s9 + $0x170] sm:$0xff] }
  0xac   : > { %16682 = vmatmul.mubr.msk.f32.gmra.mxu0 %vm430_vm0, %v2618_v30 }
  0xad   : > { %16486 = vmatmul.mubr.msk.f32.gmra.mxu1 %vm430_vm0, %v178_v29  ;;  %16684 = vmatprep.mubr.msk.f32.mxu0 %vm430_vm0, %v2619_v32  ;;  %v2647_v32 = vld [vmem:[%s18749_s9 + $0x17a] sm:$0xff] }
  0xae   : > { %16488 = vmatprep.mubr.msk.f32.mxu1 %vm430_vm0, %v179_v31  ;;  %v207_v31 = vld [vmem:[%s18749_s9 + $0x178] sm:$0xff] }
  0xb0   : > { %16685 = vmatmul.mubr.msk.f32.gmra.mxu0 %vm430_vm0, %v2620_v34 }
  0xb1   : > { %16489 = vmatmul.mubr.msk.f32.gmra.mxu1 %vm430_vm0, %v180_v33  ;;  %16687 = vmatprep.mubr.msk.f32.mxu0 %vm430_vm0, %v2621_v36  ;;  %v2648_v36 = vld [vmem:[%s18749_s9 + $0x182] sm:$0xff] }
  0xb2   : > { %16491 = vmatprep.mubr.msk.f32.mxu1 %vm430_vm0, %v181_v35  ;;  %v208_v35 = vld [vmem:[%s18749_s9 + $0x180] sm:$0xff] }
  0xb4   : > { %16688 = vmatmul.mubr.msk.f32.gmra.mxu0 %vm430_vm0, %v2622_v38 }
  0xb5   : > { %16492 = vmatmul.mubr.msk.f32.gmra.mxu1 %vm430_vm0, %v182_v37  ;;  %16690 = vmatprep.mubr.msk.f32.mxu0 %vm430_vm0, %v2623_v40  ;;  %v2649_v40 = vld [vmem:[%s18749_s9 + $0x192] sm:$0xff] }
  0xb6   : > { %16494 = vmatprep.mubr.msk.f32.mxu1 %vm430_vm0, %v183_v39  ;;  %v209_v39 = vld [vmem:[%s18749_s9 + $0x190] sm:$0xff] }
  0xb8   : > { %16691 = vmatmul.mubr.msk.f32.gmra.mxu0 %vm430_vm0, %v2624_v42 }
  0xb9   : > { %16495 = vmatmul.mubr.msk.f32.gmra.mxu1 %vm430_vm0, %v184_v41  ;;  %16693 = vmatprep.mubr.msk.f32.mxu0 %vm430_vm0, %v2625_v44  ;;  %v2650_v44 = vld [vmem:[%s18749_s9 + $0x19a] sm:$0xff] }
  0xba   : > { %16497 = vmatprep.mubr.msk.f32.mxu1 %vm430_vm0, %v185_v43  ;;  %v210_v43 = vld [vmem:[%s18749_s9 + $0x198] sm:$0xff] }
  0xbc   : > { %16694 = vmatmul.mubr.msk.f32.gmra.mxu0 %vm430_vm0, %v2626_v46 }
  0xbd   : > { %16498 = vmatmul.mubr.msk.f32.gmra.mxu1 %vm430_vm0, %v186_v45  ;;  %16696 = vmatprep.mubr.msk.f32.mxu0 %vm430_vm0, %v2627_v48  ;;  %v2651_v48 = vld [vmem:[%s18749_s9 + $0x1a2] sm:$0xff] }
  0xbe   : > { %16500 = vmatprep.mubr.msk.f32.mxu1 %vm430_vm0, %v187_v47  ;;  %v211_v47 = vld [vmem:[%s18749_s9 + $0x1a0] sm:$0xff] }
  0xc0   : > { %16697 = vmatmul.mubr.msk.f32.gmra.mxu0 %vm430_vm0, %v2628_v50 }
  0xc1   : > { %16501 = vmatmul.mubr.msk.f32.gmra.mxu1 %vm430_vm0, %v188_v49  ;;  %16699 = vmatprep.mubr.msk.f32.mxu0 %vm430_vm0, %v2629_v52  ;;  %v2652_v52 = vld [vmem:[%s18749_s9 + $0x1aa] sm:$0xff] }
  0xc2   : > { %16503 = vmatprep.mubr.msk.f32.mxu1 %vm430_vm0, %v189_v51  ;;  %v212_v51 = vld [vmem:[%s18749_s9 + $0x1a8] sm:$0xff] }
  0xc4   : > { %16700 = vmatmul.mubr.msk.f32.gmra.mxu0 %vm430_vm0, %v2630_v54 }
  0xc5   : > { %16504 = vmatmul.mubr.msk.f32.gmra.mxu1 %vm430_vm0, %v190_v53  ;;  %16702 = vmatprep.mubr.msk.f32.mxu0 %vm430_vm0, %v2631_v56  ;;  %v2653_v56 = vld [vmem:[%s18749_s9 + $0x1ba] sm:$0xff] }
  0xc6   : > { %16506 = vmatprep.mubr.msk.f32.mxu1 %vm430_vm0, %v191_v55  ;;  %v213_v55 = vld [vmem:[%s18749_s9 + $0x1b8] sm:$0xff] }
  0xc8   : > { %16703 = vmatmul.mubr.msk.f32.gmra.mxu0 %vm430_vm0, %v2632_v59 }
  0xc9   : > { %16507 = vmatmul.mubr.msk.f32.gmra.mxu1 %vm430_vm0, %v192_v58  ;;  %16705 = vmatprep.mubr.msk.f32.mxu0 %vm430_vm0, %v2633_v61  ;;  %v2654_v61 = vld [vmem:[%s18749_s9 + $0x1c2] sm:$0xff] }
  0xca   : > { %16509 = vmatprep.mubr.msk.f32.mxu1 %vm430_vm0, %v193_v60  ;;  %v214_v60 = vld [vmem:[%s18749_s9 + $0x1c0] sm:$0xff] }
  0xcc   : > { %16706 = vmatmul.mubr.msk.f32.gmra.mxu0 %vm430_vm0, %v2634_v63 }
  0xcd   : > { %16510 = vmatmul.mubr.msk.f32.gmra.mxu1 %vm430_vm0, %v194_v62  ;;  %16708 = vmatprep.mubr.msk.f32.mxu0 %vm430_vm0, %v2635_v1  ;;  %v2655_v1 = vld [vmem:[%s18749_s9 + $0x1ca] sm:$0xff] }
  0xce   : > { %16512 = vmatprep.mubr.msk.f32.mxu1 %vm430_vm0, %v195_v0  ;;  %v215_v0 = vld [vmem:[%s18749_s9 + $0x1c8] sm:$0xff] }
  0xd0   : > { %16709 = vmatmul.mubr.msk.f32.gmra.mxu0 %vm430_vm0, %v2636_v3 }
  0xd1   : > { %16513 = vmatmul.mubr.msk.f32.gmra.mxu1 %vm430_vm0, %v196_v2  ;;  %16711 = vmatprep.mubr.msk.f32.mxu0 %vm430_vm0, %v2637_v5  ;;  %v2656_v5 = vld [vmem:[%s18749_s9 + $0x1d2] sm:$0xff] }
  0xd2   : > { %16515 = vmatprep.mubr.msk.f32.mxu1 %vm430_vm0, %v197_v4  ;;  %v216_v4 = vld [vmem:[%s18749_s9 + $0x1d0] sm:$0xff] }
  0xd4   : > { %16712 = vmatmul.mubr.msk.f32.gmra.mxu0 %vm430_vm0, %v2638_v7 }
  0xd5   : > { %16516 = vmatmul.mubr.msk.f32.gmra.mxu1 %vm430_vm0, %v198_v6  ;;  %16714 = vmatprep.mubr.msk.f32.mxu0 %vm430_vm0, %v2639_v9  ;;  %v2657_v9 = vld [vmem:[%s18749_s9 + $0x1e2] sm:$0xff] }
  0xd6   : > { %16518 = vmatprep.mubr.msk.f32.mxu1 %vm430_vm0, %v199_v8  ;;  %v217_v8 = vld [vmem:[%s18749_s9 + $0x1e0] sm:$0xff] }
  0xd8   : > { %16715 = vmatmul.mubr.msk.f32.gmra.mxu0 %vm430_vm0, %v2640_v11 }
  0xd9   : > { %16519 = vmatmul.mubr.msk.f32.gmra.mxu1 %vm430_vm0, %v200_v10  ;;  %16717 = vmatprep.mubr.msk.f32.mxu0 %vm430_vm0, %v2641_v13  ;;  %v2658_v13 = vld [vmem:[%s18749_s9 + $0x1ea] sm:$0xff] }
  0xda   : > { %16521 = vmatprep.mubr.msk.f32.mxu1 %vm430_vm0, %v201_v12  ;;  %v218_v12 = vld [vmem:[%s18749_s9 + $0x1e8] sm:$0xff] }
  0xdc   : > { %v19169_v19 = vpop.f32.mrf.mxu0  ;;  %16718 = vmatmul.mubr.msk.f32.gmra.mxu0 %vm430_vm0, %v2642_v15 }
  0xdd   : > { %v19171_v20 = vpop.f32.mrf.mxu1  ;;  %16522 = vmatmul.mubr.msk.f32.gmra.mxu1 %vm430_vm0, %v202_v14  ;;  %16720 = vmatprep.mubr.msk.f32.mxu0 %vm430_vm0, %v2643_v18  ;;  %v2659_v18 = vld [vmem:[%s18749_s9 + $0x1f2] sm:$0xff] }
  0xde   : > { %23980 = vst [vmem:[#allocation5_spill] sm:$0xff] %v19171_v20  ;;  %16524 = vmatprep.mubr.msk.f32.mxu1 %vm430_vm0, %v203_v17  ;;  %v19179_v16 = vpop.f32.mrf.mxu0  ;;  %v219_v17 = vld [vmem:[%s18749_s9 + $0x1f0] sm:$0xff] }
  0xdf   : > { %v19181_v57 = vpop.f32.mrf.mxu1 }
  0xe0   : > { %23981 = vst [vmem:[#allocation6_spill] sm:$0xff] %v19181_v57  ;;  %v19185_v25 = vpop.f32.mrf.mxu0  ;;  %16721 = vmatmul.mubr.msk.f32.gmra.mxu0 %vm430_vm0, %v2644_v22  ;;  %v255_v57 = vld [vmem:[%s18749_s9 + $0x358] sm:$0xff] }
  0xe1   : > { %v19187_v26 = vpop.f32.mrf.mxu1  ;;  %16525 = vmatmul.mubr.msk.f32.gmra.mxu1 %vm430_vm0, %v204_v21  ;;  %16723 = vmatprep.mubr.msk.f32.mxu0 %vm430_vm0, %v2645_v24  ;;  %v2660_v24 = vld [vmem:[%s18749_s9 + $0x1fa] sm:$0xff] }
  0xe2   : > { %23982 = vst [vmem:[#allocation7_spill] sm:$0xff] %v19187_v26  ;;  %16527 = vmatprep.mubr.msk.f32.mxu1 %vm430_vm0, %v205_v23  ;;  %v19195_v29 = vpop.f32.mrf.mxu0  ;;  %v220_v23 = vld [vmem:[%s18749_s9 + $0x1f8] sm:$0xff] }
  0xe3   : > { %v19197_v30 = vpop.f32.mrf.mxu1 }
  0xe4   : > { %23983 = vst [vmem:[#allocation8_spill] sm:$0xff] %v19197_v30  ;;  %v19201_v33 = vpop.f32.mrf.mxu0  ;;  %16724 = vmatmul.mubr.msk.f32.gmra.mxu0 %vm430_vm0, %v2646_v28  ;;  %v253_v30 = vld [vmem:[%s18749_s9 + $0x348] sm:$0xff] }
  0xe5   : > { %v19203_v34 = vpop.f32.mrf.mxu1  ;;  %16528 = vmatmul.mubr.msk.f32.gmra.mxu1 %vm430_vm0, %v206_v27  ;;  %16726 = vmatprep.mubr.msk.f32.mxu0 %vm430_vm0, %v2647_v32  ;;  %v2661_v32 = vld [vmem:[%s18749_s9 + $0x20a] sm:$0xff] }
  0xe6   : > { %23984 = vst [vmem:[#allocation9_spill] sm:$0xff] %v19203_v34  ;;  %16530 = vmatprep.mubr.msk.f32.mxu1 %vm430_vm0, %v207_v31  ;;  %v19211_v37 = vpop.f32.mrf.mxu0  ;;  %v221_v31 = vld [vmem:[%s18749_s9 + $0x208] sm:$0xff] }
  0xe7   : > { %v19213_v38 = vpop.f32.mrf.mxu1 }
  0xe8   : > { %23985 = vst [vmem:[#allocation10_spill] sm:$0xff] %v19213_v38  ;;  %v19217_v41 = vpop.f32.mrf.mxu0  ;;  %16727 = vmatmul.mubr.msk.f32.gmra.mxu0 %vm430_vm0, %v2648_v36  ;;  %v251_v38 = vld [vmem:[%s18749_s9 + $0x330] sm:$0xff] }
  0xe9   : > { %v19219_v42 = vpop.f32.mrf.mxu1  ;;  %16531 = vmatmul.mubr.msk.f32.gmra.mxu1 %vm430_vm0, %v208_v35  ;;  %16729 = vmatprep.mubr.msk.f32.mxu0 %vm430_vm0, %v2649_v40  ;;  %v2662_v40 = vld [vmem:[%s18749_s9 + $0x212] sm:$0xff] }
  0xea   : > { %23986 = vst [vmem:[#allocation11_spill] sm:$0xff] %v19219_v42  ;;  %16533 = vmatprep.mubr.msk.f32.mxu1 %vm430_vm0, %v209_v39  ;;  %v19227_v45 = vpop.f32.mrf.mxu0  ;;  %v222_v39 = vld [vmem:[%s18749_s9 + $0x210] sm:$0xff] }
  0xeb   : > { %v19229_v46 = vpop.f32.mrf.mxu1 }
  0xec   : > { %23987 = vst [vmem:[#allocation12_spill] sm:$0xff] %v19229_v46  ;;  %v19233_v49 = vpop.f32.mrf.mxu0  ;;  %16730 = vmatmul.mubr.msk.f32.gmra.mxu0 %vm430_vm0, %v2650_v44  ;;  %v249_v46 = vld [vmem:[%s18749_s9 + $0x320] sm:$0xff] }
  0xed   : > { %v19235_v50 = vpop.f32.mrf.mxu1  ;;  %16534 = vmatmul.mubr.msk.f32.gmra.mxu1 %vm430_vm0, %v210_v43  ;;  %16732 = vmatprep.mubr.msk.f32.mxu0 %vm430_vm0, %v2651_v48  ;;  %v2663_v48 = vld [vmem:[%s18749_s9 + $0x21a] sm:$0xff] }
  0xee   : > { %23988 = vst [vmem:[#allocation13_spill] sm:$0xff] %v19235_v50  ;;  %16536 = vmatprep.mubr.msk.f32.mxu1 %vm430_vm0, %v211_v47  ;;  %v19243_v53 = vpop.f32.mrf.mxu0  ;;  %v223_v47 = vld [vmem:[%s18749_s9 + $0x218] sm:$0xff] }
  0xef   : > { %v19245_v54 = vpop.f32.mrf.mxu1 }
  0xf0   : > { %23989 = vst [vmem:[#allocation14_spill] sm:$0xff] %v19245_v54  ;;  %v19249_v58 = vpop.f32.mrf.mxu0  ;;  %16733 = vmatmul.mubr.msk.f32.gmra.mxu0 %vm430_vm0, %v2652_v52  ;;  %v247_v54 = vld [vmem:[%s18749_s9 + $0x308] sm:$0xff] }
  0xf1   : > { %v19251_v59 = vpop.f32.mrf.mxu1  ;;  %16537 = vmatmul.mubr.msk.f32.gmra.mxu1 %vm430_vm0, %v212_v51  ;;  %16735 = vmatprep.mubr.msk.f32.mxu0 %vm430_vm0, %v2653_v56  ;;  %v2664_v56 = vld [vmem:[%s18749_s9 + $0x222] sm:$0xff] }
  0xf2   : > { %23990 = vst [vmem:[#allocation15_spill] sm:$0xff] %v19251_v59  ;;  %16539 = vmatprep.mubr.msk.f32.mxu1 %vm430_vm0, %v213_v55  ;;  %v19259_v62 = vpop.f32.mrf.mxu0  ;;  %v224_v55 = vld [vmem:[%s18749_s9 + $0x220] sm:$0xff] }
  0xf3   : > { %v19261_v63 = vpop.f32.mrf.mxu1 }
  0xf4   : > { %23991 = vst [vmem:[#allocation16_spill] sm:$0xff] %v19261_v63  ;;  %v19265_v2 = vpop.f32.mrf.mxu0  ;;  %16736 = vmatmul.mubr.msk.f32.gmra.mxu0 %vm430_vm0, %v2654_v61  ;;  %v245_v63 = vld [vmem:[%s18749_s9 + $0x2f8] sm:$0xff] }
  0xf5   : > { %v19267_v3 = vpop.f32.mrf.mxu1  ;;  %16540 = vmatmul.mubr.msk.f32.gmra.mxu1 %vm430_vm0, %v214_v60  ;;  %16738 = vmatprep.mubr.msk.f32.mxu0 %vm430_vm0, %v2655_v1  ;;  %v2665_v1 = vld [vmem:[%s18749_s9 + $0x232] sm:$0xff] }
  0xf6   : > { %23992 = vst [vmem:[#allocation17_spill] sm:$0xff] %v19267_v3  ;;  %16542 = vmatprep.mubr.msk.f32.mxu1 %vm430_vm0, %v215_v0  ;;  %v19275_v6 = vpop.f32.mrf.mxu0  ;;  %v225_v0 = vld [vmem:[%s18749_s9 + $0x230] sm:$0xff] }
  0xf7   : > { %v19277_v7 = vpop.f32.mrf.mxu1 }
  0xf8   : > { %23993 = vst [vmem:[#allocation18_spill] sm:$0xff] %v19277_v7  ;;  %v19281_v10 = vpop.f32.mrf.mxu0  ;;  %16739 = vmatmul.mubr.msk.f32.gmra.mxu0 %vm430_vm0, %v2656_v5  ;;  %v243_v7 = vld [vmem:[%s18749_s9 + $0x2e0] sm:$0xff] }
  0xf9   : > { %v19283_v11 = vpop.f32.mrf.mxu1  ;;  %16543 = vmatmul.mubr.msk.f32.gmra.mxu1 %vm430_vm0, %v216_v4  ;;  %16741 = vmatprep.mubr.msk.f32.mxu0 %vm430_vm0, %v2657_v9  ;;  %v2666_v9 = vld [vmem:[%s18749_s9 + $0x23a] sm:$0xff] }
  0xfa   : > { %23994 = vst [vmem:[#allocation19_spill] sm:$0xff] %v19283_v11  ;;  %16545 = vmatprep.mubr.msk.f32.mxu1 %vm430_vm0, %v217_v8  ;;  %v19291_v14 = vpop.f32.mrf.mxu0  ;;  %v226_v8 = vld [vmem:[%s18749_s9 + $0x238] sm:$0xff] }
  0xfb   : > { %v19293_v15 = vpop.f32.mrf.mxu1 }
  0xfc   : > { %23995 = vst [vmem:[#allocation20_spill] sm:$0xff] %v19293_v15  ;;  %v19297_v21 = vpop.f32.mrf.mxu0  ;;  %16742 = vmatmul.mubr.msk.f32.gmra.mxu0 %vm430_vm0, %v2658_v13  ;;  %v241_v15 = vld [vmem:[%s18749_s9 + $0x2d0] sm:$0xff] }
  0xfd   : > { %v19299_v22 = vpop.f32.mrf.mxu1  ;;  %16546 = vmatmul.mubr.msk.f32.gmra.mxu1 %vm430_vm0, %v218_v12  ;;  %16744 = vmatprep.mubr.msk.f32.mxu0 %vm430_vm0, %v2659_v18  ;;  %v2667_v18 = vld [vmem:[%s18749_s9 + $0x242] sm:$0xff] }
  0xfe   : > { %23996 = vst [vmem:[#allocation21_spill] sm:$0xff] %v19299_v22  ;;  %16548 = vmatprep.mubr.msk.f32.mxu1 %vm430_vm0, %v219_v17  ;;  %v19307_v27 = vpop.f32.mrf.mxu0  ;;  %v227_v17 = vld [vmem:[%s18749_s9 + $0x240] sm:$0xff] }
  0xff   : > { %v19309_v28 = vpop.f32.mrf.mxu1 }
 0x100   : > { %23997 = vst [vmem:[#allocation22_spill] sm:$0xff] %v19309_v28  ;;  %v19313_v35 = vpop.f32.mrf.mxu0  ;;  %16745 = vmatmul.mubr.msk.f32.gmra.mxu0 %vm430_vm0, %v2660_v24  ;;  %v239_v28 = vld [vmem:[%s18749_s9 + $0x2b8] sm:$0xff] }
 0x101   : > { %v19315_v36 = vpop.f32.mrf.mxu1  ;;  %16549 = vmatmul.mubr.msk.f32.gmra.mxu1 %vm430_vm0, %v220_v23  ;;  %16747 = vmatprep.mubr.msk.f32.mxu0 %vm430_vm0, %v2661_v32  ;;  %v2668_v32 = vld [vmem:[%s18749_s9 + $0x24a] sm:$0xff] }
 0x102   : > { %23998 = vst [vmem:[#allocation23_spill] sm:$0xff] %v19315_v36  ;;  %16551 = vmatprep.mubr.msk.f32.mxu1 %vm430_vm0, %v221_v31  ;;  %v19323_v43 = vpop.f32.mrf.mxu0  ;;  %v228_v31 = vld [vmem:[%s18749_s9 + $0x248] sm:$0xff] }
 0x103   : > { %v19325_v44 = vpop.f32.mrf.mxu1 }
 0x104   : > { %23999 = vst [vmem:[#allocation24_spill] sm:$0xff] %v19325_v44  ;;  %v19329_v51 = vpop.f32.mrf.mxu0  ;;  %16748 = vmatmul.mubr.msk.f32.gmra.mxu0 %vm430_vm0, %v2662_v40 }
 0x105   : > { %v19331_v52 = vpop.f32.mrf.mxu1  ;;  %16552 = vmatmul.mubr.msk.f32.gmra.mxu1 %vm430_vm0, %v222_v39  ;;  %16750 = vmatprep.mubr.msk.f32.mxu0 %vm430_vm0, %v2663_v48  ;;  %v2669_v48 = vld [vmem:[%s18749_s9 + $0x25a] sm:$0xff] }
 0x106   : > { %24000 = vst [vmem:[#allocation25_spill] sm:$0xff] %v19331_v52  ;;  %16554 = vmatprep.mubr.msk.f32.mxu1 %vm430_vm0, %v223_v47  ;;  %v19339_v60 = vpop.f32.mrf.mxu0  ;;  %v229_v47 = vld [vmem:[%s18749_s9 + $0x258] sm:$0xff] }
 0x107   : > { %v19341_v61 = vpop.f32.mrf.mxu1  ;;  %v2678_v52 = vld [vmem:[%s18749_s9 + $0x2b2] sm:$0xff] }
 0x108   : > { %24001 = vst [vmem:[#allocation26_spill] sm:$0xff] %v19341_v61  ;;  %v19345_v4 = vpop.f32.mrf.mxu0  ;;  %16751 = vmatmul.mubr.msk.f32.gmra.mxu0 %vm430_vm0, %v2664_v56 }
 0x109   : > { %v19347_v5 = vpop.f32.mrf.mxu1  ;;  %16555 = vmatmul.mubr.msk.f32.gmra.mxu1 %vm430_vm0, %v224_v55  ;;  %16753 = vmatprep.mubr.msk.f32.mxu0 %vm430_vm0, %v2665_v1  ;;  %v2670_v1 = vld [vmem:[%s18749_s9 + $0x262] sm:$0xff] }
 0x10a   : > { %24002 = vst [vmem:[#allocation27_spill] sm:$0xff] %v19347_v5  ;;  %16557 = vmatprep.mubr.msk.f32.mxu1 %vm430_vm0, %v225_v0  ;;  %v19355_v12 = vpop.f32.mrf.mxu0  ;;  %v230_v0 = vld [vmem:[%s18749_s9 + $0x260] sm:$0xff] }
 0x10b   : > { %v19357_v13 = vpop.f32.mrf.mxu1 }
 0x10c   : > { %24003 = vst [vmem:[#allocation28_spill] sm:$0xff] %v19357_v13  ;;  %v19361_v23 = vpop.f32.mrf.mxu0  ;;  %16754 = vmatmul.mubr.msk.f32.gmra.mxu0 %vm430_vm0, %v2666_v9  ;;  %v235_v13 = vld [vmem:[%s18749_s9 + $0x290] sm:$0xff] }
 0x10d   : > { %v19363_v24 = vpop.f32.mrf.mxu1  ;;  %16558 = vmatmul.mubr.msk.f32.gmra.mxu1 %vm430_vm0, %v226_v8  ;;  %16756 = vmatprep.mubr.msk.f32.mxu0 %vm430_vm0, %v2667_v18  ;;  %v2671_v18 = vld [vmem:[%s18749_s9 + $0x26a] sm:$0xff] }
 0x10e   : > { %24004 = vst [vmem:[#allocation29_spill] sm:$0xff] %v19363_v24  ;;  %16560 = vmatprep.mubr.msk.f32.mxu1 %vm430_vm0, %v227_v17  ;;  %v19371_v39 = vpop.f32.mrf.mxu0  ;;  %v231_v17 = vld [vmem:[%s18749_s9 + $0x268] sm:$0xff] }
 0x10f   : > { %v19373_v40 = vpop.f32.mrf.mxu1 }
 0x110   : > { %24005 = vst [vmem:[#allocation30_spill] sm:$0xff] %v19373_v40  ;;  %v19377_v55 = vpop.f32.mrf.mxu0  ;;  %16757 = vmatmul.mubr.msk.f32.gmra.mxu0 %vm430_vm0, %v2668_v32  ;;  %v232_v32 = vld [vmem:[%s18749_s9 + $0x270] sm:$0xff]  ;;  %v233_v40 = vld [vmem:[%s18749_s9 + $0x280] sm:$0xff] }
 0x111   : > { %v19379_v56 = vpop.f32.mrf.mxu1  ;;  %16561 = vmatmul.mubr.msk.f32.gmra.mxu1 %vm430_vm0, %v228_v31  ;;  %16759 = vmatprep.mubr.msk.f32.mxu0 %vm430_vm0, %v2669_v48 }
 0x112   : > { %24006 = vst [vmem:[#allocation31_spill] sm:$0xff] %v19379_v56  ;;  %16563 = vmatprep.mubr.msk.f32.mxu1 %vm430_vm0, %v229_v47  ;;  %v19387_v8 = vpop.f32.mrf.mxu0  ;;  %v2672_v47 = vld [vmem:[%s18749_s9 + $0x272] sm:$0xff] }
 0x113   : > { %v19389_v9 = vpop.f32.mrf.mxu1 }
 0x114   : > { %24007 = vst [vmem:[#allocation32_spill] sm:$0xff] %v19389_v9  ;;  %v19393_v56 = vpop.f32.mrf.mxu0  ;;  %16760 = vmatmul.mubr.msk.f32.gmra.mxu0 %vm430_vm0, %v2670_v1  ;;  %v234_v1 = vld [vmem:[%s18749_s9 + $0x288] sm:$0xff] }
 0x115   : > { %v19395_v31 = vpop.f32.mrf.mxu1  ;;  %16564 = vmatmul.mubr.msk.f32.gmra.mxu1 %vm430_vm0, %v230_v0  ;;  %16762 = vmatprep.mubr.msk.f32.mxu0 %vm430_vm0, %v2671_v18 }
 0x116   : > { %24008 = vst [vmem:[#allocation33_spill] sm:$0xff] %v19395_v31  ;;  %16566 = vmatprep.mubr.msk.f32.mxu1 %vm430_vm0, %v231_v17  ;;  %v19403_v48 = vpop.f32.mrf.mxu0  ;;  %v2673_v31 = vld [vmem:[%s18749_s9 + $0x282] sm:$0xff]  ;;  %v2674_v17 = vld [vmem:[%s18749_s9 + $0x28a] sm:$0xff] }
 0x117   : > { %v19405_v9 = vpop.f32.mrf.mxu1 }
 0x118   : > { %24009 = vst [vmem:[#allocation34_spill] sm:$0xff] %v19405_v9  ;;  %v19409_v24 = vpop.f32.mrf.mxu0  ;;  %16763 = vmatmul.mubr.msk.f32.gmra.mxu0 %vm430_vm0, %v2672_v47  ;;  %v19438_v47 = vld [vmem:[%s23975_s1 + $0x58] sm:$0xff] }
 0x119   : > { %v19411_v0 = vpop.f32.mrf.mxu1  ;;  %16567 = vmatmul.mubr.msk.f32.gmra.mxu1 %vm430_vm0, %v232_v32  ;;  %16765 = vmatprep.mubr.msk.f32.mxu0 %vm430_vm0, %v2673_v31  ;;  %v2676_v31 = vld [vmem:[%s18749_s9 + $0x29a] sm:$0xff] }
 0x11a   : > { %24010 = vst [vmem:[#allocation35_spill] sm:$0xff] %v19411_v0  ;;  %16569 = vmatprep.mubr.msk.f32.mxu1 %vm430_vm0, %v233_v40  ;;  %v19419_v18 = vpop.f32.mrf.mxu0  ;;  %v2675_v0 = vld [vmem:[%s18749_s9 + $0x292] sm:$0xff]  ;;  %17253 = vmatprep.subr.mxu1 %v19438_v47 }
 0x11b   : > { %v19421_v9 = vpop.f32.mrf.mxu1  ;;  %v236_v40 = vld [vmem:[%s18749_s9 + $0x298] sm:$0xff] }
 0x11c   : > { %24011 = vst [vmem:[#allocation36_spill] sm:$0xff] %v19421_v9  ;;  %v19425_v5 = vpop.f32.mrf.mxu0  ;;  %16766 = vmatmul.mubr.msk.f32.gmra.mxu0 %vm430_vm0, %v2674_v17  ;;  %v2677_v17 = vld [vmem:[%s18749_s9 + $0x2aa] sm:$0xff] }
 0x11d   : > { %v19427_v32 = vpop.f32.mrf.mxu1  ;;  %16570 = vmatmul.mubr.msk.f32.gmra.mxu1 %vm430_vm0, %v234_v1  ;;  %16768 = vmatprep.mubr.msk.f32.mxu0 %vm430_vm0, %v2675_v0  ;;  %v237_v1 = vld [vmem:[%s18749_s9 + $0x2a8] sm:$0xff] }
 0x11e   : > { %24012 = vst [vmem:[#allocation37_spill] sm:$0xff] %v19427_v32  ;;  %16572 = vmatprep.mubr.msk.f32.mxu1 %vm430_vm0, %v235_v13  ;;  %v19440_v9 = vpop.f32.mrf.mxu0  ;;  %v19450_v13 = vld [vmem:[%s23975_s1 + $0x68] sm:$0xff] }
 0x11f   : > { %v19442_v32 = vpop.f32.mrf.mxu1  ;;  %17449 = vmatprep.subr.mxu0 %v19450_v13 }
 0x120   : > { %24013 = vst [vmem:[#allocation38_spill] sm:$0xff] %v19442_v32  ;;  %v19452_v0 = vpop.f32.mrf.mxu0  ;;  %16769 = vmatmul.mubr.msk.f32.gmra.mxu0 %vm430_vm0, %v2676_v31  ;;  %v238_v32 = vld [vmem:[%s18749_s9 + $0x2b0] sm:$0xff] }
 0x121   : > { %v19454_v61 = vpop.f32.mrf.mxu1  ;;  %16573 = vmatmul.mubr.msk.f32.gmra.mxu1 %vm430_vm0, %v236_v40  ;;  %16771 = vmatprep.mubr.msk.f32.mxu0 %vm430_vm0, %v2677_v17  ;;  %v2680_v17 = vld [vmem:[%s18749_s9 + $0x2c2] sm:$0xff] }
 0x122   : > { %24014 = vst [vmem:[#allocation39_spill] sm:$0xff] %v19454_v61  ;;  %16575 = vmatprep.mubr.msk.f32.mxu1 %vm430_vm0, %v237_v1  ;;  %v19462_v44 = vpop.f32.mrf.mxu0  ;;  %v2679_v61 = vld [vmem:[%s18749_s9 + $0x2ba] sm:$0xff] }
 0x123   : > { %v19464_v36 = vpop.f32.mrf.mxu1  ;;  %v240_v1 = vld [vmem:[%s18749_s9 + $0x2c0] sm:$0xff] }
 0x124   : > { %24015 = vst [vmem:[#allocation40_spill] sm:$0xff] %v19464_v36  ;;  %v19469_v40 = vpop.f32.mrf.mxu0  ;;  %16772 = vmatmul.mubr.msk.f32.gmra.mxu0 %vm430_vm0, %v2678_v52  ;;  %v2682_v52 = vld [vmem:[%s18749_s9 + $0x2da] sm:$0xff] }
 0x125   : > { %v19471_v31 = vpop.f32.mrf.mxu1  ;;  %16576 = vmatmul.mubr.msk.f32.gmra.mxu1 %vm430_vm0, %v238_v32  ;;  %16774 = vmatprep.mubr.msk.f32.mxu0 %vm430_vm0, %v2679_v61 }
 0x126   : > { %24016 = vst [vmem:[#allocation41_spill] sm:$0xff] %v19471_v31  ;;  %16578 = vmatprep.mubr.msk.f32.mxu1 %vm430_vm0, %v239_v28  ;;  %v19479_v36 = vpop.f32.mrf.mxu0  ;;  %v2681_v31 = vld [vmem:[%s18749_s9 + $0x2d2] sm:$0xff] }
 0x127   : > { %v19481_v22 = vpop.f32.mrf.mxu1  ;;  %v242_v28 = vld [vmem:[%s18749_s9 + $0x2d8] sm:$0xff] }
 0x128   : > { %24017 = vst [vmem:[#allocation42_spill] sm:$0xff] %v19481_v22  ;;  %v19485_v11 = vpop.f32.mrf.mxu0  ;;  %16775 = vmatmul.mubr.msk.f32.gmra.mxu0 %vm430_vm0, %v2680_v17 }
 0x129   : > { %v19487_v32 = vpop.f32.mrf.mxu1  ;;  %16579 = vmatmul.mubr.msk.f32.gmra.mxu1 %vm430_vm0, %v240_v1  ;;  %16777 = vmatprep.mubr.msk.f32.mxu0 %vm430_vm0, %v2681_v31  ;;  %v2684_v31 = vld [vmem:[%s18749_s9 + $0x2ea] sm:$0xff] }
 0x12a   : > { %24018 = vst [vmem:[#allocation43_spill] sm:$0xff] %v19487_v32  ;;  %16581 = vmatprep.mubr.msk.f32.mxu1 %vm430_vm0, %v241_v15  ;;  %v19495_v61 = vpop.f32.mrf.mxu0  ;;  %v2683_v32 = vld [vmem:[%s18749_s9 + $0x2e2] sm:$0xff] }
 0x12b   : > { %v19497_v22 = vpop.f32.mrf.mxu1  ;;  %v244_v15 = vld [vmem:[%s18749_s9 + $0x2e8] sm:$0xff] }
 0x12c   : > { %24019 = vst [vmem:[#allocation44_spill] sm:$0xff] %v19497_v22  ;;  %v19501_v3 = vpop.f32.mrf.mxu0  ;;  %16778 = vmatmul.mubr.msk.f32.gmra.mxu0 %vm430_vm0, %v2682_v52 }
 0x12d   : > { %v19503_v1 = vpop.f32.mrf.mxu1  ;;  %16582 = vmatmul.mubr.msk.f32.gmra.mxu1 %vm430_vm0, %v242_v28  ;;  %16780 = vmatprep.mubr.msk.f32.mxu0 %vm430_vm0, %v2683_v32  ;;  %v2686_v32 = vld [vmem:[%s18749_s9 + $0x302] sm:$0xff] }
 0x12e   : > { %24020 = vst [vmem:[#allocation45_spill] sm:$0xff] %v19503_v1  ;;  %16584 = vmatprep.mubr.msk.f32.mxu1 %vm430_vm0, %v243_v7  ;;  %v19511_v17 = vpop.f32.mrf.mxu0  ;;  %v2685_v1 = vld [vmem:[%s18749_s9 + $0x2fa] sm:$0xff] }
 0x12f   : > { %v19513_v22 = vpop.f32.mrf.mxu1  ;;  %v246_v7 = vld [vmem:[%s18749_s9 + $0x300] sm:$0xff] }
 0x130   : > { %24021 = vst [vmem:[#allocation46_spill] sm:$0xff] %v19513_v22  ;;  %v19517_v59 = vpop.f32.mrf.mxu0  ;;  %16781 = vmatmul.mubr.msk.f32.gmra.mxu0 %vm430_vm0, %v2684_v31 }
 0x131   : > { %v19519_v28 = vpop.f32.mrf.mxu1  ;;  %16585 = vmatmul.mubr.msk.f32.gmra.mxu1 %vm430_vm0, %v244_v15  ;;  %16783 = vmatprep.mubr.msk.f32.mxu0 %vm430_vm0, %v2685_v1  ;;  %v2688_v1 = vld [vmem:[%s18749_s9 + $0x312] sm:$0xff] }
 0x132   : > { %24022 = vst [vmem:[#allocation47_spill] sm:$0xff] %v19519_v28  ;;  %16587 = vmatprep.mubr.msk.f32.mxu1 %vm430_vm0, %v245_v63  ;;  %v19527_v52 = vpop.f32.mrf.mxu0  ;;  %v2687_v28 = vld [vmem:[%s18749_s9 + $0x30a] sm:$0xff] }
 0x133   : > { %v19529_v22 = vpop.f32.mrf.mxu1  ;;  %v248_v63 = vld [vmem:[%s18749_s9 + $0x310] sm:$0xff] }
 0x134   : > { %24023 = vst [vmem:[#allocation48_spill] sm:$0xff] %v19529_v22  ;;  %v19533_v50 = vpop.f32.mrf.mxu0  ;;  %16784 = vmatmul.mubr.msk.f32.gmra.mxu0 %vm430_vm0, %v2686_v32 }
 0x135   : > { %v19535_v15 = vpop.f32.mrf.mxu1  ;;  %16588 = vmatmul.mubr.msk.f32.gmra.mxu1 %vm430_vm0, %v246_v7  ;;  %16786 = vmatprep.mubr.msk.f32.mxu0 %vm430_vm0, %v2687_v28  ;;  %v2690_v28 = vld [vmem:[%s18749_s9 + $0x32a] sm:$0xff] }
 0x136   : > { %24024 = vst [vmem:[#allocation49_spill] sm:$0xff] %v19535_v15  ;;  %16590 = vmatprep.mubr.msk.f32.mxu1 %vm430_vm0, %v247_v54  ;;  %v19543_v31 = vpop.f32.mrf.mxu0  ;;  %v2689_v15 = vld [vmem:[%s18749_s9 + $0x322] sm:$0xff] }
 0x137   : > { %v19545_v22 = vpop.f32.mrf.mxu1  ;;  %v250_v54 = vld [vmem:[%s18749_s9 + $0x328] sm:$0xff] }
 0x138   : > { %24025 = vst [vmem:[#allocation50_spill] sm:$0xff] %v19545_v22  ;;  %v19549_v42 = vpop.f32.mrf.mxu0  ;;  %16787 = vmatmul.mubr.msk.f32.gmra.mxu0 %vm430_vm0, %v2688_v1 }
 0x139   : > { %v19551_v7 = vpop.f32.mrf.mxu1  ;;  %16591 = vmatmul.mubr.msk.f32.gmra.mxu1 %vm430_vm0, %v248_v63  ;;  %16789 = vmatprep.mubr.msk.f32.mxu0 %vm430_vm0, %v2689_v15  ;;  %v2692_v15 = vld [vmem:[%s18749_s9 + $0x33a] sm:$0xff] }
 0x13a   : > { %24026 = vst [vmem:[#allocation51_spill] sm:$0xff] %v19551_v7  ;;  %16593 = vmatprep.mubr.msk.f32.mxu1 %vm430_vm0, %v249_v46  ;;  %v19559_v32 = vpop.f32.mrf.mxu0  ;;  %v2691_v7 = vld [vmem:[%s18749_s9 + $0x332] sm:$0xff] }
 0x13b   : > { %v19561_v22 = vpop.f32.mrf.mxu1  ;;  %v252_v46 = vld [vmem:[%s18749_s9 + $0x338] sm:$0xff] }
 0x13c   : > { %24027 = vst [vmem:[#allocation52_spill] sm:$0xff] %v19561_v22  ;;  %v19565_v34 = vpop.f32.mrf.mxu0  ;;  %16790 = vmatmul.mubr.msk.f32.gmra.mxu0 %vm430_vm0, %v2690_v28 }
 0x13d   : > { %24028 = vst [vmem:[#allocation53_spill] sm:$0xff] %v19565_v34  ;;  %v19567_v63 = vpop.f32.mrf.mxu1  ;;  %16594 = vmatmul.mubr.msk.f32.gmra.mxu1 %vm430_vm0, %v250_v54  ;;  %16792 = vmatprep.mubr.msk.f32.mxu0 %vm430_vm0, %v2691_v7  ;;  %v2694_v7 = vld [vmem:[%s18749_s9 + $0x352] sm:$0xff] }
 0x13e   : > { %24029 = vst [vmem:[#allocation54_spill] sm:$0xff] %v19567_v63  ;;  %16596 = vmatprep.mubr.msk.f32.mxu1 %vm430_vm0, %v251_v38  ;;  %v19575_v1 = vpop.f32.mrf.mxu0  ;;  %v2693_v63 = vld [vmem:[%s18749_s9 + $0x34a] sm:$0xff] }
 0x13f   : > { %24030 = vst [vmem:[#allocation55_spill] sm:$0xff] %v19575_v1  ;;  %v19577_v22 = vpop.f32.mrf.mxu1  ;;  %v254_v38 = vld [vmem:[%s18749_s9 + $0x350] sm:$0xff] }
 0x140   : > { %24031 = vst [vmem:[#allocation56_spill] sm:$0xff] %v19577_v22  ;;  %v19581_v26 = vpop.f32.mrf.mxu0  ;;  %16793 = vmatmul.mubr.msk.f32.gmra.mxu0 %vm430_vm0, %v2692_v15  ;;  %v2709_v1 = vld [vmem:[%s18749_s9 + $0x3ea] sm:$0xff] }
 0x141   : > { %24032 = vst [vmem:[#allocation57_spill] sm:$0xff] %v19581_v26  ;;  %v19583_v54 = vpop.f32.mrf.mxu1  ;;  %16597 = vmatmul.mubr.msk.f32.gmra.mxu1 %vm430_vm0, %v252_v46  ;;  %16795 = vmatprep.mubr.msk.f32.mxu0 %vm430_vm0, %v2693_v63  ;;  %v2696_v63 = vld [vmem:[%s18749_s9 + $0x362] sm:$0xff] }
 0x142   : > { %24033 = vst [vmem:[#allocation58_spill] sm:$0xff] %v19583_v54  ;;  %16599 = vmatprep.mubr.msk.f32.mxu1 %vm430_vm0, %v253_v30  ;;  %v19591_v28 = vpop.f32.mrf.mxu0  ;;  %v2695_v54 = vld [vmem:[%s18749_s9 + $0x35a] sm:$0xff]  ;;  %v269_v26 = vld [vmem:[%s18749_s9 + $0x3e8] sm:$0xff] }
 0x143   : > { %24034 = vst [vmem:[#allocation59_spill] sm:$0xff] %v19591_v28  ;;  %v19593_v22 = vpop.f32.mrf.mxu1  ;;  %v256_v30 = vld [vmem:[%s18749_s9 + $0x360] sm:$0xff] }
 0x144   : > { %24035 = vst [vmem:[#allocation60_spill] sm:$0xff] %v19593_v22  ;;  %v19597_v20 = vpop.f32.mrf.mxu0  ;;  %16796 = vmatmul.mubr.msk.f32.gmra.mxu0 %vm430_vm0, %v2694_v7 }
 0x145   : > { %24036 = vst [vmem:[#allocation61_spill] sm:$0xff] %v19597_v20  ;;  %v19599_v46 = vpop.f32.mrf.mxu1  ;;  %16600 = vmatmul.mubr.msk.f32.gmra.mxu1 %vm430_vm0, %v254_v38  ;;  %16798 = vmatprep.mubr.msk.f32.mxu0 %vm430_vm0, %v2695_v54  ;;  %v257_v20 = vld [vmem:[%s18749_s9 + $0x370] sm:$0xff]  ;;  %v2698_v54 = vld [vmem:[%s18749_s9 + $0x37a] sm:$0xff] }
 0x146   : > { %24037 = vst [vmem:[#allocation62_spill] sm:$0xff] %v19599_v46  ;;  %16602 = vmatprep.mubr.msk.f32.mxu1 %vm430_vm0, %v255_v57  ;;  %v19607_v15 = vpop.f32.mrf.mxu0  ;;  %v2697_v46 = vld [vmem:[%s18749_s9 + $0x372] sm:$0xff] }
 0x147   : > { %24038 = vst [vmem:[#allocation63_spill] sm:$0xff] %v19607_v15  ;;  %v19609_v22 = vpop.f32.mrf.mxu1  ;;  %v258_v57 = vld [vmem:[%s18749_s9 + $0x378] sm:$0xff] }
 0x148   : > { %24039 = vst [vmem:[#allocation64_spill] sm:$0xff] %v19609_v22  ;;  %v19613_v28 = vpop.f32.mrf.mxu0  ;;  %16799 = vmatmul.mubr.msk.f32.gmra.mxu0 %vm430_vm0, %v2696_v63 }
 0x149   : > { %24040 = vst [vmem:[#allocation65_spill] sm:$0xff] %v19613_v28  ;;  %v19615_v38 = vpop.f32.mrf.mxu1  ;;  %16603 = vmatmul.mubr.msk.f32.gmra.mxu1 %vm430_vm0, %v256_v30  ;;  %16801 = vmatprep.mubr.msk.f32.mxu0 %vm430_vm0, %v2697_v46  ;;  %v259_v28 = vld [vmem:[%s18749_s9 + $0x380] sm:$0xff]  ;;  %v2700_v46 = vld [vmem:[%s18749_s9 + $0x38a] sm:$0xff] }
 0x14a   : > { %24041 = vst [vmem:[#allocation66_spill] sm:$0xff] %v19615_v38  ;;  %16605 = vmatprep.mubr.msk.f32.mxu1 %vm430_vm0, %v257_v20  ;;  %v19623_v7 = vpop.f32.mrf.mxu0  ;;  %v2699_v38 = vld [vmem:[%s18749_s9 + $0x382] sm:$0xff] }
 0x14b   : > { %24042 = vst [vmem:[#allocation67_spill] sm:$0xff] %v19623_v7  ;;  %v19625_v22 = vpop.f32.mrf.mxu1  ;;  %v260_v20 = vld [vmem:[%s18749_s9 + $0x388] sm:$0xff] }
 0x14c   : > { %24043 = vst [vmem:[#allocation68_spill] sm:$0xff] %v19625_v22  ;;  %v19629_v15 = vpop.f32.mrf.mxu0  ;;  %16802 = vmatmul.mubr.msk.f32.gmra.mxu0 %vm430_vm0, %v2698_v54 }
 0x14d   : > { %24044 = vst [vmem:[#allocation69_spill] sm:$0xff] %v19629_v15  ;;  %v19631_v30 = vpop.f32.mrf.mxu1  ;;  %16606 = vmatmul.mubr.msk.f32.gmra.mxu1 %vm430_vm0, %v258_v57  ;;  %16804 = vmatprep.mubr.msk.f32.mxu0 %vm430_vm0, %v2699_v38  ;;  %v261_v15 = vld [vmem:[%s18749_s9 + $0x398] sm:$0xff]  ;;  %v2702_v38 = vld [vmem:[%s18749_s9 + $0x3a2] sm:$0xff] }
 0x14e   : > { %24045 = vst [vmem:[#allocation70_spill] sm:$0xff] %v19631_v30  ;;  %16608 = vmatprep.mubr.msk.f32.mxu1 %vm430_vm0, %v259_v28  ;;  %v19639_v63 = vpop.f32.mrf.mxu0  ;;  %v2701_v30 = vld [vmem:[%s18749_s9 + $0x39a] sm:$0xff] }
 0x14f   : > { %24046 = vst [vmem:[#allocation71_spill] sm:$0xff] %v19639_v63  ;;  %v19641_v22 = vpop.f32.mrf.mxu1  ;;  %v262_v28 = vld [vmem:[%s18749_s9 + $0x3a0] sm:$0xff] }
 0x150   : > { %24047 = vst [vmem:[#allocation72_spill] sm:$0xff] %v19641_v22  ;;  %v19645_v7 = vpop.f32.mrf.mxu0  ;;  %16805 = vmatmul.mubr.msk.f32.gmra.mxu0 %vm430_vm0, %v2700_v46 }
 0x151   : > { %24048 = vst [vmem:[#allocation73_spill] sm:$0xff] %v19645_v7  ;;  %v19647_v57 = vpop.f32.mrf.mxu1  ;;  %16609 = vmatmul.mubr.msk.f32.gmra.mxu1 %vm430_vm0, %v260_v20  ;;  %16807 = vmatprep.mubr.msk.f32.mxu0 %vm430_vm0, %v2701_v30  ;;  %v263_v7 = vld [vmem:[%s18749_s9 + $0x3a8] sm:$0xff]  ;;  %v2704_v30 = vld [vmem:[%s18749_s9 + $0x3b2] sm:$0xff] }
 0x152   : > { %24049 = vst [vmem:[#allocation74_spill] sm:$0xff] %v19647_v57  ;;  %16611 = vmatprep.mubr.msk.f32.mxu1 %vm430_vm0, %v261_v15  ;;  %v19655_v54 = vpop.f32.mrf.mxu0  ;;  %v2703_v57 = vld [vmem:[%s18749_s9 + $0x3aa] sm:$0xff] }
 0x153   : > { %24050 = vst [vmem:[#allocation75_spill] sm:$0xff] %v19655_v54  ;;  %v19657_v22 = vpop.f32.mrf.mxu1  ;;  %v264_v15 = vld [vmem:[%s18749_s9 + $0x3b0] sm:$0xff] }
 0x154   : > { %24051 = vst [vmem:[#allocation76_spill] sm:$0xff] %v19657_v22  ;;  %v19661_v63 = vpop.f32.mrf.mxu0  ;;  %16808 = vmatmul.mubr.msk.f32.gmra.mxu0 %vm430_vm0, %v2702_v38 }
 0x155   : > { %24052 = vst [vmem:[#allocation77_spill] sm:$0xff] %v19661_v63  ;;  %v19663_v20 = vpop.f32.mrf.mxu1  ;;  %16612 = vmatmul.mubr.msk.f32.gmra.mxu1 %vm430_vm0, %v262_v28  ;;  %16810 = vmatprep.mubr.msk.f32.mxu0 %vm430_vm0, %v2703_v57  ;;  %v265_v63 = vld [vmem:[%s18749_s9 + $0x3c0] sm:$0xff]  ;;  %v2706_v57 = vld [vmem:[%s18749_s9 + $0x3ca] sm:$0xff] }
 0x156   : > { %24053 = vst [vmem:[#allocation78_spill] sm:$0xff] %v19663_v20  ;;  %16614 = vmatprep.mubr.msk.f32.mxu1 %vm430_vm0, %v263_v7  ;;  %v19671_v46 = vpop.f32.mrf.mxu0  ;;  %v2705_v20 = vld [vmem:[%s18749_s9 + $0x3c2] sm:$0xff] }
 0x157   : > { %24054 = vst [vmem:[#allocation79_spill] sm:$0xff] %v19671_v46  ;;  %v19673_v22 = vpop.f32.mrf.mxu1  ;;  %v266_v7 = vld [vmem:[%s18749_s9 + $0x3c8] sm:$0xff] }
 0x158   : > { %24055 = vst [vmem:[#allocation80_spill] sm:$0xff] %v19673_v22  ;;  %v19677_v54 = vpop.f32.mrf.mxu0  ;;  %16811 = vmatmul.mubr.msk.f32.gmra.mxu0 %vm430_vm0, %v2704_v30  ;;  %v2708_v30 = vld [vmem:[%s18749_s9 + $0x3da] sm:$0xff] }
 0x159   : > { %24056 = vst [vmem:[#allocation81_spill] sm:$0xff] %v19677_v54  ;;  %v19679_v28 = vpop.f32.mrf.mxu1  ;;  %16615 = vmatmul.mubr.msk.f32.gmra.mxu1 %vm430_vm0, %v264_v15  ;;  %16813 = vmatprep.mubr.msk.f32.mxu0 %vm430_vm0, %v2705_v20  ;;  %v267_v54 = vld [vmem:[%s18749_s9 + $0x3d0] sm:$0xff]  ;;  %v268_v20 = vld [vmem:[%s18749_s9 + $0x3d8] sm:$0xff] }
 0x15a   : > { %24057 = vst [vmem:[#allocation82_spill] sm:$0xff] %v19679_v28  ;;  %16617 = vmatprep.mubr.msk.f32.mxu1 %vm430_vm0, %v265_v63  ;;  %v19687_v38 = vpop.f32.mrf.mxu0  ;;  %v2707_v28 = vld [vmem:[%s18749_s9 + $0x3d2] sm:$0xff] }
 0x15b   : > { %24058 = vst [vmem:[#allocation83_spill] sm:$0xff] %v19687_v38  ;;  %v19689_v22 = vpop.f32.mrf.mxu1 }
 0x15c   : > { %24059 = vst [vmem:[#allocation84_spill] sm:$0xff] %v19689_v22  ;;  %v16671_v15 = vpop.f32.mrf.mxu0  ;;  %16814 = vmatmul.mubr.msk.f32.gmra.mxu0 %vm430_vm0, %v2706_v57 }
 0x15d   : > { %v16475_v46 = vpop.f32.mrf.mxu1  ;;  %16618 = vmatmul.mubr.msk.f32.gmra.mxu1 %vm430_vm0, %v266_v7  ;;  %16816 = vmatprep.mubr.msk.f32.mxu0 %vm430_vm0, %v2707_v28  ;;  %v270_v28 = vld [vmem:[%s18749_s9 + $0x3f0] sm:$0xff] }
 0x15e   : > { %v1976_v63 = vadd.f32 %v16475_v46, %v19169_v19  ;;  %16620 = vmatprep.mubr.msk.f32.mxu1 %vm430_vm0, %v267_v54  ;;  %v3190_v22 = vpop.f32.mrf.mxu0 }
 0x15f   : > { %v1970_v38 = vpop.f32.mrf.mxu1 }
 0x160   : > { %v19702_v7 = vadd.f32 %v16671_v15, %v1976_v63  ;;  %v1971_v57 = vadd.f32 %v1970_v38, %v19179_v16  ;;  %v16674_v19 = vpop.f32.mrf.mxu0  ;;  %16817 = vmatmul.mubr.msk.f32.gmra.mxu0 %vm430_vm0, %v2708_v30  ;;  %v2710_v15 = vld [vmem:[%s18749_s9 + $0x3f2] sm:$0xff] }
 0x161   : > { %v16478_v34 = vpop.f32.mrf.mxu1  ;;  %16621 = vmatmul.mubr.msk.f32.gmra.mxu1 %vm430_vm0, %v268_v20  ;;  %16819 = vmatprep.mubr.msk.f32.mxu0 %vm430_vm0, %v2709_v1  ;;  %v271_v38 = vld [vmem:[%s18749_s9 + $0x3f8] sm:$0xff]  ;;  %v272_v1 = vld [vmem:[%s18749_s9 + $0x400] sm:$0xff] }
 0x162   : > { %24060 = vst [vmem:[#allocation85_spill] sm:$0xff] %v19702_v7  ;;  %v19707_v54 = vadd.f32 %v3190_v22, %v1971_v57  ;;  %v1986_v46 = vadd.f32 %v16478_v34, %v19185_v25  ;;  %16623 = vmatprep.mubr.msk.f32.mxu1 %vm430_vm0, %v269_v26  ;;  %v3200_v16 = vpop.f32.mrf.mxu0  ;;  %v2711_v20 = vld [vmem:[%s18749_s9 + $0x3fa] sm:$0xff]  ;;  %v2712_v57 = vld [vmem:[%s18749_s9 + $0x402] sm:$0xff] }
 0x163   : > { %v1980_v63 = vpop.f32.mrf.mxu1 }
 0x164   : > { %v19716_v7 = vadd.f32 %v16674_v19, %v1986_v46  ;;  %v1981_v22 = vadd.f32 %v1980_v63, %v19195_v29  ;;  %v16677_v25 = vpop.f32.mrf.mxu0  ;;  %16820 = vmatmul.mubr.msk.f32.gmra.mxu0 %vm430_vm0, %v2710_v15  ;;  %v273_v46 = vld [vmem:[%s18749_s9 + $0x410] sm:$0xff] }
 0x165   : > { %v16481_v30 = vpop.f32.mrf.mxu1  ;;  %16624 = vmatmul.mubr.msk.f32.gmra.mxu1 %vm430_vm0, %v270_v28  ;;  %16822 = vmatprep.mubr.msk.f32.mxu0 %vm430_vm0, %v2711_v20  ;;  %v2713_v28 = vld [vmem:[%s18749_s9 + $0x412] sm:$0xff] }
 0x166   : > { %v19721_v26 = vadd.f32 %v3200_v16, %v1981_v22  ;;  %v1996_v34 = vadd.f32 %v16481_v30, %v19201_v33  ;;  %16626 = vmatprep.mubr.msk.f32.mxu1 %vm430_vm0, %v271_v38  ;;  %v3210_v29 = vpop.f32.mrf.mxu0  ;;  %v274_v22 = vld [vmem:[%s18749_s9 + $0x418] sm:$0xff] }
 0x167   : > { %v1990_v19 = vpop.f32.mrf.mxu1  ;;  %v2714_v30 = vld [vmem:[%s18749_s9 + $0x41a] sm:$0xff] }
 0x168   : > { %v19730_v63 = vadd.f32 %v16677_v25, %v1996_v34  ;;  %v1991_v15 = vadd.f32 %v1990_v19, %v19211_v37  ;;  %v16680_v33 = vpop.f32.mrf.mxu0  ;;  %16823 = vmatmul.mubr.msk.f32.gmra.mxu0 %vm430_vm0, %v2712_v57  ;;  %v275_v34 = vld [vmem:[%s18749_s9 + $0x420] sm:$0xff] }
 0x169   : > { %v16484_v16 = vpop.f32.mrf.mxu1  ;;  %16627 = vmatmul.mubr.msk.f32.gmra.mxu1 %vm430_vm0, %v272_v1  ;;  %16825 = vmatprep.mubr.msk.f32.mxu0 %vm430_vm0, %v2713_v28  ;;  %v2715_v1 = vld [vmem:[%s18749_s9 + $0x422] sm:$0xff] }
 0x16a   : > { %v19735_v38 = vadd.f32 %v3210_v29, %v1991_v15  ;;  %v2006_v20 = vadd.f32 %v16484_v16, %v19217_v41  ;;  %16629 = vmatprep.mubr.msk.f32.mxu1 %vm430_vm0, %v273_v46  ;;  %v3220_v37 = vpop.f32.mrf.mxu0  ;;  %v276_v15 = vld [vmem:[%s18749_s9 + $0x428] sm:$0xff] }
 0x16b   : > { %v2000_v25 = vpop.f32.mrf.mxu1  ;;  %v2716_v16 = vld [vmem:[%s18749_s9 + $0x42a] sm:$0xff] }
 0x16c   : > { %v19744_v19 = vadd.f32 %v16680_v33, %v2006_v20  ;;  %v2001_v57 = vadd.f32 %v2000_v25, %v19227_v45  ;;  %v16683_v41 = vpop.f32.mrf.mxu0  ;;  %16826 = vmatmul.mubr.msk.f32.gmra.mxu0 %vm430_vm0, %v2714_v30  ;;  %v277_v20 = vld [vmem:[%s18749_s9 + $0x438] sm:$0xff] }
 0x16d   : > { %v16487_v29 = vpop.f32.mrf.mxu1  ;;  %16630 = vmatmul.mubr.msk.f32.gmra.mxu1 %vm430_vm0, %v274_v22  ;;  %16828 = vmatprep.mubr.msk.f32.mxu0 %vm430_vm0, %v2715_v1  ;;  %v2717_v22 = vld [vmem:[%s18749_s9 + $0x43a] sm:$0xff] }
 0x16e   : > { %v19749_v46 = vadd.f32 %v3220_v37, %v2001_v57  ;;  %v2016_v28 = vadd.f32 %v16487_v29, %v19233_v49  ;;  %16632 = vmatprep.mubr.msk.f32.mxu1 %vm430_vm0, %v275_v34  ;;  %v3230_v45 = vpop.f32.mrf.mxu0  ;;  %v278_v57 = vld [vmem:[%s18749_s9 + $0x440] sm:$0xff] }
 0x16f   : > { %v2010_v33 = vpop.f32.mrf.mxu1  ;;  %v2718_v29 = vld [vmem:[%s18749_s9 + $0x442] sm:$0xff] }
 0x170   : > { %v19758_v25 = vadd.f32 %v16683_v41, %v2016_v28  ;;  %v2011_v30 = vadd.f32 %v2010_v33, %v19243_v53  ;;  %v16686_v49 = vpop.f32.mrf.mxu0  ;;  %16829 = vmatmul.mubr.msk.f32.gmra.mxu0 %vm430_vm0, %v2716_v16  ;;  %v279_v28 = vld [vmem:[%s18749_s9 + $0x448] sm:$0xff] }
 0x171   : > { %v16490_v37 = vpop.f32.mrf.mxu1  ;;  %16633 = vmatmul.mubr.msk.f32.gmra.mxu1 %vm430_vm0, %v276_v15  ;;  %16831 = vmatprep.mubr.msk.f32.mxu0 %vm430_vm0, %v2717_v22  ;;  %v2719_v15 = vld [vmem:[%s18749_s9 + $0x44a] sm:$0xff] }
 0x172   : > { %v19763_v34 = vadd.f32 %v3230_v45, %v2011_v30  ;;  %v2026_v1 = vadd.f32 %v16490_v37, %v19249_v58  ;;  %16635 = vmatprep.mubr.msk.f32.mxu1 %vm430_vm0, %v277_v20  ;;  %v3240_v53 = vpop.f32.mrf.mxu0  ;;  %v280_v30 = vld [vmem:[%s18749_s9 + $0x450] sm:$0xff] }
 0x173   : > { %v2020_v41 = vpop.f32.mrf.mxu1  ;;  %v2720_v37 = vld [vmem:[%s18749_s9 + $0x452] sm:$0xff] }
 0x174   : > { %v19772_v33 = vadd.f32 %v16686_v49, %v2026_v1  ;;  %v2021_v16 = vadd.f32 %v2020_v41, %v19259_v62  ;;  %v16689_v58 = vpop.f32.mrf.mxu0  ;;  %16832 = vmatmul.mubr.msk.f32.gmra.mxu0 %vm430_vm0, %v2718_v29  ;;  %v281_v1 = vld [vmem:[%s18749_s9 + $0x460] sm:$0xff] }
 0x175   : > { %v16493_v45 = vpop.f32.mrf.mxu1  ;;  %16636 = vmatmul.mubr.msk.f32.gmra.mxu1 %vm430_vm0, %v278_v57  ;;  %16834 = vmatprep.mubr.msk.f32.mxu0 %vm430_vm0, %v2719_v15  ;;  %v2721_v57 = vld [vmem:[%s18749_s9 + $0x462] sm:$0xff] }
 0x176   : > { %v19777_v20 = vadd.f32 %v3240_v53, %v2021_v16  ;;  %v2036_v22 = vadd.f32 %v16493_v45, %v19265_v2  ;;  %16638 = vmatprep.mubr.msk.f32.mxu1 %vm430_vm0, %v279_v28  ;;  %v3250_v62 = vpop.f32.mrf.mxu0  ;;  %v282_v16 = vld [vmem:[%s18749_s9 + $0x468] sm:$0xff] }
 0x177   : > { %v2030_v49 = vpop.f32.mrf.mxu1  ;;  %v2722_v45 = vld [vmem:[%s18749_s9 + $0x46a] sm:$0xff] }
 0x178   : > { %v19786_v41 = vadd.f32 %v16689_v58, %v2036_v22  ;;  %v2031_v29 = vadd.f32 %v2030_v49, %v19275_v6  ;;  %v16692_v2 = vpop.f32.mrf.mxu0  ;;  %16835 = vmatmul.mubr.msk.f32.gmra.mxu0 %vm430_vm0, %v2720_v37  ;;  %v283_v22 = vld [vmem:[%s18749_s9 + $0x470] sm:$0xff] }
 0x179   : > { %v16496_v53 = vpop.f32.mrf.mxu1  ;;  %16639 = vmatmul.mubr.msk.f32.gmra.mxu1 %vm430_vm0, %v280_v30  ;;  %16837 = vmatprep.mubr.msk.f32.mxu0 %vm430_vm0, %v2721_v57  ;;  %v2723_v30 = vld [vmem:[%s18749_s9 + $0x472] sm:$0xff] }
 0x17a   : > { %v19791_v28 = vadd.f32 %v3250_v62, %v2031_v29  ;;  %v2046_v15 = vadd.f32 %v16496_v53, %v19281_v10  ;;  %16641 = vmatprep.mubr.msk.f32.mxu1 %vm430_vm0, %v281_v1  ;;  %v3260_v6 = vpop.f32.mrf.mxu0  ;;  %v284_v29 = vld [vmem:[%s18749_s9 + $0x478] sm:$0xff] }
 0x17b   : > { %v2040_v58 = vpop.f32.mrf.mxu1  ;;  %v2724_v53 = vld [vmem:[%s18749_s9 + $0x47a] sm:$0xff] }
 0x17c   : > { %v19800_v49 = vadd.f32 %v16692_v2, %v2046_v15  ;;  %v2041_v37 = vadd.f32 %v2040_v58, %v19291_v14  ;;  %v16695_v10 = vpop.f32.mrf.mxu0  ;;  %16838 = vmatmul.mubr.msk.f32.gmra.mxu0 %vm430_vm0, %v2722_v45  ;;  %v285_v15 = vld [vmem:[%s18749_s9 + $0x488] sm:$0xff] }
 0x17d   : > { %v16499_v62 = vpop.f32.mrf.mxu1  ;;  %16642 = vmatmul.mubr.msk.f32.gmra.mxu1 %vm430_vm0, %v282_v16  ;;  %16840 = vmatprep.mubr.msk.f32.mxu0 %vm430_vm0, %v2723_v30  ;;  %v2725_v16 = vld [vmem:[%s18749_s9 + $0x48a] sm:$0xff] }
 0x17e   : > { %v19805_v1 = vadd.f32 %v3260_v6, %v2041_v37  ;;  %v2056_v57 = vadd.f32 %v16499_v62, %v19297_v21  ;;  %16644 = vmatprep.mubr.msk.f32.mxu1 %vm430_vm0, %v283_v22  ;;  %v3270_v14 = vpop.f32.mrf.mxu0  ;;  %v286_v37 = vld [vmem:[%s18749_s9 + $0x490] sm:$0xff] }
 0x17f   : > { %v2050_v2 = vpop.f32.mrf.mxu1  ;;  %v2726_v62 = vld [vmem:[%s18749_s9 + $0x492] sm:$0xff] }
 0x180   : > { %v19814_v58 = vadd.f32 %v16695_v10, %v2056_v57  ;;  %v2051_v45 = vadd.f32 %v2050_v2, %v19307_v27  ;;  %v16698_v21 = vpop.f32.mrf.mxu0  ;;  %16841 = vmatmul.mubr.msk.f32.gmra.mxu0 %vm430_vm0, %v2724_v53  ;;  %v287_v57 = vld [vmem:[%s18749_s9 + $0x498] sm:$0xff] }
 0x181   : > { %v16502_v6 = vpop.f32.mrf.mxu1  ;;  %16645 = vmatmul.mubr.msk.f32.gmra.mxu1 %vm430_vm0, %v284_v29  ;;  %16843 = vmatprep.mubr.msk.f32.mxu0 %vm430_vm0, %v2725_v16  ;;  %v2727_v29 = vld [vmem:[%s18749_s9 + $0x49a] sm:$0xff] }
 0x182   : > { %v19819_v22 = vadd.f32 %v3270_v14, %v2051_v45  ;;  %v2066_v30 = vadd.f32 %v16502_v6, %v19313_v35  ;;  %16647 = vmatprep.mubr.msk.f32.mxu1 %vm430_vm0, %v285_v15  ;;  %v3280_v27 = vpop.f32.mrf.mxu0  ;;  %v288_v45 = vld [vmem:[%s18749_s9 + $0x4a0] sm:$0xff] }
 0x183   : > { %v2060_v10 = vpop.f32.mrf.mxu1  ;;  %v2728_v6 = vld [vmem:[%s18749_s9 + $0x4a2] sm:$0xff] }
 0x184   : > { %v19828_v2 = vadd.f32 %v16698_v21, %v2066_v30  ;;  %v2061_v53 = vadd.f32 %v2060_v10, %v19323_v43  ;;  %v16701_v35 = vpop.f32.mrf.mxu0  ;;  %16844 = vmatmul.mubr.msk.f32.gmra.mxu0 %vm430_vm0, %v2726_v62  ;;  %v289_v30 = vld [vmem:[%s18749_s9 + $0x4b0] sm:$0xff] }
 0x185   : > { %v16505_v14 = vpop.f32.mrf.mxu1  ;;  %16648 = vmatmul.mubr.msk.f32.gmra.mxu1 %vm430_vm0, %v286_v37  ;;  %16846 = vmatprep.mubr.msk.f32.mxu0 %vm430_vm0, %v2727_v29  ;;  %v2729_v37 = vld [vmem:[%s18749_s9 + $0x4b2] sm:$0xff] }
 0x186   : > { %v19833_v15 = vadd.f32 %v3280_v27, %v2061_v53  ;;  %v2076_v16 = vadd.f32 %v16505_v14, %v19329_v51  ;;  %16650 = vmatprep.mubr.msk.f32.mxu1 %vm430_vm0, %v287_v57  ;;  %v3290_v43 = vpop.f32.mrf.mxu0  ;;  %v290_v53 = vld [vmem:[%s18749_s9 + $0x4b8] sm:$0xff] }
 0x187   : > { %v2070_v21 = vpop.f32.mrf.mxu1  ;;  %v2730_v14 = vld [vmem:[%s18749_s9 + $0x4ba] sm:$0xff] }
 0x188   : > { %v19842_v10 = vadd.f32 %v16701_v35, %v2076_v16  ;;  %v2071_v62 = vadd.f32 %v2070_v21, %v19339_v60  ;;  %v16704_v51 = vpop.f32.mrf.mxu0  ;;  %16847 = vmatmul.mubr.msk.f32.gmra.mxu0 %vm430_vm0, %v2728_v6  ;;  %v291_v16 = vld [vmem:[%s18749_s9 + $0x4c0] sm:$0xff] }
 0x189   : > { %v16508_v27 = vpop.f32.mrf.mxu1  ;;  %16651 = vmatmul.mubr.msk.f32.gmra.mxu1 %vm430_vm0, %v288_v45  ;;  %16849 = vmatprep.mubr.msk.f32.mxu0 %vm430_vm0, %v2729_v37  ;;  %v2731_v45 = vld [vmem:[%s18749_s9 + $0x4c2] sm:$0xff] }
 0x18a   : > { %v19847_v57 = vadd.f32 %v3290_v43, %v2071_v62  ;;  %v2086_v29 = vadd.f32 %v16508_v27, %v19345_v4  ;;  %16653 = vmatprep.mubr.msk.f32.mxu1 %vm430_vm0, %v289_v30  ;;  %v3300_v60 = vpop.f32.mrf.mxu0  ;;  %v292_v62 = vld [vmem:[%s18749_s9 + $0x4c8] sm:$0xff] }
 0x18b   : > { %v2080_v35 = vpop.f32.mrf.mxu1  ;;  %v2732_v27 = vld [vmem:[%s18749_s9 + $0x4ca] sm:$0xff] }
 0x18c   : > { %v19856_v21 = vadd.f32 %v16704_v51, %v2086_v29  ;;  %v2081_v6 = vadd.f32 %v2080_v35, %v19355_v12  ;;  %v16707_v4 = vpop.f32.mrf.mxu0  ;;  %16850 = vmatmul.mubr.msk.f32.gmra.mxu0 %vm430_vm0, %v2730_v14  ;;  %v293_v29 = vld [vmem:[%s18749_s9 + $0x4d8] sm:$0xff] }
 0x18d   : > { %v16511_v43 = vpop.f32.mrf.mxu1  ;;  %16654 = vmatmul.mubr.msk.f32.gmra.mxu1 %vm430_vm0, %v290_v53  ;;  %16852 = vmatprep.mubr.msk.f32.mxu0 %vm430_vm0, %v2731_v45  ;;  %v2733_v53 = vld [vmem:[%s18749_s9 + $0x4da] sm:$0xff] }
 0x18e   : > { %v19861_v30 = vadd.f32 %v3300_v60, %v2081_v6  ;;  %v2096_v37 = vadd.f32 %v16511_v43, %v19361_v23  ;;  %16656 = vmatprep.mubr.msk.f32.mxu1 %vm430_vm0, %v291_v16  ;;  %v3310_v12 = vpop.f32.mrf.mxu0  ;;  %v294_v6 = vld [vmem:[%s18749_s9 + $0x4e0] sm:$0xff] }
 0x18f   : > { %v2090_v51 = vpop.f32.mrf.mxu1  ;;  %v2734_v43 = vld [vmem:[%s18749_s9 + $0x4e2] sm:$0xff] }
 0x190   : > { %v19870_v35 = vadd.f32 %v16707_v4, %v2096_v37  ;;  %v2091_v14 = vadd.f32 %v2090_v51, %v19371_v39  ;;  %v16710_v23 = vpop.f32.mrf.mxu0  ;;  %16853 = vmatmul.mubr.msk.f32.gmra.mxu0 %vm430_vm0, %v2732_v27  ;;  %v295_v37 = vld [vmem:[%s18749_s9 + $0x4e8] sm:$0xff] }
 0x191   : > { %v16514_v60 = vpop.f32.mrf.mxu1  ;;  %16657 = vmatmul.mubr.msk.f32.gmra.mxu1 %vm430_vm0, %v292_v62  ;;  %16855 = vmatprep.mubr.msk.f32.mxu0 %vm430_vm0, %v2733_v53  ;;  %v2735_v62 = vld [vmem:[%s18749_s9 + $0x4ea] sm:$0xff] }
 0x192   : > { %v19875_v16 = vadd.f32 %v3310_v12, %v2091_v14  ;;  %v2106_v45 = vadd.f32 %v16514_v60, %v19377_v55  ;;  %16659 = vmatprep.mubr.msk.f32.mxu1 %vm430_vm0, %v293_v29  ;;  %v3320_v39 = vpop.f32.mrf.mxu0  ;;  %v296_v14 = vld [vmem:[%s18749_s9 + $0x4f0] sm:$0xff] }
 0x193   : > { %v2100_v4 = vpop.f32.mrf.mxu1  ;;  %v2736_v60 = vld [vmem:[%s18749_s9 + $0x4f2] sm:$0xff] }
 0x194   : > { %v19884_v51 = vadd.f32 %v16710_v23, %v2106_v45  ;;  %v2101_v27 = vadd.f32 %v2100_v4, %v19387_v8  ;;  %v16713_v55 = vpop.f32.mrf.mxu0  ;;  %16856 = vmatmul.mubr.msk.f32.gmra.mxu0 %vm430_vm0, %v2734_v43  ;;  %v13548_v45 = vld [vmem:[%s18749_s9 + $0x28] sm:$0xff] }
 0x195   : > { %v16517_v12 = vpop.f32.mrf.mxu1  ;;  %16660 = vmatmul.mubr.msk.f32.gmra.mxu1 %vm430_vm0, %v294_v6  ;;  %16858 = vmatprep.mubr.msk.f32.mxu0 %vm430_vm0, %v2735_v62  ;;  %v13806_v4 = vld [vmem:[%s18749_s9 + $0x29] sm:$0xff] }
 0x196   : > { %v19889_v29 = vadd.f32 %v3320_v39, %v2101_v27  ;;  %v2116_v53 = vadd.f32 %v16517_v12, %v19393_v56  ;;  %16662 = vmatprep.mubr.msk.f32.mxu1 %vm430_vm0, %v295_v37  ;;  %v3330_v8 = vpop.f32.mrf.mxu0  ;;  %v13549_v27 = vld [vmem:[%s18749_s9 + $0x30] sm:$0xff] }
 0x197   : > { %v2110_v23 = vpop.f32.mrf.mxu1  ;;  %v13807_v12 = vld [vmem:[%s18749_s9 + $0x31] sm:$0xff] }
 0x198   : > { %v19898_v6 = vadd.f32 %v16713_v55, %v2116_v53  ;;  %v2111_v43 = vadd.f32 %v2110_v23, %v19403_v48  ;;  %v16716_v56 = vpop.f32.mrf.mxu0  ;;  %16859 = vmatmul.mubr.msk.f32.gmra.mxu0 %vm430_vm0, %v2736_v60  ;;  %v13550_v23 = vld [vmem:[%s18749_s9 + $0x38] sm:$0xff] }
 0x199   : > { %v16520_v39 = vpop.f32.mrf.mxu1  ;;  %16663 = vmatmul.mubr.msk.f32.gmra.mxu1 %vm430_vm0, %v296_v14  ;;  %17061 = vmatprep.mubr.msk.f32.mxu0 %vm430_vm0, %v13806_v4  ;;  %v13808_v60 = vld [vmem:[%s18749_s9 + $0x39] sm:$0xff] }
 0x19a   : > { %v19903_v37 = vadd.f32 %v3330_v8, %v2111_v43  ;;  %v2126_v62 = vadd.f32 %v16520_v39, %v19409_v24  ;;  %16865 = vmatprep.mubr.msk.f32.mxu1 %vm430_vm0, %v13548_v45  ;;  %v3340_v55 = vpop.f32.mrf.mxu0  ;;  %v13551_v43 = vld [vmem:[%s18749_s9 + $0x40] sm:$0xff]  ;;  %v14192_v39 = vld [vmem:[%s23975_s1 + $0x50] sm:$0xff] }
 0x19b   : > { %v2120_v48 = vpop.f32.mrf.mxu1 }
 0x19c   : > { %v19910_v53 = vadd.f32 %v16716_v56, %v2126_v62  ;;  %v2121_v14 = vadd.f32 %v2120_v48, %v19419_v18  ;;  %v16719_v24 = vpop.f32.mrf.mxu0  ;;  %17062 = vmatmul.mubr.msk.f32.vlgmr.msra.gmra.mxu0 %vm430_vm0, %v13807_v12  ;;  %v13809_v18 = vld [vmem:[%s18749_s9 + $0x41] sm:$0xff] }
 0x19d   : > { %v16523_v8 = vpop.f32.mrf.mxu1  ;;  %16866 = vmatmul.mubr.msk.f32.vlgmr.msra.gmra.mxu1 %vm430_vm0, %v13549_v27  ;;  %17450 = vmatpush3.msra.mxu0 %v19450_v13  ;;  %v13552_v27 = vld [vmem:[%s18749_s9 + $0x50] sm:$0xff]  ;;  %v14450_v13 = vld [vmem:[%s23975_s1 + $0x60] sm:$0xff] }
 0x19e   : > { %v19917_v45 = vadd.f32 %v3340_v55, %v2121_v14  ;;  %v2136_v4 = vadd.f32 %v16523_v8, %v19425_v5  ;;  %17254 = vmatpush3.msra.mxu1 %v19438_v47  ;;  %v3350_v62 = vpop.f32.mrf.mxu0  ;;  %16868 = vmatprep.mubr.msk.f32.mxu1 %vm430_vm0, %v13550_v23  ;;  %v13810_v5 = vld [vmem:[%s18749_s9 + $0x51] sm:$0xff] }
 0x19f   : > { %v2130_v56 = vpop.f32.mrf.mxu1  ;;  %17064 = vmatprep.mubr.msk.f32.mxu0 %vm430_vm0, %v13808_v60  ;;  %17255 = vmatprep.subr.mxu1 %v14192_v39  ;;  %v13811_v60 = vld [vmem:[%s18749_s9 + $0x59] sm:$0xff] }
 0x1a0   : > { %v19931_v12 = vadd.f32 %v16719_v24, %v2136_v4  ;;  %v2131_v47 = vadd.f32 %v2130_v56, %v19440_v9  ;;  %v16722_v55 = vpop.f32.mrf.mxu0  ;;  %17065 = vmatmul.mubr.msk.f32.gmra.mxu0 %vm430_vm0, %v13809_v18  ;;  %v13553_v9 = vld [vmem:[%s18749_s9 + $0x58] sm:$0xff]  ;;  %v13554_v4 = vld [vmem:[%s18749_s9 + $0x60] sm:$0xff]  ;;  %17256 = vmatpush3.msra.mxu1 %v14192_v39  ;;  %v13555_v39 = vld [vmem:[%s18749_s9 + $0x68] sm:$0xff] }
 0x1a1   : > { %v16526_v48 = vpop.f32.mrf.mxu1  ;;  %16869 = vmatmul.mubr.msk.f32.gmra.mxu1 %vm430_vm0, %v13551_v43  ;;  %17067 = vmatprep.mubr.msk.f32.mxu0 %vm430_vm0, %v13810_v5  ;;  %v13812_v56 = vld [vmem:[%s18749_s9 + $0x61] sm:$0xff] }
 0x1a2   : > { %v19939_v14 = vadd.f32 %v3350_v62, %v2131_v47  ;;  %v2146_v23 = vadd.f32 %v16526_v48, %v19452_v0  ;;  %16871 = vmatprep.mubr.msk.f32.mxu1 %vm430_vm0, %v13552_v27  ;;  %v3360_v24 = vpop.f32.mrf.mxu0  ;;  %17451 = vmatprep.subr.mxu0 %v14450_v13  ;;  %v13813_v47 = vld [vmem:[%s18749_s9 + $0x69] sm:$0xff]  ;;  %v13556_v48 = vld [vmem:[%s18749_s9 + $0x78] sm:$0xff] }
 0x1a3   : > { %v2140_v8 = vpop.f32.mrf.mxu1  ;;  %17452 = vmatpush3.msra.mxu0 %v14450_v13 }
 0x1a4   : > { %v19948_v43 = vadd.f32 %v16722_v55, %v2146_v23  ;;  %v2141_v0 = vadd.f32 %v2140_v8, %v19462_v44  ;;  %v16725_v62 = vpop.f32.mrf.mxu0  ;;  %17068 = vmatmul.mubr.msk.f32.gmra.mxu0 %vm430_vm0, %v13811_v60  ;;  %v13814_v55 = vld [vmem:[%s18749_s9 + $0x79] sm:$0xff] }
 0x1a5   : > { %v16529_v18 = vpop.f32.mrf.mxu1  ;;  %16872 = vmatmul.mubr.msk.f32.gmra.mxu1 %vm430_vm0, %v13553_v9  ;;  %17070 = vmatprep.mubr.msk.f32.mxu0 %vm430_vm0, %v13812_v56  ;;  %v13815_v56 = vld [vmem:[%s18749_s9 + $0x81] sm:$0xff] }
 0x1a6   : > { %v19953_v27 = vadd.f32 %v3360_v24, %v2141_v0  ;;  %v2156_v5 = vadd.f32 %v16529_v18, %v19469_v40  ;;  %16874 = vmatprep.mubr.msk.f32.mxu1 %vm430_vm0, %v13554_v4  ;;  %v3370_v13 = vpop.f32.mrf.mxu0  ;;  %v13557_v4 = vld [vmem:[%s18749_s9 + $0x80] sm:$0xff]  ;;  %v13558_v18 = vld [vmem:[%s18749_s9 + $0x88] sm:$0xff] }
 0x1a7   : > { %v2150_v44 = vpop.f32.mrf.mxu1 }
 0x1a8   : > { %v19962_v23 = vadd.f32 %v16725_v62, %v2156_v5  ;;  %v2151_v9 = vadd.f32 %v2150_v44, %v19479_v36  ;;  %v16728_v40 = vpop.f32.mrf.mxu0  ;;  %17071 = vmatmul.mubr.msk.f32.gmra.mxu0 %vm430_vm0, %v13813_v47  ;;  %v13816_v62 = vld [vmem:[%s18749_s9 + $0x89] sm:$0xff] }
 0x1a9   : > { %v16532_v60 = vpop.f32.mrf.mxu1  ;;  %16875 = vmatmul.mubr.msk.f32.gmra.mxu1 %vm430_vm0, %v13555_v39  ;;  %17073 = vmatprep.mubr.msk.f32.mxu0 %vm430_vm0, %v13814_v55  ;;  %v13817_v55 = vld [vmem:[%s18749_s9 + $0x91] sm:$0xff] }
 0x1aa   : > { %v19967_v8 = vadd.f32 %v3370_v13, %v2151_v9  ;;  %v2166_v24 = vadd.f32 %v16532_v60, %v19485_v11  ;;  %16877 = vmatprep.mubr.msk.f32.mxu1 %vm430_vm0, %v13556_v48  ;;  %v3380_v36 = vpop.f32.mrf.mxu0  ;;  %v13559_v48 = vld [vmem:[%s18749_s9 + $0x90] sm:$0xff]  ;;  %v13560_v60 = vld [vmem:[%s18749_s9 + $0xa0] sm:$0xff] }
 0x1ab   : > { %v2160_v0 = vpop.f32.mrf.mxu1 }
 0x1ac   : > { %v19976_v5 = vadd.f32 %v16728_v40, %v2166_v24  ;;  %v2161_v39 = vadd.f32 %v2160_v0, %v19495_v61  ;;  %v16731_v11 = vpop.f32.mrf.mxu0  ;;  %17074 = vmatmul.mubr.msk.f32.gmra.mxu0 %vm430_vm0, %v13815_v56  ;;  %v13818_v40 = vld [vmem:[%s18749_s9 + $0xa1] sm:$0xff] }
 0x1ad   : > { %v16535_v47 = vpop.f32.mrf.mxu1  ;;  %16878 = vmatmul.mubr.msk.f32.gmra.mxu1 %vm430_vm0, %v13557_v4  ;;  %17076 = vmatprep.mubr.msk.f32.mxu0 %vm430_vm0, %v13816_v62  ;;  %v13819_v62 = vld [vmem:[%s18749_s9 + $0xa9] sm:$0xff] }
 0x1ae   : > { %v19981_v44 = vadd.f32 %v3380_v36, %v2161_v39  ;;  %v2176_v13 = vadd.f32 %v16535_v47, %v19501_v3  ;;  %16880 = vmatprep.mubr.msk.f32.mxu1 %vm430_vm0, %v13558_v18  ;;  %v3390_v61 = vpop.f32.mrf.mxu0  ;;  %v13561_v18 = vld [vmem:[%s18749_s9 + $0xa8] sm:$0xff]  ;;  %v13562_v47 = vld [vmem:[%s18749_s9 + $0xb0] sm:$0xff] }
 0x1af   : > { %v2170_v9 = vpop.f32.mrf.mxu1 }
 0x1b0   : > { %v19990_v24 = vadd.f32 %v16731_v11, %v2176_v13  ;;  %v2171_v4 = vadd.f32 %v2170_v9, %v19511_v17  ;;  %v16734_v3 = vpop.f32.mrf.mxu0  ;;  %17077 = vmatmul.mubr.msk.f32.gmra.mxu0 %vm430_vm0, %v13817_v55  ;;  %v13820_v11 = vld [vmem:[%s18749_s9 + $0xb1] sm:$0xff] }
 0x1b1   : > { %v16538_v56 = vpop.f32.mrf.mxu1  ;;  %16881 = vmatmul.mubr.msk.f32.gmra.mxu1 %vm430_vm0, %v13559_v48  ;;  %17079 = vmatprep.mubr.msk.f32.mxu0 %vm430_vm0, %v13818_v40  ;;  %v13821_v40 = vld [vmem:[%s18749_s9 + $0xb9] sm:$0xff] }
 0x1b2   : > { %v19995_v0 = vadd.f32 %v3390_v61, %v2171_v4  ;;  %v2186_v36 = vadd.f32 %v16538_v56, %v19517_v59  ;;  %16883 = vmatprep.mubr.msk.f32.mxu1 %vm430_vm0, %v13560_v60  ;;  %v3400_v17 = vpop.f32.mrf.mxu0  ;;  %v13563_v60 = vld [vmem:[%s18749_s9 + $0xb8] sm:$0xff]  ;;  %v13564_v56 = vld [vmem:[%s18749_s9 + $0xc8] sm:$0xff] }
 0x1b3   : > { %v2180_v39 = vpop.f32.mrf.mxu1 }
 0x1b4   : > { %v20004_v13 = vadd.f32 %v16734_v3, %v2186_v36  ;;  %v2181_v48 = vadd.f32 %v2180_v39, %v19527_v52  ;;  %v16737_v59 = vpop.f32.mrf.mxu0  ;;  %17080 = vmatmul.mubr.msk.f32.gmra.mxu0 %vm430_vm0, %v13819_v62  ;;  %v13822_v3 = vld [vmem:[%s18749_s9 + $0xc9] sm:$0xff] }
 0x1b5   : > { %v16541_v55 = vpop.f32.mrf.mxu1  ;;  %16884 = vmatmul.mubr.msk.f32.gmra.mxu1 %vm430_vm0, %v13561_v18  ;;  %17082 = vmatprep.mubr.msk.f32.mxu0 %vm430_vm0, %v13820_v11  ;;  %v13823_v11 = vld [vmem:[%s18749_s9 + $0xd1] sm:$0xff] }
 0x1b6   : > { %v20009_v9 = vadd.f32 %v3400_v17, %v2181_v48  ;;  %v2196_v61 = vadd.f32 %v16541_v55, %v19533_v50  ;;  %16886 = vmatprep.mubr.msk.f32.mxu1 %vm430_vm0, %v13562_v47  ;;  %v3410_v52 = vpop.f32.mrf.mxu0  ;;  %v13565_v47 = vld [vmem:[%s18749_s9 + $0xd0] sm:$0xff]  ;;  %v13566_v55 = vld [vmem:[%s18749_s9 + $0xd8] sm:$0xff] }
 0x1b7   : > { %v2190_v4 = vpop.f32.mrf.mxu1 }
 0x1b8   : > { %v20018_v36 = vadd.f32 %v16737_v59, %v2196_v61  ;;  %v2191_v18 = vadd.f32 %v2190_v4, %v19543_v31  ;;  %v16740_v50 = vpop.f32.mrf.mxu0  ;;  %17083 = vmatmul.mubr.msk.f32.gmra.mxu0 %vm430_vm0, %v13821_v40  ;;  %v13824_v59 = vld [vmem:[%s18749_s9 + $0xd9] sm:$0xff] }
 0x1b9   : > { %v16544_v62 = vpop.f32.mrf.mxu1  ;;  %16887 = vmatmul.mubr.msk.f32.gmra.mxu1 %vm430_vm0, %v13563_v60  ;;  %17085 = vmatprep.mubr.msk.f32.mxu0 %vm430_vm0, %v13822_v3  ;;  %v13567_v3 = vld [vmem:[%s18749_s9 + $0xe0] sm:$0xff] }
 0x1ba   : > { %v20023_v39 = vadd.f32 %v3410_v52, %v2191_v18  ;;  %v2206_v17 = vadd.f32 %v16544_v62, %v19549_v42  ;;  %16889 = vmatprep.mubr.msk.f32.mxu1 %vm430_vm0, %v13564_v56  ;;  %v3420_v31 = vpop.f32.mrf.mxu0  ;;  %v24062_v52 = vld [vmem:[#allocation53_spill] sm:$0xff] }
 0x1bb   : > { %v2200_v48 = vpop.f32.mrf.mxu1  ;;  %v13825_v18 = vld [vmem:[%s18749_s9 + $0xe1] sm:$0xff] }
 0x1bc   : > { %v20032_v61 = vadd.f32 %v16740_v50, %v2206_v17  ;;  %v2201_v60 = vadd.f32 %v2200_v48, %v19559_v32  ;;  %v16743_v42 = vpop.f32.mrf.mxu0  ;;  %17086 = vmatmul.mubr.msk.f32.gmra.mxu0 %vm430_vm0, %v13823_v11  ;;  %v13568_v50 = vld [vmem:[%s18749_s9 + $0xf0] sm:$0xff] }
 0x1bd   : > { %v16547_v40 = vpop.f32.mrf.mxu1  ;;  %16890 = vmatmul.mubr.msk.f32.gmra.mxu1 %vm430_vm0, %v13565_v47  ;;  %17088 = vmatprep.mubr.msk.f32.mxu0 %vm430_vm0, %v13824_v59  ;;  %v13826_v17 = vld [vmem:[%s18749_s9 + $0xf1] sm:$0xff]  ;;  %v24066_v59 = vld [vmem:[#allocation57_spill] sm:$0xff] }
 0x1be   : > { %v20037_v4 = vadd.f32 %v3420_v31, %v2201_v60  ;;  %v2216_v56 = vadd.f32 %v16547_v40, %v24062_v52  ;;  %16892 = vmatprep.mubr.msk.f32.mxu1 %vm430_vm0, %v13566_v55  ;;  %v3430_v32 = vpop.f32.mrf.mxu0  ;;  %v24064_v11 = vld [vmem:[#allocation55_spill] sm:$0xff]  ;;  %v13569_v52 = vld [vmem:[%s18749_s9 + $0xf8] sm:$0xff] }
 0x1bf   : > { %v2210_v62 = vpop.f32.mrf.mxu1 }
 0x1c0   : > { %24061 = vst [vmem:[#allocation86_spill] sm:$0xff] %v20037_v4  ;;  %v20046_v47 = vadd.f32 %v16743_v42, %v2216_v56  ;;  %v2211_v48 = vadd.f32 %v2210_v62, %v24064_v11  ;;  %v16746_v60 = vpop.f32.mrf.mxu0  ;;  %17089 = vmatmul.mubr.msk.f32.gmra.mxu0 %vm430_vm0, %v13825_v18  ;;  %v13827_v42 = vld [vmem:[%s18749_s9 + $0xf9] sm:$0xff]  ;;  %v24068_v18 = vld [vmem:[#allocation59_spill] sm:$0xff]  ;;  %v13876_v4 = vld [vmem:[%s18749_s9 + $0x2e1] sm:$0xff] }
 0x1c1   : > { %v16550_v31 = vpop.f32.mrf.mxu1  ;;  %16893 = vmatmul.mubr.msk.f32.gmra.mxu1 %vm430_vm0, %v13567_v3  ;;  %17091 = vmatprep.mubr.msk.f32.mxu0 %vm430_vm0, %v13826_v17  ;;  %v13570_v11 = vld [vmem:[%s18749_s9 + $0x100] sm:$0xff] }
 0x1c2   : > { %24063 = vst [vmem:[#allocation53_spill] sm:$0xff] %v20046_v47  ;;  %v20051_v55 = vadd.f32 %v3430_v32, %v2211_v48  ;;  %v2226_v40 = vadd.f32 %v16550_v31, %v24066_v59  ;;  %16895 = vmatprep.mubr.msk.f32.mxu1 %vm430_vm0, %v13568_v50  ;;  %v3440_v62 = vpop.f32.mrf.mxu0  ;;  %v13828_v47 = vld [vmem:[%s18749_s9 + $0x101] sm:$0xff] }
 0x1c3   : > { %v2220_v56 = vpop.f32.mrf.mxu1  ;;  %v24070_v17 = vld [vmem:[#allocation61_spill] sm:$0xff] }
 0x1c4   : > { %24065 = vst [vmem:[#allocation55_spill] sm:$0xff] %v20051_v55  ;;  %v20060_v3 = vadd.f32 %v16746_v60, %v2226_v40  ;;  %v2221_v32 = vadd.f32 %v2220_v56, %v24068_v18  ;;  %v16749_v31 = vpop.f32.mrf.mxu0  ;;  %17092 = vmatmul.mubr.msk.f32.gmra.mxu0 %vm430_vm0, %v13827_v42  ;;  %v13571_v55 = vld [vmem:[%s18749_s9 + $0x108] sm:$0xff]  ;;  %v13572_v18 = vld [vmem:[%s18749_s9 + $0x118] sm:$0xff]  ;;  %v24072_v42 = vld [vmem:[#allocation63_spill] sm:$0xff] }
 0x1c5   : > { %v16553_v48 = vpop.f32.mrf.mxu1  ;;  %16896 = vmatmul.mubr.msk.f32.gmra.mxu1 %vm430_vm0, %v13569_v52  ;;  %17094 = vmatprep.mubr.msk.f32.mxu0 %vm430_vm0, %v13828_v47  ;;  %v13829_v60 = vld [vmem:[%s18749_s9 + $0x109] sm:$0xff] }
 0x1c6   : > { %24067 = vst [vmem:[#allocation57_spill] sm:$0xff] %v20060_v3  ;;  %v20065_v50 = vadd.f32 %v3440_v62, %v2221_v32  ;;  %v2236_v59 = vadd.f32 %v16553_v48, %v24070_v17  ;;  %16898 = vmatprep.mubr.msk.f32.mxu1 %vm430_vm0, %v13570_v11  ;;  %v3450_v56 = vpop.f32.mrf.mxu0  ;;  %v13830_v3 = vld [vmem:[%s18749_s9 + $0x119] sm:$0xff] }
 0x1c7   : > { %v2230_v40 = vpop.f32.mrf.mxu1  ;;  %v24074_v11 = vld [vmem:[#allocation65_spill] sm:$0xff] }
 0x1c8   : > { %24069 = vst [vmem:[#allocation59_spill] sm:$0xff] %v20065_v50  ;;  %v20074_v52 = vadd.f32 %v16749_v31, %v2236_v59  ;;  %v2231_v62 = vadd.f32 %v2230_v40, %v24072_v42  ;;  %v16752_v48 = vpop.f32.mrf.mxu0  ;;  %17095 = vmatmul.mubr.msk.f32.gmra.mxu0 %vm430_vm0, %v13829_v60  ;;  %v13573_v50 = vld [vmem:[%s18749_s9 + $0x120] sm:$0xff]  ;;  %v13574_v42 = vld [vmem:[%s18749_s9 + $0x128] sm:$0xff]  ;;  %v24076_v60 = vld [vmem:[#allocation67_spill] sm:$0xff] }
 0x1c9   : > { %v16556_v32 = vpop.f32.mrf.mxu1  ;;  %16899 = vmatmul.mubr.msk.f32.gmra.mxu1 %vm430_vm0, %v13571_v55  ;;  %17097 = vmatprep.mubr.msk.f32.mxu0 %vm430_vm0, %v13830_v3  ;;  %v13831_v31 = vld [vmem:[%s18749_s9 + $0x121] sm:$0xff] }
 0x1ca   : > { %24071 = vst [vmem:[#allocation61_spill] sm:$0xff] %v20074_v52  ;;  %v20079_v47 = vadd.f32 %v3450_v56, %v2231_v62  ;;  %v2246_v17 = vadd.f32 %v16556_v32, %v24074_v11  ;;  %16901 = vmatprep.mubr.msk.f32.mxu1 %vm430_vm0, %v13572_v18  ;;  %v3460_v40 = vpop.f32.mrf.mxu0  ;;  %v13832_v52 = vld [vmem:[%s18749_s9 + $0x129] sm:$0xff]  ;;  %v24078_v18 = vld [vmem:[#allocation69_spill] sm:$0xff] }
 0x1cb   : > { %v2240_v59 = vpop.f32.mrf.mxu1 }
 0x1cc   : > { %24073 = vst [vmem:[#allocation63_spill] sm:$0xff] %v20079_v47  ;;  %v20088_v55 = vadd.f32 %v16752_v48, %v2246_v17  ;;  %v2241_v56 = vadd.f32 %v2240_v59, %v24076_v60  ;;  %v16755_v32 = vpop.f32.mrf.mxu0  ;;  %17098 = vmatmul.mubr.msk.f32.gmra.mxu0 %vm430_vm0, %v13831_v31  ;;  %v13575_v47 = vld [vmem:[%s18749_s9 + $0x130] sm:$0xff]  ;;  %v13576_v60 = vld [vmem:[%s18749_s9 + $0x140] sm:$0xff] }
 0x1cd   : > { %v16559_v62 = vpop.f32.mrf.mxu1  ;;  %16902 = vmatmul.mubr.msk.f32.gmra.mxu1 %vm430_vm0, %v13573_v50  ;;  %17100 = vmatprep.mubr.msk.f32.mxu0 %vm430_vm0, %v13832_v52  ;;  %v13833_v48 = vld [vmem:[%s18749_s9 + $0x131] sm:$0xff] }
 0x1ce   : > { %24075 = vst [vmem:[#allocation65_spill] sm:$0xff] %v20088_v55  ;;  %v20093_v3 = vadd.f32 %v3460_v40, %v2241_v56  ;;  %v2256_v11 = vadd.f32 %v16559_v62, %v24078_v18  ;;  %16904 = vmatprep.mubr.msk.f32.mxu1 %vm430_vm0, %v13574_v42  ;;  %v3470_v59 = vpop.f32.mrf.mxu0  ;;  %v13834_v55 = vld [vmem:[%s18749_s9 + $0x141] sm:$0xff]  ;;  %v24080_v31 = vld [vmem:[#allocation71_spill] sm:$0xff] }
 0x1cf   : > { %v2250_v17 = vpop.f32.mrf.mxu1  ;;  %v24082_v42 = vld [vmem:[#allocation73_spill] sm:$0xff] }
 0x1d0   : > { %24077 = vst [vmem:[#allocation67_spill] sm:$0xff] %v20093_v3  ;;  %v20102_v50 = vadd.f32 %v16755_v32, %v2256_v11  ;;  %v2251_v40 = vadd.f32 %v2250_v17, %v24080_v31  ;;  %v16758_v62 = vpop.f32.mrf.mxu0  ;;  %17101 = vmatmul.mubr.msk.f32.gmra.mxu0 %vm430_vm0, %v13833_v48  ;;  %v13577_v3 = vld [vmem:[%s18749_s9 + $0x148] sm:$0xff]  ;;  %v13578_v31 = vld [vmem:[%s18749_s9 + $0x150] sm:$0xff] }
 0x1d1   : > { %v16562_v56 = vpop.f32.mrf.mxu1  ;;  %16905 = vmatmul.mubr.msk.f32.gmra.mxu1 %vm430_vm0, %v13575_v47  ;;  %17103 = vmatprep.mubr.msk.f32.mxu0 %vm430_vm0, %v13834_v55  ;;  %v13835_v32 = vld [vmem:[%s18749_s9 + $0x149] sm:$0xff] }
 0x1d2   : > { %24079 = vst [vmem:[#allocation69_spill] sm:$0xff] %v20102_v50  ;;  %v20107_v52 = vadd.f32 %v3470_v59, %v2251_v40  ;;  %v2266_v18 = vadd.f32 %v16562_v56, %v24082_v42  ;;  %16907 = vmatprep.mubr.msk.f32.mxu1 %vm430_vm0, %v13576_v60  ;;  %v3480_v17 = vpop.f32.mrf.mxu0  ;;  %v13836_v50 = vld [vmem:[%s18749_s9 + $0x151] sm:$0xff]  ;;  %v24086_v60 = vld [vmem:[#allocation77_spill] sm:$0xff] }
 0x1d3   : > { %v2260_v11 = vpop.f32.mrf.mxu1  ;;  %v24084_v48 = vld [vmem:[#allocation75_spill] sm:$0xff] }
 0x1d4   : > { %24081 = vst [vmem:[#allocation71_spill] sm:$0xff] %v20107_v52  ;;  %v20116_v47 = vadd.f32 %v16758_v62, %v2266_v18  ;;  %v2261_v59 = vadd.f32 %v2260_v11, %v24084_v48  ;;  %v16761_v56 = vpop.f32.mrf.mxu0  ;;  %17104 = vmatmul.mubr.msk.f32.gmra.mxu0 %vm430_vm0, %v13835_v32  ;;  %v13579_v52 = vld [vmem:[%s18749_s9 + $0x158] sm:$0xff]  ;;  %v13580_v48 = vld [vmem:[%s18749_s9 + $0x168] sm:$0xff]  ;;  %v24088_v32 = vld [vmem:[#allocation79_spill] sm:$0xff] }
 0x1d5   : > { %v16565_v40 = vpop.f32.mrf.mxu1  ;;  %16908 = vmatmul.mubr.msk.f32.gmra.mxu1 %vm430_vm0, %v13577_v3  ;;  %17106 = vmatprep.mubr.msk.f32.mxu0 %vm430_vm0, %v13836_v50  ;;  %v13837_v62 = vld [vmem:[%s18749_s9 + $0x159] sm:$0xff] }
 0x1d6   : > { %24083 = vst [vmem:[#allocation73_spill] sm:$0xff] %v20116_v47  ;;  %v20121_v55 = vadd.f32 %v3480_v17, %v2261_v59  ;;  %v2276_v42 = vadd.f32 %v16565_v40, %v24086_v60  ;;  %16910 = vmatprep.mubr.msk.f32.mxu1 %vm430_vm0, %v13578_v31  ;;  %v3490_v11 = vpop.f32.mrf.mxu0  ;;  %v13838_v47 = vld [vmem:[%s18749_s9 + $0x169] sm:$0xff]  ;;  %v24090_v31 = vld [vmem:[#allocation81_spill] sm:$0xff] }
 0x1d7   : > { %v2270_v18 = vpop.f32.mrf.mxu1 }
 0x1d8   : > { %24085 = vst [vmem:[#allocation75_spill] sm:$0xff] %v20121_v55  ;;  %v20130_v3 = vadd.f32 %v16761_v56, %v2276_v42  ;;  %v2271_v17 = vadd.f32 %v2270_v18, %v24088_v32  ;;  %v16764_v40 = vpop.f32.mrf.mxu0  ;;  %17107 = vmatmul.mubr.msk.f32.gmra.mxu0 %vm430_vm0, %v13837_v62  ;;  %v13581_v55 = vld [vmem:[%s18749_s9 + $0x170] sm:$0xff]  ;;  %v13582_v32 = vld [vmem:[%s18749_s9 + $0x178] sm:$0xff] }
 0x1d9   : > { %v16568_v59 = vpop.f32.mrf.mxu1  ;;  %16911 = vmatmul.mubr.msk.f32.gmra.mxu1 %vm430_vm0, %v13579_v52  ;;  %17109 = vmatprep.mubr.msk.f32.mxu0 %vm430_vm0, %v13838_v47  ;;  %v13839_v56 = vld [vmem:[%s18749_s9 + $0x171] sm:$0xff] }
 0x1da   : > { %24087 = vst [vmem:[#allocation77_spill] sm:$0xff] %v20130_v3  ;;  %v20135_v50 = vadd.f32 %v3490_v11, %v2271_v17  ;;  %v2286_v60 = vadd.f32 %v16568_v59, %v24090_v31  ;;  %16913 = vmatprep.mubr.msk.f32.mxu1 %vm430_vm0, %v13580_v48  ;;  %v3500_v18 = vpop.f32.mrf.mxu0  ;;  %v13840_v3 = vld [vmem:[%s18749_s9 + $0x179] sm:$0xff]  ;;  %v24092_v62 = vld [vmem:[#allocation83_spill] sm:$0xff] }
 0x1db   : > { %v2280_v42 = vpop.f32.mrf.mxu1  ;;  %v24094_v48 = vld [vmem:[#allocation5_spill] sm:$0xff] }
 0x1dc   : > { %24089 = vst [vmem:[#allocation79_spill] sm:$0xff] %v20135_v50  ;;  %v20144_v52 = vadd.f32 %v16764_v40, %v2286_v60  ;;  %v2281_v11 = vadd.f32 %v2280_v42, %v24092_v62  ;;  %v16767_v59 = vpop.f32.mrf.mxu0  ;;  %17110 = vmatmul.mubr.msk.f32.gmra.mxu0 %vm430_vm0, %v13839_v56  ;;  %v13583_v50 = vld [vmem:[%s18749_s9 + $0x180] sm:$0xff]  ;;  %v13584_v62 = vld [vmem:[%s18749_s9 + $0x190] sm:$0xff]  ;;  %v24096_v56 = vld [vmem:[#allocation6_spill] sm:$0xff] }
 0x1dd   : > { %v16571_v17 = vpop.f32.mrf.mxu1  ;;  %16914 = vmatmul.mubr.msk.f32.gmra.mxu1 %vm430_vm0, %v13581_v55  ;;  %17112 = vmatprep.mubr.msk.f32.mxu0 %vm430_vm0, %v13840_v3  ;;  %v13841_v40 = vld [vmem:[%s18749_s9 + $0x181] sm:$0xff] }
 0x1de   : > { %24091 = vst [vmem:[#allocation81_spill] sm:$0xff] %v20144_v52  ;;  %v20149_v47 = vadd.f32 %v3500_v18, %v2281_v11  ;;  %v2296_v31 = vadd.f32 %v16571_v17, %v24094_v48  ;;  %16916 = vmatprep.mubr.msk.f32.mxu1 %vm430_vm0, %v13582_v32  ;;  %v3510_v42 = vpop.f32.mrf.mxu0  ;;  %v13842_v52 = vld [vmem:[%s18749_s9 + $0x191] sm:$0xff] }
 0x1df   : > { %v2290_v60 = vpop.f32.mrf.mxu1  ;;  %v24098_v32 = vld [vmem:[#allocation7_spill] sm:$0xff] }
 0x1e0   : > { %24093 = vst [vmem:[#allocation83_spill] sm:$0xff] %v20149_v47  ;;  %v20158_v55 = vadd.f32 %v16767_v59, %v2296_v31  ;;  %v2291_v18 = vadd.f32 %v2290_v60, %v24096_v56  ;;  %v16770_v17 = vpop.f32.mrf.mxu0  ;;  %17113 = vmatmul.mubr.msk.f32.gmra.mxu0 %vm430_vm0, %v13841_v40  ;;  %v13585_v47 = vld [vmem:[%s18749_s9 + $0x198] sm:$0xff]  ;;  %v13586_v56 = vld [vmem:[%s18749_s9 + $0x1a0] sm:$0xff] }
 0x1e1   : > { %v16574_v11 = vpop.f32.mrf.mxu1  ;;  %16917 = vmatmul.mubr.msk.f32.gmra.mxu1 %vm430_vm0, %v13583_v50  ;;  %17115 = vmatprep.mubr.msk.f32.mxu0 %vm430_vm0, %v13842_v52  ;;  %v13843_v59 = vld [vmem:[%s18749_s9 + $0x199] sm:$0xff] }
 0x1e2   : > { %24095 = vst [vmem:[#allocation5_spill] sm:$0xff] %v20158_v55  ;;  %v20163_v3 = vadd.f32 %v3510_v42, %v2291_v18  ;;  %v2306_v48 = vadd.f32 %v16574_v11, %v24098_v32  ;;  %16919 = vmatprep.mubr.msk.f32.mxu1 %vm430_vm0, %v13584_v62  ;;  %v3520_v60 = vpop.f32.mrf.mxu0  ;;  %v13844_v55 = vld [vmem:[%s18749_s9 + $0x1a1] sm:$0xff]  ;;  %v24100_v40 = vld [vmem:[#allocation8_spill] sm:$0xff] }
 0x1e3   : > { %v2300_v31 = vpop.f32.mrf.mxu1  ;;  %v24102_v62 = vld [vmem:[#allocation9_spill] sm:$0xff] }
 0x1e4   : > { %24097 = vst [vmem:[#allocation6_spill] sm:$0xff] %v20163_v3  ;;  %v20172_v50 = vadd.f32 %v16770_v17, %v2306_v48  ;;  %v2301_v42 = vadd.f32 %v2300_v31, %v24100_v40  ;;  %v16773_v11 = vpop.f32.mrf.mxu0  ;;  %17116 = vmatmul.mubr.msk.f32.gmra.mxu0 %vm430_vm0, %v13843_v59  ;;  %v13587_v3 = vld [vmem:[%s18749_s9 + $0x1a8] sm:$0xff]  ;;  %v13588_v40 = vld [vmem:[%s18749_s9 + $0x1b8] sm:$0xff] }
 0x1e5   : > { %v16577_v18 = vpop.f32.mrf.mxu1  ;;  %16920 = vmatmul.mubr.msk.f32.gmra.mxu1 %vm430_vm0, %v13585_v47  ;;  %17118 = vmatprep.mubr.msk.f32.mxu0 %vm430_vm0, %v13844_v55  ;;  %v13845_v17 = vld [vmem:[%s18749_s9 + $0x1a9] sm:$0xff] }
 0x1e6   : > { %24099 = vst [vmem:[#allocation7_spill] sm:$0xff] %v20172_v50  ;;  %v20177_v52 = vadd.f32 %v3520_v60, %v2301_v42  ;;  %v2316_v32 = vadd.f32 %v16577_v18, %v24102_v62  ;;  %16922 = vmatprep.mubr.msk.f32.mxu1 %vm430_vm0, %v13586_v56  ;;  %v3530_v31 = vpop.f32.mrf.mxu0  ;;  %v13846_v50 = vld [vmem:[%s18749_s9 + $0x1b9] sm:$0xff]  ;;  %v24104_v59 = vld [vmem:[#allocation10_spill] sm:$0xff]  ;;  %v24106_v56 = vld [vmem:[#allocation11_spill] sm:$0xff] }
 0x1e7   : > { %v2310_v48 = vpop.f32.mrf.mxu1 }
 0x1e8   : > { %24101 = vst [vmem:[#allocation8_spill] sm:$0xff] %v20177_v52  ;;  %v20186_v47 = vadd.f32 %v16773_v11, %v2316_v32  ;;  %v2311_v60 = vadd.f32 %v2310_v48, %v24104_v59  ;;  %v16776_v18 = vpop.f32.mrf.mxu0  ;;  %17119 = vmatmul.mubr.msk.f32.gmra.mxu0 %vm430_vm0, %v13845_v17  ;;  %v13589_v52 = vld [vmem:[%s18749_s9 + $0x1c0] sm:$0xff]  ;;  %v13590_v59 = vld [vmem:[%s18749_s9 + $0x1c8] sm:$0xff]  ;;  %v24108_v17 = vld [vmem:[#allocation12_spill] sm:$0xff] }
 0x1e9   : > { %v16580_v42 = vpop.f32.mrf.mxu1  ;;  %16923 = vmatmul.mubr.msk.f32.gmra.mxu1 %vm430_vm0, %v13587_v3  ;;  %17121 = vmatprep.mubr.msk.f32.mxu0 %vm430_vm0, %v13846_v50  ;;  %v13847_v11 = vld [vmem:[%s18749_s9 + $0x1c1] sm:$0xff] }
 0x1ea   : > { %24103 = vst [vmem:[#allocation9_spill] sm:$0xff] %v20186_v47  ;;  %v20191_v55 = vadd.f32 %v3530_v31, %v2311_v60  ;;  %v2326_v62 = vadd.f32 %v16580_v42, %v24106_v56  ;;  %16925 = vmatprep.mubr.msk.f32.mxu1 %vm430_vm0, %v13588_v40  ;;  %v3540_v48 = vpop.f32.mrf.mxu0  ;;  %v13848_v47 = vld [vmem:[%s18749_s9 + $0x1c9] sm:$0xff]  ;;  %v24110_v40 = vld [vmem:[#allocation13_spill] sm:$0xff] }
 0x1eb   : > { %v2320_v32 = vpop.f32.mrf.mxu1 }
 0x1ec   : > { %24105 = vst [vmem:[#allocation10_spill] sm:$0xff] %v20191_v55  ;;  %v20200_v3 = vadd.f32 %v16776_v18, %v2326_v62  ;;  %v2321_v31 = vadd.f32 %v2320_v32, %v24108_v17  ;;  %v16779_v42 = vpop.f32.mrf.mxu0  ;;  %17122 = vmatmul.mubr.msk.f32.gmra.mxu0 %vm430_vm0, %v13847_v11  ;;  %v13591_v55 = vld [vmem:[%s18749_s9 + $0x1d0] sm:$0xff]  ;;  %v13592_v17 = vld [vmem:[%s18749_s9 + $0x1e0] sm:$0xff]  ;;  %v24112_v11 = vld [vmem:[#allocation14_spill] sm:$0xff] }
 0x1ed   : > { %v16583_v60 = vpop.f32.mrf.mxu1  ;;  %16926 = vmatmul.mubr.msk.f32.gmra.mxu1 %vm430_vm0, %v13589_v52  ;;  %17124 = vmatprep.mubr.msk.f32.mxu0 %vm430_vm0, %v13848_v47  ;;  %v13849_v18 = vld [vmem:[%s18749_s9 + $0x1d1] sm:$0xff] }
 0x1ee   : > { %24107 = vst [vmem:[#allocation11_spill] sm:$0xff] %v20200_v3  ;;  %v20205_v50 = vadd.f32 %v3540_v48, %v2321_v31  ;;  %v2336_v56 = vadd.f32 %v16583_v60, %v24110_v40  ;;  %16928 = vmatprep.mubr.msk.f32.mxu1 %vm430_vm0, %v13590_v59  ;;  %v3550_v32 = vpop.f32.mrf.mxu0  ;;  %v13850_v3 = vld [vmem:[%s18749_s9 + $0x1e1] sm:$0xff]  ;;  %v24114_v59 = vld [vmem:[#allocation15_spill] sm:$0xff] }
 0x1ef   : > { %v2330_v62 = vpop.f32.mrf.mxu1 }
 0x1f0   : > { %24109 = vst [vmem:[#allocation12_spill] sm:$0xff] %v20205_v50  ;;  %v20214_v52 = vadd.f32 %v16779_v42, %v2336_v56  ;;  %v2331_v48 = vadd.f32 %v2330_v62, %v24112_v11  ;;  %v16782_v60 = vpop.f32.mrf.mxu0  ;;  %17125 = vmatmul.mubr.msk.f32.gmra.mxu0 %vm430_vm0, %v13849_v18  ;;  %v13593_v50 = vld [vmem:[%s18749_s9 + $0x1e8] sm:$0xff]  ;;  %v13594_v11 = vld [vmem:[%s18749_s9 + $0x1f0] sm:$0xff]  ;;  %v24116_v18 = vld [vmem:[#allocation16_spill] sm:$0xff] }
 0x1f1   : > { %v16586_v31 = vpop.f32.mrf.mxu1  ;;  %16929 = vmatmul.mubr.msk.f32.gmra.mxu1 %vm430_vm0, %v13591_v55  ;;  %17127 = vmatprep.mubr.msk.f32.mxu0 %vm430_vm0, %v13850_v3  ;;  %v13851_v42 = vld [vmem:[%s18749_s9 + $0x1e9] sm:$0xff] }
 0x1f2   : > { %24111 = vst [vmem:[#allocation13_spill] sm:$0xff] %v20214_v52  ;;  %v20219_v47 = vadd.f32 %v3550_v32, %v2331_v48  ;;  %v2346_v40 = vadd.f32 %v16586_v31, %v24114_v59  ;;  %16931 = vmatprep.mubr.msk.f32.mxu1 %vm430_vm0, %v13592_v17  ;;  %v3560_v62 = vpop.f32.mrf.mxu0  ;;  %v13852_v52 = vld [vmem:[%s18749_s9 + $0x1f1] sm:$0xff]  ;;  %v24118_v17 = vld [vmem:[#allocation17_spill] sm:$0xff] }
 0x1f3   : > { %v2340_v56 = vpop.f32.mrf.mxu1 }
 0x1f4   : > { %24113 = vst [vmem:[#allocation14_spill] sm:$0xff] %v20219_v47  ;;  %v20228_v55 = vadd.f32 %v16782_v60, %v2346_v40  ;;  %v2341_v32 = vadd.f32 %v2340_v56, %v24116_v18  ;;  %v16785_v31 = vpop.f32.mrf.mxu0  ;;  %17128 = vmatmul.mubr.msk.f32.gmra.mxu0 %vm430_vm0, %v13851_v42  ;;  %v13595_v47 = vld [vmem:[%s18749_s9 + $0x1f8] sm:$0xff]  ;;  %v13596_v18 = vld [vmem:[%s18749_s9 + $0x208] sm:$0xff] }
 0x1f5   : > { %v16589_v48 = vpop.f32.mrf.mxu1  ;;  %16932 = vmatmul.mubr.msk.f32.gmra.mxu1 %vm430_vm0, %v13593_v50  ;;  %17130 = vmatprep.mubr.msk.f32.mxu0 %vm430_vm0, %v13852_v52  ;;  %v13853_v60 = vld [vmem:[%s18749_s9 + $0x1f9] sm:$0xff]  ;;  %v24120_v42 = vld [vmem:[#allocation18_spill] sm:$0xff] }
 0x1f6   : > { %24115 = vst [vmem:[#allocation15_spill] sm:$0xff] %v20228_v55  ;;  %v20233_v3 = vadd.f32 %v3560_v62, %v2341_v32  ;;  %v2356_v59 = vadd.f32 %v16589_v48, %v24118_v17  ;;  %16934 = vmatprep.mubr.msk.f32.mxu1 %vm430_vm0, %v13594_v11  ;;  %v3570_v56 = vpop.f32.mrf.mxu0  ;;  %v13854_v55 = vld [vmem:[%s18749_s9 + $0x209] sm:$0xff] }
 0x1f7   : > { %v2350_v40 = vpop.f32.mrf.mxu1  ;;  %v24122_v11 = vld [vmem:[#allocation19_spill] sm:$0xff] }
 0x1f8   : > { %24117 = vst [vmem:[#allocation16_spill] sm:$0xff] %v20233_v3  ;;  %v20242_v50 = vadd.f32 %v16785_v31, %v2356_v59  ;;  %v2351_v62 = vadd.f32 %v2350_v40, %v24120_v42  ;;  %v16788_v48 = vpop.f32.mrf.mxu0  ;;  %17131 = vmatmul.mubr.msk.f32.gmra.mxu0 %vm430_vm0, %v13853_v60  ;;  %v13597_v3 = vld [vmem:[%s18749_s9 + $0x210] sm:$0xff]  ;;  %v13598_v42 = vld [vmem:[%s18749_s9 + $0x218] sm:$0xff] }
 0x1f9   : > { %v16592_v32 = vpop.f32.mrf.mxu1  ;;  %16935 = vmatmul.mubr.msk.f32.gmra.mxu1 %vm430_vm0, %v13595_v47  ;;  %17133 = vmatprep.mubr.msk.f32.mxu0 %vm430_vm0, %v13854_v55  ;;  %v13855_v31 = vld [vmem:[%s18749_s9 + $0x211] sm:$0xff] }
 0x1fa   : > { %24119 = vst [vmem:[#allocation17_spill] sm:$0xff] %v20242_v50  ;;  %v20247_v52 = vadd.f32 %v3570_v56, %v2351_v62  ;;  %v2366_v17 = vadd.f32 %v16592_v32, %v24122_v11  ;;  %16937 = vmatprep.mubr.msk.f32.mxu1 %vm430_vm0, %v13596_v18  ;;  %v3580_v40 = vpop.f32.mrf.mxu0  ;;  %v13856_v50 = vld [vmem:[%s18749_s9 + $0x219] sm:$0xff] }
 0x1fb   : > { %v2360_v59 = vpop.f32.mrf.mxu1  ;;  %v24124_v60 = vld [vmem:[#allocation20_spill] sm:$0xff]  ;;  %v24126_v18 = vld [vmem:[#allocation21_spill] sm:$0xff] }
 0x1fc   : > { %24121 = vst [vmem:[#allocation18_spill] sm:$0xff] %v20247_v52  ;;  %v20256_v47 = vadd.f32 %v16788_v48, %v2366_v17  ;;  %v2361_v56 = vadd.f32 %v2360_v59, %v24124_v60  ;;  %v16791_v32 = vpop.f32.mrf.mxu0  ;;  %17134 = vmatmul.mubr.msk.f32.gmra.mxu0 %vm430_vm0, %v13855_v31  ;;  %v13599_v52 = vld [vmem:[%s18749_s9 + $0x220] sm:$0xff]  ;;  %v13600_v60 = vld [vmem:[%s18749_s9 + $0x230] sm:$0xff]  ;;  %v24128_v31 = vld [vmem:[#allocation22_spill] sm:$0xff] }
 0x1fd   : > { %v16595_v62 = vpop.f32.mrf.mxu1  ;;  %16938 = vmatmul.mubr.msk.f32.gmra.mxu1 %vm430_vm0, %v13597_v3  ;;  %17136 = vmatprep.mubr.msk.f32.mxu0 %vm430_vm0, %v13856_v50  ;;  %v13857_v48 = vld [vmem:[%s18749_s9 + $0x221] sm:$0xff] }
 0x1fe   : > { %24123 = vst [vmem:[#allocation19_spill] sm:$0xff] %v20256_v47  ;;  %v20261_v55 = vadd.f32 %v3580_v40, %v2361_v56  ;;  %v2376_v11 = vadd.f32 %v16595_v62, %v24126_v18  ;;  %16940 = vmatprep.mubr.msk.f32.mxu1 %vm430_vm0, %v13598_v42  ;;  %v3590_v59 = vpop.f32.mrf.mxu0  ;;  %v13858_v47 = vld [vmem:[%s18749_s9 + $0x231] sm:$0xff] }
 0x1ff   : > { %v2370_v17 = vpop.f32.mrf.mxu1  ;;  %v24130_v42 = vld [vmem:[#allocation23_spill] sm:$0xff] }
 0x200   : > { %24125 = vst [vmem:[#allocation20_spill] sm:$0xff] %v20261_v55  ;;  %v20270_v3 = vadd.f32 %v16791_v32, %v2376_v11  ;;  %v2371_v40 = vadd.f32 %v2370_v17, %v24128_v31  ;;  %v16794_v62 = vpop.f32.mrf.mxu0  ;;  %17137 = vmatmul.mubr.msk.f32.gmra.mxu0 %vm430_vm0, %v13857_v48  ;;  %v13601_v55 = vld [vmem:[%s18749_s9 + $0x238] sm:$0xff]  ;;  %v13602_v31 = vld [vmem:[%s18749_s9 + $0x240] sm:$0xff] }
 0x201   : > { %v16598_v56 = vpop.f32.mrf.mxu1  ;;  %16941 = vmatmul.mubr.msk.f32.gmra.mxu1 %vm430_vm0, %v13599_v52  ;;  %17139 = vmatprep.mubr.msk.f32.mxu0 %vm430_vm0, %v13858_v47  ;;  %v13859_v32 = vld [vmem:[%s18749_s9 + $0x239] sm:$0xff] }
 0x202   : > { %24127 = vst [vmem:[#allocation21_spill] sm:$0xff] %v20270_v3  ;;  %v20275_v50 = vadd.f32 %v3590_v59, %v2371_v40  ;;  %v2386_v18 = vadd.f32 %v16598_v56, %v24130_v42  ;;  %16943 = vmatprep.mubr.msk.f32.mxu1 %vm430_vm0, %v13600_v60  ;;  %v3600_v17 = vpop.f32.mrf.mxu0  ;;  %v13860_v3 = vld [vmem:[%s18749_s9 + $0x241] sm:$0xff]  ;;  %v24132_v48 = vld [vmem:[#allocation24_spill] sm:$0xff] }
 0x203   : > { %v2380_v11 = vpop.f32.mrf.mxu1  ;;  %v24134_v60 = vld [vmem:[#allocation25_spill] sm:$0xff] }
 0x204   : > { %24129 = vst [vmem:[#allocation22_spill] sm:$0xff] %v20275_v50  ;;  %v20284_v52 = vadd.f32 %v16794_v62, %v2386_v18  ;;  %v2381_v59 = vadd.f32 %v2380_v11, %v24132_v48  ;;  %v16797_v56 = vpop.f32.mrf.mxu0  ;;  %17140 = vmatmul.mubr.msk.f32.gmra.mxu0 %vm430_vm0, %v13859_v32  ;;  %v13603_v50 = vld [vmem:[%s18749_s9 + $0x248] sm:$0xff]  ;;  %v13604_v48 = vld [vmem:[%s18749_s9 + $0x258] sm:$0xff] }
 0x205   : > { %v16601_v40 = vpop.f32.mrf.mxu1  ;;  %16944 = vmatmul.mubr.msk.f32.gmra.mxu1 %vm430_vm0, %v13601_v55  ;;  %17142 = vmatprep.mubr.msk.f32.mxu0 %vm430_vm0, %v13860_v3  ;;  %v13861_v62 = vld [vmem:[%s18749_s9 + $0x249] sm:$0xff] }
 0x206   : > { %24131 = vst [vmem:[#allocation23_spill] sm:$0xff] %v20284_v52  ;;  %v20289_v47 = vadd.f32 %v3600_v17, %v2381_v59  ;;  %v2396_v42 = vadd.f32 %v16601_v40, %v24134_v60  ;;  %16946 = vmatprep.mubr.msk.f32.mxu1 %vm430_vm0, %v13602_v31  ;;  %v3610_v11 = vpop.f32.mrf.mxu0  ;;  %v13862_v52 = vld [vmem:[%s18749_s9 + $0x259] sm:$0xff]  ;;  %v24136_v32 = vld [vmem:[#allocation26_spill] sm:$0xff]  ;;  %v24138_v31 = vld [vmem:[#allocation27_spill] sm:$0xff] }
 0x207   : > { %v2390_v18 = vpop.f32.mrf.mxu1 }
 0x208   : > { %24133 = vst [vmem:[#allocation24_spill] sm:$0xff] %v20289_v47  ;;  %v20298_v55 = vadd.f32 %v16797_v56, %v2396_v42  ;;  %v2391_v17 = vadd.f32 %v2390_v18, %v24136_v32  ;;  %v16800_v40 = vpop.f32.mrf.mxu0  ;;  %17143 = vmatmul.mubr.msk.f32.gmra.mxu0 %vm430_vm0, %v13861_v62  ;;  %v13605_v47 = vld [vmem:[%s18749_s9 + $0x260] sm:$0xff]  ;;  %v13606_v32 = vld [vmem:[%s18749_s9 + $0x268] sm:$0xff]  ;;  %v24140_v62 = vld [vmem:[#allocation28_spill] sm:$0xff] }
 0x209   : > { %v16604_v59 = vpop.f32.mrf.mxu1  ;;  %16947 = vmatmul.mubr.msk.f32.gmra.mxu1 %vm430_vm0, %v13603_v50  ;;  %17145 = vmatprep.mubr.msk.f32.mxu0 %vm430_vm0, %v13862_v52  ;;  %v13863_v56 = vld [vmem:[%s18749_s9 + $0x261] sm:$0xff] }
 0x20a   : > { %24135 = vst [vmem:[#allocation25_spill] sm:$0xff] %v20298_v55  ;;  %v20303_v3 = vadd.f32 %v3610_v11, %v2391_v17  ;;  %v2406_v60 = vadd.f32 %v16604_v59, %v24138_v31  ;;  %16949 = vmatprep.mubr.msk.f32.mxu1 %vm430_vm0, %v13604_v48  ;;  %v3620_v18 = vpop.f32.mrf.mxu0  ;;  %v13864_v55 = vld [vmem:[%s18749_s9 + $0x269] sm:$0xff]  ;;  %v24142_v48 = vld [vmem:[#allocation29_spill] sm:$0xff] }
 0x20b   : > { %v2400_v42 = vpop.f32.mrf.mxu1 }
 0x20c   : > { %24137 = vst [vmem:[#allocation26_spill] sm:$0xff] %v20303_v3  ;;  %v20312_v50 = vadd.f32 %v16800_v40, %v2406_v60  ;;  %v2401_v11 = vadd.f32 %v2400_v42, %v24140_v62  ;;  %v16803_v59 = vpop.f32.mrf.mxu0  ;;  %17146 = vmatmul.mubr.msk.f32.gmra.mxu0 %vm430_vm0, %v13863_v56  ;;  %v13607_v3 = vld [vmem:[%s18749_s9 + $0x270] sm:$0xff]  ;;  %v13608_v62 = vld [vmem:[%s18749_s9 + $0x280] sm:$0xff]  ;;  %v24144_v56 = vld [vmem:[#allocation30_spill] sm:$0xff] }
 0x20d   : > { %v16607_v17 = vpop.f32.mrf.mxu1  ;;  %16950 = vmatmul.mubr.msk.f32.gmra.mxu1 %vm430_vm0, %v13605_v47  ;;  %17148 = vmatprep.mubr.msk.f32.mxu0 %vm430_vm0, %v13864_v55  ;;  %v13865_v40 = vld [vmem:[%s18749_s9 + $0x271] sm:$0xff] }
 0x20e   : > { %24139 = vst [vmem:[#allocation27_spill] sm:$0xff] %v20312_v50  ;;  %v20317_v52 = vadd.f32 %v3620_v18, %v2401_v11  ;;  %v2416_v31 = vadd.f32 %v16607_v17, %v24142_v48  ;;  %16952 = vmatprep.mubr.msk.f32.mxu1 %vm430_vm0, %v13606_v32  ;;  %v3630_v42 = vpop.f32.mrf.mxu0  ;;  %v13866_v50 = vld [vmem:[%s18749_s9 + $0x281] sm:$0xff]  ;;  %v24146_v32 = vld [vmem:[#allocation31_spill] sm:$0xff] }
 0x20f   : > { %v2410_v60 = vpop.f32.mrf.mxu1 }
 0x210   : > { %24141 = vst [vmem:[#allocation28_spill] sm:$0xff] %v20317_v52  ;;  %v20326_v47 = vadd.f32 %v16803_v59, %v2416_v31  ;;  %v2411_v18 = vadd.f32 %v2410_v60, %v24144_v56  ;;  %v16806_v17 = vpop.f32.mrf.mxu0  ;;  %17149 = vmatmul.mubr.msk.f32.gmra.mxu0 %vm430_vm0, %v13865_v40  ;;  %v13609_v52 = vld [vmem:[%s18749_s9 + $0x288] sm:$0xff]  ;;  %v13610_v56 = vld [vmem:[%s18749_s9 + $0x290] sm:$0xff]  ;;  %v24148_v40 = vld [vmem:[#allocation32_spill] sm:$0xff] }
 0x211   : > { %v16610_v11 = vpop.f32.mrf.mxu1  ;;  %16953 = vmatmul.mubr.msk.f32.gmra.mxu1 %vm430_vm0, %v13607_v3  ;;  %17151 = vmatprep.mubr.msk.f32.mxu0 %vm430_vm0, %v13866_v50  ;;  %v13867_v59 = vld [vmem:[%s18749_s9 + $0x289] sm:$0xff] }
 0x212   : > { %24143 = vst [vmem:[#allocation29_spill] sm:$0xff] %v20326_v47  ;;  %v20331_v55 = vadd.f32 %v3630_v42, %v2411_v18  ;;  %v2426_v48 = vadd.f32 %v16610_v11, %v24146_v32  ;;  %16955 = vmatprep.mubr.msk.f32.mxu1 %vm430_vm0, %v13608_v62  ;;  %v3640_v60 = vpop.f32.mrf.mxu0  ;;  %v13868_v47 = vld [vmem:[%s18749_s9 + $0x291] sm:$0xff]  ;;  %v24150_v62 = vld [vmem:[#allocation33_spill] sm:$0xff] }
 0x213   : > { %v2420_v31 = vpop.f32.mrf.mxu1 }
 0x214   : > { %24145 = vst [vmem:[#allocation30_spill] sm:$0xff] %v20331_v55  ;;  %v20340_v3 = vadd.f32 %v16806_v17, %v2426_v48  ;;  %v2421_v42 = vadd.f32 %v2420_v31, %v24148_v40  ;;  %v16809_v11 = vpop.f32.mrf.mxu0  ;;  %17152 = vmatmul.mubr.msk.f32.gmra.mxu0 %vm430_vm0, %v13867_v59  ;;  %v13611_v55 = vld [vmem:[%s18749_s9 + $0x298] sm:$0xff]  ;;  %v13612_v40 = vld [vmem:[%s18749_s9 + $0x2a8] sm:$0xff] }
 0x215   : > { %v16613_v18 = vpop.f32.mrf.mxu1  ;;  %16956 = vmatmul.mubr.msk.f32.gmra.mxu1 %vm430_vm0, %v13609_v52  ;;  %17154 = vmatprep.mubr.msk.f32.mxu0 %vm430_vm0, %v13868_v47  ;;  %v13869_v17 = vld [vmem:[%s18749_s9 + $0x299] sm:$0xff]  ;;  %v24152_v59 = vld [vmem:[#allocation34_spill] sm:$0xff] }
 0x216   : > { %24147 = vst [vmem:[#allocation31_spill] sm:$0xff] %v20340_v3  ;;  %v20345_v50 = vadd.f32 %v3640_v60, %v2421_v42  ;;  %v2436_v32 = vadd.f32 %v16613_v18, %v24150_v62  ;;  %16958 = vmatprep.mubr.msk.f32.mxu1 %vm430_vm0, %v13610_v56  ;;  %v3650_v31 = vpop.f32.mrf.mxu0  ;;  %v13870_v3 = vld [vmem:[%s18749_s9 + $0x2a9] sm:$0xff] }
 0x217   : > { %v2430_v48 = vpop.f32.mrf.mxu1  ;;  %v24154_v56 = vld [vmem:[#allocation35_spill] sm:$0xff] }
 0x218   : > { %24149 = vst [vmem:[#allocation32_spill] sm:$0xff] %v20345_v50  ;;  %v20354_v52 = vadd.f32 %v16809_v11, %v2436_v32  ;;  %v2431_v60 = vadd.f32 %v2430_v48, %v24152_v59  ;;  %v16812_v18 = vpop.f32.mrf.mxu0  ;;  %17155 = vmatmul.mubr.msk.f32.gmra.mxu0 %vm430_vm0, %v13869_v17  ;;  %v13613_v50 = vld [vmem:[%s18749_s9 + $0x2b0] sm:$0xff]  ;;  %v13614_v59 = vld [vmem:[%s18749_s9 + $0x2b8] sm:$0xff] }
 0x219   : > { %v16616_v42 = vpop.f32.mrf.mxu1  ;;  %16959 = vmatmul.mubr.msk.f32.gmra.mxu1 %vm430_vm0, %v13611_v55  ;;  %17157 = vmatprep.mubr.msk.f32.mxu0 %vm430_vm0, %v13870_v3  ;;  %v13871_v11 = vld [vmem:[%s18749_s9 + $0x2b1] sm:$0xff] }
 0x21a   : > { %24151 = vst [vmem:[#allocation33_spill] sm:$0xff] %v20354_v52  ;;  %v20359_v47 = vadd.f32 %v3650_v31, %v2431_v60  ;;  %v2446_v62 = vadd.f32 %v16616_v42, %v24154_v56  ;;  %16961 = vmatprep.mubr.msk.f32.mxu1 %vm430_vm0, %v13612_v40  ;;  %v3660_v48 = vpop.f32.mrf.mxu0  ;;  %v13872_v52 = vld [vmem:[%s18749_s9 + $0x2b9] sm:$0xff] }
 0x21b   : > { %v2440_v32 = vpop.f32.mrf.mxu1  ;;  %v24156_v17 = vld [vmem:[#allocation36_spill] sm:$0xff]  ;;  %v24158_v40 = vld [vmem:[#allocation37_spill] sm:$0xff] }
 0x21c   : > { %24153 = vst [vmem:[#allocation34_spill] sm:$0xff] %v20359_v47  ;;  %v20368_v55 = vadd.f32 %v16812_v18, %v2446_v62  ;;  %v2441_v31 = vadd.f32 %v2440_v32, %v24156_v17  ;;  %v16815_v42 = vpop.f32.mrf.mxu0  ;;  %17158 = vmatmul.mubr.msk.f32.gmra.mxu0 %vm430_vm0, %v13871_v11  ;;  %v13615_v47 = vld [vmem:[%s18749_s9 + $0x2c0] sm:$0xff]  ;;  %v14709_v62 = vld [vmem:[%s23975_s1 + $0x78] sm:$0xff] }
 0x21d   : > { %v16619_v60 = vpop.f32.mrf.mxu1  ;;  %16962 = vmatmul.mubr.msk.f32.gmra.mxu1 %vm430_vm0, %v13613_v50  ;;  %17160 = vmatprep.mubr.msk.f32.mxu0 %vm430_vm0, %v13872_v52  ;;  %v13873_v18 = vld [vmem:[%s18749_s9 + $0x2c1] sm:$0xff]  ;;  %v13616_v50 = vld [vmem:[%s18749_s9 + $0x2d0] sm:$0xff] }
 0x21e   : > { %24155 = vst [vmem:[#allocation35_spill] sm:$0xff] %v20368_v55  ;;  %v20373_v3 = vadd.f32 %v3660_v48, %v2441_v31  ;;  %v2456_v56 = vadd.f32 %v16619_v60, %v24158_v40  ;;  %16964 = vmatprep.mubr.msk.f32.mxu1 %vm430_vm0, %v13614_v59  ;;  %v3670_v17 = vpop.f32.mrf.mxu0  ;;  %v13874_v11 = vld [vmem:[%s18749_s9 + $0x2d1] sm:$0xff]  ;;  %17645 = vmatprep.subr.mxu1 %v14709_v62  ;;  %v24160_v31 = vld [vmem:[#allocation38_spill] sm:$0xff] }
 0x21f   : > { %v2450_v32 = vpop.f32.mrf.mxu1  ;;  %v20391_v52 = vld [vmem:[%s23975_s1 + $0x88] sm:$0xff]  ;;  %v24162_v62 = vld [vmem:[#allocation39_spill] sm:$0xff] }
 0x220   : > { %24157 = vst [vmem:[#allocation36_spill] sm:$0xff] %v20373_v3  ;;  %v20385_v48 = vadd.f32 %v16815_v42, %v2456_v56  ;;  %v2451_v59 = vadd.f32 %v2450_v32, %v24160_v31  ;;  %v16818_v40 = vpop.f32.mrf.mxu0  ;;  %17161 = vmatmul.mubr.msk.f32.gmra.mxu0 %vm430_vm0, %v13873_v18  ;;  %v13617_v42 = vld [vmem:[%s18749_s9 + $0x2d8] sm:$0xff]  ;;  %17841 = vmatprep.subr.mxu0 %v20391_v52 }
 0x221   : > { %v16622_v60 = vpop.f32.mrf.mxu1  ;;  %16965 = vmatmul.mubr.msk.f32.gmra.mxu1 %vm430_vm0, %v13615_v47  ;;  %17163 = vmatprep.mubr.msk.f32.mxu0 %vm430_vm0, %v13874_v11  ;;  %v13875_v56 = vld [vmem:[%s18749_s9 + $0x2d9] sm:$0xff] }
 0x222   : > { %24159 = vst [vmem:[#allocation37_spill] sm:$0xff] %v20385_v48  ;;  %v20395_v3 = vadd.f32 %v3670_v17, %v2451_v59  ;;  %v2466_v55 = vadd.f32 %v16622_v60, %v24162_v62  ;;  %16967 = vmatprep.mubr.msk.f32.mxu1 %vm430_vm0, %v13616_v50  ;;  %v3680_v31 = vpop.f32.mrf.mxu0  ;;  %v13618_v48 = vld [vmem:[%s18749_s9 + $0x2e0] sm:$0xff]  ;;  %v24164_v18 = vld [vmem:[#allocation40_spill] sm:$0xff] }
 0x223   : > { %v2460_v32 = vpop.f32.mrf.mxu1  ;;  %v24166_v60 = vld [vmem:[#allocation41_spill] sm:$0xff] }
 0x224   : > { %24161 = vst [vmem:[#allocation38_spill] sm:$0xff] %v20395_v3  ;;  %v20405_v47 = vadd.f32 %v16818_v40, %v2466_v55  ;;  %v2461_v17 = vadd.f32 %v2460_v32, %v24164_v18  ;;  %v16821_v50 = vpop.f32.mrf.mxu0  ;;  %17164 = vmatmul.mubr.msk.f32.gmra.mxu0 %vm430_vm0, %v13875_v56  ;;  %v13619_v3 = vld [vmem:[%s18749_s9 + $0x2e8] sm:$0xff]  ;;  %v13620_v18 = vld [vmem:[%s18749_s9 + $0x2f8] sm:$0xff] }
 0x225   : > { %v16625_v59 = vpop.f32.mrf.mxu1  ;;  %16968 = vmatmul.mubr.msk.f32.gmra.mxu1 %vm430_vm0, %v13617_v42  ;;  %17166 = vmatprep.mubr.msk.f32.mxu0 %vm430_vm0, %v13876_v4  ;;  %v13877_v55 = vld [vmem:[%s18749_s9 + $0x2e9] sm:$0xff] }
 0x226   : > { %24163 = vst [vmem:[#allocation39_spill] sm:$0xff] %v20405_v47  ;;  %v20410_v11 = vadd.f32 %v3680_v31, %v2461_v17  ;;  %v2476_v62 = vadd.f32 %v16625_v59, %v24166_v60  ;;  %16970 = vmatprep.mubr.msk.f32.mxu1 %vm430_vm0, %v13618_v48  ;;  %v3690_v32 = vpop.f32.mrf.mxu0  ;;  %v13878_v47 = vld [vmem:[%s18749_s9 + $0x2f9] sm:$0xff]  ;;  %v24168_v56 = vld [vmem:[#allocation42_spill] sm:$0xff]  ;;  %v24170_v48 = vld [vmem:[#allocation43_spill] sm:$0xff] }
 0x227   : > { %v2470_v40 = vpop.f32.mrf.mxu1 }
 0x228   : > { %24165 = vst [vmem:[#allocation40_spill] sm:$0xff] %v20410_v11  ;;  %v20419_v42 = vadd.f32 %v16821_v50, %v2476_v62  ;;  %v2471_v31 = vadd.f32 %v2470_v40, %v24168_v56  ;;  %v16824_v59 = vpop.f32.mrf.mxu0  ;;  %17167 = vmatmul.mubr.msk.f32.gmra.mxu0 %vm430_vm0, %v13877_v55  ;;  %v13621_v11 = vld [vmem:[%s18749_s9 + $0x300] sm:$0xff]  ;;  %v13622_v56 = vld [vmem:[%s18749_s9 + $0x308] sm:$0xff]  ;;  %v24172_v55 = vld [vmem:[#allocation44_spill] sm:$0xff] }
 0x229   : > { %v16628_v17 = vpop.f32.mrf.mxu1  ;;  %16971 = vmatmul.mubr.msk.f32.gmra.mxu1 %vm430_vm0, %v13619_v3  ;;  %17169 = vmatprep.mubr.msk.f32.mxu0 %vm430_vm0, %v13878_v47  ;;  %v13879_v50 = vld [vmem:[%s18749_s9 + $0x301] sm:$0xff] }
 0x22a   : > { %24167 = vst [vmem:[#allocation41_spill] sm:$0xff] %v20419_v42  ;;  %v20424_v4 = vadd.f32 %v3690_v32, %v2471_v31  ;;  %v2486_v60 = vadd.f32 %v16628_v17, %v24170_v48  ;;  %16973 = vmatprep.mubr.msk.f32.mxu1 %vm430_vm0, %v13620_v18  ;;  %v3700_v40 = vpop.f32.mrf.mxu0  ;;  %v13880_v42 = vld [vmem:[%s18749_s9 + $0x309] sm:$0xff]  ;;  %v24174_v18 = vld [vmem:[#allocation45_spill] sm:$0xff] }
 0x22b   : > { %v2480_v62 = vpop.f32.mrf.mxu1 }
 0x22c   : > { %24169 = vst [vmem:[#allocation42_spill] sm:$0xff] %v20424_v4  ;;  %v20433_v3 = vadd.f32 %v16824_v59, %v2486_v60  ;;  %v2481_v32 = vadd.f32 %v2480_v62, %v24172_v55  ;;  %v16827_v17 = vpop.f32.mrf.mxu0  ;;  %17170 = vmatmul.mubr.msk.f32.gmra.mxu0 %vm430_vm0, %v13879_v50  ;;  %v13623_v4 = vld [vmem:[%s18749_s9 + $0x310] sm:$0xff]  ;;  %v13624_v55 = vld [vmem:[%s18749_s9 + $0x320] sm:$0xff]  ;;  %v24176_v50 = vld [vmem:[#allocation46_spill] sm:$0xff] }
 0x22d   : > { %v16631_v31 = vpop.f32.mrf.mxu1  ;;  %16974 = vmatmul.mubr.msk.f32.gmra.mxu1 %vm430_vm0, %v13621_v11  ;;  %17172 = vmatprep.mubr.msk.f32.mxu0 %vm430_vm0, %v13880_v42  ;;  %v13881_v59 = vld [vmem:[%s18749_s9 + $0x311] sm:$0xff] }
 0x22e   : > { %24171 = vst [vmem:[#allocation43_spill] sm:$0xff] %v20433_v3  ;;  %v20438_v47 = vadd.f32 %v3700_v40, %v2481_v32  ;;  %v2496_v48 = vadd.f32 %v16631_v31, %v24174_v18  ;;  %16976 = vmatprep.mubr.msk.f32.mxu1 %vm430_vm0, %v13622_v56  ;;  %v3710_v62 = vpop.f32.mrf.mxu0  ;;  %v13882_v3 = vld [vmem:[%s18749_s9 + $0x321] sm:$0xff]  ;;  %v24178_v56 = vld [vmem:[#allocation47_spill] sm:$0xff] }
 0x22f   : > { %v2490_v60 = vpop.f32.mrf.mxu1 }
 0x230   : > { %24173 = vst [vmem:[#allocation44_spill] sm:$0xff] %v20438_v47  ;;  %v20447_v11 = vadd.f32 %v16827_v17, %v2496_v48  ;;  %v2491_v40 = vadd.f32 %v2490_v60, %v24176_v50  ;;  %v16830_v31 = vpop.f32.mrf.mxu0  ;;  %17173 = vmatmul.mubr.msk.f32.gmra.mxu0 %vm430_vm0, %v13881_v59  ;;  %v13625_v47 = vld [vmem:[%s18749_s9 + $0x328] sm:$0xff]  ;;  %v13626_v50 = vld [vmem:[%s18749_s9 + $0x330] sm:$0xff]  ;;  %v24180_v59 = vld [vmem:[#allocation48_spill] sm:$0xff] }
 0x231   : > { %v16634_v32 = vpop.f32.mrf.mxu1  ;;  %16977 = vmatmul.mubr.msk.f32.gmra.mxu1 %vm430_vm0, %v13623_v4  ;;  %17175 = vmatprep.mubr.msk.f32.mxu0 %vm430_vm0, %v13882_v3  ;;  %v13883_v17 = vld [vmem:[%s18749_s9 + $0x329] sm:$0xff] }
 0x232   : > { %24175 = vst [vmem:[#allocation45_spill] sm:$0xff] %v20447_v11  ;;  %v20452_v42 = vadd.f32 %v3710_v62, %v2491_v40  ;;  %v2506_v18 = vadd.f32 %v16634_v32, %v24178_v56  ;;  %16979 = vmatprep.mubr.msk.f32.mxu1 %vm430_vm0, %v13624_v55  ;;  %v3720_v60 = vpop.f32.mrf.mxu0  ;;  %v13884_v11 = vld [vmem:[%s18749_s9 + $0x331] sm:$0xff]  ;;  %v24182_v55 = vld [vmem:[#allocation49_spill] sm:$0xff] }
 0x233   : > { %v2500_v48 = vpop.f32.mrf.mxu1 }
 0x234   : > { %24177 = vst [vmem:[#allocation46_spill] sm:$0xff] %v20452_v42  ;;  %v20461_v4 = vadd.f32 %v16830_v31, %v2506_v18  ;;  %v2501_v62 = vadd.f32 %v2500_v48, %v24180_v59  ;;  %v16833_v32 = vpop.f32.mrf.mxu0  ;;  %17176 = vmatmul.mubr.msk.f32.gmra.mxu0 %vm430_vm0, %v13883_v17  ;;  %v13627_v42 = vld [vmem:[%s18749_s9 + $0x338] sm:$0xff]  ;;  %v13628_v59 = vld [vmem:[%s18749_s9 + $0x348] sm:$0xff] }
 0x235   : > { %v16637_v40 = vpop.f32.mrf.mxu1  ;;  %16980 = vmatmul.mubr.msk.f32.gmra.mxu1 %vm430_vm0, %v13625_v47  ;;  %17178 = vmatprep.mubr.msk.f32.mxu0 %vm430_vm0, %v13884_v11  ;;  %v13885_v31 = vld [vmem:[%s18749_s9 + $0x339] sm:$0xff]  ;;  %v24184_v17 = vld [vmem:[#allocation50_spill] sm:$0xff] }
 0x236   : > { %24179 = vst [vmem:[#allocation47_spill] sm:$0xff] %v20461_v4  ;;  %v20466_v3 = vadd.f32 %v3720_v60, %v2501_v62  ;;  %v2516_v56 = vadd.f32 %v16637_v40, %v24182_v55  ;;  %16982 = vmatprep.mubr.msk.f32.mxu1 %vm430_vm0, %v13626_v50  ;;  %v3730_v48 = vpop.f32.mrf.mxu0  ;;  %v13886_v4 = vld [vmem:[%s18749_s9 + $0x349] sm:$0xff] }
 0x237   : > { %v2510_v18 = vpop.f32.mrf.mxu1  ;;  %v24186_v50 = vld [vmem:[#allocation51_spill] sm:$0xff] }
 0x238   : > { %24181 = vst [vmem:[#allocation48_spill] sm:$0xff] %v20466_v3  ;;  %v20475_v47 = vadd.f32 %v16833_v32, %v2516_v56  ;;  %v2511_v60 = vadd.f32 %v2510_v18, %v24184_v17  ;;  %v16836_v40 = vpop.f32.mrf.mxu0  ;;  %17179 = vmatmul.mubr.msk.f32.gmra.mxu0 %vm430_vm0, %v13885_v31  ;;  %v13629_v3 = vld [vmem:[%s18749_s9 + $0x350] sm:$0xff]  ;;  %v13630_v17 = vld [vmem:[%s18749_s9 + $0x358] sm:$0xff] }
 0x239   : > { %v16640_v62 = vpop.f32.mrf.mxu1  ;;  %16983 = vmatmul.mubr.msk.f32.gmra.mxu1 %vm430_vm0, %v13627_v42  ;;  %17181 = vmatprep.mubr.msk.f32.mxu0 %vm430_vm0, %v13886_v4  ;;  %v13887_v32 = vld [vmem:[%s18749_s9 + $0x351] sm:$0xff] }
 0x23a   : > { %24183 = vst [vmem:[#allocation49_spill] sm:$0xff] %v20475_v47  ;;  %v20480_v11 = vadd.f32 %v3730_v48, %v2511_v60  ;;  %v2526_v55 = vadd.f32 %v16640_v62, %v24186_v50  ;;  %16985 = vmatprep.mubr.msk.f32.mxu1 %vm430_vm0, %v13628_v59  ;;  %v3740_v18 = vpop.f32.mrf.mxu0  ;;  %v13888_v47 = vld [vmem:[%s18749_s9 + $0x359] sm:$0xff]  ;;  %v24190_v59 = vld [vmem:[#allocation54_spill] sm:$0xff] }
 0x23b   : > { %v2520_v56 = vpop.f32.mrf.mxu1  ;;  %v24188_v31 = vld [vmem:[#allocation52_spill] sm:$0xff] }
 0x23c   : > { %24185 = vst [vmem:[#allocation50_spill] sm:$0xff] %v20480_v11  ;;  %v20489_v42 = vadd.f32 %v16836_v40, %v2526_v55  ;;  %v2521_v48 = vadd.f32 %v2520_v56, %v24188_v31  ;;  %v16839_v62 = vpop.f32.mrf.mxu0  ;;  %17182 = vmatmul.mubr.msk.f32.gmra.mxu0 %vm430_vm0, %v13887_v32  ;;  %v13631_v11 = vld [vmem:[%s18749_s9 + $0x360] sm:$0xff]  ;;  %v13632_v31 = vld [vmem:[%s18749_s9 + $0x370] sm:$0xff]  ;;  %v24192_v32 = vld [vmem:[#allocation56_spill] sm:$0xff] }
 0x23d   : > { %v16643_v60 = vpop.f32.mrf.mxu1  ;;  %16986 = vmatmul.mubr.msk.f32.gmra.mxu1 %vm430_vm0, %v13629_v3  ;;  %17184 = vmatprep.mubr.msk.f32.mxu0 %vm430_vm0, %v13888_v47  ;;  %v13889_v40 = vld [vmem:[%s18749_s9 + $0x361] sm:$0xff] }
 0x23e   : > { %24187 = vst [vmem:[#allocation51_spill] sm:$0xff] %v20489_v42  ;;  %v20494_v4 = vadd.f32 %v3740_v18, %v2521_v48  ;;  %v2536_v50 = vadd.f32 %v16643_v60, %v24190_v59  ;;  %16988 = vmatprep.mubr.msk.f32.mxu1 %vm430_vm0, %v13630_v17  ;;  %v3750_v56 = vpop.f32.mrf.mxu0  ;;  %v13890_v42 = vld [vmem:[%s18749_s9 + $0x371] sm:$0xff]  ;;  %v24194_v17 = vld [vmem:[#allocation58_spill] sm:$0xff] }
 0x23f   : > { %v2530_v55 = vpop.f32.mrf.mxu1 }
 0x240   : > { %24189 = vst [vmem:[#allocation52_spill] sm:$0xff] %v20494_v4  ;;  %v20503_v3 = vadd.f32 %v16839_v62, %v2536_v50  ;;  %v2531_v18 = vadd.f32 %v2530_v55, %v24192_v32  ;;  %v16842_v60 = vpop.f32.mrf.mxu0  ;;  %17185 = vmatmul.mubr.msk.f32.gmra.mxu0 %vm430_vm0, %v13889_v40  ;;  %v13633_v4 = vld [vmem:[%s18749_s9 + $0x378] sm:$0xff]  ;;  %v13634_v32 = vld [vmem:[%s18749_s9 + $0x380] sm:$0xff] }
 0x241   : > { %v16646_v48 = vpop.f32.mrf.mxu1  ;;  %16989 = vmatmul.mubr.msk.f32.gmra.mxu1 %vm430_vm0, %v13631_v11  ;;  %17187 = vmatprep.mubr.msk.f32.mxu0 %vm430_vm0, %v13890_v42  ;;  %v13891_v62 = vld [vmem:[%s18749_s9 + $0x379] sm:$0xff] }
 0x242   : > { %24191 = vst [vmem:[#allocation54_spill] sm:$0xff] %v20503_v3  ;;  %v20508_v47 = vadd.f32 %v3750_v56, %v2531_v18  ;;  %v2546_v59 = vadd.f32 %v16646_v48, %v24194_v17  ;;  %16991 = vmatprep.mubr.msk.f32.mxu1 %vm430_vm0, %v13632_v31  ;;  %v3760_v55 = vpop.f32.mrf.mxu0  ;;  %v13892_v3 = vld [vmem:[%s18749_s9 + $0x381] sm:$0xff]  ;;  %v24196_v40 = vld [vmem:[#allocation60_spill] sm:$0xff] }
 0x243   : > { %v2540_v50 = vpop.f32.mrf.mxu1  ;;  %v24198_v31 = vld [vmem:[#allocation62_spill] sm:$0xff] }
 0x244   : > { %24193 = vst [vmem:[#allocation56_spill] sm:$0xff] %v20508_v47  ;;  %v20517_v11 = vadd.f32 %v16842_v60, %v2546_v59  ;;  %v2541_v56 = vadd.f32 %v2540_v50, %v24196_v40  ;;  %v16845_v48 = vpop.f32.mrf.mxu0  ;;  %17188 = vmatmul.mubr.msk.f32.gmra.mxu0 %vm430_vm0, %v13891_v62  ;;  %v13635_v47 = vld [vmem:[%s18749_s9 + $0x388] sm:$0xff]  ;;  %v13636_v40 = vld [vmem:[%s18749_s9 + $0x398] sm:$0xff] }
 0x245   : > { %v16649_v18 = vpop.f32.mrf.mxu1  ;;  %16992 = vmatmul.mubr.msk.f32.gmra.mxu1 %vm430_vm0, %v13633_v4  ;;  %17190 = vmatprep.mubr.msk.f32.mxu0 %vm430_vm0, %v13892_v3  ;;  %v13893_v60 = vld [vmem:[%s18749_s9 + $0x389] sm:$0xff]  ;;  %v24200_v62 = vld [vmem:[#allocation64_spill] sm:$0xff] }
 0x246   : > { %24195 = vst [vmem:[#allocation58_spill] sm:$0xff] %v20517_v11  ;;  %v20522_v42 = vadd.f32 %v3760_v55, %v2541_v56  ;;  %v2556_v17 = vadd.f32 %v16649_v18, %v24198_v31  ;;  %16994 = vmatprep.mubr.msk.f32.mxu1 %vm430_vm0, %v13634_v32  ;;  %v3770_v50 = vpop.f32.mrf.mxu0  ;;  %v13894_v11 = vld [vmem:[%s18749_s9 + $0x399] sm:$0xff]  ;;  %v24202_v32 = vld [vmem:[#allocation66_spill] sm:$0xff] }
 0x247   : > { %v2550_v59 = vpop.f32.mrf.mxu1 }
 0x248   : > { %24197 = vst [vmem:[#allocation60_spill] sm:$0xff] %v20522_v42  ;;  %v20531_v4 = vadd.f32 %v16845_v48, %v2556_v17  ;;  %v2551_v55 = vadd.f32 %v2550_v59, %v24200_v62  ;;  %v16848_v18 = vpop.f32.mrf.mxu0  ;;  %17191 = vmatmul.mubr.msk.f32.gmra.mxu0 %vm430_vm0, %v13893_v60  ;;  %v13637_v42 = vld [vmem:[%s18749_s9 + $0x3a0] sm:$0xff]  ;;  %v13638_v62 = vld [vmem:[%s18749_s9 + $0x3a8] sm:$0xff]  ;;  %v24204_v60 = vld [vmem:[#allocation68_spill] sm:$0xff] }
 0x249   : > { %v16652_v56 = vpop.f32.mrf.mxu1  ;;  %16995 = vmatmul.mubr.msk.f32.gmra.mxu1 %vm430_vm0, %v13635_v47  ;;  %17193 = vmatprep.mubr.msk.f32.mxu0 %vm430_vm0, %v13894_v11  ;;  %v13895_v48 = vld [vmem:[%s18749_s9 + $0x3a1] sm:$0xff] }
 0x24a   : > { %24199 = vst [vmem:[#allocation62_spill] sm:$0xff] %v20531_v4  ;;  %v20536_v3 = vadd.f32 %v3770_v50, %v2551_v55  ;;  %v2566_v31 = vadd.f32 %v16652_v56, %v24202_v32  ;;  %16997 = vmatprep.mubr.msk.f32.mxu1 %vm430_vm0, %v13636_v40  ;;  %v3780_v59 = vpop.f32.mrf.mxu0  ;;  %v13896_v4 = vld [vmem:[%s18749_s9 + $0x3a9] sm:$0xff] }
 0x24b   : > { %v2560_v17 = vpop.f32.mrf.mxu1  ;;  %v24206_v40 = vld [vmem:[#allocation70_spill] sm:$0xff] }
 0x24c   : > { %24201 = vst [vmem:[#allocation64_spill] sm:$0xff] %v20536_v3  ;;  %v20545_v47 = vadd.f32 %v16848_v18, %v2566_v31  ;;  %v2561_v50 = vadd.f32 %v2560_v17, %v24204_v60  ;;  %v16851_v56 = vpop.f32.mrf.mxu0  ;;  %17194 = vmatmul.mubr.msk.f32.gmra.mxu0 %vm430_vm0, %v13895_v48  ;;  %v13639_v3 = vld [vmem:[%s18749_s9 + $0x3b0] sm:$0xff]  ;;  %v13640_v60 = vld [vmem:[%s18749_s9 + $0x3c0] sm:$0xff]  ;;  %v24208_v48 = vld [vmem:[#allocation72_spill] sm:$0xff] }
 0x24d   : > { %v16655_v55 = vpop.f32.mrf.mxu1  ;;  %16998 = vmatmul.mubr.msk.f32.gmra.mxu1 %vm430_vm0, %v13637_v42  ;;  %17196 = vmatprep.mubr.msk.f32.mxu0 %vm430_vm0, %v13896_v4  ;;  %v13897_v18 = vld [vmem:[%s18749_s9 + $0x3b1] sm:$0xff] }
 0x24e   : > { %24203 = vst [vmem:[#allocation66_spill] sm:$0xff] %v20545_v47  ;;  %v20550_v11 = vadd.f32 %v3780_v59, %v2561_v50  ;;  %v2576_v32 = vadd.f32 %v16655_v55, %v24206_v40  ;;  %17000 = vmatprep.mubr.msk.f32.mxu1 %vm430_vm0, %v13638_v62  ;;  %v3790_v17 = vpop.f32.mrf.mxu0  ;;  %v13898_v47 = vld [vmem:[%s18749_s9 + $0x3c1] sm:$0xff] }
 0x24f   : > { %v2570_v31 = vpop.f32.mrf.mxu1  ;;  %v24210_v62 = vld [vmem:[#allocation74_spill] sm:$0xff] }
 0x250   : > { %24205 = vst [vmem:[#allocation68_spill] sm:$0xff] %v20550_v11  ;;  %v20559_v42 = vadd.f32 %v16851_v56, %v2576_v32  ;;  %v2571_v59 = vadd.f32 %v2570_v31, %v24208_v48  ;;  %v16854_v55 = vpop.f32.mrf.mxu0  ;;  %17197 = vmatmul.mubr.msk.f32.gmra.mxu0 %vm430_vm0, %v13897_v18  ;;  %v13641_v11 = vld [vmem:[%s18749_s9 + $0x3c8] sm:$0xff]  ;;  %v13642_v48 = vld [vmem:[%s18749_s9 + $0x3d0] sm:$0xff]  ;;  %v24212_v18 = vld [vmem:[#allocation76_spill] sm:$0xff] }
 0x251   : > { %v16658_v50 = vpop.f32.mrf.mxu1  ;;  %17001 = vmatmul.mubr.msk.f32.gmra.mxu1 %vm430_vm0, %v13639_v3  ;;  %17199 = vmatprep.mubr.msk.f32.mxu0 %vm430_vm0, %v13898_v47  ;;  %v13899_v56 = vld [vmem:[%s18749_s9 + $0x3c9] sm:$0xff] }
 0x252   : > { %24207 = vst [vmem:[#allocation70_spill] sm:$0xff] %v20559_v42  ;;  %v20564_v4 = vadd.f32 %v3790_v17, %v2571_v59  ;;  %v2586_v40 = vadd.f32 %v16658_v50, %v24210_v62  ;;  %17003 = vmatprep.mubr.msk.f32.mxu1 %vm430_vm0, %v13640_v60  ;;  %v3800_v31 = vpop.f32.mrf.mxu0  ;;  %v13900_v42 = vld [vmem:[%s18749_s9 + $0x3d1] sm:$0xff]  ;;  %v24214_v60 = vld [vmem:[#allocation78_spill] sm:$0xff] }
 0x253   : > { %v2580_v32 = vpop.f32.mrf.mxu1 }
 0x254   : > { %24209 = vst [vmem:[#allocation72_spill] sm:$0xff] %v20564_v4  ;;  %v20573_v3 = vadd.f32 %v16854_v55, %v2586_v40  ;;  %v2581_v17 = vadd.f32 %v2580_v32, %v24212_v18  ;;  %v16857_v50 = vpop.f32.mrf.mxu0  ;;  %17200 = vmatmul.mubr.msk.f32.gmra.mxu0 %vm430_vm0, %v13899_v56  ;;  %v13643_v4 = vld [vmem:[%s18749_s9 + $0x3d8] sm:$0xff]  ;;  %v13644_v18 = vld [vmem:[%s18749_s9 + $0x3e8] sm:$0xff] }
 0x255   : > { %v16661_v59 = vpop.f32.mrf.mxu1  ;;  %17004 = vmatmul.mubr.msk.f32.gmra.mxu1 %vm430_vm0, %v13641_v11  ;;  %17202 = vmatprep.mubr.msk.f32.mxu0 %vm430_vm0, %v13900_v42  ;;  %v13901_v55 = vld [vmem:[%s18749_s9 + $0x3d9] sm:$0xff] }
 0x256   : > { %24211 = vst [vmem:[#allocation74_spill] sm:$0xff] %v20573_v3  ;;  %v20578_v47 = vadd.f32 %v3800_v31, %v2581_v17  ;;  %v2596_v62 = vadd.f32 %v16661_v59, %v24214_v60  ;;  %17006 = vmatprep.mubr.msk.f32.mxu1 %vm430_vm0, %v13642_v48  ;;  %v3810_v32 = vpop.f32.mrf.mxu0  ;;  %v13902_v3 = vld [vmem:[%s18749_s9 + $0x3e9] sm:$0xff]  ;;  %v24216_v56 = vld [vmem:[#allocation80_spill] sm:$0xff] }
 0x257   : > { %v2590_v40 = vpop.f32.mrf.mxu1  ;;  %v24218_v48 = vld [vmem:[#allocation82_spill] sm:$0xff] }
 0x258   : > { %24213 = vst [vmem:[#allocation76_spill] sm:$0xff] %v20578_v47  ;;  %v20587_v11 = vadd.f32 %v16857_v50, %v2596_v62  ;;  %v2591_v31 = vadd.f32 %v2590_v40, %v24216_v56  ;;  %v16860_v59 = vpop.f32.mrf.mxu0  ;;  %17203 = vmatmul.mubr.msk.f32.gmra.mxu0 %vm430_vm0, %v13901_v55  ;;  %v13645_v47 = vld [vmem:[%s18749_s9 + $0x3f0] sm:$0xff]  ;;  %v13646_v56 = vld [vmem:[%s18749_s9 + $0x3f8] sm:$0xff] }
 0x259   : > { %v16664_v17 = vpop.f32.mrf.mxu1  ;;  %17007 = vmatmul.mubr.msk.f32.gmra.mxu1 %vm430_vm0, %v13643_v4  ;;  %17205 = vmatprep.mubr.msk.f32.mxu0 %vm430_vm0, %v13902_v3  ;;  %v13903_v50 = vld [vmem:[%s18749_s9 + $0x3f1] sm:$0xff] }
 0x25a   : > { %24215 = vst [vmem:[#allocation78_spill] sm:$0xff] %v20587_v11  ;;  %v20592_v42 = vadd.f32 %v3810_v32, %v2591_v31  ;;  %v2606_v60 = vadd.f32 %v16664_v17, %v24218_v48  ;;  %17009 = vmatprep.mubr.msk.f32.mxu1 %vm430_vm0, %v13644_v18  ;;  %v3820_v40 = vpop.f32.mrf.mxu0  ;;  %v13904_v11 = vld [vmem:[%s18749_s9 + $0x3f9] sm:$0xff] }
 0x25b   : > { %v2600_v62 = vpop.f32.mrf.mxu1  ;;  %v24220_v55 = vld [vmem:[#allocation84_spill] sm:$0xff]  ;;  %v24221_v17 = vld [vmem:[#allocation85_spill] sm:$0xff] }
 0x25c   : > { %24217 = vst [vmem:[#allocation80_spill] sm:$0xff] %v20592_v42  ;;  %v20601_v4 = vadd.f32 %v16860_v59, %v2606_v60  ;;  %v2601_v32 = vadd.f32 %v2600_v62, %v24220_v55  ;;  %v17063_v18 = vpop.f32.mrf.mxu0  ;;  %17206 = vmatmul.mubr.msk.f32.gmra.mxu0 %vm430_vm0, %v13903_v50  ;;  %v13647_v42 = vld [vmem:[%s18749_s9 + $0x400] sm:$0xff]  ;;  %v13648_v55 = vld [vmem:[%s18749_s9 + $0x410] sm:$0xff] }
 0x25d   : > { %v16867_v31 = vpop.f32.mrf.mxu1  ;;  %17010 = vmatmul.mubr.msk.f32.gmra.mxu1 %vm430_vm0, %v13645_v47  ;;  %17208 = vmatprep.mubr.msk.f32.mxu0 %vm430_vm0, %v13904_v11  ;;  %v13905_v59 = vld [vmem:[%s18749_s9 + $0x401] sm:$0xff]  ;;  %v13906_v47 = vld [vmem:[%s18749_s9 + $0x411] sm:$0xff] }
 0x25e   : > { %24219 = vst [vmem:[#allocation82_spill] sm:$0xff] %v20601_v4  ;;  %v20606_v3 = vadd.f32 %v3820_v40, %v2601_v32  ;;  %v5179_v48 = vadd.f32 %v16867_v31, %v24221_v17  ;;  %17012 = vmatprep.mubr.msk.f32.mxu1 %vm430_vm0, %v13646_v56  ;;  %v5887_v62 = vpop.f32.mrf.mxu0  ;;  %v13649_v31 = vld [vmem:[%s18749_s9 + $0x418] sm:$0xff] }
 0x25f   : > { %v4539_v60 = vpop.f32.mrf.mxu1 }
 0x260   : > { %v20615_v4 = vadd.f32 %v17063_v18, %v5179_v48  ;;  %v5178_v50 = vadd.f32 %v4539_v60, %v19707_v54  ;;  %v17066_v56 = vpop.f32.mrf.mxu0  ;;  %17209 = vmatmul.mubr.msk.f32.gmra.mxu0 %vm430_vm0, %v13905_v59  ;;  %v13907_v18 = vld [vmem:[%s18749_s9 + $0x419] sm:$0xff] }
 0x261   : > { %v16870_v40 = vpop.f32.mrf.mxu1  ;;  %17013 = vmatmul.mubr.msk.f32.gmra.mxu1 %vm430_vm0, %v13647_v42  ;;  %17211 = vmatprep.mubr.msk.f32.mxu0 %vm430_vm0, %v13906_v47  ;;  %v13650_v48 = vld [vmem:[%s18749_s9 + $0x420] sm:$0xff] }
 0x262   : > { %v20620_v11 = vadd.f32 %v5887_v62, %v5178_v50  ;;  %v5181_v32 = vadd.f32 %v16870_v40, %v19716_v7  ;;  %17015 = vmatprep.mubr.msk.f32.mxu1 %vm430_vm0, %v13648_v55  ;;  %v5897_v54 = vpop.f32.mrf.mxu0  ;;  %v13908_v42 = vld [vmem:[%s18749_s9 + $0x421] sm:$0xff]  ;;  %v13909_v40 = vld [vmem:[%s18749_s9 + $0x429] sm:$0xff] }
 0x263   : > { %v4549_v17 = vpop.f32.mrf.mxu1  ;;  %v13651_v50 = vld [vmem:[%s18749_s9 + $0x428] sm:$0xff] }
 0x264   : > { %v20629_v60 = vadd.f32 %v17066_v56, %v5181_v32  ;;  %v5180_v59 = vadd.f32 %v4549_v17, %v19721_v26  ;;  %v17069_v7 = vpop.f32.mrf.mxu0  ;;  %17212 = vmatmul.mubr.msk.f32.gmra.mxu0 %vm430_vm0, %v13907_v18  ;;  %v13652_v32 = vld [vmem:[%s18749_s9 + $0x438] sm:$0xff] }
 0x265   : > { %v16873_v62 = vpop.f32.mrf.mxu1  ;;  %17016 = vmatmul.mubr.msk.f32.gmra.mxu1 %vm430_vm0, %v13649_v31  ;;  %17214 = vmatprep.mubr.msk.f32.mxu0 %vm430_vm0, %v13908_v42  ;;  %v13910_v31 = vld [vmem:[%s18749_s9 + $0x439] sm:$0xff] }
 0x266   : > { %v20634_v55 = vadd.f32 %v5897_v54, %v5180_v59  ;;  %v5183_v47 = vadd.f32 %v16873_v62, %v19730_v63  ;;  %17018 = vmatprep.mubr.msk.f32.mxu1 %vm430_vm0, %v13650_v48  ;;  %v5907_v26 = vpop.f32.mrf.mxu0  ;;  %v13653_v59 = vld [vmem:[%s18749_s9 + $0x440] sm:$0xff] }
 0x267   : > { %v4559_v56 = vpop.f32.mrf.mxu1  ;;  %v13911_v62 = vld [vmem:[%s18749_s9 + $0x441] sm:$0xff] }
 0x268   : > { %v20643_v17 = vadd.f32 %v17069_v7, %v5183_v47  ;;  %v5182_v18 = vadd.f32 %v4559_v56, %v19735_v38  ;;  %v17072_v63 = vpop.f32.mrf.mxu0  ;;  %17215 = vmatmul.mubr.msk.f32.gmra.mxu0 %vm430_vm0, %v13909_v40  ;;  %v13654_v47 = vld [vmem:[%s18749_s9 + $0x448] sm:$0xff] }
 0x269   : > { %v16876_v54 = vpop.f32.mrf.mxu1  ;;  %17019 = vmatmul.mubr.msk.f32.gmra.mxu1 %vm430_vm0, %v13651_v50  ;;  %17217 = vmatprep.mubr.msk.f32.mxu0 %vm430_vm0, %v13910_v31  ;;  %v13912_v50 = vld [vmem:[%s18749_s9 + $0x449] sm:$0xff] }
 0x26a   : > { %v20648_v48 = vadd.f32 %v5907_v26, %v5182_v18  ;;  %v5185_v42 = vadd.f32 %v16876_v54, %v19744_v19  ;;  %17021 = vmatprep.mubr.msk.f32.mxu1 %vm430_vm0, %v13652_v32  ;;  %v5917_v38 = vpop.f32.mrf.mxu0  ;;  %v13655_v18 = vld [vmem:[%s18749_s9 + $0x450] sm:$0xff] }
 0x26b   : > { %v4569_v7 = vpop.f32.mrf.mxu1  ;;  %v13913_v54 = vld [vmem:[%s18749_s9 + $0x451] sm:$0xff] }
 0x26c   : > { %v20657_v56 = vadd.f32 %v17072_v63, %v5185_v42  ;;  %v5184_v40 = vadd.f32 %v4569_v7, %v19749_v46  ;;  %v17075_v19 = vpop.f32.mrf.mxu0  ;;  %17218 = vmatmul.mubr.msk.f32.gmra.mxu0 %vm430_vm0, %v13911_v62  ;;  %v13656_v42 = vld [vmem:[%s18749_s9 + $0x460] sm:$0xff] }
 0x26d   : > { %v16879_v26 = vpop.f32.mrf.mxu1  ;;  %17022 = vmatmul.mubr.msk.f32.gmra.mxu1 %vm430_vm0, %v13653_v59  ;;  %17220 = vmatprep.mubr.msk.f32.mxu0 %vm430_vm0, %v13912_v50  ;;  %v13914_v59 = vld [vmem:[%s18749_s9 + $0x461] sm:$0xff] }
 0x26e   : > { %v20662_v32 = vadd.f32 %v5917_v38, %v5184_v40  ;;  %v5187_v31 = vadd.f32 %v16879_v26, %v19758_v25  ;;  %17024 = vmatprep.mubr.msk.f32.mxu1 %vm430_vm0, %v13654_v47  ;;  %v5927_v46 = vpop.f32.mrf.mxu0  ;;  %v13657_v40 = vld [vmem:[%s18749_s9 + $0x468] sm:$0xff] }
 0x26f   : > { %v4579_v63 = vpop.f32.mrf.mxu1  ;;  %v13915_v26 = vld [vmem:[%s18749_s9 + $0x469] sm:$0xff] }
 0x270   : > { %v20671_v7 = vadd.f32 %v17075_v19, %v5187_v31  ;;  %v5186_v62 = vadd.f32 %v4579_v63, %v19763_v34  ;;  %v17078_v25 = vpop.f32.mrf.mxu0  ;;  %17221 = vmatmul.mubr.msk.f32.gmra.mxu0 %vm430_vm0, %v13913_v54  ;;  %v13658_v31 = vld [vmem:[%s18749_s9 + $0x470] sm:$0xff] }
 0x271   : > { %v16882_v38 = vpop.f32.mrf.mxu1  ;;  %17025 = vmatmul.mubr.msk.f32.gmra.mxu1 %vm430_vm0, %v13655_v18  ;;  %17223 = vmatprep.mubr.msk.f32.mxu0 %vm430_vm0, %v13914_v59  ;;  %v13916_v18 = vld [vmem:[%s18749_s9 + $0x471] sm:$0xff] }
 0x272   : > { %v20676_v47 = vadd.f32 %v5927_v46, %v5186_v62  ;;  %v5189_v50 = vadd.f32 %v16882_v38, %v19772_v33  ;;  %17027 = vmatprep.mubr.msk.f32.mxu1 %vm430_vm0, %v13656_v42  ;;  %v5937_v34 = vpop.f32.mrf.mxu0  ;;  %v13659_v62 = vld [vmem:[%s18749_s9 + $0x478] sm:$0xff] }
 0x273   : > { %v4589_v19 = vpop.f32.mrf.mxu1  ;;  %v13917_v38 = vld [vmem:[%s18749_s9 + $0x479] sm:$0xff] }
 0x274   : > { %v20685_v63 = vadd.f32 %v17078_v25, %v5189_v50  ;;  %v5188_v54 = vadd.f32 %v4589_v19, %v19777_v20  ;;  %v17081_v33 = vpop.f32.mrf.mxu0  ;;  %17224 = vmatmul.mubr.msk.f32.gmra.mxu0 %vm430_vm0, %v13915_v26  ;;  %v13660_v50 = vld [vmem:[%s18749_s9 + $0x488] sm:$0xff] }
 0x275   : > { %v16885_v46 = vpop.f32.mrf.mxu1  ;;  %17028 = vmatmul.mubr.msk.f32.gmra.mxu1 %vm430_vm0, %v13657_v40  ;;  %17226 = vmatprep.mubr.msk.f32.mxu0 %vm430_vm0, %v13916_v18  ;;  %v13918_v40 = vld [vmem:[%s18749_s9 + $0x489] sm:$0xff] }
 0x276   : > { %v20690_v42 = vadd.f32 %v5937_v34, %v5188_v54  ;;  %v5191_v59 = vadd.f32 %v16885_v46, %v19786_v41  ;;  %17030 = vmatprep.mubr.msk.f32.mxu1 %vm430_vm0, %v13658_v31  ;;  %v5947_v20 = vpop.f32.mrf.mxu0  ;;  %v13661_v54 = vld [vmem:[%s18749_s9 + $0x490] sm:$0xff] }
 0x277   : > { %v4599_v25 = vpop.f32.mrf.mxu1  ;;  %v13919_v46 = vld [vmem:[%s18749_s9 + $0x491] sm:$0xff] }
 0x278   : > { %v20699_v19 = vadd.f32 %v17081_v33, %v5191_v59  ;;  %v5190_v26 = vadd.f32 %v4599_v25, %v19791_v28  ;;  %v17084_v41 = vpop.f32.mrf.mxu0  ;;  %17227 = vmatmul.mubr.msk.f32.gmra.mxu0 %vm430_vm0, %v13917_v38  ;;  %v13662_v59 = vld [vmem:[%s18749_s9 + $0x498] sm:$0xff] }
 0x279   : > { %v16888_v34 = vpop.f32.mrf.mxu1  ;;  %17031 = vmatmul.mubr.msk.f32.gmra.mxu1 %vm430_vm0, %v13659_v62  ;;  %17229 = vmatprep.mubr.msk.f32.mxu0 %vm430_vm0, %v13918_v40  ;;  %v13920_v62 = vld [vmem:[%s18749_s9 + $0x499] sm:$0xff] }
 0x27a   : > { %v20704_v31 = vadd.f32 %v5947_v20, %v5190_v26  ;;  %v5193_v18 = vadd.f32 %v16888_v34, %v19800_v49  ;;  %17033 = vmatprep.mubr.msk.f32.mxu1 %vm430_vm0, %v13660_v50  ;;  %v5957_v28 = vpop.f32.mrf.mxu0  ;;  %v13663_v26 = vld [vmem:[%s18749_s9 + $0x4a0] sm:$0xff] }
 0x27b   : > { %v4609_v33 = vpop.f32.mrf.mxu1  ;;  %v13921_v34 = vld [vmem:[%s18749_s9 + $0x4a1] sm:$0xff] }
 0x27c   : > { %v20713_v25 = vadd.f32 %v17084_v41, %v5193_v18  ;;  %v5192_v38 = vadd.f32 %v4609_v33, %v19805_v1  ;;  %v17087_v49 = vpop.f32.mrf.mxu0  ;;  %17230 = vmatmul.mubr.msk.f32.gmra.mxu0 %vm430_vm0, %v13919_v46  ;;  %v13664_v18 = vld [vmem:[%s18749_s9 + $0x4b0] sm:$0xff] }
 0x27d   : > { %v16891_v20 = vpop.f32.mrf.mxu1  ;;  %17034 = vmatmul.mubr.msk.f32.gmra.mxu1 %vm430_vm0, %v13661_v54  ;;  %17232 = vmatprep.mubr.msk.f32.mxu0 %vm430_vm0, %v13920_v62  ;;  %v13922_v54 = vld [vmem:[%s18749_s9 + $0x4b1] sm:$0xff] }
 0x27e   : > { %v20718_v50 = vadd.f32 %v5957_v28, %v5192_v38  ;;  %v5195_v40 = vadd.f32 %v16891_v20, %v19814_v58  ;;  %17036 = vmatprep.mubr.msk.f32.mxu1 %vm430_vm0, %v13662_v59  ;;  %v5967_v1 = vpop.f32.mrf.mxu0  ;;  %v13665_v38 = vld [vmem:[%s18749_s9 + $0x4b8] sm:$0xff] }
 0x27f   : > { %v4619_v41 = vpop.f32.mrf.mxu1  ;;  %v13923_v20 = vld [vmem:[%s18749_s9 + $0x4b9] sm:$0xff] }
 0x280   : > { %v20727_v33 = vadd.f32 %v17087_v49, %v5195_v40  ;;  %v5194_v46 = vadd.f32 %v4619_v41, %v19819_v22  ;;  %v17090_v58 = vpop.f32.mrf.mxu0  ;;  %17233 = vmatmul.mubr.msk.f32.gmra.mxu0 %vm430_vm0, %v13921_v34  ;;  %v13666_v40 = vld [vmem:[%s18749_s9 + $0x4c0] sm:$0xff] }
 0x281   : > { %v16894_v28 = vpop.f32.mrf.mxu1  ;;  %17037 = vmatmul.mubr.msk.f32.gmra.mxu1 %vm430_vm0, %v13663_v26  ;;  %17235 = vmatprep.mubr.msk.f32.mxu0 %vm430_vm0, %v13922_v54  ;;  %v13924_v26 = vld [vmem:[%s18749_s9 + $0x4c1] sm:$0xff] }
 0x282   : > { %v20732_v59 = vadd.f32 %v5967_v1, %v5194_v46  ;;  %v5197_v62 = vadd.f32 %v16894_v28, %v19828_v2  ;;  %17039 = vmatprep.mubr.msk.f32.mxu1 %vm430_vm0, %v13664_v18  ;;  %v5977_v22 = vpop.f32.mrf.mxu0  ;;  %v13667_v46 = vld [vmem:[%s18749_s9 + $0x4c8] sm:$0xff] }
 0x283   : > { %v4629_v49 = vpop.f32.mrf.mxu1  ;;  %v13925_v28 = vld [vmem:[%s18749_s9 + $0x4c9] sm:$0xff] }
 0x284   : > { %v20741_v41 = vadd.f32 %v17090_v58, %v5197_v62  ;;  %v5196_v34 = vadd.f32 %v4629_v49, %v19833_v15  ;;  %v17093_v2 = vpop.f32.mrf.mxu0  ;;  %17236 = vmatmul.mubr.msk.f32.gmra.mxu0 %vm430_vm0, %v13923_v20  ;;  %v13668_v62 = vld [vmem:[%s18749_s9 + $0x4d8] sm:$0xff] }
 0x285   : > { %v16897_v1 = vpop.f32.mrf.mxu1  ;;  %17040 = vmatmul.mubr.msk.f32.gmra.mxu1 %vm430_vm0, %v13665_v38  ;;  %17238 = vmatprep.mubr.msk.f32.mxu0 %vm430_vm0, %v13924_v26  ;;  %v13926_v38 = vld [vmem:[%s18749_s9 + $0x4d9] sm:$0xff] }
 0x286   : > { %v20746_v18 = vadd.f32 %v5977_v22, %v5196_v34  ;;  %v5199_v54 = vadd.f32 %v16897_v1, %v19842_v10  ;;  %17042 = vmatprep.mubr.msk.f32.mxu1 %vm430_vm0, %v13666_v40  ;;  %v5987_v15 = vpop.f32.mrf.mxu0  ;;  %v13669_v34 = vld [vmem:[%s18749_s9 + $0x4e0] sm:$0xff] }
 0x287   : > { %v4639_v58 = vpop.f32.mrf.mxu1  ;;  %v13927_v1 = vld [vmem:[%s18749_s9 + $0x4e1] sm:$0xff] }
 0x288   : > { %v20755_v49 = vadd.f32 %v17093_v2, %v5199_v54  ;;  %v5198_v20 = vadd.f32 %v4639_v58, %v19847_v57  ;;  %v17096_v10 = vpop.f32.mrf.mxu0  ;;  %17239 = vmatmul.mubr.msk.f32.gmra.mxu0 %vm430_vm0, %v13925_v28  ;;  %v13670_v54 = vld [vmem:[%s18749_s9 + $0x4e8] sm:$0xff] }
 0x289   : > { %v16900_v22 = vpop.f32.mrf.mxu1  ;;  %17043 = vmatmul.mubr.msk.f32.gmra.mxu1 %vm430_vm0, %v13667_v46  ;;  %17241 = vmatprep.mubr.msk.f32.mxu0 %vm430_vm0, %v13926_v38  ;;  %v13928_v46 = vld [vmem:[%s18749_s9 + $0x4e9] sm:$0xff] }
 0x28a   : > { %v20760_v40 = vadd.f32 %v5987_v15, %v5198_v20  ;;  %v5201_v26 = vadd.f32 %v16900_v22, %v19856_v21  ;;  %17045 = vmatprep.mubr.msk.f32.mxu1 %vm430_vm0, %v13668_v62  ;;  %v5997_v57 = vpop.f32.mrf.mxu0  ;;  %v13671_v20 = vld [vmem:[%s18749_s9 + $0x4f0] sm:$0xff] }
 0x28b   : > { %v4649_v2 = vpop.f32.mrf.mxu1  ;;  %v13929_v22 = vld [vmem:[%s18749_s9 + $0x4f1] sm:$0xff] }
 0x28c   : > { %v20769_v58 = vadd.f32 %v17096_v10, %v5201_v26  ;;  %v5200_v28 = vadd.f32 %v4649_v2, %v19861_v30  ;;  %v17099_v21 = vpop.f32.mrf.mxu0  ;;  %17242 = vmatmul.mubr.msk.f32.gmra.mxu0 %vm430_vm0, %v13927_v1  ;;  %v13672_v26 = vld [vmem:[%s18749_s9 + $0x500] sm:$0xff] }
 0x28d   : > { %v16903_v15 = vpop.f32.mrf.mxu1  ;;  %17046 = vmatmul.mubr.msk.f32.gmra.mxu1 %vm430_vm0, %v13669_v34  ;;  %17244 = vmatprep.mubr.msk.f32.mxu0 %vm430_vm0, %v13928_v46  ;;  %v13930_v34 = vld [vmem:[%s18749_s9 + $0x501] sm:$0xff] }
 0x28e   : > { %v20774_v62 = vadd.f32 %v5997_v57, %v5200_v28  ;;  %v5203_v38 = vadd.f32 %v16903_v15, %v19870_v35  ;;  %17048 = vmatprep.mubr.msk.f32.mxu1 %vm430_vm0, %v13670_v54  ;;  %v6007_v30 = vpop.f32.mrf.mxu0  ;;  %v13673_v28 = vld [vmem:[%s18749_s9 + $0x508] sm:$0xff] }
 0x28f   : > { %v4659_v10 = vpop.f32.mrf.mxu1  ;;  %v13931_v15 = vld [vmem:[%s18749_s9 + $0x509] sm:$0xff] }
 0x290   : > { %v20783_v2 = vadd.f32 %v17099_v21, %v5203_v38  ;;  %v5202_v1 = vadd.f32 %v4659_v10, %v19875_v16  ;;  %v17102_v35 = vpop.f32.mrf.mxu0  ;;  %17245 = vmatmul.mubr.msk.f32.gmra.mxu0 %vm430_vm0, %v13929_v22  ;;  %v13674_v38 = vld [vmem:[%s18749_s9 + $0x510] sm:$0xff] }
 0x291   : > { %v16906_v57 = vpop.f32.mrf.mxu1  ;;  %17049 = vmatmul.mubr.msk.f32.gmra.mxu1 %vm430_vm0, %v13671_v20  ;;  %17247 = vmatprep.mubr.msk.f32.mxu0 %vm430_vm0, %v13930_v34  ;;  %v13932_v20 = vld [vmem:[%s18749_s9 + $0x511] sm:$0xff] }
 0x292   : > { %v20788_v54 = vadd.f32 %v6007_v30, %v5202_v1  ;;  %v5205_v46 = vadd.f32 %v16906_v57, %v19884_v51  ;;  %17051 = vmatprep.mubr.msk.f32.mxu1 %vm430_vm0, %v13672_v26  ;;  %v6017_v16 = vpop.f32.mrf.mxu0  ;;  %v13675_v1 = vld [vmem:[%s18749_s9 + $0x518] sm:$0xff] }
 0x293   : > { %v4669_v21 = vpop.f32.mrf.mxu1  ;;  %v13933_v57 = vld [vmem:[%s18749_s9 + $0x519] sm:$0xff] }
 0x294   : > { %v20797_v10 = vadd.f32 %v17102_v35, %v5205_v46  ;;  %v5204_v22 = vadd.f32 %v4669_v21, %v19889_v29  ;;  %v17105_v51 = vpop.f32.mrf.mxu0  ;;  %17248 = vmatmul.mubr.msk.f32.gmra.mxu0 %vm430_vm0, %v13931_v15  ;;  %v14064_v46 = vld [vmem:[%s18749_s9 + $0x2a] sm:$0xff] }
 0x295   : > { %v16909_v30 = vpop.f32.mrf.mxu1  ;;  %17052 = vmatmul.mubr.msk.f32.gmra.mxu1 %vm430_vm0, %v13673_v28  ;;  %17250 = vmatprep.mubr.msk.f32.mxu0 %vm430_vm0, %v13932_v20  ;;  %v14322_v21 = vld [vmem:[%s18749_s9 + $0x50] sm:$0xff] }
 0x296   : > { %v20802_v26 = vadd.f32 %v6017_v16, %v5204_v22  ;;  %v5207_v34 = vadd.f32 %v16909_v30, %v19898_v6  ;;  %17054 = vmatprep.mubr.msk.f32.mxu1 %vm430_vm0, %v13674_v38  ;;  %v6027_v29 = vpop.f32.mrf.mxu0  ;;  %v14065_v22 = vld [vmem:[%s18749_s9 + $0x32] sm:$0xff] }
 0x297   : > { %v4679_v35 = vpop.f32.mrf.mxu1  ;;  %v14323_v30 = vld [vmem:[%s18749_s9 + $0x58] sm:$0xff] }
 0x298   : > { %v20811_v28 = vadd.f32 %v17105_v51, %v5207_v34  ;;  %v5206_v15 = vadd.f32 %v4679_v35, %v19903_v37  ;;  %v17108_v6 = vpop.f32.mrf.mxu0  ;;  %17251 = vmatmul.mubr.msk.f32.gmra.mxu0 %vm430_vm0, %v13933_v57  ;;  %v14066_v35 = vld [vmem:[%s18749_s9 + $0x3a] sm:$0xff] }
 0x299   : > { %v16912_v16 = vpop.f32.mrf.mxu1  ;;  %17055 = vmatmul.mubr.msk.f32.gmra.mxu1 %vm430_vm0, %v13675_v1  ;;  %17453 = vmatprep.mubr.msk.f32.mxu0 %vm430_vm0, %v14322_v21  ;;  %v14324_v57 = vld [vmem:[%s18749_s9 + $0x60] sm:$0xff]  ;;  %v18595_v21 = vld [vmem:[%s23975_s1 + $0x78] sm:$0xff] }
 0x29a   : > { %v20816_v38 = vadd.f32 %v6027_v29, %v5206_v15  ;;  %v5209_v20 = vadd.f32 %v16912_v16, %v19910_v53  ;;  %17257 = vmatprep.mubr.msk.f32.mxu1 %vm430_vm0, %v14064_v46  ;;  %v6037_v37 = vpop.f32.mrf.mxu0  ;;  %v14325_v16 = vld [vmem:[%s18749_s9 + $0x68] sm:$0xff] }
 0x29b   : > { %v4689_v51 = vpop.f32.mrf.mxu1 }
 0x29c   : > { %v20823_v34 = vadd.f32 %v17108_v6, %v5209_v20  ;;  %v5208_v1 = vadd.f32 %v4689_v51, %v19917_v45  ;;  %v17111_v15 = vpop.f32.mrf.mxu0  ;;  %17454 = vmatmul.mubr.msk.f32.vlgmr.msra.gmra.mxu0 %vm430_vm0, %v14323_v30  ;;  %v14067_v45 = vld [vmem:[%s18749_s9 + $0x42] sm:$0xff]  ;;  %v14708_v6 = vld [vmem:[%s23975_s1 + $0x70] sm:$0xff]  ;;  %v14326_v30 = vld [vmem:[%s18749_s9 + $0x78] sm:$0xff] }
 0x29d   : > { %v16915_v29 = vpop.f32.mrf.mxu1  ;;  %17258 = vmatmul.mubr.msk.f32.vlgmr.msra.gmra.mxu1 %vm430_vm0, %v14065_v22  ;;  %17842 = vmatpush3.msra.mxu0 %v20391_v52 }
 0x29e   : > { %v20830_v53 = vadd.f32 %v6037_v37, %v5208_v1  ;;  %v5211_v46 = vadd.f32 %v16915_v29, %v19931_v12  ;;  %17646 = vmatpush3.msra.mxu1 %v18595_v21  ;;  %v6047_v22 = vpop.f32.mrf.mxu0  ;;  %17260 = vmatprep.mubr.msk.f32.mxu1 %vm430_vm0, %v14066_v35  ;;  %v14068_v12 = vld [vmem:[%s18749_s9 + $0x52] sm:$0xff]  ;;  %v14966_v37 = vld [vmem:[%s23975_s1 + $0x80] sm:$0xff] }
 0x29f   : > { %v4699_v20 = vpop.f32.mrf.mxu1  ;;  %17456 = vmatprep.mubr.msk.f32.mxu0 %vm430_vm0, %v14324_v57  ;;  %17647 = vmatprep.subr.mxu1 %v14708_v6 }
 0x2a0   : > { %v20846_v51 = vadd.f32 %v17111_v15, %v5211_v46  ;;  %v5210_v52 = vadd.f32 %v4699_v20, %v19939_v14  ;;  %v17114_v29 = vpop.f32.mrf.mxu0  ;;  %17457 = vmatmul.mubr.msk.f32.gmra.mxu0 %vm430_vm0, %v14325_v16  ;;  %v14069_v14 = vld [vmem:[%s18749_s9 + $0x5a] sm:$0xff]  ;;  %v14070_v20 = vld [vmem:[%s18749_s9 + $0x62] sm:$0xff]  ;;  %17648 = vmatpush3.msra.mxu1 %v14708_v6  ;;  %v14071_v6 = vld [vmem:[%s18749_s9 + $0x6a] sm:$0xff] }
 0x2a1   : > { %v16918_v1 = vpop.f32.mrf.mxu1  ;;  %17261 = vmatmul.mubr.msk.f32.gmra.mxu1 %vm430_vm0, %v14067_v45  ;;  %17459 = vmatprep.mubr.msk.f32.mxu0 %vm430_vm0, %v14326_v30  ;;  %v14327_v15 = vld [vmem:[%s18749_s9 + $0x80] sm:$0xff] }
 0x2a2   : > { %24222 = vst [vmem:[#allocation84_spill] sm:$0xff] %v20846_v51  ;;  %v20854_v35 = vadd.f32 %v6047_v22, %v5210_v52  ;;  %v5213_v57 = vadd.f32 %v16918_v1, %v19948_v43  ;;  %17263 = vmatprep.mubr.msk.f32.mxu1 %vm430_vm0, %v14068_v12  ;;  %v6057_v21 = vpop.f32.mrf.mxu0  ;;  %v14328_v51 = vld [vmem:[%s18749_s9 + $0x88] sm:$0xff]  ;;  %17843 = vmatprep.subr.mxu0 %v14966_v37  ;;  %v14329_v52 = vld [vmem:[%s18749_s9 + $0x90] sm:$0xff]  ;;  %v14072_v1 = vld [vmem:[%s18749_s9 + $0x7a] sm:$0xff] }
 0x2a3   : > { %v4709_v46 = vpop.f32.mrf.mxu1  ;;  %17844 = vmatpush3.msra.mxu0 %v14966_v37 }
 0x2a4   : > { %v20863_v45 = vadd.f32 %v17114_v29, %v5213_v57  ;;  %v5212_v43 = vadd.f32 %v4709_v46, %v19953_v27  ;;  %v17117_v22 = vpop.f32.mrf.mxu0  ;;  %17460 = vmatmul.mubr.msk.f32.gmra.mxu0 %vm430_vm0, %v14327_v15  ;;  %v14330_v29 = vld [vmem:[%s18749_s9 + $0xa0] sm:$0xff] }
 0x2a5   : > { %v16921_v16 = vpop.f32.mrf.mxu1  ;;  %17264 = vmatmul.mubr.msk.f32.gmra.mxu1 %vm430_vm0, %v14069_v14  ;;  %17462 = vmatprep.mubr.msk.f32.mxu0 %vm430_vm0, %v14328_v51 }
 0x2a6   : > { %v20868_v12 = vadd.f32 %v6057_v21, %v5212_v43  ;;  %v5215_v30 = vadd.f32 %v16921_v16, %v19962_v23  ;;  %17266 = vmatprep.mubr.msk.f32.mxu1 %vm430_vm0, %v14070_v20  ;;  %v6067_v37 = vpop.f32.mrf.mxu0  ;;  %v14073_v21 = vld [vmem:[%s18749_s9 + $0x82] sm:$0xff]  ;;  %v14074_v16 = vld [vmem:[%s18749_s9 + $0x8a] sm:$0xff] }
 0x2a7   : > { %v4719_v27 = vpop.f32.mrf.mxu1  ;;  %v14331_v20 = vld [vmem:[%s18749_s9 + $0xa8] sm:$0xff] }
 0x2a8   : > { %v20877_v57 = vadd.f32 %v17117_v22, %v5215_v30  ;;  %v5214_v14 = vadd.f32 %v4719_v27, %v19967_v8  ;;  %v17120_v23 = vpop.f32.mrf.mxu0  ;;  %17463 = vmatmul.mubr.msk.f32.gmra.mxu0 %vm430_vm0, %v14329_v52  ;;  %v14332_v22 = vld [vmem:[%s18749_s9 + $0xb0] sm:$0xff] }
 0x2a9   : > { %v16924_v15 = vpop.f32.mrf.mxu1  ;;  %17267 = vmatmul.mubr.msk.f32.gmra.mxu1 %vm430_vm0, %v14071_v6  ;;  %17465 = vmatprep.mubr.msk.f32.mxu0 %vm430_vm0, %v14330_v29  ;;  %v14333_v29 = vld [vmem:[%s18749_s9 + $0xb8] sm:$0xff] }
 0x2aa   : > { %v20882_v51 = vadd.f32 %v6067_v37, %v5214_v14  ;;  %v5217_v46 = vadd.f32 %v16924_v15, %v19976_v5  ;;  %17269 = vmatprep.mubr.msk.f32.mxu1 %vm430_vm0, %v14072_v1  ;;  %v6077_v8 = vpop.f32.mrf.mxu0  ;;  %v14075_v1 = vld [vmem:[%s18749_s9 + $0x92] sm:$0xff]  ;;  %v14076_v15 = vld [vmem:[%s18749_s9 + $0xa2] sm:$0xff] }
 0x2ab   : > { %v4729_v43 = vpop.f32.mrf.mxu1 }
 0x2ac   : > { %v20891_v30 = vadd.f32 %v17120_v23, %v5217_v46  ;;  %v5216_v6 = vadd.f32 %v4729_v43, %v19981_v44  ;;  %v17123_v5 = vpop.f32.mrf.mxu0  ;;  %17466 = vmatmul.mubr.msk.f32.gmra.mxu0 %vm430_vm0, %v14331_v20  ;;  %v14334_v23 = vld [vmem:[%s18749_s9 + $0xc8] sm:$0xff] }
 0x2ad   : > { %v16927_v52 = vpop.f32.mrf.mxu1  ;;  %17270 = vmatmul.mubr.msk.f32.gmra.mxu1 %vm430_vm0, %v14073_v21  ;;  %17468 = vmatprep.mubr.msk.f32.mxu0 %vm430_vm0, %v14332_v22  ;;  %v14335_v22 = vld [vmem:[%s18749_s9 + $0xd0] sm:$0xff] }
 0x2ae   : > { %v20896_v27 = vadd.f32 %v6077_v8, %v5216_v6  ;;  %v5219_v37 = vadd.f32 %v16927_v52, %v19990_v24  ;;  %17272 = vmatprep.mubr.msk.f32.mxu1 %vm430_vm0, %v14074_v16  ;;  %v6087_v44 = vpop.f32.mrf.mxu0  ;;  %v14077_v16 = vld [vmem:[%s18749_s9 + $0xaa] sm:$0xff]  ;;  %v14078_v52 = vld [vmem:[%s18749_s9 + $0xb2] sm:$0xff] }
 0x2af   : > { %v4739_v14 = vpop.f32.mrf.mxu1 }
 0x2b0   : > { %v20905_v46 = vadd.f32 %v17123_v5, %v5219_v37  ;;  %v5218_v21 = vadd.f32 %v4739_v14, %v19995_v0  ;;  %v17126_v24 = vpop.f32.mrf.mxu0  ;;  %17469 = vmatmul.mubr.msk.f32.gmra.mxu0 %vm430_vm0, %v14333_v29  ;;  %v14336_v5 = vld [vmem:[%s18749_s9 + $0xd8] sm:$0xff] }
 0x2b1   : > { %v16930_v20 = vpop.f32.mrf.mxu1  ;;  %17273 = vmatmul.mubr.msk.f32.gmra.mxu1 %vm430_vm0, %v14075_v1  ;;  %17471 = vmatprep.mubr.msk.f32.mxu0 %vm430_vm0, %v14334_v23  ;;  %v14337_v23 = vld [vmem:[%s18749_s9 + $0xe0] sm:$0xff] }
 0x2b2   : > { %v20910_v43 = vadd.f32 %v6087_v44, %v5218_v21  ;;  %v5221_v8 = vadd.f32 %v16930_v20, %v20004_v13  ;;  %17275 = vmatprep.mubr.msk.f32.mxu1 %vm430_vm0, %v14076_v15  ;;  %v6097_v0 = vpop.f32.mrf.mxu0  ;;  %v14079_v15 = vld [vmem:[%s18749_s9 + $0xba] sm:$0xff]  ;;  %v14080_v20 = vld [vmem:[%s18749_s9 + $0xca] sm:$0xff] }
 0x2b3   : > { %v4749_v6 = vpop.f32.mrf.mxu1 }
 0x2b4   : > { %v20919_v37 = vadd.f32 %v17126_v24, %v5221_v8  ;;  %v5220_v1 = vadd.f32 %v4749_v6, %v20009_v9  ;;  %v17129_v13 = vpop.f32.mrf.mxu0  ;;  %17472 = vmatmul.mubr.msk.f32.gmra.mxu0 %vm430_vm0, %v14335_v22  ;;  %v14338_v24 = vld [vmem:[%s18749_s9 + $0xf0] sm:$0xff] }
 0x2b5   : > { %v16933_v29 = vpop.f32.mrf.mxu1  ;;  %17276 = vmatmul.mubr.msk.f32.gmra.mxu1 %vm430_vm0, %v14077_v16  ;;  %17474 = vmatprep.mubr.msk.f32.mxu0 %vm430_vm0, %v14336_v5  ;;  %v14339_v5 = vld [vmem:[%s18749_s9 + $0xf8] sm:$0xff] }
 0x2b6   : > { %v20924_v14 = vadd.f32 %v6097_v0, %v5220_v1  ;;  %v5223_v44 = vadd.f32 %v16933_v29, %v20018_v36  ;;  %17278 = vmatprep.mubr.msk.f32.mxu1 %vm430_vm0, %v14078_v52  ;;  %v6107_v9 = vpop.f32.mrf.mxu0  ;;  %v14081_v52 = vld [vmem:[%s18749_s9 + $0xd2] sm:$0xff]  ;;  %v14082_v29 = vld [vmem:[%s18749_s9 + $0xda] sm:$0xff] }
 0x2b7   : > { %v4759_v21 = vpop.f32.mrf.mxu1 }
 0x2b8   : > { %v20933_v8 = vadd.f32 %v17129_v13, %v5223_v44  ;;  %v5222_v16 = vadd.f32 %v4759_v21, %v20023_v39  ;;  %v17132_v36 = vpop.f32.mrf.mxu0  ;;  %17475 = vmatmul.mubr.msk.f32.gmra.mxu0 %vm430_vm0, %v14337_v23  ;;  %v14340_v13 = vld [vmem:[%s18749_s9 + $0x100] sm:$0xff] }
 0x2b9   : > { %v16936_v22 = vpop.f32.mrf.mxu1  ;;  %17279 = vmatmul.mubr.msk.f32.gmra.mxu1 %vm430_vm0, %v14079_v15  ;;  %17477 = vmatprep.mubr.msk.f32.mxu0 %vm430_vm0, %v14338_v24  ;;  %v24223_v15 = vld [vmem:[#allocation86_spill] sm:$0xff] }
 0x2ba   : > { %v20938_v6 = vadd.f32 %v6107_v9, %v5222_v16  ;;  %v5225_v0 = vadd.f32 %v16936_v22, %v20032_v61  ;;  %17281 = vmatprep.mubr.msk.f32.mxu1 %vm430_vm0, %v14080_v20  ;;  %v6117_v39 = vpop.f32.mrf.mxu0  ;;  %v24225_v20 = vld [vmem:[#allocation53_spill] sm:$0xff]  ;;  %v14341_v22 = vld [vmem:[%s18749_s9 + $0x108] sm:$0xff] }
 0x2bb   : > { %v4769_v1 = vpop.f32.mrf.mxu1  ;;  %v14083_v16 = vld [vmem:[%s18749_s9 + $0xe2] sm:$0xff] }
 0x2bc   : > { %v20947_v44 = vadd.f32 %v17132_v36, %v5225_v0  ;;  %v5224_v23 = vadd.f32 %v4769_v1, %v24223_v15  ;;  %v17135_v61 = vpop.f32.mrf.mxu0  ;;  %17478 = vmatmul.mubr.msk.f32.gmra.mxu0 %vm430_vm0, %v14339_v5  ;;  %v14084_v1 = vld [vmem:[%s18749_s9 + $0xf2] sm:$0xff] }
 0x2bd   : > { %v16939_v21 = vpop.f32.mrf.mxu1  ;;  %17282 = vmatmul.mubr.msk.f32.gmra.mxu1 %vm430_vm0, %v14081_v52  ;;  %17480 = vmatprep.mubr.msk.f32.mxu0 %vm430_vm0, %v14340_v13  ;;  %v14342_v15 = vld [vmem:[%s18749_s9 + $0x118] sm:$0xff]  ;;  %v24227_v5 = vld [vmem:[#allocation55_spill] sm:$0xff]  ;;  %v24229_v13 = vld [vmem:[#allocation57_spill] sm:$0xff] }
 0x2be   : > { %v20952_v9 = vadd.f32 %v6117_v39, %v5224_v23  ;;  %v5227_v24 = vadd.f32 %v16939_v21, %v24225_v20  ;;  %17284 = vmatprep.mubr.msk.f32.mxu1 %vm430_vm0, %v14082_v29  ;;  %v6127_v0 = vpop.f32.mrf.mxu0 }
 0x2bf   : > { %v4779_v36 = vpop.f32.mrf.mxu1 }
 0x2c0   : > { %24224 = vst [vmem:[#allocation85_spill] sm:$0xff] %v20952_v9  ;;  %v20961_v52 = vadd.f32 %v17135_v61, %v5227_v24  ;;  %v5226_v39 = vadd.f32 %v4779_v36, %v24227_v5  ;;  %v17138_v21 = vpop.f32.mrf.mxu0  ;;  %17481 = vmatmul.mubr.msk.f32.gmra.mxu0 %vm430_vm0, %v14341_v22  ;;  %v14085_v9 = vld [vmem:[%s18749_s9 + $0xfa] sm:$0xff]  ;;  %v14086_v5 = vld [vmem:[%s18749_s9 + $0x102] sm:$0xff]  ;;  %v24231_v22 = vld [vmem:[#allocation59_spill] sm:$0xff] }
 0x2c1   : > { %v16942_v23 = vpop.f32.mrf.mxu1  ;;  %17285 = vmatmul.mubr.msk.f32.gmra.mxu1 %vm430_vm0, %v14083_v16  ;;  %17483 = vmatprep.mubr.msk.f32.mxu0 %vm430_vm0, %v14342_v15  ;;  %v14343_v61 = vld [vmem:[%s18749_s9 + $0x120] sm:$0xff] }
 0x2c2   : > { %24226 = vst [vmem:[#allocation86_spill] sm:$0xff] %v20961_v52  ;;  %v20966_v29 = vadd.f32 %v6127_v0, %v5226_v39  ;;  %v5229_v20 = vadd.f32 %v16942_v23, %v24229_v13  ;;  %17287 = vmatprep.mubr.msk.f32.mxu1 %vm430_vm0, %v14084_v1  ;;  %v6137_v36 = vpop.f32.mrf.mxu0  ;;  %v14344_v52 = vld [vmem:[%s18749_s9 + $0x128] sm:$0xff]  ;;  %v24233_v15 = vld [vmem:[#allocation61_spill] sm:$0xff] }
 0x2c3   : > { %v4789_v24 = vpop.f32.mrf.mxu1 }
 0x2c4   : > { %24228 = vst [vmem:[#allocation53_spill] sm:$0xff] %v20966_v29  ;;  %v20975_v16 = vadd.f32 %v17138_v21, %v5229_v20  ;;  %v5228_v0 = vadd.f32 %v4789_v24, %v24231_v22  ;;  %v17141_v23 = vpop.f32.mrf.mxu0  ;;  %17484 = vmatmul.mubr.msk.f32.gmra.mxu0 %vm430_vm0, %v14343_v61  ;;  %v14087_v29 = vld [vmem:[%s18749_s9 + $0x10a] sm:$0xff]  ;;  %v14088_v22 = vld [vmem:[%s18749_s9 + $0x11a] sm:$0xff] }
 0x2c5   : > { %v16945_v39 = vpop.f32.mrf.mxu1  ;;  %17288 = vmatmul.mubr.msk.f32.gmra.mxu1 %vm430_vm0, %v14085_v9  ;;  %17486 = vmatprep.mubr.msk.f32.mxu0 %vm430_vm0, %v14344_v52  ;;  %v14345_v21 = vld [vmem:[%s18749_s9 + $0x130] sm:$0xff] }
 0x2c6   : > { %24230 = vst [vmem:[#allocation55_spill] sm:$0xff] %v20975_v16  ;;  %v20980_v1 = vadd.f32 %v6137_v36, %v5228_v0  ;;  %v5231_v13 = vadd.f32 %v16945_v39, %v24233_v15  ;;  %17290 = vmatprep.mubr.msk.f32.mxu1 %vm430_vm0, %v14086_v5  ;;  %v6147_v24 = vpop.f32.mrf.mxu0  ;;  %v14346_v16 = vld [vmem:[%s18749_s9 + $0x140] sm:$0xff]  ;;  %v24235_v61 = vld [vmem:[#allocation63_spill] sm:$0xff] }
 0x2c7   : > { %v4799_v20 = vpop.f32.mrf.mxu1  ;;  %v24237_v5 = vld [vmem:[#allocation65_spill] sm:$0xff] }
 0x2c8   : > { %24232 = vst [vmem:[#allocation57_spill] sm:$0xff] %v20980_v1  ;;  %v20989_v9 = vadd.f32 %v17141_v23, %v5231_v13  ;;  %v5230_v36 = vadd.f32 %v4799_v20, %v24235_v61  ;;  %v17144_v39 = vpop.f32.mrf.mxu0  ;;  %17487 = vmatmul.mubr.msk.f32.gmra.mxu0 %vm430_vm0, %v14345_v21  ;;  %v14089_v1 = vld [vmem:[%s18749_s9 + $0x122] sm:$0xff]  ;;  %v14090_v61 = vld [vmem:[%s18749_s9 + $0x12a] sm:$0xff] }
 0x2c9   : > { %v16948_v0 = vpop.f32.mrf.mxu1  ;;  %17291 = vmatmul.mubr.msk.f32.gmra.mxu1 %vm430_vm0, %v14087_v29  ;;  %17489 = vmatprep.mubr.msk.f32.mxu0 %vm430_vm0, %v14346_v16  ;;  %v14347_v23 = vld [vmem:[%s18749_s9 + $0x148] sm:$0xff]  ;;  %v24239_v21 = vld [vmem:[#allocation67_spill] sm:$0xff] }
 0x2ca   : > { %24234 = vst [vmem:[#allocation59_spill] sm:$0xff] %v20989_v9  ;;  %v20994_v52 = vadd.f32 %v6147_v24, %v5230_v36  ;;  %v5233_v15 = vadd.f32 %v16948_v0, %v24237_v5  ;;  %17293 = vmatprep.mubr.msk.f32.mxu1 %vm430_vm0, %v14088_v22  ;;  %v6157_v20 = vpop.f32.mrf.mxu0  ;;  %v14348_v9 = vld [vmem:[%s18749_s9 + $0x150] sm:$0xff]  ;;  %v24241_v22 = vld [vmem:[#allocation69_spill] sm:$0xff] }
 0x2cb   : > { %v4809_v13 = vpop.f32.mrf.mxu1 }
 0x2cc   : > { %24236 = vst [vmem:[#allocation61_spill] sm:$0xff] %v20994_v52  ;;  %v21003_v29 = vadd.f32 %v17144_v39, %v5233_v15  ;;  %v5232_v24 = vadd.f32 %v4809_v13, %v24239_v21  ;;  %v17147_v0 = vpop.f32.mrf.mxu0  ;;  %17490 = vmatmul.mubr.msk.f32.gmra.mxu0 %vm430_vm0, %v14347_v23  ;;  %v14091_v52 = vld [vmem:[%s18749_s9 + $0x132] sm:$0xff]  ;;  %v14092_v21 = vld [vmem:[%s18749_s9 + $0x142] sm:$0xff] }
 0x2cd   : > { %v16951_v36 = vpop.f32.mrf.mxu1  ;;  %17294 = vmatmul.mubr.msk.f32.gmra.mxu1 %vm430_vm0, %v14089_v1  ;;  %17492 = vmatprep.mubr.msk.f32.mxu0 %vm430_vm0, %v14348_v9  ;;  %v14349_v39 = vld [vmem:[%s18749_s9 + $0x158] sm:$0xff]  ;;  %v24243_v23 = vld [vmem:[#allocation71_spill] sm:$0xff] }
 0x2ce   : > { %24238 = vst [vmem:[#allocation63_spill] sm:$0xff] %v21003_v29  ;;  %v21008_v16 = vadd.f32 %v6157_v20, %v5232_v24  ;;  %v5235_v5 = vadd.f32 %v16951_v36, %v24241_v22  ;;  %17296 = vmatprep.mubr.msk.f32.mxu1 %vm430_vm0, %v14090_v61  ;;  %v6167_v13 = vpop.f32.mrf.mxu0  ;;  %v14350_v29 = vld [vmem:[%s18749_s9 + $0x168] sm:$0xff]  ;;  %v24245_v61 = vld [vmem:[#allocation73_spill] sm:$0xff] }
 0x2cf   : > { %v4819_v15 = vpop.f32.mrf.mxu1 }
 0x2d0   : > { %24240 = vst [vmem:[#allocation65_spill] sm:$0xff] %v21008_v16  ;;  %v21017_v1 = vadd.f32 %v17147_v0, %v5235_v5  ;;  %v5234_v20 = vadd.f32 %v4819_v15, %v24243_v23  ;;  %v17150_v36 = vpop.f32.mrf.mxu0  ;;  %17493 = vmatmul.mubr.msk.f32.gmra.mxu0 %vm430_vm0, %v14349_v39  ;;  %v14093_v16 = vld [vmem:[%s18749_s9 + $0x14a] sm:$0xff]  ;;  %v14094_v23 = vld [vmem:[%s18749_s9 + $0x152] sm:$0xff] }
 0x2d1   : > { %v16954_v24 = vpop.f32.mrf.mxu1  ;;  %17297 = vmatmul.mubr.msk.f32.gmra.mxu1 %vm430_vm0, %v14091_v52  ;;  %17495 = vmatprep.mubr.msk.f32.mxu0 %vm430_vm0, %v14350_v29  ;;  %v14351_v0 = vld [vmem:[%s18749_s9 + $0x170] sm:$0xff] }
 0x2d2   : > { %24242 = vst [vmem:[#allocation67_spill] sm:$0xff] %v21017_v1  ;;  %v21022_v9 = vadd.f32 %v6167_v13, %v5234_v20  ;;  %v5237_v22 = vadd.f32 %v16954_v24, %v24245_v61  ;;  %17299 = vmatprep.mubr.msk.f32.mxu1 %vm430_vm0, %v14092_v21  ;;  %v6177_v15 = vpop.f32.mrf.mxu0  ;;  %v14352_v1 = vld [vmem:[%s18749_s9 + $0x178] sm:$0xff]  ;;  %v24247_v39 = vld [vmem:[#allocation75_spill] sm:$0xff]  ;;  %v24249_v21 = vld [vmem:[#allocation77_spill] sm:$0xff] }
 0x2d3   : > { %v4829_v5 = vpop.f32.mrf.mxu1 }
 0x2d4   : > { %24244 = vst [vmem:[#allocation69_spill] sm:$0xff] %v21022_v9  ;;  %v21031_v52 = vadd.f32 %v17150_v36, %v5237_v22  ;;  %v5236_v13 = vadd.f32 %v4829_v5, %v24247_v39  ;;  %v17153_v24 = vpop.f32.mrf.mxu0  ;;  %17496 = vmatmul.mubr.msk.f32.gmra.mxu0 %vm430_vm0, %v14351_v0  ;;  %v14095_v9 = vld [vmem:[%s18749_s9 + $0x15a] sm:$0xff]  ;;  %v14096_v39 = vld [vmem:[%s18749_s9 + $0x16a] sm:$0xff] }
 0x2d5   : > { %v16957_v20 = vpop.f32.mrf.mxu1  ;;  %17300 = vmatmul.mubr.msk.f32.gmra.mxu1 %vm430_vm0, %v14093_v16  ;;  %17498 = vmatprep.mubr.msk.f32.mxu0 %vm430_vm0, %v14352_v1  ;;  %v14353_v36 = vld [vmem:[%s18749_s9 + $0x180] sm:$0xff]  ;;  %v24251_v0 = vld [vmem:[#allocation79_spill] sm:$0xff] }
 0x2d6   : > { %24246 = vst [vmem:[#allocation71_spill] sm:$0xff] %v21031_v52  ;;  %v21036_v29 = vadd.f32 %v6177_v15, %v5236_v13  ;;  %v5239_v61 = vadd.f32 %v16957_v20, %v24249_v21  ;;  %17302 = vmatprep.mubr.msk.f32.mxu1 %vm430_vm0, %v14094_v23  ;;  %v6187_v5 = vpop.f32.mrf.mxu0  ;;  %v14354_v52 = vld [vmem:[%s18749_s9 + $0x190] sm:$0xff]  ;;  %v24253_v23 = vld [vmem:[#allocation81_spill] sm:$0xff] }
 0x2d7   : > { %v4839_v22 = vpop.f32.mrf.mxu1 }
 0x2d8   : > { %24248 = vst [vmem:[#allocation73_spill] sm:$0xff] %v21036_v29  ;;  %v21045_v16 = vadd.f32 %v17153_v24, %v5239_v61  ;;  %v5238_v15 = vadd.f32 %v4839_v22, %v24251_v0  ;;  %v17156_v20 = vpop.f32.mrf.mxu0  ;;  %17499 = vmatmul.mubr.msk.f32.gmra.mxu0 %vm430_vm0, %v14353_v36  ;;  %v14097_v29 = vld [vmem:[%s18749_s9 + $0x172] sm:$0xff]  ;;  %v14098_v0 = vld [vmem:[%s18749_s9 + $0x17a] sm:$0xff] }
 0x2d9   : > { %v16960_v13 = vpop.f32.mrf.mxu1  ;;  %17303 = vmatmul.mubr.msk.f32.gmra.mxu1 %vm430_vm0, %v14095_v9  ;;  %17501 = vmatprep.mubr.msk.f32.mxu0 %vm430_vm0, %v14354_v52  ;;  %v14355_v24 = vld [vmem:[%s18749_s9 + $0x198] sm:$0xff]  ;;  %v24255_v36 = vld [vmem:[#allocation83_spill] sm:$0xff] }
 0x2da   : > { %24250 = vst [vmem:[#allocation75_spill] sm:$0xff] %v21045_v16  ;;  %v21050_v1 = vadd.f32 %v6187_v5, %v5238_v15  ;;  %v5241_v21 = vadd.f32 %v16960_v13, %v24253_v23  ;;  %17305 = vmatprep.mubr.msk.f32.mxu1 %vm430_vm0, %v14096_v39  ;;  %v6197_v22 = vpop.f32.mrf.mxu0  ;;  %v14356_v16 = vld [vmem:[%s18749_s9 + $0x1a0] sm:$0xff] }
 0x2db   : > { %v4849_v61 = vpop.f32.mrf.mxu1  ;;  %v24257_v39 = vld [vmem:[#allocation5_spill] sm:$0xff] }
 0x2dc   : > { %24252 = vst [vmem:[#allocation77_spill] sm:$0xff] %v21050_v1  ;;  %v21059_v9 = vadd.f32 %v17156_v20, %v5241_v21  ;;  %v5240_v5 = vadd.f32 %v4849_v61, %v24255_v36  ;;  %v17159_v13 = vpop.f32.mrf.mxu0  ;;  %17502 = vmatmul.mubr.msk.f32.gmra.mxu0 %vm430_vm0, %v14355_v24  ;;  %v14099_v1 = vld [vmem:[%s18749_s9 + $0x182] sm:$0xff]  ;;  %v14100_v36 = vld [vmem:[%s18749_s9 + $0x192] sm:$0xff] }
 0x2dd   : > { %v16963_v15 = vpop.f32.mrf.mxu1  ;;  %17306 = vmatmul.mubr.msk.f32.gmra.mxu1 %vm430_vm0, %v14097_v29  ;;  %17504 = vmatprep.mubr.msk.f32.mxu0 %vm430_vm0, %v14356_v16  ;;  %v14357_v20 = vld [vmem:[%s18749_s9 + $0x1a8] sm:$0xff] }
 0x2de   : > { %24254 = vst [vmem:[#allocation79_spill] sm:$0xff] %v21059_v9  ;;  %v21064_v52 = vadd.f32 %v6197_v22, %v5240_v5  ;;  %v5243_v23 = vadd.f32 %v16963_v15, %v24257_v39  ;;  %17308 = vmatprep.mubr.msk.f32.mxu1 %vm430_vm0, %v14098_v0  ;;  %v6207_v61 = vpop.f32.mrf.mxu0  ;;  %v14358_v9 = vld [vmem:[%s18749_s9 + $0x1b8] sm:$0xff]  ;;  %v24259_v24 = vld [vmem:[#allocation6_spill] sm:$0xff]  ;;  %v24261_v0 = vld [vmem:[#allocation7_spill] sm:$0xff] }
 0x2df   : > { %v4859_v21 = vpop.f32.mrf.mxu1 }
 0x2e0   : > { %24256 = vst [vmem:[#allocation81_spill] sm:$0xff] %v21064_v52  ;;  %v21073_v29 = vadd.f32 %v17159_v13, %v5243_v23  ;;  %v5242_v22 = vadd.f32 %v4859_v21, %v24259_v24  ;;  %v17162_v15 = vpop.f32.mrf.mxu0  ;;  %17505 = vmatmul.mubr.msk.f32.gmra.mxu0 %vm430_vm0, %v14357_v20  ;;  %v14101_v52 = vld [vmem:[%s18749_s9 + $0x19a] sm:$0xff]  ;;  %v14102_v24 = vld [vmem:[%s18749_s9 + $0x1a2] sm:$0xff] }
 0x2e1   : > { %v16966_v5 = vpop.f32.mrf.mxu1  ;;  %17309 = vmatmul.mubr.msk.f32.gmra.mxu1 %vm430_vm0, %v14099_v1  ;;  %17507 = vmatprep.mubr.msk.f32.mxu0 %vm430_vm0, %v14358_v9  ;;  %v14359_v13 = vld [vmem:[%s18749_s9 + $0x1c0] sm:$0xff]  ;;  %v24263_v20 = vld [vmem:[#allocation8_spill] sm:$0xff] }
 0x2e2   : > { %24258 = vst [vmem:[#allocation83_spill] sm:$0xff] %v21073_v29  ;;  %v21078_v16 = vadd.f32 %v6207_v61, %v5242_v22  ;;  %v5245_v39 = vadd.f32 %v16966_v5, %v24261_v0  ;;  %17311 = vmatprep.mubr.msk.f32.mxu1 %vm430_vm0, %v14100_v36  ;;  %v6217_v21 = vpop.f32.mrf.mxu0  ;;  %v14360_v29 = vld [vmem:[%s18749_s9 + $0x1c8] sm:$0xff]  ;;  %v24265_v36 = vld [vmem:[#allocation9_spill] sm:$0xff] }
 0x2e3   : > { %v4869_v23 = vpop.f32.mrf.mxu1 }
 0x2e4   : > { %24260 = vst [vmem:[#allocation5_spill] sm:$0xff] %v21078_v16  ;;  %v21087_v1 = vadd.f32 %v17162_v15, %v5245_v39  ;;  %v5244_v61 = vadd.f32 %v4869_v23, %v24263_v20  ;;  %v17165_v5 = vpop.f32.mrf.mxu0  ;;  %17508 = vmatmul.mubr.msk.f32.gmra.mxu0 %vm430_vm0, %v14359_v13  ;;  %v14103_v16 = vld [vmem:[%s18749_s9 + $0x1aa] sm:$0xff]  ;;  %v14104_v20 = vld [vmem:[%s18749_s9 + $0x1ba] sm:$0xff] }
 0x2e5   : > { %v16969_v22 = vpop.f32.mrf.mxu1  ;;  %17312 = vmatmul.mubr.msk.f32.gmra.mxu1 %vm430_vm0, %v14101_v52  ;;  %17510 = vmatprep.mubr.msk.f32.mxu0 %vm430_vm0, %v14360_v29  ;;  %v14361_v15 = vld [vmem:[%s18749_s9 + $0x1d0] sm:$0xff]  ;;  %v24267_v13 = vld [vmem:[#allocation10_spill] sm:$0xff] }
 0x2e6   : > { %24262 = vst [vmem:[#allocation6_spill] sm:$0xff] %v21087_v1  ;;  %v21092_v9 = vadd.f32 %v6217_v21, %v5244_v61  ;;  %v5247_v0 = vadd.f32 %v16969_v22, %v24265_v36  ;;  %17314 = vmatprep.mubr.msk.f32.mxu1 %vm430_vm0, %v14102_v24  ;;  %v6227_v23 = vpop.f32.mrf.mxu0  ;;  %v14362_v1 = vld [vmem:[%s18749_s9 + $0x1e0] sm:$0xff]  ;;  %v24269_v24 = vld [vmem:[#allocation11_spill] sm:$0xff] }
 0x2e7   : > { %v4879_v39 = vpop.f32.mrf.mxu1 }
 0x2e8   : > { %24264 = vst [vmem:[#allocation7_spill] sm:$0xff] %v21092_v9  ;;  %v21101_v52 = vadd.f32 %v17165_v5, %v5247_v0  ;;  %v5246_v21 = vadd.f32 %v4879_v39, %v24267_v13  ;;  %v17168_v22 = vpop.f32.mrf.mxu0  ;;  %17511 = vmatmul.mubr.msk.f32.gmra.mxu0 %vm430_vm0, %v14361_v15  ;;  %v14105_v9 = vld [vmem:[%s18749_s9 + $0x1c2] sm:$0xff]  ;;  %v14106_v13 = vld [vmem:[%s18749_s9 + $0x1ca] sm:$0xff]  ;;  %v24271_v15 = vld [vmem:[#allocation12_spill] sm:$0xff] }
 0x2e9   : > { %v16972_v61 = vpop.f32.mrf.mxu1  ;;  %17315 = vmatmul.mubr.msk.f32.gmra.mxu1 %vm430_vm0, %v14103_v16  ;;  %17513 = vmatprep.mubr.msk.f32.mxu0 %vm430_vm0, %v14362_v1  ;;  %v14363_v5 = vld [vmem:[%s18749_s9 + $0x1e8] sm:$0xff] }
 0x2ea   : > { %24266 = vst [vmem:[#allocation8_spill] sm:$0xff] %v21101_v52  ;;  %v21106_v29 = vadd.f32 %v6227_v23, %v5246_v21  ;;  %v5249_v36 = vadd.f32 %v16972_v61, %v24269_v24  ;;  %17317 = vmatprep.mubr.msk.f32.mxu1 %vm430_vm0, %v14104_v20  ;;  %v6237_v39 = vpop.f32.mrf.mxu0  ;;  %v14364_v52 = vld [vmem:[%s18749_s9 + $0x1f0] sm:$0xff]  ;;  %v24273_v20 = vld [vmem:[#allocation13_spill] sm:$0xff] }
 0x2eb   : > { %v4889_v0 = vpop.f32.mrf.mxu1 }
 0x2ec   : > { %24268 = vst [vmem:[#allocation9_spill] sm:$0xff] %v21106_v29  ;;  %v21115_v16 = vadd.f32 %v17168_v22, %v5249_v36  ;;  %v5248_v23 = vadd.f32 %v4889_v0, %v24271_v15  ;;  %v17171_v61 = vpop.f32.mrf.mxu0  ;;  %17514 = vmatmul.mubr.msk.f32.gmra.mxu0 %vm430_vm0, %v14363_v5  ;;  %v14107_v29 = vld [vmem:[%s18749_s9 + $0x1d2] sm:$0xff]  ;;  %v14108_v15 = vld [vmem:[%s18749_s9 + $0x1e2] sm:$0xff] }
 0x2ed   : > { %v16975_v21 = vpop.f32.mrf.mxu1  ;;  %17318 = vmatmul.mubr.msk.f32.gmra.mxu1 %vm430_vm0, %v14105_v9  ;;  %17516 = vmatprep.mubr.msk.f32.mxu0 %vm430_vm0, %v14364_v52  ;;  %v14365_v22 = vld [vmem:[%s18749_s9 + $0x1f8] sm:$0xff]  ;;  %v24275_v5 = vld [vmem:[#allocation14_spill] sm:$0xff] }
 0x2ee   : > { %24270 = vst [vmem:[#allocation10_spill] sm:$0xff] %v21115_v16  ;;  %v21120_v1 = vadd.f32 %v6237_v39, %v5248_v23  ;;  %v5251_v24 = vadd.f32 %v16975_v21, %v24273_v20  ;;  %17320 = vmatprep.mubr.msk.f32.mxu1 %vm430_vm0, %v14106_v13  ;;  %v6247_v0 = vpop.f32.mrf.mxu0  ;;  %v14366_v16 = vld [vmem:[%s18749_s9 + $0x208] sm:$0xff]  ;;  %v24277_v13 = vld [vmem:[#allocation15_spill] sm:$0xff] }
 0x2ef   : > { %v4899_v36 = vpop.f32.mrf.mxu1 }
 0x2f0   : > { %24272 = vst [vmem:[#allocation11_spill] sm:$0xff] %v21120_v1  ;;  %v21129_v9 = vadd.f32 %v17171_v61, %v5251_v24  ;;  %v5250_v39 = vadd.f32 %v4899_v36, %v24275_v5  ;;  %v17174_v21 = vpop.f32.mrf.mxu0  ;;  %17517 = vmatmul.mubr.msk.f32.gmra.mxu0 %vm430_vm0, %v14365_v22  ;;  %v14109_v1 = vld [vmem:[%s18749_s9 + $0x1ea] sm:$0xff]  ;;  %v14110_v5 = vld [vmem:[%s18749_s9 + $0x1f2] sm:$0xff] }
 0x2f1   : > { %v16978_v23 = vpop.f32.mrf.mxu1  ;;  %17321 = vmatmul.mubr.msk.f32.gmra.mxu1 %vm430_vm0, %v14107_v29  ;;  %17519 = vmatprep.mubr.msk.f32.mxu0 %vm430_vm0, %v14366_v16  ;;  %v14367_v61 = vld [vmem:[%s18749_s9 + $0x210] sm:$0xff]  ;;  %v24279_v22 = vld [vmem:[#allocation16_spill] sm:$0xff] }
 0x2f2   : > { %24274 = vst [vmem:[#allocation12_spill] sm:$0xff] %v21129_v9  ;;  %v21134_v52 = vadd.f32 %v6247_v0, %v5250_v39  ;;  %v5253_v20 = vadd.f32 %v16978_v23, %v24277_v13  ;;  %17323 = vmatprep.mubr.msk.f32.mxu1 %vm430_vm0, %v14108_v15  ;;  %v6257_v36 = vpop.f32.mrf.mxu0  ;;  %v14368_v9 = vld [vmem:[%s18749_s9 + $0x218] sm:$0xff]  ;;  %v24281_v15 = vld [vmem:[#allocation17_spill] sm:$0xff] }
 0x2f3   : > { %v4909_v24 = vpop.f32.mrf.mxu1 }
 0x2f4   : > { %24276 = vst [vmem:[#allocation13_spill] sm:$0xff] %v21134_v52  ;;  %v21143_v29 = vadd.f32 %v17174_v21, %v5253_v20  ;;  %v5252_v0 = vadd.f32 %v4909_v24, %v24279_v22  ;;  %v17177_v23 = vpop.f32.mrf.mxu0  ;;  %17520 = vmatmul.mubr.msk.f32.gmra.mxu0 %vm430_vm0, %v14367_v61  ;;  %v14111_v52 = vld [vmem:[%s18749_s9 + $0x1fa] sm:$0xff]  ;;  %v14112_v22 = vld [vmem:[%s18749_s9 + $0x20a] sm:$0xff] }
 0x2f5   : > { %v16981_v39 = vpop.f32.mrf.mxu1  ;;  %17324 = vmatmul.mubr.msk.f32.gmra.mxu1 %vm430_vm0, %v14109_v1  ;;  %17522 = vmatprep.mubr.msk.f32.mxu0 %vm430_vm0, %v14368_v9  ;;  %v14369_v21 = vld [vmem:[%s18749_s9 + $0x220] sm:$0xff]  ;;  %v24283_v61 = vld [vmem:[#allocation18_spill] sm:$0xff] }
 0x2f6   : > { %24278 = vst [vmem:[#allocation14_spill] sm:$0xff] %v21143_v29  ;;  %v21148_v16 = vadd.f32 %v6257_v36, %v5252_v0  ;;  %v5255_v13 = vadd.f32 %v16981_v39, %v24281_v15  ;;  %17326 = vmatprep.mubr.msk.f32.mxu1 %vm430_vm0, %v14110_v5  ;;  %v6267_v24 = vpop.f32.mrf.mxu0  ;;  %v14370_v29 = vld [vmem:[%s18749_s9 + $0x230] sm:$0xff] }
 0x2f7   : > { %v4919_v20 = vpop.f32.mrf.mxu1  ;;  %v24285_v5 = vld [vmem:[#allocation19_spill] sm:$0xff] }
 0x2f8   : > { %24280 = vst [vmem:[#allocation15_spill] sm:$0xff] %v21148_v16  ;;  %v21157_v1 = vadd.f32 %v17177_v23, %v5255_v13  ;;  %v5254_v36 = vadd.f32 %v4919_v20, %v24283_v61  ;;  %v17180_v39 = vpop.f32.mrf.mxu0  ;;  %17523 = vmatmul.mubr.msk.f32.gmra.mxu0 %vm430_vm0, %v14369_v21  ;;  %v14113_v16 = vld [vmem:[%s18749_s9 + $0x212] sm:$0xff]  ;;  %v14114_v61 = vld [vmem:[%s18749_s9 + $0x21a] sm:$0xff] }
 0x2f9   : > { %v16984_v0 = vpop.f32.mrf.mxu1  ;;  %17327 = vmatmul.mubr.msk.f32.gmra.mxu1 %vm430_vm0, %v14111_v52  ;;  %17525 = vmatprep.mubr.msk.f32.mxu0 %vm430_vm0, %v14370_v29  ;;  %v14371_v23 = vld [vmem:[%s18749_s9 + $0x238] sm:$0xff] }
 0x2fa   : > { %24282 = vst [vmem:[#allocation16_spill] sm:$0xff] %v21157_v1  ;;  %v21162_v9 = vadd.f32 %v6267_v24, %v5254_v36  ;;  %v5257_v15 = vadd.f32 %v16984_v0, %v24285_v5  ;;  %17329 = vmatprep.mubr.msk.f32.mxu1 %vm430_vm0, %v14112_v22  ;;  %v6277_v20 = vpop.f32.mrf.mxu0  ;;  %v14372_v1 = vld [vmem:[%s18749_s9 + $0x240] sm:$0xff]  ;;  %v24287_v21 = vld [vmem:[#allocation20_spill] sm:$0xff] }
 0x2fb   : > { %v4929_v13 = vpop.f32.mrf.mxu1  ;;  %v24289_v22 = vld [vmem:[#allocation21_spill] sm:$0xff] }
 0x2fc   : > { %24284 = vst [vmem:[#allocation17_spill] sm:$0xff] %v21162_v9  ;;  %v21171_v52 = vadd.f32 %v17180_v39, %v5257_v15  ;;  %v5256_v24 = vadd.f32 %v4929_v13, %v24287_v21  ;;  %v17183_v0 = vpop.f32.mrf.mxu0  ;;  %17526 = vmatmul.mubr.msk.f32.gmra.mxu0 %vm430_vm0, %v14371_v23  ;;  %v14115_v9 = vld [vmem:[%s18749_s9 + $0x222] sm:$0xff]  ;;  %v14116_v21 = vld [vmem:[%s18749_s9 + $0x232] sm:$0xff] }
 0x2fd   : > { %v16987_v36 = vpop.f32.mrf.mxu1  ;;  %17330 = vmatmul.mubr.msk.f32.gmra.mxu1 %vm430_vm0, %v14113_v16  ;;  %17528 = vmatprep.mubr.msk.f32.mxu0 %vm430_vm0, %v14372_v1  ;;  %v14373_v39 = vld [vmem:[%s18749_s9 + $0x248] sm:$0xff] }
 0x2fe   : > { %24286 = vst [vmem:[#allocation18_spill] sm:$0xff] %v21171_v52  ;;  %v21176_v29 = vadd.f32 %v6277_v20, %v5256_v24  ;;  %v5259_v5 = vadd.f32 %v16987_v36, %v24289_v22  ;;  %17332 = vmatprep.mubr.msk.f32.mxu1 %vm430_vm0, %v14114_v61  ;;  %v6287_v13 = vpop.f32.mrf.mxu0  ;;  %v14374_v52 = vld [vmem:[%s18749_s9 + $0x258] sm:$0xff]  ;;  %v24291_v23 = vld [vmem:[#allocation22_spill] sm:$0xff]  ;;  %v24293_v61 = vld [vmem:[#allocation23_spill] sm:$0xff] }
 0x2ff   : > { %v4939_v15 = vpop.f32.mrf.mxu1 }
 0x300   : > { %24288 = vst [vmem:[#allocation19_spill] sm:$0xff] %v21176_v29  ;;  %v21185_v16 = vadd.f32 %v17183_v0, %v5259_v5  ;;  %v5258_v20 = vadd.f32 %v4939_v15, %v24291_v23  ;;  %v17186_v36 = vpop.f32.mrf.mxu0  ;;  %17529 = vmatmul.mubr.msk.f32.gmra.mxu0 %vm430_vm0, %v14373_v39  ;;  %v14117_v29 = vld [vmem:[%s18749_s9 + $0x23a] sm:$0xff]  ;;  %v14118_v23 = vld [vmem:[%s18749_s9 + $0x242] sm:$0xff] }
 0x301   : > { %v16990_v24 = vpop.f32.mrf.mxu1  ;;  %17333 = vmatmul.mubr.msk.f32.gmra.mxu1 %vm430_vm0, %v14115_v9  ;;  %17531 = vmatprep.mubr.msk.f32.mxu0 %vm430_vm0, %v14374_v52  ;;  %v14375_v0 = vld [vmem:[%s18749_s9 + $0x260] sm:$0xff]  ;;  %v24295_v39 = vld [vmem:[#allocation24_spill] sm:$0xff] }
 0x302   : > { %24290 = vst [vmem:[#allocation20_spill] sm:$0xff] %v21185_v16  ;;  %v21190_v1 = vadd.f32 %v6287_v13, %v5258_v20  ;;  %v5261_v22 = vadd.f32 %v16990_v24, %v24293_v61  ;;  %17335 = vmatprep.mubr.msk.f32.mxu1 %vm430_vm0, %v14116_v21  ;;  %v6297_v15 = vpop.f32.mrf.mxu0  ;;  %v14376_v16 = vld [vmem:[%s18749_s9 + $0x268] sm:$0xff]  ;;  %v24297_v21 = vld [vmem:[#allocation25_spill] sm:$0xff] }
 0x303   : > { %v4949_v5 = vpop.f32.mrf.mxu1 }
 0x304   : > { %24292 = vst [vmem:[#allocation21_spill] sm:$0xff] %v21190_v1  ;;  %v21199_v9 = vadd.f32 %v17186_v36, %v5261_v22  ;;  %v5260_v13 = vadd.f32 %v4949_v5, %v24295_v39  ;;  %v17189_v24 = vpop.f32.mrf.mxu0  ;;  %17532 = vmatmul.mubr.msk.f32.gmra.mxu0 %vm430_vm0, %v14375_v0  ;;  %v14119_v1 = vld [vmem:[%s18749_s9 + $0x24a] sm:$0xff]  ;;  %v14120_v39 = vld [vmem:[%s18749_s9 + $0x25a] sm:$0xff] }
 0x305   : > { %v16993_v20 = vpop.f32.mrf.mxu1  ;;  %17336 = vmatmul.mubr.msk.f32.gmra.mxu1 %vm430_vm0, %v14117_v29  ;;  %17534 = vmatprep.mubr.msk.f32.mxu0 %vm430_vm0, %v14376_v16  ;;  %v14377_v36 = vld [vmem:[%s18749_s9 + $0x270] sm:$0xff]  ;;  %v24299_v0 = vld [vmem:[#allocation26_spill] sm:$0xff] }
 0x306   : > { %24294 = vst [vmem:[#allocation22_spill] sm:$0xff] %v21199_v9  ;;  %v21204_v52 = vadd.f32 %v6297_v15, %v5260_v13  ;;  %v5263_v61 = vadd.f32 %v16993_v20, %v24297_v21  ;;  %17338 = vmatprep.mubr.msk.f32.mxu1 %vm430_vm0, %v14118_v23  ;;  %v6307_v5 = vpop.f32.mrf.mxu0  ;;  %v14378_v9 = vld [vmem:[%s18749_s9 + $0x280] sm:$0xff]  ;;  %v24301_v23 = vld [vmem:[#allocation27_spill] sm:$0xff] }
 0x307   : > { %v4959_v22 = vpop.f32.mrf.mxu1 }
 0x308   : > { %24296 = vst [vmem:[#allocation23_spill] sm:$0xff] %v21204_v52  ;;  %v21213_v29 = vadd.f32 %v17189_v24, %v5263_v61  ;;  %v5262_v15 = vadd.f32 %v4959_v22, %v24299_v0  ;;  %v17192_v20 = vpop.f32.mrf.mxu0  ;;  %17535 = vmatmul.mubr.msk.f32.gmra.mxu0 %vm430_vm0, %v14377_v36  ;;  %v14121_v52 = vld [vmem:[%s18749_s9 + $0x262] sm:$0xff]  ;;  %v14122_v0 = vld [vmem:[%s18749_s9 + $0x26a] sm:$0xff]  ;;  %v24303_v36 = vld [vmem:[#allocation28_spill] sm:$0xff] }
 0x309   : > { %v16996_v13 = vpop.f32.mrf.mxu1  ;;  %17339 = vmatmul.mubr.msk.f32.gmra.mxu1 %vm430_vm0, %v14119_v1  ;;  %17537 = vmatprep.mubr.msk.f32.mxu0 %vm430_vm0, %v14378_v9  ;;  %v14379_v24 = vld [vmem:[%s18749_s9 + $0x288] sm:$0xff] }
 0x30a   : > { %24298 = vst [vmem:[#allocation24_spill] sm:$0xff] %v21213_v29  ;;  %v21218_v16 = vadd.f32 %v6307_v5, %v5262_v15  ;;  %v5265_v21 = vadd.f32 %v16996_v13, %v24301_v23  ;;  %17341 = vmatprep.mubr.msk.f32.mxu1 %vm430_vm0, %v14120_v39  ;;  %v6317_v22 = vpop.f32.mrf.mxu0  ;;  %v14380_v29 = vld [vmem:[%s18749_s9 + $0x290] sm:$0xff]  ;;  %v24305_v39 = vld [vmem:[#allocation29_spill] sm:$0xff] }
 0x30b   : > { %v4969_v61 = vpop.f32.mrf.mxu1 }
 0x30c   : > { %24300 = vst [vmem:[#allocation25_spill] sm:$0xff] %v21218_v16  ;;  %v21227_v1 = vadd.f32 %v17192_v20, %v5265_v21  ;;  %v5264_v5 = vadd.f32 %v4969_v61, %v24303_v36  ;;  %v17195_v13 = vpop.f32.mrf.mxu0  ;;  %17538 = vmatmul.mubr.msk.f32.gmra.mxu0 %vm430_vm0, %v14379_v24  ;;  %v14123_v16 = vld [vmem:[%s18749_s9 + $0x272] sm:$0xff]  ;;  %v14124_v36 = vld [vmem:[%s18749_s9 + $0x282] sm:$0xff] }
 0x30d   : > { %v16999_v15 = vpop.f32.mrf.mxu1  ;;  %17342 = vmatmul.mubr.msk.f32.gmra.mxu1 %vm430_vm0, %v14121_v52  ;;  %17540 = vmatprep.mubr.msk.f32.mxu0 %vm430_vm0, %v14380_v29  ;;  %v14381_v20 = vld [vmem:[%s18749_s9 + $0x298] sm:$0xff]  ;;  %v24307_v24 = vld [vmem:[#allocation30_spill] sm:$0xff] }
 0x30e   : > { %24302 = vst [vmem:[#allocation26_spill] sm:$0xff] %v21227_v1  ;;  %v21232_v9 = vadd.f32 %v6317_v22, %v5264_v5  ;;  %v5267_v23 = vadd.f32 %v16999_v15, %v24305_v39  ;;  %17344 = vmatprep.mubr.msk.f32.mxu1 %vm430_vm0, %v14122_v0  ;;  %v6327_v61 = vpop.f32.mrf.mxu0  ;;  %v14382_v1 = vld [vmem:[%s18749_s9 + $0x2a8] sm:$0xff]  ;;  %v24309_v0 = vld [vmem:[#allocation31_spill] sm:$0xff] }
 0x30f   : > { %v4979_v21 = vpop.f32.mrf.mxu1 }
 0x310   : > { %24304 = vst [vmem:[#allocation27_spill] sm:$0xff] %v21232_v9  ;;  %v21241_v52 = vadd.f32 %v17195_v13, %v5267_v23  ;;  %v5266_v22 = vadd.f32 %v4979_v21, %v24307_v24  ;;  %v17198_v15 = vpop.f32.mrf.mxu0  ;;  %17541 = vmatmul.mubr.msk.f32.gmra.mxu0 %vm430_vm0, %v14381_v20  ;;  %v14125_v9 = vld [vmem:[%s18749_s9 + $0x28a] sm:$0xff]  ;;  %v14126_v24 = vld [vmem:[%s18749_s9 + $0x292] sm:$0xff] }
 0x311   : > { %v17002_v5 = vpop.f32.mrf.mxu1  ;;  %17345 = vmatmul.mubr.msk.f32.gmra.mxu1 %vm430_vm0, %v14123_v16  ;;  %17543 = vmatprep.mubr.msk.f32.mxu0 %vm430_vm0, %v14382_v1  ;;  %v14383_v13 = vld [vmem:[%s18749_s9 + $0x2b0] sm:$0xff]  ;;  %v24311_v20 = vld [vmem:[#allocation32_spill] sm:$0xff] }
 0x312   : > { %24306 = vst [vmem:[#allocation28_spill] sm:$0xff] %v21241_v52  ;;  %v21246_v29 = vadd.f32 %v6327_v61, %v5266_v22  ;;  %v5269_v39 = vadd.f32 %v17002_v5, %v24309_v0  ;;  %17347 = vmatprep.mubr.msk.f32.mxu1 %vm430_vm0, %v14124_v36  ;;  %v6337_v21 = vpop.f32.mrf.mxu0  ;;  %v14384_v52 = vld [vmem:[%s18749_s9 + $0x2b8] sm:$0xff]  ;;  %v24313_v36 = vld [vmem:[#allocation33_spill] sm:$0xff] }
 0x313   : > { %v4989_v23 = vpop.f32.mrf.mxu1 }
 0x314   : > { %24308 = vst [vmem:[#allocation29_spill] sm:$0xff] %v21246_v29  ;;  %v21255_v16 = vadd.f32 %v17198_v15, %v5269_v39  ;;  %v5268_v61 = vadd.f32 %v4989_v23, %v24311_v20  ;;  %v17201_v5 = vpop.f32.mrf.mxu0  ;;  %17544 = vmatmul.mubr.msk.f32.gmra.mxu0 %vm430_vm0, %v14383_v13  ;;  %v14127_v29 = vld [vmem:[%s18749_s9 + $0x29a] sm:$0xff]  ;;  %v14128_v20 = vld [vmem:[%s18749_s9 + $0x2aa] sm:$0xff] }
 0x315   : > { %v17005_v22 = vpop.f32.mrf.mxu1  ;;  %17348 = vmatmul.mubr.msk.f32.gmra.mxu1 %vm430_vm0, %v14125_v9  ;;  %17546 = vmatprep.mubr.msk.f32.mxu0 %vm430_vm0, %v14384_v52  ;;  %v14385_v15 = vld [vmem:[%s18749_s9 + $0x2c0] sm:$0xff]  ;;  %v24315_v13 = vld [vmem:[#allocation34_spill] sm:$0xff] }
 0x316   : > { %24310 = vst [vmem:[#allocation30_spill] sm:$0xff] %v21255_v16  ;;  %v21260_v1 = vadd.f32 %v6337_v21, %v5268_v61  ;;  %v5271_v0 = vadd.f32 %v17005_v22, %v24313_v36  ;;  %17350 = vmatprep.mubr.msk.f32.mxu1 %vm430_vm0, %v14126_v24  ;;  %v6347_v23 = vpop.f32.mrf.mxu0  ;;  %v14386_v16 = vld [vmem:[%s18749_s9 + $0x2d0] sm:$0xff] }
 0x317   : > { %v4999_v39 = vpop.f32.mrf.mxu1  ;;  %v24317_v24 = vld [vmem:[#allocation35_spill] sm:$0xff] }
 0x318   : > { %24312 = vst [vmem:[#allocation31_spill] sm:$0xff] %v21260_v1  ;;  %v21269_v9 = vadd.f32 %v17201_v5, %v5271_v0  ;;  %v5270_v21 = vadd.f32 %v4999_v39, %v24315_v13  ;;  %v17204_v22 = vpop.f32.mrf.mxu0  ;;  %17547 = vmatmul.mubr.msk.f32.gmra.mxu0 %vm430_vm0, %v14385_v15  ;;  %v14129_v1 = vld [vmem:[%s18749_s9 + $0x2b2] sm:$0xff]  ;;  %v14130_v13 = vld [vmem:[%s18749_s9 + $0x2ba] sm:$0xff] }
 0x319   : > { %v17008_v61 = vpop.f32.mrf.mxu1  ;;  %17351 = vmatmul.mubr.msk.f32.gmra.mxu1 %vm430_vm0, %v14127_v29  ;;  %17549 = vmatprep.mubr.msk.f32.mxu0 %vm430_vm0, %v14386_v16  ;;  %v14387_v5 = vld [vmem:[%s18749_s9 + $0x2d8] sm:$0xff] }
 0x31a   : > { %24314 = vst [vmem:[#allocation32_spill] sm:$0xff] %v21269_v9  ;;  %v21274_v52 = vadd.f32 %v6347_v23, %v5270_v21  ;;  %v5273_v36 = vadd.f32 %v17008_v61, %v24317_v24  ;;  %17353 = vmatprep.mubr.msk.f32.mxu1 %vm430_vm0, %v14128_v20  ;;  %v6357_v39 = vpop.f32.mrf.mxu0  ;;  %v14388_v9 = vld [vmem:[%s18749_s9 + $0x2e0] sm:$0xff]  ;;  %v24319_v15 = vld [vmem:[#allocation36_spill] sm:$0xff] }
 0x31b   : > { %v5009_v0 = vpop.f32.mrf.mxu1  ;;  %v24321_v20 = vld [vmem:[#allocation37_spill] sm:$0xff] }
 0x31c   : > { %24316 = vst [vmem:[#allocation33_spill] sm:$0xff] %v21274_v52  ;;  %v21283_v29 = vadd.f32 %v17204_v22, %v5273_v36  ;;  %v5272_v23 = vadd.f32 %v5009_v0, %v24319_v15  ;;  %v17207_v61 = vpop.f32.mrf.mxu0  ;;  %17550 = vmatmul.mubr.msk.f32.gmra.mxu0 %vm430_vm0, %v14387_v5  ;;  %v14131_v52 = vld [vmem:[%s18749_s9 + $0x2c2] sm:$0xff]  ;;  %v14132_v15 = vld [vmem:[%s18749_s9 + $0x2d2] sm:$0xff] }
 0x31d   : > { %v17011_v21 = vpop.f32.mrf.mxu1  ;;  %17354 = vmatmul.mubr.msk.f32.gmra.mxu1 %vm430_vm0, %v14129_v1  ;;  %17552 = vmatprep.mubr.msk.f32.mxu0 %vm430_vm0, %v14388_v9  ;;  %v14389_v22 = vld [vmem:[%s18749_s9 + $0x2e8] sm:$0xff] }
 0x31e   : > { %24318 = vst [vmem:[#allocation34_spill] sm:$0xff] %v21283_v29  ;;  %v21288_v16 = vadd.f32 %v6357_v39, %v5272_v23  ;;  %v5275_v24 = vadd.f32 %v17011_v21, %v24321_v20  ;;  %17356 = vmatprep.mubr.msk.f32.mxu1 %vm430_vm0, %v14130_v13  ;;  %v6367_v0 = vpop.f32.mrf.mxu0  ;;  %v14390_v29 = vld [vmem:[%s18749_s9 + $0x2f8] sm:$0xff]  ;;  %v24323_v5 = vld [vmem:[#allocation38_spill] sm:$0xff]  ;;  %v24325_v13 = vld [vmem:[#allocation39_spill] sm:$0xff] }
 0x31f   : > { %v5019_v36 = vpop.f32.mrf.mxu1 }
 0x320   : > { %24320 = vst [vmem:[#allocation35_spill] sm:$0xff] %v21288_v16  ;;  %v21297_v1 = vadd.f32 %v17207_v61, %v5275_v24  ;;  %v5274_v39 = vadd.f32 %v5019_v36, %v24323_v5  ;;  %v17210_v21 = vpop.f32.mrf.mxu0  ;;  %17553 = vmatmul.mubr.msk.f32.gmra.mxu0 %vm430_vm0, %v14389_v22  ;;  %v14133_v16 = vld [vmem:[%s18749_s9 + $0x2da] sm:$0xff]  ;;  %v14134_v5 = vld [vmem:[%s18749_s9 + $0x2e2] sm:$0xff] }
 0x321   : > { %v17014_v23 = vpop.f32.mrf.mxu1  ;;  %17357 = vmatmul.mubr.msk.f32.gmra.mxu1 %vm430_vm0, %v14131_v52  ;;  %17555 = vmatprep.mubr.msk.f32.mxu0 %vm430_vm0, %v14390_v29  ;;  %v14391_v61 = vld [vmem:[%s18749_s9 + $0x300] sm:$0xff]  ;;  %v24327_v22 = vld [vmem:[#allocation40_spill] sm:$0xff] }
 0x322   : > { %24322 = vst [vmem:[#allocation36_spill] sm:$0xff] %v21297_v1  ;;  %v21302_v9 = vadd.f32 %v6367_v0, %v5274_v39  ;;  %v5277_v20 = vadd.f32 %v17014_v23, %v24325_v13  ;;  %17359 = vmatprep.mubr.msk.f32.mxu1 %vm430_vm0, %v14132_v15  ;;  %v6377_v36 = vpop.f32.mrf.mxu0  ;;  %v14392_v1 = vld [vmem:[%s18749_s9 + $0x308] sm:$0xff]  ;;  %v24329_v15 = vld [vmem:[#allocation41_spill] sm:$0xff] }
 0x323   : > { %v5029_v24 = vpop.f32.mrf.mxu1 }
 0x324   : > { %24324 = vst [vmem:[#allocation37_spill] sm:$0xff] %v21302_v9  ;;  %v21311_v52 = vadd.f32 %v17210_v21, %v5277_v20  ;;  %v5276_v0 = vadd.f32 %v5029_v24, %v24327_v22  ;;  %v17213_v23 = vpop.f32.mrf.mxu0  ;;  %17556 = vmatmul.mubr.msk.f32.gmra.mxu0 %vm430_vm0, %v14391_v61  ;;  %v14135_v9 = vld [vmem:[%s18749_s9 + $0x2ea] sm:$0xff]  ;;  %v14136_v22 = vld [vmem:[%s18749_s9 + $0x2fa] sm:$0xff] }
 0x325   : > { %v17017_v39 = vpop.f32.mrf.mxu1  ;;  %17360 = vmatmul.mubr.msk.f32.gmra.mxu1 %vm430_vm0, %v14133_v16  ;;  %17558 = vmatprep.mubr.msk.f32.mxu0 %vm430_vm0, %v14392_v1  ;;  %v14393_v21 = vld [vmem:[%s18749_s9 + $0x310] sm:$0xff]  ;;  %v24331_v61 = vld [vmem:[#allocation42_spill] sm:$0xff] }
 0x326   : > { %24326 = vst [vmem:[#allocation38_spill] sm:$0xff] %v21311_v52  ;;  %v21316_v29 = vadd.f32 %v6377_v36, %v5276_v0  ;;  %v5279_v13 = vadd.f32 %v17017_v39, %v24329_v15  ;;  %17362 = vmatprep.mubr.msk.f32.mxu1 %vm430_vm0, %v14134_v5  ;;  %v6387_v24 = vpop.f32.mrf.mxu0  ;;  %v14394_v52 = vld [vmem:[%s18749_s9 + $0x320] sm:$0xff]  ;;  %v24333_v5 = vld [vmem:[#allocation43_spill] sm:$0xff] }
 0x327   : > { %v5039_v20 = vpop.f32.mrf.mxu1 }
 0x328   : > { %24328 = vst [vmem:[#allocation39_spill] sm:$0xff] %v21316_v29  ;;  %v21325_v16 = vadd.f32 %v17213_v23, %v5279_v13  ;;  %v5278_v36 = vadd.f32 %v5039_v20, %v24331_v61  ;;  %v17216_v39 = vpop.f32.mrf.mxu0  ;;  %17559 = vmatmul.mubr.msk.f32.gmra.mxu0 %vm430_vm0, %v14393_v21  ;;  %v14137_v29 = vld [vmem:[%s18749_s9 + $0x302] sm:$0xff]  ;;  %v14138_v61 = vld [vmem:[%s18749_s9 + $0x30a] sm:$0xff]  ;;  %v24335_v21 = vld [vmem:[#allocation44_spill] sm:$0xff] }
 0x329   : > { %v17020_v0 = vpop.f32.mrf.mxu1  ;;  %17363 = vmatmul.mubr.msk.f32.gmra.mxu1 %vm430_vm0, %v14135_v9  ;;  %17561 = vmatprep.mubr.msk.f32.mxu0 %vm430_vm0, %v14394_v52  ;;  %v14395_v23 = vld [vmem:[%s18749_s9 + $0x328] sm:$0xff] }
 0x32a   : > { %24330 = vst [vmem:[#allocation40_spill] sm:$0xff] %v21325_v16  ;;  %v21330_v1 = vadd.f32 %v6387_v24, %v5278_v36  ;;  %v5281_v15 = vadd.f32 %v17020_v0, %v24333_v5  ;;  %17365 = vmatprep.mubr.msk.f32.mxu1 %vm430_vm0, %v14136_v22  ;;  %v6397_v20 = vpop.f32.mrf.mxu0  ;;  %v14396_v16 = vld [vmem:[%s18749_s9 + $0x330] sm:$0xff]  ;;  %v24337_v22 = vld [vmem:[#allocation45_spill] sm:$0xff] }
 0x32b   : > { %v5049_v13 = vpop.f32.mrf.mxu1 }
 0x32c   : > { %24332 = vst [vmem:[#allocation41_spill] sm:$0xff] %v21330_v1  ;;  %v21339_v9 = vadd.f32 %v17216_v39, %v5281_v15  ;;  %v5280_v24 = vadd.f32 %v5049_v13, %v24335_v21  ;;  %v17219_v0 = vpop.f32.mrf.mxu0  ;;  %17562 = vmatmul.mubr.msk.f32.gmra.mxu0 %vm430_vm0, %v14395_v23  ;;  %v14139_v1 = vld [vmem:[%s18749_s9 + $0x312] sm:$0xff]  ;;  %v14140_v21 = vld [vmem:[%s18749_s9 + $0x322] sm:$0xff] }
 0x32d   : > { %v17023_v36 = vpop.f32.mrf.mxu1  ;;  %17366 = vmatmul.mubr.msk.f32.gmra.mxu1 %vm430_vm0, %v14137_v29  ;;  %17564 = vmatprep.mubr.msk.f32.mxu0 %vm430_vm0, %v14396_v16  ;;  %v14397_v39 = vld [vmem:[%s18749_s9 + $0x338] sm:$0xff]  ;;  %v24339_v23 = vld [vmem:[#allocation46_spill] sm:$0xff] }
 0x32e   : > { %24334 = vst [vmem:[#allocation42_spill] sm:$0xff] %v21339_v9  ;;  %v21344_v52 = vadd.f32 %v6397_v20, %v5280_v24  ;;  %v5283_v5 = vadd.f32 %v17023_v36, %v24337_v22  ;;  %17368 = vmatprep.mubr.msk.f32.mxu1 %vm430_vm0, %v14138_v61  ;;  %v6407_v13 = vpop.f32.mrf.mxu0  ;;  %v14398_v9 = vld [vmem:[%s18749_s9 + $0x348] sm:$0xff]  ;;  %v24341_v61 = vld [vmem:[#allocation47_spill] sm:$0xff] }
 0x32f   : > { %v5059_v15 = vpop.f32.mrf.mxu1 }
 0x330   : > { %24336 = vst [vmem:[#allocation43_spill] sm:$0xff] %v21344_v52  ;;  %v21353_v29 = vadd.f32 %v17219_v0, %v5283_v5  ;;  %v5282_v20 = vadd.f32 %v5059_v15, %v24339_v23  ;;  %v17222_v36 = vpop.f32.mrf.mxu0  ;;  %17565 = vmatmul.mubr.msk.f32.gmra.mxu0 %vm430_vm0, %v14397_v39  ;;  %v14141_v52 = vld [vmem:[%s18749_s9 + $0x32a] sm:$0xff]  ;;  %v14142_v23 = vld [vmem:[%s18749_s9 + $0x332] sm:$0xff] }
 0x331   : > { %v17026_v24 = vpop.f32.mrf.mxu1  ;;  %17369 = vmatmul.mubr.msk.f32.gmra.mxu1 %vm430_vm0, %v14139_v1  ;;  %17567 = vmatprep.mubr.msk.f32.mxu0 %vm430_vm0, %v14398_v9  ;;  %v14399_v0 = vld [vmem:[%s18749_s9 + $0x350] sm:$0xff]  ;;  %v24343_v39 = vld [vmem:[#allocation48_spill] sm:$0xff] }
 0x332   : > { %24338 = vst [vmem:[#allocation44_spill] sm:$0xff] %v21353_v29  ;;  %v21358_v16 = vadd.f32 %v6407_v13, %v5282_v20  ;;  %v5285_v22 = vadd.f32 %v17026_v24, %v24341_v61  ;;  %17371 = vmatprep.mubr.msk.f32.mxu1 %vm430_vm0, %v14140_v21  ;;  %v6417_v15 = vpop.f32.mrf.mxu0  ;;  %v14400_v29 = vld [vmem:[%s18749_s9 + $0x358] sm:$0xff]  ;;  %v24345_v21 = vld [vmem:[#allocation49_spill] sm:$0xff] }
 0x333   : > { %v5069_v5 = vpop.f32.mrf.mxu1 }
 0x334   : > { %24340 = vst [vmem:[#allocation45_spill] sm:$0xff] %v21358_v16  ;;  %v21367_v1 = vadd.f32 %v17222_v36, %v5285_v22  ;;  %v5284_v13 = vadd.f32 %v5069_v5, %v24343_v39  ;;  %v17225_v24 = vpop.f32.mrf.mxu0  ;;  %17568 = vmatmul.mubr.msk.f32.gmra.mxu0 %vm430_vm0, %v14399_v0  ;;  %v14143_v16 = vld [vmem:[%s18749_s9 + $0x33a] sm:$0xff]  ;;  %v14144_v39 = vld [vmem:[%s18749_s9 + $0x34a] sm:$0xff] }
 0x335   : > { %v17029_v20 = vpop.f32.mrf.mxu1  ;;  %17372 = vmatmul.mubr.msk.f32.gmra.mxu1 %vm430_vm0, %v14141_v52  ;;  %17570 = vmatprep.mubr.msk.f32.mxu0 %vm430_vm0, %v14400_v29  ;;  %v14401_v36 = vld [vmem:[%s18749_s9 + $0x360] sm:$0xff]  ;;  %v24347_v0 = vld [vmem:[#allocation50_spill] sm:$0xff] }
 0x336   : > { %24342 = vst [vmem:[#allocation46_spill] sm:$0xff] %v21367_v1  ;;  %v21372_v9 = vadd.f32 %v6417_v15, %v5284_v13  ;;  %v5287_v61 = vadd.f32 %v17029_v20, %v24345_v21  ;;  %17374 = vmatprep.mubr.msk.f32.mxu1 %vm430_vm0, %v14142_v23  ;;  %v6427_v5 = vpop.f32.mrf.mxu0  ;;  %v14402_v1 = vld [vmem:[%s18749_s9 + $0x370] sm:$0xff] }
 0x337   : > { %v5079_v22 = vpop.f32.mrf.mxu1  ;;  %v24349_v23 = vld [vmem:[#allocation51_spill] sm:$0xff] }
 0x338   : > { %24344 = vst [vmem:[#allocation47_spill] sm:$0xff] %v21372_v9  ;;  %v21381_v52 = vadd.f32 %v17225_v24, %v5287_v61  ;;  %v5286_v15 = vadd.f32 %v5079_v22, %v24347_v0  ;;  %v17228_v20 = vpop.f32.mrf.mxu0  ;;  %17571 = vmatmul.mubr.msk.f32.gmra.mxu0 %vm430_vm0, %v14401_v36  ;;  %v14145_v9 = vld [vmem:[%s18749_s9 + $0x352] sm:$0xff]  ;;  %v14146_v0 = vld [vmem:[%s18749_s9 + $0x35a] sm:$0xff] }
 0x339   : > { %v17032_v13 = vpop.f32.mrf.mxu1  ;;  %17375 = vmatmul.mubr.msk.f32.gmra.mxu1 %vm430_vm0, %v14143_v16  ;;  %17573 = vmatprep.mubr.msk.f32.mxu0 %vm430_vm0, %v14402_v1  ;;  %v14403_v24 = vld [vmem:[%s18749_s9 + $0x378] sm:$0xff] }
 0x33a   : > { %24346 = vst [vmem:[#allocation48_spill] sm:$0xff] %v21381_v52  ;;  %v21386_v29 = vadd.f32 %v6427_v5, %v5286_v15  ;;  %v5289_v21 = vadd.f32 %v17032_v13, %v24349_v23  ;;  %17377 = vmatprep.mubr.msk.f32.mxu1 %vm430_vm0, %v14144_v39  ;;  %v6437_v22 = vpop.f32.mrf.mxu0  ;;  %v14404_v52 = vld [vmem:[%s18749_s9 + $0x380] sm:$0xff]  ;;  %v24351_v36 = vld [vmem:[#allocation52_spill] sm:$0xff]  ;;  %v24353_v39 = vld [vmem:[#allocation54_spill] sm:$0xff] }
 0x33b   : > { %v5089_v61 = vpop.f32.mrf.mxu1 }
 0x33c   : > { %24348 = vst [vmem:[#allocation49_spill] sm:$0xff] %v21386_v29  ;;  %v21395_v16 = vadd.f32 %v17228_v20, %v5289_v21  ;;  %v5288_v5 = vadd.f32 %v5089_v61, %v24351_v36  ;;  %v17231_v13 = vpop.f32.mrf.mxu0  ;;  %17574 = vmatmul.mubr.msk.f32.gmra.mxu0 %vm430_vm0, %v14403_v24  ;;  %v14147_v29 = vld [vmem:[%s18749_s9 + $0x362] sm:$0xff]  ;;  %v14148_v36 = vld [vmem:[%s18749_s9 + $0x372] sm:$0xff] }
 0x33d   : > { %v17035_v15 = vpop.f32.mrf.mxu1  ;;  %17378 = vmatmul.mubr.msk.f32.gmra.mxu1 %vm430_vm0, %v14145_v9  ;;  %17576 = vmatprep.mubr.msk.f32.mxu0 %vm430_vm0, %v14404_v52  ;;  %v14405_v20 = vld [vmem:[%s18749_s9 + $0x388] sm:$0xff]  ;;  %v24355_v24 = vld [vmem:[#allocation56_spill] sm:$0xff] }
 0x33e   : > { %24350 = vst [vmem:[#allocation50_spill] sm:$0xff] %v21395_v16  ;;  %v21400_v1 = vadd.f32 %v6437_v22, %v5288_v5  ;;  %v5291_v23 = vadd.f32 %v17035_v15, %v24353_v39  ;;  %17380 = vmatprep.mubr.msk.f32.mxu1 %vm430_vm0, %v14146_v0  ;;  %v6447_v61 = vpop.f32.mrf.mxu0  ;;  %v14406_v16 = vld [vmem:[%s18749_s9 + $0x398] sm:$0xff]  ;;  %v24357_v0 = vld [vmem:[#allocation58_spill] sm:$0xff] }
 0x33f   : > { %v5099_v21 = vpop.f32.mrf.mxu1 }
 0x340   : > { %24352 = vst [vmem:[#allocation51_spill] sm:$0xff] %v21400_v1  ;;  %v21409_v9 = vadd.f32 %v17231_v13, %v5291_v23  ;;  %v5290_v22 = vadd.f32 %v5099_v21, %v24355_v24  ;;  %v17234_v15 = vpop.f32.mrf.mxu0  ;;  %17577 = vmatmul.mubr.msk.f32.gmra.mxu0 %vm430_vm0, %v14405_v20  ;;  %v14149_v1 = vld [vmem:[%s18749_s9 + $0x37a] sm:$0xff]  ;;  %v14150_v24 = vld [vmem:[%s18749_s9 + $0x382] sm:$0xff] }
 0x341   : > { %v17038_v5 = vpop.f32.mrf.mxu1  ;;  %17381 = vmatmul.mubr.msk.f32.gmra.mxu1 %vm430_vm0, %v14147_v29  ;;  %17579 = vmatprep.mubr.msk.f32.mxu0 %vm430_vm0, %v14406_v16  ;;  %v14407_v13 = vld [vmem:[%s18749_s9 + $0x3a0] sm:$0xff]  ;;  %v24359_v20 = vld [vmem:[#allocation60_spill] sm:$0xff] }
 0x342   : > { %24354 = vst [vmem:[#allocation52_spill] sm:$0xff] %v21409_v9  ;;  %v21414_v52 = vadd.f32 %v6447_v61, %v5290_v22  ;;  %v5293_v39 = vadd.f32 %v17038_v5, %v24357_v0  ;;  %17383 = vmatprep.mubr.msk.f32.mxu1 %vm430_vm0, %v14148_v36  ;;  %v6457_v21 = vpop.f32.mrf.mxu0  ;;  %v14408_v9 = vld [vmem:[%s18749_s9 + $0x3a8] sm:$0xff] }
 0x343   : > { %v5109_v23 = vpop.f32.mrf.mxu1  ;;  %v24361_v36 = vld [vmem:[#allocation62_spill] sm:$0xff] }
 0x344   : > { %24356 = vst [vmem:[#allocation54_spill] sm:$0xff] %v21414_v52  ;;  %v21423_v29 = vadd.f32 %v17234_v15, %v5293_v39  ;;  %v5292_v61 = vadd.f32 %v5109_v23, %v24359_v20  ;;  %v17237_v5 = vpop.f32.mrf.mxu0  ;;  %17580 = vmatmul.mubr.msk.f32.gmra.mxu0 %vm430_vm0, %v14407_v13  ;;  %v14151_v52 = vld [vmem:[%s18749_s9 + $0x38a] sm:$0xff]  ;;  %v14152_v20 = vld [vmem:[%s18749_s9 + $0x39a] sm:$0xff] }
 0x345   : > { %v17041_v22 = vpop.f32.mrf.mxu1  ;;  %17384 = vmatmul.mubr.msk.f32.gmra.mxu1 %vm430_vm0, %v14149_v1  ;;  %17582 = vmatprep.mubr.msk.f32.mxu0 %vm430_vm0, %v14408_v9  ;;  %v14409_v15 = vld [vmem:[%s18749_s9 + $0x3b0] sm:$0xff]  ;;  %v24363_v13 = vld [vmem:[#allocation64_spill] sm:$0xff] }
 0x346   : > { %24358 = vst [vmem:[#allocation56_spill] sm:$0xff] %v21423_v29  ;;  %v21428_v16 = vadd.f32 %v6457_v21, %v5292_v61  ;;  %v5295_v0 = vadd.f32 %v17041_v22, %v24361_v36  ;;  %17386 = vmatprep.mubr.msk.f32.mxu1 %vm430_vm0, %v14150_v24  ;;  %v6467_v23 = vpop.f32.mrf.mxu0  ;;  %v14410_v29 = vld [vmem:[%s18749_s9 + $0x3c0] sm:$0xff]  ;;  %v24365_v24 = vld [vmem:[#allocation66_spill] sm:$0xff] }
 0x347   : > { %v5119_v39 = vpop.f32.mrf.mxu1 }
 0x348   : > { %24360 = vst [vmem:[#allocation58_spill] sm:$0xff] %v21428_v16  ;;  %v21437_v1 = vadd.f32 %v17237_v5, %v5295_v0  ;;  %v5294_v21 = vadd.f32 %v5119_v39, %v24363_v13  ;;  %v17240_v22 = vpop.f32.mrf.mxu0  ;;  %17583 = vmatmul.mubr.msk.f32.gmra.mxu0 %vm430_vm0, %v14409_v15  ;;  %v14153_v16 = vld [vmem:[%s18749_s9 + $0x3a2] sm:$0xff]  ;;  %v14154_v13 = vld [vmem:[%s18749_s9 + $0x3aa] sm:$0xff]  ;;  %v24367_v15 = vld [vmem:[#allocation68_spill] sm:$0xff] }
 0x349   : > { %v17044_v61 = vpop.f32.mrf.mxu1  ;;  %17387 = vmatmul.mubr.msk.f32.gmra.mxu1 %vm430_vm0, %v14151_v52  ;;  %17585 = vmatprep.mubr.msk.f32.mxu0 %vm430_vm0, %v14410_v29  ;;  %v14411_v5 = vld [vmem:[%s18749_s9 + $0x3c8] sm:$0xff] }
 0x34a   : > { %24362 = vst [vmem:[#allocation60_spill] sm:$0xff] %v21437_v1  ;;  %v21442_v9 = vadd.f32 %v6467_v23, %v5294_v21  ;;  %v5297_v36 = vadd.f32 %v17044_v61, %v24365_v24  ;;  %17389 = vmatprep.mubr.msk.f32.mxu1 %vm430_vm0, %v14152_v20  ;;  %v6477_v39 = vpop.f32.mrf.mxu0  ;;  %v14412_v1 = vld [vmem:[%s18749_s9 + $0x3d0] sm:$0xff]  ;;  %v24369_v20 = vld [vmem:[#allocation70_spill] sm:$0xff] }
 0x34b   : > { %v5129_v0 = vpop.f32.mrf.mxu1 }
 0x34c   : > { %24364 = vst [vmem:[#allocation62_spill] sm:$0xff] %v21442_v9  ;;  %v21451_v52 = vadd.f32 %v17240_v22, %v5297_v36  ;;  %v5296_v23 = vadd.f32 %v5129_v0, %v24367_v15  ;;  %v17243_v61 = vpop.f32.mrf.mxu0  ;;  %17586 = vmatmul.mubr.msk.f32.gmra.mxu0 %vm430_vm0, %v14411_v5  ;;  %v14155_v9 = vld [vmem:[%s18749_s9 + $0x3b2] sm:$0xff]  ;;  %v14156_v15 = vld [vmem:[%s18749_s9 + $0x3c2] sm:$0xff] }
 0x34d   : > { %v17047_v21 = vpop.f32.mrf.mxu1  ;;  %17390 = vmatmul.mubr.msk.f32.gmra.mxu1 %vm430_vm0, %v14153_v16  ;;  %17588 = vmatprep.mubr.msk.f32.mxu0 %vm430_vm0, %v14412_v1  ;;  %v14413_v22 = vld [vmem:[%s18749_s9 + $0x3d8] sm:$0xff] }
 0x34e   : > { %24366 = vst [vmem:[#allocation64_spill] sm:$0xff] %v21451_v52  ;;  %v21456_v29 = vadd.f32 %v6477_v39, %v5296_v23  ;;  %v5299_v24 = vadd.f32 %v17047_v21, %v24369_v20  ;;  %17392 = vmatprep.mubr.msk.f32.mxu1 %vm430_vm0, %v14154_v13  ;;  %v6487_v0 = vpop.f32.mrf.mxu0  ;;  %v14414_v52 = vld [vmem:[%s18749_s9 + $0x3e8] sm:$0xff]  ;;  %v24371_v5 = vld [vmem:[#allocation72_spill] sm:$0xff] }
 0x34f   : > { %v5139_v36 = vpop.f32.mrf.mxu1  ;;  %v24373_v13 = vld [vmem:[#allocation74_spill] sm:$0xff] }
 0x350   : > { %24368 = vst [vmem:[#allocation66_spill] sm:$0xff] %v21456_v29  ;;  %v21465_v16 = vadd.f32 %v17243_v61, %v5299_v24  ;;  %v5298_v39 = vadd.f32 %v5139_v36, %v24371_v5  ;;  %v17246_v21 = vpop.f32.mrf.mxu0  ;;  %17589 = vmatmul.mubr.msk.f32.gmra.mxu0 %vm430_vm0, %v14413_v22  ;;  %v14157_v29 = vld [vmem:[%s18749_s9 + $0x3ca] sm:$0xff]  ;;  %v14158_v5 = vld [vmem:[%s18749_s9 + $0x3d2] sm:$0xff] }
 0x351   : > { %v17050_v23 = vpop.f32.mrf.mxu1  ;;  %17393 = vmatmul.mubr.msk.f32.gmra.mxu1 %vm430_vm0, %v14155_v9  ;;  %17591 = vmatprep.mubr.msk.f32.mxu0 %vm430_vm0, %v14414_v52  ;;  %v14415_v61 = vld [vmem:[%s18749_s9 + $0x3f0] sm:$0xff]  ;;  %v24375_v22 = vld [vmem:[#allocation76_spill] sm:$0xff] }
 0x352   : > { %24370 = vst [vmem:[#allocation68_spill] sm:$0xff] %v21465_v16  ;;  %v21470_v1 = vadd.f32 %v6487_v0, %v5298_v39  ;;  %v5301_v20 = vadd.f32 %v17050_v23, %v24373_v13  ;;  %17395 = vmatprep.mubr.msk.f32.mxu1 %vm430_vm0, %v14156_v15  ;;  %v6497_v36 = vpop.f32.mrf.mxu0  ;;  %v14416_v16 = vld [vmem:[%s18749_s9 + $0x3f8] sm:$0xff]  ;;  %v24377_v15 = vld [vmem:[#allocation78_spill] sm:$0xff] }
 0x353   : > { %v5149_v24 = vpop.f32.mrf.mxu1 }
 0x354   : > { %24372 = vst [vmem:[#allocation70_spill] sm:$0xff] %v21470_v1  ;;  %v21479_v9 = vadd.f32 %v17246_v21, %v5301_v20  ;;  %v5300_v0 = vadd.f32 %v5149_v24, %v24375_v22  ;;  %v17249_v23 = vpop.f32.mrf.mxu0  ;;  %17592 = vmatmul.mubr.msk.f32.gmra.mxu0 %vm430_vm0, %v14415_v61  ;;  %v14159_v1 = vld [vmem:[%s18749_s9 + $0x3da] sm:$0xff]  ;;  %v14160_v22 = vld [vmem:[%s18749_s9 + $0x3ea] sm:$0xff] }
 0x355   : > { %v17053_v39 = vpop.f32.mrf.mxu1  ;;  %17396 = vmatmul.mubr.msk.f32.gmra.mxu1 %vm430_vm0, %v14157_v29  ;;  %17594 = vmatprep.mubr.msk.f32.mxu0 %vm430_vm0, %v14416_v16  ;;  %v14417_v21 = vld [vmem:[%s18749_s9 + $0x400] sm:$0xff]  ;;  %v24379_v61 = vld [vmem:[#allocation80_spill] sm:$0xff] }
 0x356   : > { %24374 = vst [vmem:[#allocation72_spill] sm:$0xff] %v21479_v9  ;;  %v21484_v52 = vadd.f32 %v6497_v36, %v5300_v0  ;;  %v5303_v13 = vadd.f32 %v17053_v39, %v24377_v15  ;;  %17398 = vmatprep.mubr.msk.f32.mxu1 %vm430_vm0, %v14158_v5  ;;  %v6507_v24 = vpop.f32.mrf.mxu0  ;;  %v14418_v9 = vld [vmem:[%s18749_s9 + $0x410] sm:$0xff]  ;;  %v24380_v5 = vld [vmem:[#allocation82_spill] sm:$0xff] }
 0x357   : > { %v5159_v20 = vpop.f32.mrf.mxu1 }
 0x358   : > { %24376 = vst [vmem:[#allocation74_spill] sm:$0xff] %v21484_v52  ;;  %v21493_v29 = vadd.f32 %v17249_v23, %v5303_v13  ;;  %v5302_v36 = vadd.f32 %v5159_v20, %v24379_v61  ;;  %v17252_v39 = vpop.f32.mrf.mxu0  ;;  %17595 = vmatmul.mubr.msk.f32.gmra.mxu0 %vm430_vm0, %v14417_v21  ;;  %v14161_v52 = vld [vmem:[%s18749_s9 + $0x3f2] sm:$0xff]  ;;  %v14162_v61 = vld [vmem:[%s18749_s9 + $0x3fa] sm:$0xff] }
 0x359   : > { %v17056_v0 = vpop.f32.mrf.mxu1  ;;  %17399 = vmatmul.mubr.msk.f32.gmra.mxu1 %vm430_vm0, %v14159_v1  ;;  %17597 = vmatprep.mubr.msk.f32.mxu0 %vm430_vm0, %v14418_v9  ;;  %v14419_v23 = vld [vmem:[%s18749_s9 + $0x418] sm:$0xff] }
 0x35a   : > { %24378 = vst [vmem:[#allocation76_spill] sm:$0xff] %v21493_v29  ;;  %v21498_v16 = vadd.f32 %v6507_v24, %v5302_v36  ;;  %v5305_v15 = vadd.f32 %v17056_v0, %v24380_v5  ;;  %17401 = vmatprep.mubr.msk.f32.mxu1 %vm430_vm0, %v14160_v22  ;;  %v6517_v20 = vpop.f32.mrf.mxu0  ;;  %v14420_v29 = vld [vmem:[%s18749_s9 + $0x420] sm:$0xff] }
 0x35b   : > { %v5169_v13 = vpop.f32.mrf.mxu1  ;;  %v14163_v0 = vld [vmem:[%s18749_s9 + $0x402] sm:$0xff] }
 0x35c   : > { %v21507_v1 = vadd.f32 %v17252_v39, %v5305_v15  ;;  %v5304_v21 = vadd.f32 %v5169_v13, %v20606_v3  ;;  %v17455_v22 = vpop.f32.mrf.mxu0  ;;  %17598 = vmatmul.mubr.msk.f32.gmra.mxu0 %vm430_vm0, %v14419_v23  ;;  %v14421_v39 = vld [vmem:[%s18749_s9 + $0x428] sm:$0xff]  ;;  %v14164_v15 = vld [vmem:[%s18749_s9 + $0x412] sm:$0xff] }
 0x35d   : > { %v17259_v24 = vpop.f32.mrf.mxu1  ;;  %17402 = vmatmul.mubr.msk.f32.gmra.mxu1 %vm430_vm0, %v14161_v52  ;;  %17600 = vmatprep.mubr.msk.f32.mxu0 %vm430_vm0, %v14420_v29  ;;  %v14422_v52 = vld [vmem:[%s18749_s9 + $0x438] sm:$0xff] }
 0x35e   : > { %v21512_v9 = vadd.f32 %v6517_v20, %v5304_v21  ;;  %v7875_v36 = vadd.f32 %v17259_v24, %v20615_v4  ;;  %17404 = vmatprep.mubr.msk.f32.mxu1 %vm430_vm0, %v14162_v61  ;;  %v8584_v3 = vpop.f32.mrf.mxu0  ;;  %v14165_v21 = vld [vmem:[%s18749_s9 + $0x41a] sm:$0xff] }
 0x35f   : > { %v7235_v5 = vpop.f32.mrf.mxu1  ;;  %v14423_v24 = vld [vmem:[%s18749_s9 + $0x440] sm:$0xff] }
 0x360   : > { %v21521_v13 = vadd.f32 %v17455_v22, %v7875_v36  ;;  %v7874_v23 = vadd.f32 %v7235_v5, %v20620_v11  ;;  %v17458_v4 = vpop.f32.mrf.mxu0  ;;  %17601 = vmatmul.mubr.msk.f32.gmra.mxu0 %vm430_vm0, %v14421_v39  ;;  %v14166_v36 = vld [vmem:[%s18749_s9 + $0x422] sm:$0xff] }
 0x361   : > { %v17262_v20 = vpop.f32.mrf.mxu1  ;;  %17405 = vmatmul.mubr.msk.f32.gmra.mxu1 %vm430_vm0, %v14163_v0  ;;  %17603 = vmatprep.mubr.msk.f32.mxu0 %vm430_vm0, %v14422_v52  ;;  %v14424_v0 = vld [vmem:[%s18749_s9 + $0x448] sm:$0xff] }
 0x362   : > { %v21526_v29 = vadd.f32 %v8584_v3, %v7874_v23  ;;  %v7877_v61 = vadd.f32 %v17262_v20, %v20629_v60  ;;  %17407 = vmatprep.mubr.msk.f32.mxu1 %vm430_vm0, %v14164_v15  ;;  %v8594_v11 = vpop.f32.mrf.mxu0  ;;  %v14167_v23 = vld [vmem:[%s18749_s9 + $0x42a] sm:$0xff] }
 0x363   : > { %v7245_v22 = vpop.f32.mrf.mxu1  ;;  %v14425_v20 = vld [vmem:[%s18749_s9 + $0x450] sm:$0xff] }
 0x364   : > { %v21535_v5 = vadd.f32 %v17458_v4, %v7877_v61  ;;  %v7876_v39 = vadd.f32 %v7245_v22, %v20634_v55  ;;  %v17461_v60 = vpop.f32.mrf.mxu0  ;;  %17604 = vmatmul.mubr.msk.f32.gmra.mxu0 %vm430_vm0, %v14423_v24  ;;  %v14168_v61 = vld [vmem:[%s18749_s9 + $0x43a] sm:$0xff] }
 0x365   : > { %v17265_v3 = vpop.f32.mrf.mxu1  ;;  %17408 = vmatmul.mubr.msk.f32.gmra.mxu1 %vm430_vm0, %v14165_v21  ;;  %17606 = vmatprep.mubr.msk.f32.mxu0 %vm430_vm0, %v14424_v0  ;;  %v14426_v21 = vld [vmem:[%s18749_s9 + $0x460] sm:$0xff] }
 0x366   : > { %v21540_v15 = vadd.f32 %v8594_v11, %v7876_v39  ;;  %v7879_v52 = vadd.f32 %v17265_v3, %v20643_v17  ;;  %17410 = vmatprep.mubr.msk.f32.mxu1 %vm430_vm0, %v14166_v36  ;;  %v8604_v55 = vpop.f32.mrf.mxu0  ;;  %v14169_v39 = vld [vmem:[%s18749_s9 + $0x442] sm:$0xff] }
 0x367   : > { %v7255_v4 = vpop.f32.mrf.mxu1  ;;  %v14427_v3 = vld [vmem:[%s18749_s9 + $0x468] sm:$0xff] }
 0x368   : > { %v21549_v22 = vadd.f32 %v17461_v60, %v7879_v52  ;;  %v7878_v24 = vadd.f32 %v7255_v4, %v20648_v48  ;;  %v17464_v17 = vpop.f32.mrf.mxu0  ;;  %17607 = vmatmul.mubr.msk.f32.gmra.mxu0 %vm430_vm0, %v14425_v20  ;;  %v14170_v52 = vld [vmem:[%s18749_s9 + $0x44a] sm:$0xff] }
 0x369   : > { %v17268_v11 = vpop.f32.mrf.mxu1  ;;  %17411 = vmatmul.mubr.msk.f32.gmra.mxu1 %vm430_vm0, %v14167_v23  ;;  %17609 = vmatprep.mubr.msk.f32.mxu0 %vm430_vm0, %v14426_v21  ;;  %v14428_v23 = vld [vmem:[%s18749_s9 + $0x470] sm:$0xff] }
 0x36a   : > { %v21554_v36 = vadd.f32 %v8604_v55, %v7878_v24  ;;  %v7881_v0 = vadd.f32 %v17268_v11, %v20657_v56  ;;  %17413 = vmatprep.mubr.msk.f32.mxu1 %vm430_vm0, %v14168_v61  ;;  %v8614_v48 = vpop.f32.mrf.mxu0  ;;  %v14171_v24 = vld [vmem:[%s18749_s9 + $0x452] sm:$0xff] }
 0x36b   : > { %v7265_v60 = vpop.f32.mrf.mxu1  ;;  %v14429_v11 = vld [vmem:[%s18749_s9 + $0x478] sm:$0xff] }
 0x36c   : > { %v21563_v4 = vadd.f32 %v17464_v17, %v7881_v0  ;;  %v7880_v20 = vadd.f32 %v7265_v60, %v20662_v32  ;;  %v17467_v56 = vpop.f32.mrf.mxu0  ;;  %17610 = vmatmul.mubr.msk.f32.gmra.mxu0 %vm430_vm0, %v14427_v3  ;;  %v14172_v0 = vld [vmem:[%s18749_s9 + $0x462] sm:$0xff] }
 0x36d   : > { %v17271_v55 = vpop.f32.mrf.mxu1  ;;  %17414 = vmatmul.mubr.msk.f32.gmra.mxu1 %vm430_vm0, %v14169_v39  ;;  %17612 = vmatprep.mubr.msk.f32.mxu0 %vm430_vm0, %v14428_v23  ;;  %v14430_v39 = vld [vmem:[%s18749_s9 + $0x488] sm:$0xff] }
 0x36e   : > { %v21568_v61 = vadd.f32 %v8614_v48, %v7880_v20  ;;  %v7883_v21 = vadd.f32 %v17271_v55, %v20671_v7  ;;  %17416 = vmatprep.mubr.msk.f32.mxu1 %vm430_vm0, %v14170_v52  ;;  %v8624_v32 = vpop.f32.mrf.mxu0  ;;  %v14173_v20 = vld [vmem:[%s18749_s9 + $0x46a] sm:$0xff] }
 0x36f   : > { %v7275_v17 = vpop.f32.mrf.mxu1  ;;  %v14431_v55 = vld [vmem:[%s18749_s9 + $0x490] sm:$0xff] }
 0x370   : > { %v21577_v60 = vadd.f32 %v17467_v56, %v7883_v21  ;;  %v7882_v3 = vadd.f32 %v7275_v17, %v20676_v47  ;;  %v17470_v7 = vpop.f32.mrf.mxu0  ;;  %17613 = vmatmul.mubr.msk.f32.gmra.mxu0 %vm430_vm0, %v14429_v11  ;;  %v14174_v21 = vld [vmem:[%s18749_s9 + $0x472] sm:$0xff] }
 0x371   : > { %v17274_v48 = vpop.f32.mrf.mxu1  ;;  %17417 = vmatmul.mubr.msk.f32.gmra.mxu1 %vm430_vm0, %v14171_v24  ;;  %17615 = vmatprep.mubr.msk.f32.mxu0 %vm430_vm0, %v14430_v39  ;;  %v14432_v24 = vld [vmem:[%s18749_s9 + $0x498] sm:$0xff] }
 0x372   : > { %v21582_v52 = vadd.f32 %v8624_v32, %v7882_v3  ;;  %v7885_v23 = vadd.f32 %v17274_v48, %v20685_v63  ;;  %17419 = vmatprep.mubr.msk.f32.mxu1 %vm430_vm0, %v14172_v0  ;;  %v8634_v47 = vpop.f32.mrf.mxu0  ;;  %v14175_v3 = vld [vmem:[%s18749_s9 + $0x47a] sm:$0xff] }
 0x373   : > { %v7285_v56 = vpop.f32.mrf.mxu1  ;;  %v14433_v48 = vld [vmem:[%s18749_s9 + $0x4a0] sm:$0xff] }
 0x374   : > { %v21591_v17 = vadd.f32 %v17470_v7, %v7885_v23  ;;  %v7884_v11 = vadd.f32 %v7285_v56, %v20690_v42  ;;  %v17473_v63 = vpop.f32.mrf.mxu0  ;;  %17616 = vmatmul.mubr.msk.f32.gmra.mxu0 %vm430_vm0, %v14431_v55  ;;  %v14176_v23 = vld [vmem:[%s18749_s9 + $0x48a] sm:$0xff] }
 0x375   : > { %v17277_v32 = vpop.f32.mrf.mxu1  ;;  %17420 = vmatmul.mubr.msk.f32.gmra.mxu1 %vm430_vm0, %v14173_v20  ;;  %17618 = vmatprep.mubr.msk.f32.mxu0 %vm430_vm0, %v14432_v24  ;;  %v14434_v20 = vld [vmem:[%s18749_s9 + $0x4b0] sm:$0xff] }
 0x376   : > { %v21596_v0 = vadd.f32 %v8634_v47, %v7884_v11  ;;  %v7887_v39 = vadd.f32 %v17277_v32, %v20699_v19  ;;  %17422 = vmatprep.mubr.msk.f32.mxu1 %vm430_vm0, %v14174_v21  ;;  %v8644_v42 = vpop.f32.mrf.mxu0  ;;  %v14177_v11 = vld [vmem:[%s18749_s9 + $0x492] sm:$0xff] }
 0x377   : > { %v7295_v7 = vpop.f32.mrf.mxu1  ;;  %v14435_v32 = vld [vmem:[%s18749_s9 + $0x4b8] sm:$0xff] }
 0x378   : > { %v21605_v56 = vadd.f32 %v17473_v63, %v7887_v39  ;;  %v7886_v55 = vadd.f32 %v7295_v7, %v20704_v31  ;;  %v17476_v19 = vpop.f32.mrf.mxu0  ;;  %17619 = vmatmul.mubr.msk.f32.gmra.mxu0 %vm430_vm0, %v14433_v48  ;;  %v14178_v39 = vld [vmem:[%s18749_s9 + $0x49a] sm:$0xff] }
 0x379   : > { %v17280_v47 = vpop.f32.mrf.mxu1  ;;  %17423 = vmatmul.mubr.msk.f32.gmra.mxu1 %vm430_vm0, %v14175_v3  ;;  %17621 = vmatprep.mubr.msk.f32.mxu0 %vm430_vm0, %v14434_v20  ;;  %v14436_v3 = vld [vmem:[%s18749_s9 + $0x4c0] sm:$0xff] }
 0x37a   : > { %v21610_v21 = vadd.f32 %v8644_v42, %v7886_v55  ;;  %v7889_v24 = vadd.f32 %v17280_v47, %v20713_v25  ;;  %17425 = vmatprep.mubr.msk.f32.mxu1 %vm430_vm0, %v14176_v23  ;;  %v8654_v31 = vpop.f32.mrf.mxu0  ;;  %v14179_v55 = vld [vmem:[%s18749_s9 + $0x4a2] sm:$0xff] }
 0x37b   : > { %v7305_v63 = vpop.f32.mrf.mxu1  ;;  %v14437_v47 = vld [vmem:[%s18749_s9 + $0x4c8] sm:$0xff] }
 0x37c   : > { %v21619_v7 = vadd.f32 %v17476_v19, %v7889_v24  ;;  %v7888_v48 = vadd.f32 %v7305_v63, %v20718_v50  ;;  %v17479_v25 = vpop.f32.mrf.mxu0  ;;  %17622 = vmatmul.mubr.msk.f32.gmra.mxu0 %vm430_vm0, %v14435_v32  ;;  %v14180_v24 = vld [vmem:[%s18749_s9 + $0x4b2] sm:$0xff] }
 0x37d   : > { %v17283_v42 = vpop.f32.mrf.mxu1  ;;  %17426 = vmatmul.mubr.msk.f32.gmra.mxu1 %vm430_vm0, %v14177_v11  ;;  %17624 = vmatprep.mubr.msk.f32.mxu0 %vm430_vm0, %v14436_v3  ;;  %v14438_v11 = vld [vmem:[%s18749_s9 + $0x4d8] sm:$0xff] }
 0x37e   : > { %v21624_v23 = vadd.f32 %v8654_v31, %v7888_v48  ;;  %v7891_v20 = vadd.f32 %v17283_v42, %v20727_v33  ;;  %17428 = vmatprep.mubr.msk.f32.mxu1 %vm430_vm0, %v14178_v39  ;;  %v8664_v50 = vpop.f32.mrf.mxu0  ;;  %v14181_v48 = vld [vmem:[%s18749_s9 + $0x4ba] sm:$0xff] }
 0x37f   : > { %v7315_v19 = vpop.f32.mrf.mxu1  ;;  %v14439_v42 = vld [vmem:[%s18749_s9 + $0x4e0] sm:$0xff] }
 0x380   : > { %v21633_v63 = vadd.f32 %v17479_v25, %v7891_v20  ;;  %v7890_v32 = vadd.f32 %v7315_v19, %v20732_v59  ;;  %v17482_v33 = vpop.f32.mrf.mxu0  ;;  %17625 = vmatmul.mubr.msk.f32.gmra.mxu0 %vm430_vm0, %v14437_v47  ;;  %v14182_v20 = vld [vmem:[%s18749_s9 + $0x4c2] sm:$0xff] }
 0x381   : > { %v17286_v31 = vpop.f32.mrf.mxu1  ;;  %17429 = vmatmul.mubr.msk.f32.gmra.mxu1 %vm430_vm0, %v14179_v55  ;;  %17627 = vmatprep.mubr.msk.f32.mxu0 %vm430_vm0, %v14438_v11  ;;  %v14440_v55 = vld [vmem:[%s18749_s9 + $0x4e8] sm:$0xff] }
 0x382   : > { %v21638_v39 = vadd.f32 %v8664_v50, %v7890_v32  ;;  %v7893_v3 = vadd.f32 %v17286_v31, %v20741_v41  ;;  %17431 = vmatprep.mubr.msk.f32.mxu1 %vm430_vm0, %v14180_v24  ;;  %v8674_v59 = vpop.f32.mrf.mxu0  ;;  %v14183_v32 = vld [vmem:[%s18749_s9 + $0x4ca] sm:$0xff] }
 0x383   : > { %v7325_v25 = vpop.f32.mrf.mxu1  ;;  %v14441_v31 = vld [vmem:[%s18749_s9 + $0x4f0] sm:$0xff] }
 0x384   : > { %v21647_v19 = vadd.f32 %v17482_v33, %v7893_v3  ;;  %v7892_v47 = vadd.f32 %v7325_v25, %v20746_v18  ;;  %v17485_v41 = vpop.f32.mrf.mxu0  ;;  %17628 = vmatmul.mubr.msk.f32.gmra.mxu0 %vm430_vm0, %v14439_v42  ;;  %v14184_v3 = vld [vmem:[%s18749_s9 + $0x4da] sm:$0xff] }
 0x385   : > { %v17289_v50 = vpop.f32.mrf.mxu1  ;;  %17432 = vmatmul.mubr.msk.f32.gmra.mxu1 %vm430_vm0, %v14181_v48  ;;  %17630 = vmatprep.mubr.msk.f32.mxu0 %vm430_vm0, %v14440_v55  ;;  %v14442_v48 = vld [vmem:[%s18749_s9 + $0x500] sm:$0xff] }
 0x386   : > { %v21652_v24 = vadd.f32 %v8674_v59, %v7892_v47  ;;  %v7895_v11 = vadd.f32 %v17289_v50, %v20755_v49  ;;  %17434 = vmatprep.mubr.msk.f32.mxu1 %vm430_vm0, %v14182_v20  ;;  %v8684_v18 = vpop.f32.mrf.mxu0  ;;  %v14185_v47 = vld [vmem:[%s18749_s9 + $0x4e2] sm:$0xff] }
 0x387   : > { %v7335_v33 = vpop.f32.mrf.mxu1  ;;  %v14443_v50 = vld [vmem:[%s18749_s9 + $0x508] sm:$0xff] }
 0x388   : > { %v21661_v25 = vadd.f32 %v17485_v41, %v7895_v11  ;;  %v7894_v42 = vadd.f32 %v7335_v33, %v20760_v40  ;;  %v17488_v49 = vpop.f32.mrf.mxu0  ;;  %17631 = vmatmul.mubr.msk.f32.gmra.mxu0 %vm430_vm0, %v14441_v31  ;;  %v14186_v11 = vld [vmem:[%s18749_s9 + $0x4ea] sm:$0xff] }
 0x389   : > { %v17292_v59 = vpop.f32.mrf.mxu1  ;;  %17435 = vmatmul.mubr.msk.f32.gmra.mxu1 %vm430_vm0, %v14183_v32  ;;  %17633 = vmatprep.mubr.msk.f32.mxu0 %vm430_vm0, %v14442_v48  ;;  %v14444_v32 = vld [vmem:[%s18749_s9 + $0x510] sm:$0xff] }
 0x38a   : > { %v21666_v20 = vadd.f32 %v8684_v18, %v7894_v42  ;;  %v7897_v55 = vadd.f32 %v17292_v59, %v20769_v58  ;;  %17437 = vmatprep.mubr.msk.f32.mxu1 %vm430_vm0, %v14184_v3  ;;  %v8694_v40 = vpop.f32.mrf.mxu0  ;;  %v14187_v42 = vld [vmem:[%s18749_s9 + $0x4f2] sm:$0xff] }
 0x38b   : > { %v7345_v41 = vpop.f32.mrf.mxu1  ;;  %v14445_v59 = vld [vmem:[%s18749_s9 + $0x518] sm:$0xff] }
 0x38c   : > { %v21675_v33 = vadd.f32 %v17488_v49, %v7897_v55  ;;  %v7896_v31 = vadd.f32 %v7345_v41, %v20774_v62  ;;  %v17491_v58 = vpop.f32.mrf.mxu0  ;;  %17634 = vmatmul.mubr.msk.f32.gmra.mxu0 %vm430_vm0, %v14443_v50  ;;  %v14188_v55 = vld [vmem:[%s18749_s9 + $0x502] sm:$0xff] }
 0x38d   : > { %v17295_v18 = vpop.f32.mrf.mxu1  ;;  %17438 = vmatmul.mubr.msk.f32.gmra.mxu1 %vm430_vm0, %v14185_v47  ;;  %17636 = vmatprep.mubr.msk.f32.mxu0 %vm430_vm0, %v14444_v32  ;;  %v14446_v47 = vld [vmem:[%s18749_s9 + $0x528] sm:$0xff] }
 0x38e   : > { %v21680_v3 = vadd.f32 %v8694_v40, %v7896_v31  ;;  %v7899_v48 = vadd.f32 %v17295_v18, %v20783_v2  ;;  %17440 = vmatprep.mubr.msk.f32.mxu1 %vm430_vm0, %v14186_v11  ;;  %v8704_v62 = vpop.f32.mrf.mxu0  ;;  %v14189_v31 = vld [vmem:[%s18749_s9 + $0x50a] sm:$0xff] }
 0x38f   : > { %v7355_v49 = vpop.f32.mrf.mxu1  ;;  %v14447_v18 = vld [vmem:[%s18749_s9 + $0x530] sm:$0xff] }
 0x390   : > { %v21689_v41 = vadd.f32 %v17491_v58, %v7899_v48  ;;  %v7898_v50 = vadd.f32 %v7355_v49, %v20788_v54  ;;  %v17494_v2 = vpop.f32.mrf.mxu0  ;;  %17637 = vmatmul.mubr.msk.f32.gmra.mxu0 %vm430_vm0, %v14445_v59  ;;  %v14190_v48 = vld [vmem:[%s18749_s9 + $0x512] sm:$0xff] }
 0x391   : > { %v17298_v40 = vpop.f32.mrf.mxu1  ;;  %17441 = vmatmul.mubr.msk.f32.gmra.mxu1 %vm430_vm0, %v14187_v42  ;;  %17639 = vmatprep.mubr.msk.f32.mxu0 %vm430_vm0, %v14446_v47  ;;  %v14448_v42 = vld [vmem:[%s18749_s9 + $0x538] sm:$0xff] }
 0x392   : > { %v21694_v11 = vadd.f32 %v8704_v62, %v7898_v50  ;;  %v7901_v32 = vadd.f32 %v17298_v40, %v20797_v10  ;;  %17443 = vmatprep.mubr.msk.f32.mxu1 %vm430_vm0, %v14188_v55  ;;  %v8714_v54 = vpop.f32.mrf.mxu0  ;;  %v14191_v50 = vld [vmem:[%s18749_s9 + $0x51a] sm:$0xff] }
 0x393   : > { %v7365_v58 = vpop.f32.mrf.mxu1  ;;  %v14449_v40 = vld [vmem:[%s18749_s9 + $0x540] sm:$0xff] }
 0x394   : > { %v21703_v49 = vadd.f32 %v17494_v2, %v7901_v32  ;;  %v7900_v59 = vadd.f32 %v7365_v58, %v20802_v26  ;;  %v17497_v10 = vpop.f32.mrf.mxu0  ;;  %17640 = vmatmul.mubr.msk.f32.gmra.mxu0 %vm430_vm0, %v14447_v18  ;;  %v14580_v32 = vld [vmem:[%s18749_s9 + $0x51] sm:$0xff] }
 0x395   : > { %v17301_v62 = vpop.f32.mrf.mxu1  ;;  %17444 = vmatmul.mubr.msk.f32.gmra.mxu1 %vm430_vm0, %v14189_v31  ;;  %17642 = vmatprep.mubr.msk.f32.mxu0 %vm430_vm0, %v14448_v42  ;;  %v14838_v31 = vld [vmem:[%s18749_s9 + $0x52] sm:$0xff] }
 0x396   : > { %v21708_v55 = vadd.f32 %v8714_v54, %v7900_v59  ;;  %v7903_v47 = vadd.f32 %v17301_v62, %v20811_v28  ;;  %17446 = vmatprep.mubr.msk.f32.mxu1 %vm430_vm0, %v14190_v48  ;;  %v8724_v26 = vpop.f32.mrf.mxu0  ;;  %v14581_v59 = vld [vmem:[%s18749_s9 + $0x59] sm:$0xff] }
 0x397   : > { %v7375_v2 = vpop.f32.mrf.mxu1  ;;  %v14839_v62 = vld [vmem:[%s18749_s9 + $0x5a] sm:$0xff] }
 0x398   : > { %v21717_v58 = vadd.f32 %v17497_v10, %v7903_v47  ;;  %v7902_v18 = vadd.f32 %v7375_v2, %v20816_v38  ;;  %v17500_v28 = vpop.f32.mrf.mxu0  ;;  %17643 = vmatmul.mubr.msk.f32.gmra.mxu0 %vm430_vm0, %v14449_v40  ;;  %v14582_v47 = vld [vmem:[%s18749_s9 + $0x61] sm:$0xff] }
 0x399   : > { %v17304_v54 = vpop.f32.mrf.mxu1  ;;  %17447 = vmatmul.mubr.msk.f32.gmra.mxu1 %vm430_vm0, %v14191_v50  ;;  %17845 = vmatprep.mubr.msk.f32.mxu0 %vm430_vm0, %v14838_v31  ;;  %v14840_v50 = vld [vmem:[%s18749_s9 + $0x62] sm:$0xff]  ;;  %v24382_v31 = vld [vmem:[#allocation84_spill] sm:$0xff] }
 0x39a   : > { %v21722_v48 = vadd.f32 %v8724_v26, %v7902_v18  ;;  %v7905_v42 = vadd.f32 %v17304_v54, %v20823_v34  ;;  %17649 = vmatprep.mubr.msk.f32.mxu1 %vm430_vm0, %v14580_v32  ;;  %v8734_v38 = vpop.f32.mrf.mxu0  ;;  %v14583_v54 = vld [vmem:[%s18749_s9 + $0x69] sm:$0xff] }
 0x39b   : > { %v7385_v10 = vpop.f32.mrf.mxu1 }
 0x39c   : > { %v21731_v2 = vadd.f32 %v17500_v28, %v7905_v42  ;;  %v7904_v40 = vadd.f32 %v7385_v10, %v20830_v53  ;;  %v17503_v34 = vpop.f32.mrf.mxu0  ;;  %17846 = vmatmul.mubr.msk.f32.vlgmr.msra.gmra.mxu0 %vm430_vm0, %v14839_v62  ;;  %v14841_v28 = vld [vmem:[%s18749_s9 + $0x6a] sm:$0xff]  ;;  %v14584_v10 = vld [vmem:[%s18749_s9 + $0x79] sm:$0xff] }
 0x39d   : > { %v17307_v26 = vpop.f32.mrf.mxu1  ;;  %17650 = vmatmul.mubr.msk.f32.vlgmr.msra.gmra.mxu1 %vm430_vm0, %v14581_v59  ;;  %17848 = vmatprep.mubr.msk.f32.mxu0 %vm430_vm0, %v14840_v50 }
 0x39e   : > { %24381 = vst [vmem:[#allocation78_spill] sm:$0xff] %v21731_v2  ;;  %v21736_v32 = vadd.f32 %v8734_v38, %v7904_v40  ;;  %v7907_v18 = vadd.f32 %v17307_v26, %v24382_v31  ;;  %17652 = vmatprep.mubr.msk.f32.mxu1 %vm430_vm0, %v14582_v47  ;;  %v8744_v53 = vpop.f32.mrf.mxu0  ;;  %v14842_v2 = vld [vmem:[%s18749_s9 + $0x7a] sm:$0xff] }
 0x39f   : > { %v7395_v42 = vpop.f32.mrf.mxu1  ;;  %v14585_v26 = vld [vmem:[%s18749_s9 + $0x81] sm:$0xff] }
 0x3a0   : > { %v21745_v59 = vadd.f32 %v17503_v34, %v7907_v18  ;;  %v7906_v62 = vadd.f32 %v7395_v42, %v20854_v35  ;;  %v17506_v40 = vpop.f32.mrf.mxu0  ;;  %17849 = vmatmul.mubr.msk.f32.gmra.mxu0 %vm430_vm0, %v14841_v28  ;;  %v14843_v34 = vld [vmem:[%s18749_s9 + $0x82] sm:$0xff]  ;;  %v14844_v42 = vld [vmem:[%s18749_s9 + $0x8a] sm:$0xff] }
 0x3a1   : > { %v17310_v38 = vpop.f32.mrf.mxu1  ;;  %17653 = vmatmul.mubr.msk.f32.gmra.mxu1 %vm430_vm0, %v14583_v54  ;;  %17851 = vmatprep.mubr.msk.f32.mxu0 %vm430_vm0, %v14842_v2  ;;  %v14586_v18 = vld [vmem:[%s18749_s9 + $0x89] sm:$0xff] }
 0x3a2   : > { %v21750_v47 = vadd.f32 %v8744_v53, %v7906_v62  ;;  %v7909_v50 = vadd.f32 %v17310_v38, %v20863_v45  ;;  %17655 = vmatprep.mubr.msk.f32.mxu1 %vm430_vm0, %v14584_v10  ;;  %v8754_v35 = vpop.f32.mrf.mxu0  ;;  %v14587_v62 = vld [vmem:[%s18749_s9 + $0x91] sm:$0xff] }
 0x3a3   : > { %v7405_v31 = vpop.f32.mrf.mxu1  ;;  %v14845_v38 = vld [vmem:[%s18749_s9 + $0x92] sm:$0xff] }
 0x3a4   : > { %v21759_v54 = vadd.f32 %v17506_v40, %v7909_v50  ;;  %v7908_v28 = vadd.f32 %v7405_v31, %v20868_v12  ;;  %v17509_v45 = vpop.f32.mrf.mxu0  ;;  %17852 = vmatmul.mubr.msk.f32.gmra.mxu0 %vm430_vm0, %v14843_v34  ;;  %v14588_v50 = vld [vmem:[%s18749_s9 + $0xa1] sm:$0xff] }
 0x3a5   : > { %v17313_v53 = vpop.f32.mrf.mxu1  ;;  %17656 = vmatmul.mubr.msk.f32.gmra.mxu1 %vm430_vm0, %v14585_v26  ;;  %17854 = vmatprep.mubr.msk.f32.mxu0 %vm430_vm0, %v14844_v42  ;;  %v14846_v31 = vld [vmem:[%s18749_s9 + $0xa2] sm:$0xff] }
 0x3a6   : > { %v21764_v2 = vadd.f32 %v8754_v35, %v7908_v28  ;;  %v7911_v10 = vadd.f32 %v17313_v53, %v20877_v57  ;;  %17658 = vmatprep.mubr.msk.f32.mxu1 %vm430_vm0, %v14586_v18  ;;  %v8764_v12 = vpop.f32.mrf.mxu0  ;;  %v14589_v28 = vld [vmem:[%s18749_s9 + $0xa9] sm:$0xff] }
 0x3a7   : > { %v7415_v40 = vpop.f32.mrf.mxu1  ;;  %v14847_v53 = vld [vmem:[%s18749_s9 + $0xaa] sm:$0xff] }
 0x3a8   : > { %v21773_v26 = vadd.f32 %v17509_v45, %v7911_v10  ;;  %v7910_v34 = vadd.f32 %v7415_v40, %v20882_v51  ;;  %v17512_v57 = vpop.f32.mrf.mxu0  ;;  %17855 = vmatmul.mubr.msk.f32.gmra.mxu0 %vm430_vm0, %v14845_v38  ;;  %v14590_v10 = vld [vmem:[%s18749_s9 + $0xb1] sm:$0xff] }
 0x3a9   : > { %v17316_v35 = vpop.f32.mrf.mxu1  ;;  %17659 = vmatmul.mubr.msk.f32.gmra.mxu1 %vm430_vm0, %v14587_v62  ;;  %17857 = vmatprep.mubr.msk.f32.mxu0 %vm430_vm0, %v14846_v31  ;;  %v14848_v40 = vld [vmem:[%s18749_s9 + $0xb2] sm:$0xff] }
 0x3aa   : > { %v21778_v18 = vadd.f32 %v8764_v12, %v7910_v34  ;;  %v7913_v42 = vadd.f32 %v17316_v35, %v20891_v30  ;;  %17661 = vmatprep.mubr.msk.f32.mxu1 %vm430_vm0, %v14588_v50  ;;  %v8774_v51 = vpop.f32.mrf.mxu0  ;;  %v14591_v34 = vld [vmem:[%s18749_s9 + $0xb9] sm:$0xff] }
 0x3ab   : > { %v7425_v45 = vpop.f32.mrf.mxu1  ;;  %v14849_v35 = vld [vmem:[%s18749_s9 + $0xba] sm:$0xff] }
 0x3ac   : > { %v21787_v62 = vadd.f32 %v17512_v57, %v7913_v42  ;;  %v7912_v38 = vadd.f32 %v7425_v45, %v20896_v27  ;;  %v17515_v30 = vpop.f32.mrf.mxu0  ;;  %17858 = vmatmul.mubr.msk.f32.gmra.mxu0 %vm430_vm0, %v14847_v53  ;;  %v14592_v42 = vld [vmem:[%s18749_s9 + $0xc9] sm:$0xff] }
 0x3ad   : > { %v17319_v12 = vpop.f32.mrf.mxu1  ;;  %17662 = vmatmul.mubr.msk.f32.gmra.mxu1 %vm430_vm0, %v14589_v28  ;;  %17860 = vmatprep.mubr.msk.f32.mxu0 %vm430_vm0, %v14848_v40  ;;  %v14850_v45 = vld [vmem:[%s18749_s9 + $0xca] sm:$0xff] }
 0x3ae   : > { %v21792_v50 = vadd.f32 %v8774_v51, %v7912_v38  ;;  %v7915_v31 = vadd.f32 %v17319_v12, %v20905_v46  ;;  %17664 = vmatprep.mubr.msk.f32.mxu1 %vm430_vm0, %v14590_v10  ;;  %v8784_v27 = vpop.f32.mrf.mxu0  ;;  %v14593_v38 = vld [vmem:[%s18749_s9 + $0xd1] sm:$0xff] }
 0x3af   : > { %v7435_v57 = vpop.f32.mrf.mxu1  ;;  %v14851_v12 = vld [vmem:[%s18749_s9 + $0xd2] sm:$0xff] }
 0x3b0   : > { %v21801_v28 = vadd.f32 %v17515_v30, %v7915_v31  ;;  %v7914_v53 = vadd.f32 %v7435_v57, %v20910_v43  ;;  %v17518_v46 = vpop.f32.mrf.mxu0  ;;  %17861 = vmatmul.mubr.msk.f32.gmra.mxu0 %vm430_vm0, %v14849_v35  ;;  %v14594_v31 = vld [vmem:[%s18749_s9 + $0xd9] sm:$0xff] }
 0x3b1   : > { %v17322_v51 = vpop.f32.mrf.mxu1  ;;  %17665 = vmatmul.mubr.msk.f32.gmra.mxu1 %vm430_vm0, %v14591_v34  ;;  %17863 = vmatprep.mubr.msk.f32.mxu0 %vm430_vm0, %v14850_v45  ;;  %v14852_v57 = vld [vmem:[%s18749_s9 + $0xda] sm:$0xff] }
 0x3b2   : > { %v21806_v10 = vadd.f32 %v8784_v27, %v7914_v53  ;;  %v7917_v40 = vadd.f32 %v17322_v51, %v20919_v37  ;;  %17667 = vmatprep.mubr.msk.f32.mxu1 %vm430_vm0, %v14592_v42  ;;  %v8794_v43 = vpop.f32.mrf.mxu0  ;;  %v14595_v53 = vld [vmem:[%s18749_s9 + $0xe1] sm:$0xff] }
 0x3b3   : > { %v7445_v30 = vpop.f32.mrf.mxu1  ;;  %v14853_v51 = vld [vmem:[%s18749_s9 + $0xe2] sm:$0xff] }
 0x3b4   : > { %v21815_v34 = vadd.f32 %v17518_v46, %v7917_v40  ;;  %v7916_v35 = vadd.f32 %v7445_v30, %v20924_v14  ;;  %v17521_v37 = vpop.f32.mrf.mxu0  ;;  %17864 = vmatmul.mubr.msk.f32.gmra.mxu0 %vm430_vm0, %v14851_v12  ;;  %v14596_v40 = vld [vmem:[%s18749_s9 + $0xf1] sm:$0xff] }
 0x3b5   : > { %v17325_v27 = vpop.f32.mrf.mxu1  ;;  %17668 = vmatmul.mubr.msk.f32.gmra.mxu1 %vm430_vm0, %v14593_v38  ;;  %17866 = vmatprep.mubr.msk.f32.mxu0 %vm430_vm0, %v14852_v57  ;;  %v14854_v30 = vld [vmem:[%s18749_s9 + $0xf2] sm:$0xff] }
 0x3b6   : > { %24383 = vst [vmem:[#allocation80_spill] sm:$0xff] %v21815_v34  ;;  %v21820_v42 = vadd.f32 %v8794_v43, %v7916_v35  ;;  %v7919_v45 = vadd.f32 %v17325_v27, %v20933_v8  ;;  %17670 = vmatprep.mubr.msk.f32.mxu1 %vm430_vm0, %v14594_v31  ;;  %v8804_v14 = vpop.f32.mrf.mxu0  ;;  %v14597_v35 = vld [vmem:[%s18749_s9 + $0xf9] sm:$0xff] }
 0x3b7   : > { %v7455_v46 = vpop.f32.mrf.mxu1  ;;  %v14855_v27 = vld [vmem:[%s18749_s9 + $0xfa] sm:$0xff] }
 0x3b8   : > { %24384 = vst [vmem:[#allocation82_spill] sm:$0xff] %v21820_v42  ;;  %v21829_v38 = vadd.f32 %v17521_v37, %v7919_v45  ;;  %v7918_v12 = vadd.f32 %v7455_v46, %v20938_v6  ;;  %v17524_v8 = vpop.f32.mrf.mxu0  ;;  %17867 = vmatmul.mubr.msk.f32.gmra.mxu0 %vm430_vm0, %v14853_v51  ;;  %v14598_v45 = vld [vmem:[%s18749_s9 + $0x101] sm:$0xff] }
 0x3b9   : > { %v17328_v43 = vpop.f32.mrf.mxu1  ;;  %17671 = vmatmul.mubr.msk.f32.gmra.mxu1 %vm430_vm0, %v14595_v53  ;;  %17869 = vmatprep.mubr.msk.f32.mxu0 %vm430_vm0, %v14854_v30  ;;  %v14856_v46 = vld [vmem:[%s18749_s9 + $0x102] sm:$0xff] }
 0x3ba   : > { %24385 = vst [vmem:[#allocation84_spill] sm:$0xff] %v21829_v38  ;;  %v21834_v31 = vadd.f32 %v8804_v14, %v7918_v12  ;;  %v7921_v57 = vadd.f32 %v17328_v43, %v20947_v44  ;;  %17673 = vmatprep.mubr.msk.f32.mxu1 %vm430_vm0, %v14596_v40  ;;  %v8814_v6 = vpop.f32.mrf.mxu0  ;;  %v24388_v51 = vld [vmem:[#allocation85_spill] sm:$0xff]  ;;  %v24390_v30 = vld [vmem:[#allocation86_spill] sm:$0xff] }
 0x3bb   : > { %v7465_v37 = vpop.f32.mrf.mxu1 }
 0x3bc   : > { %24386 = vst [vmem:[#allocation87_spill] sm:$0xff] %v21834_v31  ;;  %v21843_v53 = vadd.f32 %v17524_v8, %v7921_v57  ;;  %v7920_v14 = vadd.f32 %v7465_v37, %v24388_v51  ;;  %v17527_v44 = vpop.f32.mrf.mxu0  ;;  %17870 = vmatmul.mubr.msk.f32.gmra.mxu0 %vm430_vm0, %v14855_v27  ;;  %v14599_v31 = vld [vmem:[%s18749_s9 + $0x109] sm:$0xff]  ;;  %v14600_v51 = vld [vmem:[%s18749_s9 + $0x119] sm:$0xff] }
 0x3bd   : > { %v17331_v12 = vpop.f32.mrf.mxu1  ;;  %17674 = vmatmul.mubr.msk.f32.gmra.mxu1 %vm430_vm0, %v14597_v35  ;;  %17872 = vmatprep.mubr.msk.f32.mxu0 %vm430_vm0, %v14856_v46  ;;  %v14857_v8 = vld [vmem:[%s18749_s9 + $0x10a] sm:$0xff]  ;;  %v24392_v27 = vld [vmem:[#allocation53_spill] sm:$0xff] }
 0x3be   : > { %24387 = vst [vmem:[#allocation88_spill] sm:$0xff] %v21843_v53  ;;  %v21848_v40 = vadd.f32 %v8814_v6, %v7920_v14  ;;  %v7923_v43 = vadd.f32 %v17331_v12, %v24390_v30  ;;  %17676 = vmatprep.mubr.msk.f32.mxu1 %vm430_vm0, %v14598_v45  ;;  %v8824_v37 = vpop.f32.mrf.mxu0  ;;  %v14858_v53 = vld [vmem:[%s18749_s9 + $0x11a] sm:$0xff]  ;;  %v24394_v46 = vld [vmem:[#allocation55_spill] sm:$0xff] }
 0x3bf   : > { %v7475_v57 = vpop.f32.mrf.mxu1 }
 0x3c0   : > { %24389 = vst [vmem:[#allocation85_spill] sm:$0xff] %v21848_v40  ;;  %v21857_v35 = vadd.f32 %v17527_v44, %v7923_v43  ;;  %v7922_v6 = vadd.f32 %v7475_v57, %v24392_v27  ;;  %v17530_v12 = vpop.f32.mrf.mxu0  ;;  %17873 = vmatmul.mubr.msk.f32.gmra.mxu0 %vm430_vm0, %v14857_v8  ;;  %v14601_v40 = vld [vmem:[%s18749_s9 + $0x121] sm:$0xff]  ;;  %v14602_v27 = vld [vmem:[%s18749_s9 + $0x129] sm:$0xff] }
 0x3c1   : > { %v17334_v14 = vpop.f32.mrf.mxu1  ;;  %17677 = vmatmul.mubr.msk.f32.gmra.mxu1 %vm430_vm0, %v14599_v31  ;;  %17875 = vmatprep.mubr.msk.f32.mxu0 %vm430_vm0, %v14858_v53  ;;  %v14859_v44 = vld [vmem:[%s18749_s9 + $0x122] sm:$0xff] }
 0x3c2   : > { %24391 = vst [vmem:[#allocation86_spill] sm:$0xff] %v21857_v35  ;;  %v21862_v45 = vadd.f32 %v8824_v37, %v7922_v6  ;;  %v7925_v30 = vadd.f32 %v17334_v14, %v24394_v46  ;;  %17679 = vmatprep.mubr.msk.f32.mxu1 %vm430_vm0, %v14600_v51  ;;  %v8834_v57 = vpop.f32.mrf.mxu0  ;;  %v14860_v35 = vld [vmem:[%s18749_s9 + $0x12a] sm:$0xff]  ;;  %v24396_v8 = vld [vmem:[#allocation57_spill] sm:$0xff] }
 0x3c3   : > { %v7485_v43 = vpop.f32.mrf.mxu1  ;;  %v24398_v51 = vld [vmem:[#allocation59_spill] sm:$0xff] }
 0x3c4   : > { %24393 = vst [vmem:[#allocation53_spill] sm:$0xff] %v21862_v45  ;;  %v21871_v31 = vadd.f32 %v17530_v12, %v7925_v30  ;;  %v7924_v37 = vadd.f32 %v7485_v43, %v24396_v8  ;;  %v17533_v14 = vpop.f32.mrf.mxu0  ;;  %17876 = vmatmul.mubr.msk.f32.gmra.mxu0 %vm430_vm0, %v14859_v44  ;;  %v14603_v45 = vld [vmem:[%s18749_s9 + $0x131] sm:$0xff]  ;;  %v14604_v8 = vld [vmem:[%s18749_s9 + $0x141] sm:$0xff] }
 0x3c5   : > { %v17337_v6 = vpop.f32.mrf.mxu1  ;;  %17680 = vmatmul.mubr.msk.f32.gmra.mxu1 %vm430_vm0, %v14601_v40  ;;  %17878 = vmatprep.mubr.msk.f32.mxu0 %vm430_vm0, %v14860_v35  ;;  %v14861_v12 = vld [vmem:[%s18749_s9 + $0x132] sm:$0xff]  ;;  %v24400_v44 = vld [vmem:[#allocation61_spill] sm:$0xff] }
 0x3c6   : > { %24395 = vst [vmem:[#allocation55_spill] sm:$0xff] %v21871_v31  ;;  %v21876_v53 = vadd.f32 %v8834_v57, %v7924_v37  ;;  %v7927_v46 = vadd.f32 %v17337_v6, %v24398_v51  ;;  %17682 = vmatprep.mubr.msk.f32.mxu1 %vm430_vm0, %v14602_v27  ;;  %v8844_v43 = vpop.f32.mrf.mxu0  ;;  %v14862_v31 = vld [vmem:[%s18749_s9 + $0x142] sm:$0xff]  ;;  %v24402_v27 = vld [vmem:[#allocation63_spill] sm:$0xff] }
 0x3c7   : > { %v7495_v30 = vpop.f32.mrf.mxu1 }
 0x3c8   : > { %24397 = vst [vmem:[#allocation57_spill] sm:$0xff] %v21876_v53  ;;  %v21885_v40 = vadd.f32 %v17533_v14, %v7927_v46  ;;  %v7926_v57 = vadd.f32 %v7495_v30, %v24400_v44  ;;  %v17536_v6 = vpop.f32.mrf.mxu0  ;;  %17879 = vmatmul.mubr.msk.f32.gmra.mxu0 %vm430_vm0, %v14861_v12  ;;  %v14605_v53 = vld [vmem:[%s18749_s9 + $0x149] sm:$0xff]  ;;  %v14606_v44 = vld [vmem:[%s18749_s9 + $0x151] sm:$0xff]  ;;  %v24404_v12 = vld [vmem:[#allocation65_spill] sm:$0xff] }
 0x3c9   : > { %v17340_v37 = vpop.f32.mrf.mxu1  ;;  %17683 = vmatmul.mubr.msk.f32.gmra.mxu1 %vm430_vm0, %v14603_v45  ;;  %17881 = vmatprep.mubr.msk.f32.mxu0 %vm430_vm0, %v14862_v31  ;;  %v14863_v14 = vld [vmem:[%s18749_s9 + $0x14a] sm:$0xff] }
 0x3ca   : > { %24399 = vst [vmem:[#allocation59_spill] sm:$0xff] %v21885_v40  ;;  %v21890_v35 = vadd.f32 %v8844_v43, %v7926_v57  ;;  %v7929_v51 = vadd.f32 %v17340_v37, %v24402_v27  ;;  %17685 = vmatprep.mubr.msk.f32.mxu1 %vm430_vm0, %v14604_v8  ;;  %v8854_v30 = vpop.f32.mrf.mxu0  ;;  %v14864_v40 = vld [vmem:[%s18749_s9 + $0x152] sm:$0xff] }
 0x3cb   : > { %v7505_v46 = vpop.f32.mrf.mxu1  ;;  %v24406_v8 = vld [vmem:[#allocation67_spill] sm:$0xff] }
 0x3cc   : > { %24401 = vst [vmem:[#allocation61_spill] sm:$0xff] %v21890_v35  ;;  %v21899_v45 = vadd.f32 %v17536_v6, %v7929_v51  ;;  %v7928_v43 = vadd.f32 %v7505_v46, %v24404_v12  ;;  %v17539_v37 = vpop.f32.mrf.mxu0  ;;  %17882 = vmatmul.mubr.msk.f32.gmra.mxu0 %vm430_vm0, %v14863_v14  ;;  %v14607_v35 = vld [vmem:[%s18749_s9 + $0x159] sm:$0xff]  ;;  %v14608_v12 = vld [vmem:[%s18749_s9 + $0x169] sm:$0xff] }
 0x3cd   : > { %v17343_v57 = vpop.f32.mrf.mxu1  ;;  %17686 = vmatmul.mubr.msk.f32.gmra.mxu1 %vm430_vm0, %v14605_v53  ;;  %17884 = vmatprep.mubr.msk.f32.mxu0 %vm430_vm0, %v14864_v40  ;;  %v14865_v6 = vld [vmem:[%s18749_s9 + $0x15a] sm:$0xff] }
 0x3ce   : > { %24403 = vst [vmem:[#allocation63_spill] sm:$0xff] %v21899_v45  ;;  %v21904_v31 = vadd.f32 %v8854_v30, %v7928_v43  ;;  %v7931_v27 = vadd.f32 %v17343_v57, %v24406_v8  ;;  %17688 = vmatprep.mubr.msk.f32.mxu1 %vm430_vm0, %v14606_v44  ;;  %v8864_v46 = vpop.f32.mrf.mxu0  ;;  %v14866_v45 = vld [vmem:[%s18749_s9 + $0x16a] sm:$0xff]  ;;  %v24408_v14 = vld [vmem:[#allocation69_spill] sm:$0xff] }
 0x3cf   : > { %v7515_v51 = vpop.f32.mrf.mxu1  ;;  %v24410_v44 = vld [vmem:[#allocation71_spill] sm:$0xff] }
 0x3d0   : > { %24405 = vst [vmem:[#allocation65_spill] sm:$0xff] %v21904_v31  ;;  %v21913_v53 = vadd.f32 %v17539_v37, %v7931_v27  ;;  %v7930_v30 = vadd.f32 %v7515_v51, %v24408_v14  ;;  %v17542_v57 = vpop.f32.mrf.mxu0  ;;  %17885 = vmatmul.mubr.msk.f32.gmra.mxu0 %vm430_vm0, %v14865_v6  ;;  %v14609_v31 = vld [vmem:[%s18749_s9 + $0x171] sm:$0xff]  ;;  %v14610_v14 = vld [vmem:[%s18749_s9 + $0x179] sm:$0xff] }
 0x3d1   : > { %v17346_v43 = vpop.f32.mrf.mxu1  ;;  %17689 = vmatmul.mubr.msk.f32.gmra.mxu1 %vm430_vm0, %v14607_v35  ;;  %17887 = vmatprep.mubr.msk.f32.mxu0 %vm430_vm0, %v14866_v45  ;;  %v14867_v37 = vld [vmem:[%s18749_s9 + $0x172] sm:$0xff]  ;;  %v24412_v6 = vld [vmem:[#allocation73_spill] sm:$0xff] }
 0x3d2   : > { %24407 = vst [vmem:[#allocation67_spill] sm:$0xff] %v21913_v53  ;;  %v21918_v40 = vadd.f32 %v8864_v46, %v7930_v30  ;;  %v7933_v8 = vadd.f32 %v17346_v43, %v24410_v44  ;;  %17691 = vmatprep.mubr.msk.f32.mxu1 %vm430_vm0, %v14608_v12  ;;  %v8874_v51 = vpop.f32.mrf.mxu0  ;;  %v14868_v53 = vld [vmem:[%s18749_s9 + $0x17a] sm:$0xff]  ;;  %v24414_v12 = vld [vmem:[#allocation75_spill] sm:$0xff] }
 0x3d3   : > { %v7525_v27 = vpop.f32.mrf.mxu1 }
 0x3d4   : > { %24409 = vst [vmem:[#allocation69_spill] sm:$0xff] %v21918_v40  ;;  %v21927_v35 = vadd.f32 %v17542_v57, %v7933_v8  ;;  %v7932_v46 = vadd.f32 %v7525_v27, %v24412_v6  ;;  %v17545_v43 = vpop.f32.mrf.mxu0  ;;  %17888 = vmatmul.mubr.msk.f32.gmra.mxu0 %vm430_vm0, %v14867_v37  ;;  %v14611_v40 = vld [vmem:[%s18749_s9 + $0x181] sm:$0xff]  ;;  %v14612_v6 = vld [vmem:[%s18749_s9 + $0x191] sm:$0xff] }
 0x3d5   : > { %v17349_v30 = vpop.f32.mrf.mxu1  ;;  %17692 = vmatmul.mubr.msk.f32.gmra.mxu1 %vm430_vm0, %v14609_v31  ;;  %17890 = vmatprep.mubr.msk.f32.mxu0 %vm430_vm0, %v14868_v53  ;;  %v14869_v57 = vld [vmem:[%s18749_s9 + $0x182] sm:$0xff] }
 0x3d6   : > { %24411 = vst [vmem:[#allocation71_spill] sm:$0xff] %v21927_v35  ;;  %v21932_v45 = vadd.f32 %v8874_v51, %v7932_v46  ;;  %v7935_v44 = vadd.f32 %v17349_v30, %v24414_v12  ;;  %17694 = vmatprep.mubr.msk.f32.mxu1 %vm430_vm0, %v14610_v14  ;;  %v8884_v27 = vpop.f32.mrf.mxu0  ;;  %v14870_v35 = vld [vmem:[%s18749_s9 + $0x192] sm:$0xff]  ;;  %v24416_v37 = vld [vmem:[#allocation77_spill] sm:$0xff] }
 0x3d7   : > { %v7535_v8 = vpop.f32.mrf.mxu1  ;;  %v24418_v14 = vld [vmem:[#allocation79_spill] sm:$0xff] }
 0x3d8   : > { %24413 = vst [vmem:[#allocation73_spill] sm:$0xff] %v21932_v45  ;;  %v21941_v31 = vadd.f32 %v17545_v43, %v7935_v44  ;;  %v7934_v51 = vadd.f32 %v7535_v8, %v24416_v37  ;;  %v17548_v30 = vpop.f32.mrf.mxu0  ;;  %17891 = vmatmul.mubr.msk.f32.gmra.mxu0 %vm430_vm0, %v14869_v57  ;;  %v14613_v45 = vld [vmem:[%s18749_s9 + $0x199] sm:$0xff]  ;;  %v14614_v37 = vld [vmem:[%s18749_s9 + $0x1a1] sm:$0xff] }
 0x3d9   : > { %v17352_v46 = vpop.f32.mrf.mxu1  ;;  %17695 = vmatmul.mubr.msk.f32.gmra.mxu1 %vm430_vm0, %v14611_v40  ;;  %17893 = vmatprep.mubr.msk.f32.mxu0 %vm430_vm0, %v14870_v35  ;;  %v14871_v43 = vld [vmem:[%s18749_s9 + $0x19a] sm:$0xff] }
 0x3da   : > { %24415 = vst [vmem:[#allocation75_spill] sm:$0xff] %v21941_v31  ;;  %v21946_v53 = vadd.f32 %v8884_v27, %v7934_v51  ;;  %v7937_v12 = vadd.f32 %v17352_v46, %v24418_v14  ;;  %17697 = vmatprep.mubr.msk.f32.mxu1 %vm430_vm0, %v14612_v6  ;;  %v8894_v8 = vpop.f32.mrf.mxu0  ;;  %v14872_v31 = vld [vmem:[%s18749_s9 + $0x1a2] sm:$0xff]  ;;  %v24422_v6 = vld [vmem:[#allocation83_spill] sm:$0xff] }
 0x3db   : > { %v7545_v44 = vpop.f32.mrf.mxu1  ;;  %v24420_v57 = vld [vmem:[#allocation81_spill] sm:$0xff] }
 0x3dc   : > { %24417 = vst [vmem:[#allocation77_spill] sm:$0xff] %v21946_v53  ;;  %v21955_v40 = vadd.f32 %v17548_v30, %v7937_v12  ;;  %v7936_v27 = vadd.f32 %v7545_v44, %v24420_v57  ;;  %v17551_v46 = vpop.f32.mrf.mxu0  ;;  %17894 = vmatmul.mubr.msk.f32.gmra.mxu0 %vm430_vm0, %v14871_v43  ;;  %v14615_v53 = vld [vmem:[%s18749_s9 + $0x1a9] sm:$0xff]  ;;  %v14616_v57 = vld [vmem:[%s18749_s9 + $0x1b9] sm:$0xff] }
 0x3dd   : > { %v17355_v51 = vpop.f32.mrf.mxu1  ;;  %17698 = vmatmul.mubr.msk.f32.gmra.mxu1 %vm430_vm0, %v14613_v45  ;;  %17896 = vmatprep.mubr.msk.f32.mxu0 %vm430_vm0, %v14872_v31  ;;  %v14873_v30 = vld [vmem:[%s18749_s9 + $0x1aa] sm:$0xff]  ;;  %v24424_v43 = vld [vmem:[#allocation5_spill] sm:$0xff] }
 0x3de   : > { %24419 = vst [vmem:[#allocation79_spill] sm:$0xff] %v21955_v40  ;;  %v21960_v35 = vadd.f32 %v8894_v8, %v7936_v27  ;;  %v7939_v14 = vadd.f32 %v17355_v51, %v24422_v6  ;;  %17700 = vmatprep.mubr.msk.f32.mxu1 %vm430_vm0, %v14614_v37  ;;  %v8904_v44 = vpop.f32.mrf.mxu0  ;;  %v14874_v40 = vld [vmem:[%s18749_s9 + $0x1ba] sm:$0xff]  ;;  %v24426_v37 = vld [vmem:[#allocation6_spill] sm:$0xff] }
 0x3df   : > { %v7555_v12 = vpop.f32.mrf.mxu1 }
 0x3e0   : > { %24421 = vst [vmem:[#allocation81_spill] sm:$0xff] %v21960_v35  ;;  %v21969_v45 = vadd.f32 %v17551_v46, %v7939_v14  ;;  %v7938_v8 = vadd.f32 %v7555_v12, %v24424_v43  ;;  %v17554_v51 = vpop.f32.mrf.mxu0  ;;  %17897 = vmatmul.mubr.msk.f32.gmra.mxu0 %vm430_vm0, %v14873_v30  ;;  %v14617_v35 = vld [vmem:[%s18749_s9 + $0x1c1] sm:$0xff]  ;;  %v14618_v43 = vld [vmem:[%s18749_s9 + $0x1c9] sm:$0xff] }
 0x3e1   : > { %v17358_v27 = vpop.f32.mrf.mxu1  ;;  %17701 = vmatmul.mubr.msk.f32.gmra.mxu1 %vm430_vm0, %v14615_v53  ;;  %17899 = vmatprep.mubr.msk.f32.mxu0 %vm430_vm0, %v14874_v40  ;;  %v14875_v46 = vld [vmem:[%s18749_s9 + $0x1c2] sm:$0xff]  ;;  %v24428_v30 = vld [vmem:[#allocation7_spill] sm:$0xff] }
 0x3e2   : > { %24423 = vst [vmem:[#allocation83_spill] sm:$0xff] %v21969_v45  ;;  %v21974_v31 = vadd.f32 %v8904_v44, %v7938_v8  ;;  %v7941_v6 = vadd.f32 %v17358_v27, %v24426_v37  ;;  %17703 = vmatprep.mubr.msk.f32.mxu1 %vm430_vm0, %v14616_v57  ;;  %v8914_v12 = vpop.f32.mrf.mxu0  ;;  %v14876_v45 = vld [vmem:[%s18749_s9 + $0x1ca] sm:$0xff]  ;;  %v24430_v57 = vld [vmem:[#allocation8_spill] sm:$0xff] }
 0x3e3   : > { %v7565_v14 = vpop.f32.mrf.mxu1 }
 0x3e4   : > { %24425 = vst [vmem:[#allocation5_spill] sm:$0xff] %v21974_v31  ;;  %v21983_v53 = vadd.f32 %v17554_v51, %v7941_v6  ;;  %v7940_v44 = vadd.f32 %v7565_v14, %v24428_v30  ;;  %v17557_v27 = vpop.f32.mrf.mxu0  ;;  %17900 = vmatmul.mubr.msk.f32.gmra.mxu0 %vm430_vm0, %v14875_v46  ;;  %v14619_v31 = vld [vmem:[%s18749_s9 + $0x1d1] sm:$0xff]  ;;  %v14620_v30 = vld [vmem:[%s18749_s9 + $0x1e1] sm:$0xff] }
 0x3e5   : > { %v17361_v8 = vpop.f32.mrf.mxu1  ;;  %17704 = vmatmul.mubr.msk.f32.gmra.mxu1 %vm430_vm0, %v14617_v35  ;;  %17902 = vmatprep.mubr.msk.f32.mxu0 %vm430_vm0, %v14876_v45  ;;  %v14877_v51 = vld [vmem:[%s18749_s9 + $0x1d2] sm:$0xff]  ;;  %v24432_v46 = vld [vmem:[#allocation9_spill] sm:$0xff] }
 0x3e6   : > { %24427 = vst [vmem:[#allocation6_spill] sm:$0xff] %v21983_v53  ;;  %v21988_v40 = vadd.f32 %v8914_v12, %v7940_v44  ;;  %v7943_v37 = vadd.f32 %v17361_v8, %v24430_v57  ;;  %17706 = vmatprep.mubr.msk.f32.mxu1 %vm430_vm0, %v14618_v43  ;;  %v8924_v14 = vpop.f32.mrf.mxu0  ;;  %v14878_v53 = vld [vmem:[%s18749_s9 + $0x1e2] sm:$0xff] }
 0x3e7   : > { %v7575_v6 = vpop.f32.mrf.mxu1  ;;  %v24434_v43 = vld [vmem:[#allocation10_spill] sm:$0xff] }
 0x3e8   : > { %24429 = vst [vmem:[#allocation7_spill] sm:$0xff] %v21988_v40  ;;  %v21997_v35 = vadd.f32 %v17557_v27, %v7943_v37  ;;  %v7942_v12 = vadd.f32 %v7575_v6, %v24432_v46  ;;  %v17560_v8 = vpop.f32.mrf.mxu0  ;;  %17903 = vmatmul.mubr.msk.f32.gmra.mxu0 %vm430_vm0, %v14877_v51  ;;  %v14621_v40 = vld [vmem:[%s18749_s9 + $0x1e9] sm:$0xff]  ;;  %v14622_v46 = vld [vmem:[%s18749_s9 + $0x1f1] sm:$0xff] }
 0x3e9   : > { %v17364_v44 = vpop.f32.mrf.mxu1  ;;  %17707 = vmatmul.mubr.msk.f32.gmra.mxu1 %vm430_vm0, %v14619_v31  ;;  %17905 = vmatprep.mubr.msk.f32.mxu0 %vm430_vm0, %v14878_v53  ;;  %v14879_v27 = vld [vmem:[%s18749_s9 + $0x1ea] sm:$0xff] }
 0x3ea   : > { %24431 = vst [vmem:[#allocation8_spill] sm:$0xff] %v21997_v35  ;;  %v22002_v45 = vadd.f32 %v8924_v14, %v7942_v12  ;;  %v7945_v57 = vadd.f32 %v17364_v44, %v24434_v43  ;;  %17709 = vmatprep.mubr.msk.f32.mxu1 %vm430_vm0, %v14620_v30  ;;  %v8934_v6 = vpop.f32.mrf.mxu0  ;;  %v14880_v35 = vld [vmem:[%s18749_s9 + $0x1f2] sm:$0xff] }
 0x3eb   : > { %v7585_v37 = vpop.f32.mrf.mxu1  ;;  %v24436_v51 = vld [vmem:[#allocation11_spill] sm:$0xff]  ;;  %v24438_v30 = vld [vmem:[#allocation12_spill] sm:$0xff] }
 0x3ec   : > { %24433 = vst [vmem:[#allocation9_spill] sm:$0xff] %v22002_v45  ;;  %v22011_v31 = vadd.f32 %v17560_v8, %v7945_v57  ;;  %v7944_v14 = vadd.f32 %v7585_v37, %v24436_v51  ;;  %v17563_v44 = vpop.f32.mrf.mxu0  ;;  %17906 = vmatmul.mubr.msk.f32.gmra.mxu0 %vm430_vm0, %v14879_v27  ;;  %v14623_v45 = vld [vmem:[%s18749_s9 + $0x1f9] sm:$0xff]  ;;  %v14624_v51 = vld [vmem:[%s18749_s9 + $0x209] sm:$0xff] }
 0x3ed   : > { %v17367_v12 = vpop.f32.mrf.mxu1  ;;  %17710 = vmatmul.mubr.msk.f32.gmra.mxu1 %vm430_vm0, %v14621_v40  ;;  %17908 = vmatprep.mubr.msk.f32.mxu0 %vm430_vm0, %v14880_v35  ;;  %v14881_v8 = vld [vmem:[%s18749_s9 + $0x1fa] sm:$0xff] }
 0x3ee   : > { %24435 = vst [vmem:[#allocation10_spill] sm:$0xff] %v22011_v31  ;;  %v22016_v53 = vadd.f32 %v8934_v6, %v7944_v14  ;;  %v7947_v43 = vadd.f32 %v17367_v12, %v24438_v30  ;;  %17712 = vmatprep.mubr.msk.f32.mxu1 %vm430_vm0, %v14622_v46  ;;  %v8944_v37 = vpop.f32.mrf.mxu0  ;;  %v14882_v31 = vld [vmem:[%s18749_s9 + $0x20a] sm:$0xff]  ;;  %v24440_v27 = vld [vmem:[#allocation13_spill] sm:$0xff] }
 0x3ef   : > { %v7595_v57 = vpop.f32.mrf.mxu1  ;;  %v24442_v46 = vld [vmem:[#allocation14_spill] sm:$0xff] }
 0x3f0   : > { %24437 = vst [vmem:[#allocation11_spill] sm:$0xff] %v22016_v53  ;;  %v22025_v40 = vadd.f32 %v17563_v44, %v7947_v43  ;;  %v7946_v6 = vadd.f32 %v7595_v57, %v24440_v27  ;;  %v17566_v12 = vpop.f32.mrf.mxu0  ;;  %17909 = vmatmul.mubr.msk.f32.gmra.mxu0 %vm430_vm0, %v14881_v8  ;;  %v14625_v53 = vld [vmem:[%s18749_s9 + $0x211] sm:$0xff]  ;;  %v14626_v27 = vld [vmem:[%s18749_s9 + $0x219] sm:$0xff] }
 0x3f1   : > { %v17370_v14 = vpop.f32.mrf.mxu1  ;;  %17713 = vmatmul.mubr.msk.f32.gmra.mxu1 %vm430_vm0, %v14623_v45  ;;  %17911 = vmatprep.mubr.msk.f32.mxu0 %vm430_vm0, %v14882_v31  ;;  %v14883_v44 = vld [vmem:[%s18749_s9 + $0x212] sm:$0xff] }
 0x3f2   : > { %24439 = vst [vmem:[#allocation12_spill] sm:$0xff] %v22025_v40  ;;  %v22030_v35 = vadd.f32 %v8944_v37, %v7946_v6  ;;  %v7949_v30 = vadd.f32 %v17370_v14, %v24442_v46  ;;  %17715 = vmatprep.mubr.msk.f32.mxu1 %vm430_vm0, %v14624_v51  ;;  %v8954_v57 = vpop.f32.mrf.mxu0  ;;  %v14884_v40 = vld [vmem:[%s18749_s9 + $0x21a] sm:$0xff]  ;;  %v24444_v8 = vld [vmem:[#allocation15_spill] sm:$0xff] }
 0x3f3   : > { %v7605_v43 = vpop.f32.mrf.mxu1  ;;  %v24446_v51 = vld [vmem:[#allocation16_spill] sm:$0xff] }
 0x3f4   : > { %24441 = vst [vmem:[#allocation13_spill] sm:$0xff] %v22030_v35  ;;  %v22039_v45 = vadd.f32 %v17566_v12, %v7949_v30  ;;  %v7948_v37 = vadd.f32 %v7605_v43, %v24444_v8  ;;  %v17569_v14 = vpop.f32.mrf.mxu0  ;;  %17912 = vmatmul.mubr.msk.f32.gmra.mxu0 %vm430_vm0, %v14883_v44  ;;  %v14627_v35 = vld [vmem:[%s18749_s9 + $0x221] sm:$0xff]  ;;  %v14628_v8 = vld [vmem:[%s18749_s9 + $0x231] sm:$0xff] }
 0x3f5   : > { %v17373_v6 = vpop.f32.mrf.mxu1  ;;  %17716 = vmatmul.mubr.msk.f32.gmra.mxu1 %vm430_vm0, %v14625_v53  ;;  %17914 = vmatprep.mubr.msk.f32.mxu0 %vm430_vm0, %v14884_v40  ;;  %v14885_v12 = vld [vmem:[%s18749_s9 + $0x222] sm:$0xff] }
 0x3f6   : > { %24443 = vst [vmem:[#allocation14_spill] sm:$0xff] %v22039_v45  ;;  %v22044_v31 = vadd.f32 %v8954_v57, %v7948_v37  ;;  %v7951_v46 = vadd.f32 %v17373_v6, %v24446_v51  ;;  %17718 = vmatprep.mubr.msk.f32.mxu1 %vm430_vm0, %v14626_v27  ;;  %v8964_v43 = vpop.f32.mrf.mxu0  ;;  %v14886_v45 = vld [vmem:[%s18749_s9 + $0x232] sm:$0xff]  ;;  %v24448_v44 = vld [vmem:[#allocation17_spill] sm:$0xff]  ;;  %v24450_v27 = vld [vmem:[#allocation18_spill] sm:$0xff] }
 0x3f7   : > { %v7615_v30 = vpop.f32.mrf.mxu1 }
 0x3f8   : > { %24445 = vst [vmem:[#allocation15_spill] sm:$0xff] %v22044_v31  ;;  %v22053_v53 = vadd.f32 %v17569_v14, %v7951_v46  ;;  %v7950_v57 = vadd.f32 %v7615_v30, %v24448_v44  ;;  %v17572_v6 = vpop.f32.mrf.mxu0  ;;  %17915 = vmatmul.mubr.msk.f32.gmra.mxu0 %vm430_vm0, %v14885_v12  ;;  %v14629_v31 = vld [vmem:[%s18749_s9 + $0x239] sm:$0xff]  ;;  %v14630_v44 = vld [vmem:[%s18749_s9 + $0x241] sm:$0xff]  ;;  %v24452_v12 = vld [vmem:[#allocation19_spill] sm:$0xff] }
 0x3f9   : > { %v17376_v37 = vpop.f32.mrf.mxu1  ;;  %17719 = vmatmul.mubr.msk.f32.gmra.mxu1 %vm430_vm0, %v14627_v35  ;;  %17917 = vmatprep.mubr.msk.f32.mxu0 %vm430_vm0, %v14886_v45  ;;  %v14887_v14 = vld [vmem:[%s18749_s9 + $0x23a] sm:$0xff] }
 0x3fa   : > { %24447 = vst [vmem:[#allocation16_spill] sm:$0xff] %v22053_v53  ;;  %v22058_v40 = vadd.f32 %v8964_v43, %v7950_v57  ;;  %v7953_v51 = vadd.f32 %v17376_v37, %v24450_v27  ;;  %17721 = vmatprep.mubr.msk.f32.mxu1 %vm430_vm0, %v14628_v8  ;;  %v8974_v30 = vpop.f32.mrf.mxu0  ;;  %v14888_v53 = vld [vmem:[%s18749_s9 + $0x242] sm:$0xff]  ;;  %v24454_v8 = vld [vmem:[#allocation20_spill] sm:$0xff] }
 0x3fb   : > { %v7625_v46 = vpop.f32.mrf.mxu1 }
 0x3fc   : > { %24449 = vst [vmem:[#allocation17_spill] sm:$0xff] %v22058_v40  ;;  %v22067_v35 = vadd.f32 %v17572_v6, %v7953_v51  ;;  %v7952_v43 = vadd.f32 %v7625_v46, %v24452_v12  ;;  %v17575_v37 = vpop.f32.mrf.mxu0  ;;  %17918 = vmatmul.mubr.msk.f32.gmra.mxu0 %vm430_vm0, %v14887_v14  ;;  %v14631_v40 = vld [vmem:[%s18749_s9 + $0x249] sm:$0xff]  ;;  %v14632_v12 = vld [vmem:[%s18749_s9 + $0x259] sm:$0xff] }
 0x3fd   : > { %v17379_v57 = vpop.f32.mrf.mxu1  ;;  %17722 = vmatmul.mubr.msk.f32.gmra.mxu1 %vm430_vm0, %v14629_v31  ;;  %17920 = vmatprep.mubr.msk.f32.mxu0 %vm430_vm0, %v14888_v53  ;;  %v14889_v6 = vld [vmem:[%s18749_s9 + $0x24a] sm:$0xff]  ;;  %v24456_v14 = vld [vmem:[#allocation21_spill] sm:$0xff] }
 0x3fe   : > { %24451 = vst [vmem:[#allocation18_spill] sm:$0xff] %v22067_v35  ;;  %v22072_v45 = vadd.f32 %v8974_v30, %v7952_v43  ;;  %v7955_v27 = vadd.f32 %v17379_v57, %v24454_v8  ;;  %17724 = vmatprep.mubr.msk.f32.mxu1 %vm430_vm0, %v14630_v44  ;;  %v8984_v46 = vpop.f32.mrf.mxu0  ;;  %v14890_v35 = vld [vmem:[%s18749_s9 + $0x25a] sm:$0xff]  ;;  %v24458_v44 = vld [vmem:[#allocation22_spill] sm:$0xff] }
 0x3ff   : > { %v7635_v51 = vpop.f32.mrf.mxu1 }
 0x400   : > { %24453 = vst [vmem:[#allocation19_spill] sm:$0xff] %v22072_v45  ;;  %v22081_v31 = vadd.f32 %v17575_v37, %v7955_v27  ;;  %v7954_v30 = vadd.f32 %v7635_v51, %v24456_v14  ;;  %v17578_v57 = vpop.f32.mrf.mxu0  ;;  %17921 = vmatmul.mubr.msk.f32.gmra.mxu0 %vm430_vm0, %v14889_v6  ;;  %v14633_v45 = vld [vmem:[%s18749_s9 + $0x261] sm:$0xff]  ;;  %v14634_v14 = vld [vmem:[%s18749_s9 + $0x269] sm:$0xff] }
 0x401   : > { %v17382_v43 = vpop.f32.mrf.mxu1  ;;  %17725 = vmatmul.mubr.msk.f32.gmra.mxu1 %vm430_vm0, %v14631_v40  ;;  %17923 = vmatprep.mubr.msk.f32.mxu0 %vm430_vm0, %v14890_v35  ;;  %v14891_v37 = vld [vmem:[%s18749_s9 + $0x262] sm:$0xff]  ;;  %v24460_v6 = vld [vmem:[#allocation23_spill] sm:$0xff] }
 0x402   : > { %24455 = vst [vmem:[#allocation20_spill] sm:$0xff] %v22081_v31  ;;  %v22086_v53 = vadd.f32 %v8984_v46, %v7954_v30  ;;  %v7957_v8 = vadd.f32 %v17382_v43, %v24458_v44  ;;  %17727 = vmatprep.mubr.msk.f32.mxu1 %vm430_vm0, %v14632_v12  ;;  %v8994_v51 = vpop.f32.mrf.mxu0  ;;  %v14892_v31 = vld [vmem:[%s18749_s9 + $0x26a] sm:$0xff]  ;;  %v24462_v12 = vld [vmem:[#allocation24_spill] sm:$0xff] }
 0x403   : > { %v7645_v27 = vpop.f32.mrf.mxu1 }
 0x404   : > { %24457 = vst [vmem:[#allocation21_spill] sm:$0xff] %v22086_v53  ;;  %v22095_v40 = vadd.f32 %v17578_v57, %v7957_v8  ;;  %v7956_v46 = vadd.f32 %v7645_v27, %v24460_v6  ;;  %v17581_v43 = vpop.f32.mrf.mxu0  ;;  %17924 = vmatmul.mubr.msk.f32.gmra.mxu0 %vm430_vm0, %v14891_v37  ;;  %v14635_v53 = vld [vmem:[%s18749_s9 + $0x271] sm:$0xff]  ;;  %v14636_v6 = vld [vmem:[%s18749_s9 + $0x281] sm:$0xff] }
 0x405   : > { %v17385_v30 = vpop.f32.mrf.mxu1  ;;  %17728 = vmatmul.mubr.msk.f32.gmra.mxu1 %vm430_vm0, %v14633_v45  ;;  %17926 = vmatprep.mubr.msk.f32.mxu0 %vm430_vm0, %v14892_v31  ;;  %v14893_v57 = vld [vmem:[%s18749_s9 + $0x272] sm:$0xff]  ;;  %v24464_v37 = vld [vmem:[#allocation25_spill] sm:$0xff] }
 0x406   : > { %24459 = vst [vmem:[#allocation22_spill] sm:$0xff] %v22095_v40  ;;  %v22100_v35 = vadd.f32 %v8994_v51, %v7956_v46  ;;  %v7959_v44 = vadd.f32 %v17385_v30, %v24462_v12  ;;  %17730 = vmatprep.mubr.msk.f32.mxu1 %vm430_vm0, %v14634_v14  ;;  %v9004_v27 = vpop.f32.mrf.mxu0  ;;  %v14894_v40 = vld [vmem:[%s18749_s9 + $0x282] sm:$0xff] }
 0x407   : > { %v7655_v8 = vpop.f32.mrf.mxu1  ;;  %v24466_v14 = vld [vmem:[#allocation26_spill] sm:$0xff] }
 0x408   : > { %24461 = vst [vmem:[#allocation23_spill] sm:$0xff] %v22100_v35  ;;  %v22109_v45 = vadd.f32 %v17581_v43, %v7959_v44  ;;  %v7958_v51 = vadd.f32 %v7655_v8, %v24464_v37  ;;  %v17584_v30 = vpop.f32.mrf.mxu0  ;;  %17927 = vmatmul.mubr.msk.f32.gmra.mxu0 %vm430_vm0, %v14893_v57  ;;  %v14637_v35 = vld [vmem:[%s18749_s9 + $0x289] sm:$0xff]  ;;  %v14638_v37 = vld [vmem:[%s18749_s9 + $0x291] sm:$0xff] }
 0x409   : > { %v17388_v46 = vpop.f32.mrf.mxu1  ;;  %17731 = vmatmul.mubr.msk.f32.gmra.mxu1 %vm430_vm0, %v14635_v53  ;;  %17929 = vmatprep.mubr.msk.f32.mxu0 %vm430_vm0, %v14894_v40  ;;  %v14895_v43 = vld [vmem:[%s18749_s9 + $0x28a] sm:$0xff] }
 0x40a   : > { %24463 = vst [vmem:[#allocation24_spill] sm:$0xff] %v22109_v45  ;;  %v22114_v31 = vadd.f32 %v9004_v27, %v7958_v51  ;;  %v7961_v12 = vadd.f32 %v17388_v46, %v24466_v14  ;;  %17733 = vmatprep.mubr.msk.f32.mxu1 %vm430_vm0, %v14636_v6  ;;  %v9014_v8 = vpop.f32.mrf.mxu0  ;;  %v14896_v45 = vld [vmem:[%s18749_s9 + $0x292] sm:$0xff] }
 0x40b   : > { %v7665_v44 = vpop.f32.mrf.mxu1  ;;  %v24468_v57 = vld [vmem:[#allocation27_spill] sm:$0xff]  ;;  %v24470_v6 = vld [vmem:[#allocation28_spill] sm:$0xff] }
 0x40c   : > { %24465 = vst [vmem:[#allocation25_spill] sm:$0xff] %v22114_v31  ;;  %v22123_v53 = vadd.f32 %v17584_v30, %v7961_v12  ;;  %v7960_v27 = vadd.f32 %v7665_v44, %v24468_v57  ;;  %v17587_v46 = vpop.f32.mrf.mxu0  ;;  %17930 = vmatmul.mubr.msk.f32.gmra.mxu0 %vm430_vm0, %v14895_v43  ;;  %v14639_v31 = vld [vmem:[%s18749_s9 + $0x299] sm:$0xff]  ;;  %v14640_v57 = vld [vmem:[%s18749_s9 + $0x2a9] sm:$0xff] }
 0x40d   : > { %v17391_v51 = vpop.f32.mrf.mxu1  ;;  %17734 = vmatmul.mubr.msk.f32.gmra.mxu1 %vm430_vm0, %v14637_v35  ;;  %17932 = vmatprep.mubr.msk.f32.mxu0 %vm430_vm0, %v14896_v45  ;;  %v14897_v30 = vld [vmem:[%s18749_s9 + $0x29a] sm:$0xff] }
 0x40e   : > { %24467 = vst [vmem:[#allocation26_spill] sm:$0xff] %v22123_v53  ;;  %v22128_v40 = vadd.f32 %v9014_v8, %v7960_v27  ;;  %v7963_v14 = vadd.f32 %v17391_v51, %v24470_v6  ;;  %17736 = vmatprep.mubr.msk.f32.mxu1 %vm430_vm0, %v14638_v37  ;;  %v9024_v44 = vpop.f32.mrf.mxu0  ;;  %v14898_v53 = vld [vmem:[%s18749_s9 + $0x2aa] sm:$0xff]  ;;  %v24472_v43 = vld [vmem:[#allocation29_spill] sm:$0xff] }
 0x40f   : > { %v7675_v12 = vpop.f32.mrf.mxu1  ;;  %v24474_v37 = vld [vmem:[#allocation30_spill] sm:$0xff] }
 0x410   : > { %24469 = vst [vmem:[#allocation27_spill] sm:$0xff] %v22128_v40  ;;  %v22137_v35 = vadd.f32 %v17587_v46, %v7963_v14  ;;  %v7962_v8 = vadd.f32 %v7675_v12, %v24472_v43  ;;  %v17590_v51 = vpop.f32.mrf.mxu0  ;;  %17933 = vmatmul.mubr.msk.f32.gmra.mxu0 %vm430_vm0, %v14897_v30  ;;  %v14641_v40 = vld [vmem:[%s18749_s9 + $0x2b1] sm:$0xff]  ;;  %v14642_v43 = vld [vmem:[%s18749_s9 + $0x2b9] sm:$0xff] }
 0x411   : > { %v17394_v27 = vpop.f32.mrf.mxu1  ;;  %17737 = vmatmul.mubr.msk.f32.gmra.mxu1 %vm430_vm0, %v14639_v31  ;;  %17935 = vmatprep.mubr.msk.f32.mxu0 %vm430_vm0, %v14898_v53  ;;  %v14899_v46 = vld [vmem:[%s18749_s9 + $0x2b2] sm:$0xff] }
 0x412   : > { %24471 = vst [vmem:[#allocation28_spill] sm:$0xff] %v22137_v35  ;;  %v22142_v45 = vadd.f32 %v9024_v44, %v7962_v8  ;;  %v7965_v6 = vadd.f32 %v17394_v27, %v24474_v37  ;;  %17739 = vmatprep.mubr.msk.f32.mxu1 %vm430_vm0, %v14640_v57  ;;  %v9034_v12 = vpop.f32.mrf.mxu0  ;;  %v14900_v35 = vld [vmem:[%s18749_s9 + $0x2ba] sm:$0xff]  ;;  %v24476_v30 = vld [vmem:[#allocation31_spill] sm:$0xff] }
 0x413   : > { %v7685_v14 = vpop.f32.mrf.mxu1  ;;  %v24478_v57 = vld [vmem:[#allocation32_spill] sm:$0xff] }
 0x414   : > { %24473 = vst [vmem:[#allocation29_spill] sm:$0xff] %v22142_v45  ;;  %v22151_v31 = vadd.f32 %v17590_v51, %v7965_v6  ;;  %v7964_v44 = vadd.f32 %v7685_v14, %v24476_v30  ;;  %v17593_v27 = vpop.f32.mrf.mxu0  ;;  %17936 = vmatmul.mubr.msk.f32.gmra.mxu0 %vm430_vm0, %v14899_v46  ;;  %v14643_v45 = vld [vmem:[%s18749_s9 + $0x2c1] sm:$0xff]  ;;  %v14644_v30 = vld [vmem:[%s18749_s9 + $0x2d1] sm:$0xff] }
 0x415   : > { %v17397_v8 = vpop.f32.mrf.mxu1  ;;  %17740 = vmatmul.mubr.msk.f32.gmra.mxu1 %vm430_vm0, %v14641_v40  ;;  %17938 = vmatprep.mubr.msk.f32.mxu0 %vm430_vm0, %v14900_v35  ;;  %v14901_v51 = vld [vmem:[%s18749_s9 + $0x2c2] sm:$0xff] }
 0x416   : > { %24475 = vst [vmem:[#allocation30_spill] sm:$0xff] %v22151_v31  ;;  %v22156_v53 = vadd.f32 %v9034_v12, %v7964_v44  ;;  %v7967_v37 = vadd.f32 %v17397_v8, %v24478_v57  ;;  %17742 = vmatprep.mubr.msk.f32.mxu1 %vm430_vm0, %v14642_v43  ;;  %v9044_v14 = vpop.f32.mrf.mxu0  ;;  %v14902_v31 = vld [vmem:[%s18749_s9 + $0x2d2] sm:$0xff]  ;;  %v24480_v46 = vld [vmem:[#allocation33_spill] sm:$0xff]  ;;  %v24482_v43 = vld [vmem:[#allocation34_spill] sm:$0xff] }
 0x417   : > { %v7695_v6 = vpop.f32.mrf.mxu1 }
 0x418   : > { %24477 = vst [vmem:[#allocation31_spill] sm:$0xff] %v22156_v53  ;;  %v22165_v40 = vadd.f32 %v17593_v27, %v7967_v37  ;;  %v7966_v12 = vadd.f32 %v7695_v6, %v24480_v46  ;;  %v17596_v8 = vpop.f32.mrf.mxu0  ;;  %17939 = vmatmul.mubr.msk.f32.gmra.mxu0 %vm430_vm0, %v14901_v51  ;;  %v14645_v53 = vld [vmem:[%s18749_s9 + $0x2d9] sm:$0xff]  ;;  %v14646_v46 = vld [vmem:[%s18749_s9 + $0x2e1] sm:$0xff]  ;;  %v24484_v51 = vld [vmem:[#allocation35_spill] sm:$0xff] }
 0x419   : > { %v17400_v44 = vpop.f32.mrf.mxu1  ;;  %17743 = vmatmul.mubr.msk.f32.gmra.mxu1 %vm430_vm0, %v14643_v45  ;;  %17941 = vmatprep.mubr.msk.f32.mxu0 %vm430_vm0, %v14902_v31  ;;  %v14903_v27 = vld [vmem:[%s18749_s9 + $0x2da] sm:$0xff] }
 0x41a   : > { %24479 = vst [vmem:[#allocation32_spill] sm:$0xff] %v22165_v40  ;;  %v22170_v35 = vadd.f32 %v9044_v14, %v7966_v12  ;;  %v7969_v57 = vadd.f32 %v17400_v44, %v24482_v43  ;;  %17745 = vmatprep.mubr.msk.f32.mxu1 %vm430_vm0, %v14644_v30  ;;  %v9054_v6 = vpop.f32.mrf.mxu0  ;;  %v14904_v40 = vld [vmem:[%s18749_s9 + $0x2e2] sm:$0xff]  ;;  %v24486_v30 = vld [vmem:[#allocation36_spill] sm:$0xff] }
 0x41b   : > { %v7705_v37 = vpop.f32.mrf.mxu1 }
 0x41c   : > { %24481 = vst [vmem:[#allocation33_spill] sm:$0xff] %v22170_v35  ;;  %v22179_v45 = vadd.f32 %v17596_v8, %v7969_v57  ;;  %v7968_v14 = vadd.f32 %v7705_v37, %v24484_v51  ;;  %v17599_v44 = vpop.f32.mrf.mxu0  ;;  %17942 = vmatmul.mubr.msk.f32.gmra.mxu0 %vm430_vm0, %v14903_v27  ;;  %v14647_v35 = vld [vmem:[%s18749_s9 + $0x2e9] sm:$0xff]  ;;  %v14648_v51 = vld [vmem:[%s18749_s9 + $0x2f9] sm:$0xff] }
 0x41d   : > { %v17403_v12 = vpop.f32.mrf.mxu1  ;;  %17746 = vmatmul.mubr.msk.f32.gmra.mxu1 %vm430_vm0, %v14645_v53  ;;  %17944 = vmatprep.mubr.msk.f32.mxu0 %vm430_vm0, %v14904_v40  ;;  %v14905_v8 = vld [vmem:[%s18749_s9 + $0x2ea] sm:$0xff]  ;;  %v24488_v27 = vld [vmem:[#allocation37_spill] sm:$0xff] }
 0x41e   : > { %24483 = vst [vmem:[#allocation34_spill] sm:$0xff] %v22179_v45  ;;  %v22184_v31 = vadd.f32 %v9054_v6, %v7968_v14  ;;  %v7971_v43 = vadd.f32 %v17403_v12, %v24486_v30  ;;  %17748 = vmatprep.mubr.msk.f32.mxu1 %vm430_vm0, %v14646_v46  ;;  %v9064_v37 = vpop.f32.mrf.mxu0  ;;  %v14906_v45 = vld [vmem:[%s18749_s9 + $0x2fa] sm:$0xff]  ;;  %v24490_v46 = vld [vmem:[#allocation38_spill] sm:$0xff] }
 0x41f   : > { %v7715_v57 = vpop.f32.mrf.mxu1 }
 0x420   : > { %24485 = vst [vmem:[#allocation35_spill] sm:$0xff] %v22184_v31  ;;  %v22193_v53 = vadd.f32 %v17599_v44, %v7971_v43  ;;  %v7970_v6 = vadd.f32 %v7715_v57, %v24488_v27  ;;  %v17602_v12 = vpop.f32.mrf.mxu0  ;;  %17945 = vmatmul.mubr.msk.f32.gmra.mxu0 %vm430_vm0, %v14905_v8  ;;  %v14649_v31 = vld [vmem:[%s18749_s9 + $0x301] sm:$0xff]  ;;  %v14650_v27 = vld [vmem:[%s18749_s9 + $0x309] sm:$0xff] }
 0x421   : > { %v17406_v14 = vpop.f32.mrf.mxu1  ;;  %17749 = vmatmul.mubr.msk.f32.gmra.mxu1 %vm430_vm0, %v14647_v35  ;;  %17947 = vmatprep.mubr.msk.f32.mxu0 %vm430_vm0, %v14906_v45  ;;  %v14907_v44 = vld [vmem:[%s18749_s9 + $0x302] sm:$0xff]  ;;  %v24492_v8 = vld [vmem:[#allocation39_spill] sm:$0xff] }
 0x422   : > { %24487 = vst [vmem:[#allocation36_spill] sm:$0xff] %v22193_v53  ;;  %v22198_v40 = vadd.f32 %v9064_v37, %v7970_v6  ;;  %v7973_v30 = vadd.f32 %v17406_v14, %v24490_v46  ;;  %17751 = vmatprep.mubr.msk.f32.mxu1 %vm430_vm0, %v14648_v51  ;;  %v9074_v57 = vpop.f32.mrf.mxu0  ;;  %v14908_v53 = vld [vmem:[%s18749_s9 + $0x30a] sm:$0xff]  ;;  %v24494_v51 = vld [vmem:[#allocation40_spill] sm:$0xff] }
 0x423   : > { %v7725_v43 = vpop.f32.mrf.mxu1 }
 0x424   : > { %24489 = vst [vmem:[#allocation37_spill] sm:$0xff] %v22198_v40  ;;  %v22207_v35 = vadd.f32 %v17602_v12, %v7973_v30  ;;  %v7972_v37 = vadd.f32 %v7725_v43, %v24492_v8  ;;  %v17605_v14 = vpop.f32.mrf.mxu0  ;;  %17948 = vmatmul.mubr.msk.f32.gmra.mxu0 %vm430_vm0, %v14907_v44  ;;  %v14651_v40 = vld [vmem:[%s18749_s9 + $0x311] sm:$0xff]  ;;  %v14652_v8 = vld [vmem:[%s18749_s9 + $0x321] sm:$0xff] }
 0x425   : > { %v17409_v6 = vpop.f32.mrf.mxu1  ;;  %17752 = vmatmul.mubr.msk.f32.gmra.mxu1 %vm430_vm0, %v14649_v31  ;;  %17950 = vmatprep.mubr.msk.f32.mxu0 %vm430_vm0, %v14908_v53  ;;  %v14909_v12 = vld [vmem:[%s18749_s9 + $0x312] sm:$0xff]  ;;  %v24496_v44 = vld [vmem:[#allocation41_spill] sm:$0xff] }
 0x426   : > { %24491 = vst [vmem:[#allocation38_spill] sm:$0xff] %v22207_v35  ;;  %v22212_v45 = vadd.f32 %v9074_v57, %v7972_v37  ;;  %v7975_v46 = vadd.f32 %v17409_v6, %v24494_v51  ;;  %17754 = vmatprep.mubr.msk.f32.mxu1 %vm430_vm0, %v14650_v27  ;;  %v9084_v43 = vpop.f32.mrf.mxu0  ;;  %v14910_v35 = vld [vmem:[%s18749_s9 + $0x322] sm:$0xff] }
 0x427   : > { %v7735_v30 = vpop.f32.mrf.mxu1  ;;  %v24498_v27 = vld [vmem:[#allocation42_spill] sm:$0xff] }
 0x428   : > { %24493 = vst [vmem:[#allocation39_spill] sm:$0xff] %v22212_v45  ;;  %v22221_v31 = vadd.f32 %v17605_v14, %v7975_v46  ;;  %v7974_v57 = vadd.f32 %v7735_v30, %v24496_v44  ;;  %v17608_v6 = vpop.f32.mrf.mxu0  ;;  %17951 = vmatmul.mubr.msk.f32.gmra.mxu0 %vm430_vm0, %v14909_v12  ;;  %v14653_v45 = vld [vmem:[%s18749_s9 + $0x329] sm:$0xff]  ;;  %v14654_v44 = vld [vmem:[%s18749_s9 + $0x331] sm:$0xff] }
 0x429   : > { %v17412_v37 = vpop.f32.mrf.mxu1  ;;  %17755 = vmatmul.mubr.msk.f32.gmra.mxu1 %vm430_vm0, %v14651_v40  ;;  %17953 = vmatprep.mubr.msk.f32.mxu0 %vm430_vm0, %v14910_v35  ;;  %v14911_v14 = vld [vmem:[%s18749_s9 + $0x32a] sm:$0xff] }
 0x42a   : > { %24495 = vst [vmem:[#allocation40_spill] sm:$0xff] %v22221_v31  ;;  %v22226_v53 = vadd.f32 %v9084_v43, %v7974_v57  ;;  %v7977_v51 = vadd.f32 %v17412_v37, %v24498_v27  ;;  %17757 = vmatprep.mubr.msk.f32.mxu1 %vm430_vm0, %v14652_v8  ;;  %v9094_v30 = vpop.f32.mrf.mxu0  ;;  %v14912_v31 = vld [vmem:[%s18749_s9 + $0x332] sm:$0xff] }
 0x42b   : > { %v7745_v46 = vpop.f32.mrf.mxu1  ;;  %v24500_v12 = vld [vmem:[#allocation43_spill] sm:$0xff]  ;;  %v24502_v8 = vld [vmem:[#allocation44_spill] sm:$0xff] }
 0x42c   : > { %24497 = vst [vmem:[#allocation41_spill] sm:$0xff] %v22226_v53  ;;  %v22235_v40 = vadd.f32 %v17608_v6, %v7977_v51  ;;  %v7976_v43 = vadd.f32 %v7745_v46, %v24500_v12  ;;  %v17611_v37 = vpop.f32.mrf.mxu0  ;;  %17954 = vmatmul.mubr.msk.f32.gmra.mxu0 %vm430_vm0, %v14911_v14  ;;  %v14655_v53 = vld [vmem:[%s18749_s9 + $0x339] sm:$0xff]  ;;  %v14656_v12 = vld [vmem:[%s18749_s9 + $0x349] sm:$0xff] }
 0x42d   : > { %v17415_v57 = vpop.f32.mrf.mxu1  ;;  %17758 = vmatmul.mubr.msk.f32.gmra.mxu1 %vm430_vm0, %v14653_v45  ;;  %17956 = vmatprep.mubr.msk.f32.mxu0 %vm430_vm0, %v14912_v31  ;;  %v14913_v6 = vld [vmem:[%s18749_s9 + $0x33a] sm:$0xff] }
 0x42e   : > { %24499 = vst [vmem:[#allocation42_spill] sm:$0xff] %v22235_v40  ;;  %v22240_v35 = vadd.f32 %v9094_v30, %v7976_v43  ;;  %v7979_v27 = vadd.f32 %v17415_v57, %v24502_v8  ;;  %17760 = vmatprep.mubr.msk.f32.mxu1 %vm430_vm0, %v14654_v44  ;;  %v9104_v46 = vpop.f32.mrf.mxu0  ;;  %v14914_v40 = vld [vmem:[%s18749_s9 + $0x34a] sm:$0xff]  ;;  %v24504_v14 = vld [vmem:[#allocation45_spill] sm:$0xff] }
 0x42f   : > { %v7755_v51 = vpop.f32.mrf.mxu1  ;;  %v24506_v44 = vld [vmem:[#allocation46_spill] sm:$0xff] }
 0x430   : > { %24501 = vst [vmem:[#allocation43_spill] sm:$0xff] %v22240_v35  ;;  %v22249_v45 = vadd.f32 %v17611_v37, %v7979_v27  ;;  %v7978_v30 = vadd.f32 %v7755_v51, %v24504_v14  ;;  %v17614_v57 = vpop.f32.mrf.mxu0  ;;  %17957 = vmatmul.mubr.msk.f32.gmra.mxu0 %vm430_vm0, %v14913_v6  ;;  %v14657_v35 = vld [vmem:[%s18749_s9 + $0x351] sm:$0xff]  ;;  %v14658_v14 = vld [vmem:[%s18749_s9 + $0x359] sm:$0xff] }
 0x431   : > { %v17418_v43 = vpop.f32.mrf.mxu1  ;;  %17761 = vmatmul.mubr.msk.f32.gmra.mxu1 %vm430_vm0, %v14655_v53  ;;  %17959 = vmatprep.mubr.msk.f32.mxu0 %vm430_vm0, %v14914_v40  ;;  %v14915_v37 = vld [vmem:[%s18749_s9 + $0x352] sm:$0xff] }
 0x432   : > { %24503 = vst [vmem:[#allocation44_spill] sm:$0xff] %v22249_v45  ;;  %v22254_v31 = vadd.f32 %v9104_v46, %v7978_v30  ;;  %v7981_v8 = vadd.f32 %v17418_v43, %v24506_v44  ;;  %17763 = vmatprep.mubr.msk.f32.mxu1 %vm430_vm0, %v14656_v12  ;;  %v9114_v51 = vpop.f32.mrf.mxu0  ;;  %v14916_v45 = vld [vmem:[%s18749_s9 + $0x35a] sm:$0xff]  ;;  %v24508_v6 = vld [vmem:[#allocation47_spill] sm:$0xff] }
 0x433   : > { %v7765_v27 = vpop.f32.mrf.mxu1  ;;  %v24510_v12 = vld [vmem:[#allocation48_spill] sm:$0xff] }
 0x434   : > { %24505 = vst [vmem:[#allocation45_spill] sm:$0xff] %v22254_v31  ;;  %v22263_v53 = vadd.f32 %v17614_v57, %v7981_v8  ;;  %v7980_v46 = vadd.f32 %v7765_v27, %v24508_v6  ;;  %v17617_v43 = vpop.f32.mrf.mxu0  ;;  %17960 = vmatmul.mubr.msk.f32.gmra.mxu0 %vm430_vm0, %v14915_v37  ;;  %v14659_v31 = vld [vmem:[%s18749_s9 + $0x361] sm:$0xff]  ;;  %v14660_v6 = vld [vmem:[%s18749_s9 + $0x371] sm:$0xff] }
 0x435   : > { %v17421_v30 = vpop.f32.mrf.mxu1  ;;  %17764 = vmatmul.mubr.msk.f32.gmra.mxu1 %vm430_vm0, %v14657_v35  ;;  %17962 = vmatprep.mubr.msk.f32.mxu0 %vm430_vm0, %v14916_v45  ;;  %v14917_v57 = vld [vmem:[%s18749_s9 + $0x362] sm:$0xff] }
 0x436   : > { %24507 = vst [vmem:[#allocation46_spill] sm:$0xff] %v22263_v53  ;;  %v22268_v40 = vadd.f32 %v9114_v51, %v7980_v46  ;;  %v7983_v44 = vadd.f32 %v17421_v30, %v24510_v12  ;;  %17766 = vmatprep.mubr.msk.f32.mxu1 %vm430_vm0, %v14658_v14  ;;  %v9124_v27 = vpop.f32.mrf.mxu0  ;;  %v14918_v53 = vld [vmem:[%s18749_s9 + $0x372] sm:$0xff]  ;;  %v24512_v37 = vld [vmem:[#allocation49_spill] sm:$0xff]  ;;  %v24514_v14 = vld [vmem:[#allocation50_spill] sm:$0xff] }
 0x437   : > { %v7775_v8 = vpop.f32.mrf.mxu1 }
 0x438   : > { %24509 = vst [vmem:[#allocation47_spill] sm:$0xff] %v22268_v40  ;;  %v22277_v35 = vadd.f32 %v17617_v43, %v7983_v44  ;;  %v7982_v51 = vadd.f32 %v7775_v8, %v24512_v37  ;;  %v17620_v30 = vpop.f32.mrf.mxu0  ;;  %17963 = vmatmul.mubr.msk.f32.gmra.mxu0 %vm430_vm0, %v14917_v57  ;;  %v14661_v40 = vld [vmem:[%s18749_s9 + $0x379] sm:$0xff]  ;;  %v14662_v37 = vld [vmem:[%s18749_s9 + $0x381] sm:$0xff]  ;;  %v24516_v57 = vld [vmem:[#allocation51_spill] sm:$0xff] }
 0x439   : > { %v17424_v46 = vpop.f32.mrf.mxu1  ;;  %17767 = vmatmul.mubr.msk.f32.gmra.mxu1 %vm430_vm0, %v14659_v31  ;;  %17965 = vmatprep.mubr.msk.f32.mxu0 %vm430_vm0, %v14918_v53  ;;  %v14919_v43 = vld [vmem:[%s18749_s9 + $0x37a] sm:$0xff] }
 0x43a   : > { %24511 = vst [vmem:[#allocation48_spill] sm:$0xff] %v22277_v35  ;;  %v22282_v45 = vadd.f32 %v9124_v27, %v7982_v51  ;;  %v7985_v12 = vadd.f32 %v17424_v46, %v24514_v14  ;;  %17769 = vmatprep.mubr.msk.f32.mxu1 %vm430_vm0, %v14660_v6  ;;  %v9134_v8 = vpop.f32.mrf.mxu0  ;;  %v14920_v35 = vld [vmem:[%s18749_s9 + $0x382] sm:$0xff]  ;;  %v24518_v6 = vld [vmem:[#allocation52_spill] sm:$0xff] }
 0x43b   : > { %v7785_v44 = vpop.f32.mrf.mxu1 }
 0x43c   : > { %24513 = vst [vmem:[#allocation49_spill] sm:$0xff] %v22282_v45  ;;  %v22291_v31 = vadd.f32 %v17620_v30, %v7985_v12  ;;  %v7984_v27 = vadd.f32 %v7785_v44, %v24516_v57  ;;  %v17623_v46 = vpop.f32.mrf.mxu0  ;;  %17966 = vmatmul.mubr.msk.f32.gmra.mxu0 %vm430_vm0, %v14919_v43  ;;  %v14663_v45 = vld [vmem:[%s18749_s9 + $0x389] sm:$0xff]  ;;  %v14664_v57 = vld [vmem:[%s18749_s9 + $0x399] sm:$0xff] }
 0x43d   : > { %v17427_v51 = vpop.f32.mrf.mxu1  ;;  %17770 = vmatmul.mubr.msk.f32.gmra.mxu1 %vm430_vm0, %v14661_v40  ;;  %17968 = vmatprep.mubr.msk.f32.mxu0 %vm430_vm0, %v14920_v35  ;;  %v14921_v30 = vld [vmem:[%s18749_s9 + $0x38a] sm:$0xff] }
 0x43e   : > { %24515 = vst [vmem:[#allocation50_spill] sm:$0xff] %v22291_v31  ;;  %v22296_v53 = vadd.f32 %v9134_v8, %v7984_v27  ;;  %v7987_v14 = vadd.f32 %v17427_v51, %v24518_v6  ;;  %17772 = vmatprep.mubr.msk.f32.mxu1 %vm430_vm0, %v14662_v37  ;;  %v9144_v44 = vpop.f32.mrf.mxu0  ;;  %v14922_v31 = vld [vmem:[%s18749_s9 + $0x39a] sm:$0xff]  ;;  %v24520_v43 = vld [vmem:[#allocation54_spill] sm:$0xff] }
 0x43f   : > { %v7795_v12 = vpop.f32.mrf.mxu1  ;;  %v24522_v37 = vld [vmem:[#allocation56_spill] sm:$0xff] }
 0x440   : > { %24517 = vst [vmem:[#allocation51_spill] sm:$0xff] %v22296_v53  ;;  %v22305_v40 = vadd.f32 %v17623_v46, %v7987_v14  ;;  %v7986_v8 = vadd.f32 %v7795_v12, %v24520_v43  ;;  %v17626_v51 = vpop.f32.mrf.mxu0  ;;  %17969 = vmatmul.mubr.msk.f32.gmra.mxu0 %vm430_vm0, %v14921_v30  ;;  %v14665_v53 = vld [vmem:[%s18749_s9 + $0x3a1] sm:$0xff]  ;;  %v14666_v43 = vld [vmem:[%s18749_s9 + $0x3a9] sm:$0xff] }
 0x441   : > { %v17430_v27 = vpop.f32.mrf.mxu1  ;;  %17773 = vmatmul.mubr.msk.f32.gmra.mxu1 %vm430_vm0, %v14663_v45  ;;  %17971 = vmatprep.mubr.msk.f32.mxu0 %vm430_vm0, %v14922_v31  ;;  %v14923_v46 = vld [vmem:[%s18749_s9 + $0x3a2] sm:$0xff] }
 0x442   : > { %24519 = vst [vmem:[#allocation52_spill] sm:$0xff] %v22305_v40  ;;  %v22310_v35 = vadd.f32 %v9144_v44, %v7986_v8  ;;  %v7989_v6 = vadd.f32 %v17430_v27, %v24522_v37  ;;  %17775 = vmatprep.mubr.msk.f32.mxu1 %vm430_vm0, %v14664_v57  ;;  %v9154_v12 = vpop.f32.mrf.mxu0  ;;  %v14924_v40 = vld [vmem:[%s18749_s9 + $0x3aa] sm:$0xff]  ;;  %v24526_v57 = vld [vmem:[#allocation60_spill] sm:$0xff] }
 0x443   : > { %v7805_v14 = vpop.f32.mrf.mxu1  ;;  %v24524_v30 = vld [vmem:[#allocation58_spill] sm:$0xff] }
 0x444   : > { %24521 = vst [vmem:[#allocation54_spill] sm:$0xff] %v22310_v35  ;;  %v22319_v45 = vadd.f32 %v17626_v51, %v7989_v6  ;;  %v7988_v44 = vadd.f32 %v7805_v14, %v24524_v30  ;;  %v17629_v27 = vpop.f32.mrf.mxu0  ;;  %17972 = vmatmul.mubr.msk.f32.gmra.mxu0 %vm430_vm0, %v14923_v46  ;;  %v14667_v35 = vld [vmem:[%s18749_s9 + $0x3b1] sm:$0xff]  ;;  %v14668_v30 = vld [vmem:[%s18749_s9 + $0x3c1] sm:$0xff] }
 0x445   : > { %v17433_v8 = vpop.f32.mrf.mxu1  ;;  %17776 = vmatmul.mubr.msk.f32.gmra.mxu1 %vm430_vm0, %v14665_v53  ;;  %17974 = vmatprep.mubr.msk.f32.mxu0 %vm430_vm0, %v14924_v40  ;;  %v14925_v51 = vld [vmem:[%s18749_s9 + $0x3b2] sm:$0xff]  ;;  %v24528_v46 = vld [vmem:[#allocation62_spill] sm:$0xff] }
 0x446   : > { %24523 = vst [vmem:[#allocation56_spill] sm:$0xff] %v22319_v45  ;;  %v22324_v31 = vadd.f32 %v9154_v12, %v7988_v44  ;;  %v7991_v37 = vadd.f32 %v17433_v8, %v24526_v57  ;;  %17778 = vmatprep.mubr.msk.f32.mxu1 %vm430_vm0, %v14666_v43  ;;  %v9164_v14 = vpop.f32.mrf.mxu0  ;;  %v14926_v45 = vld [vmem:[%s18749_s9 + $0x3c2] sm:$0xff]  ;;  %v24530_v43 = vld [vmem:[#allocation64_spill] sm:$0xff] }
 0x447   : > { %v7815_v6 = vpop.f32.mrf.mxu1 }
 0x448   : > { %24525 = vst [vmem:[#allocation58_spill] sm:$0xff] %v22324_v31  ;;  %v22333_v53 = vadd.f32 %v17629_v27, %v7991_v37  ;;  %v7990_v12 = vadd.f32 %v7815_v6, %v24528_v46  ;;  %v17632_v8 = vpop.f32.mrf.mxu0  ;;  %17975 = vmatmul.mubr.msk.f32.gmra.mxu0 %vm430_vm0, %v14925_v51  ;;  %v14669_v31 = vld [vmem:[%s18749_s9 + $0x3c9] sm:$0xff]  ;;  %v14670_v46 = vld [vmem:[%s18749_s9 + $0x3d1] sm:$0xff] }
 0x449   : > { %v17436_v44 = vpop.f32.mrf.mxu1  ;;  %17779 = vmatmul.mubr.msk.f32.gmra.mxu1 %vm430_vm0, %v14667_v35  ;;  %17977 = vmatprep.mubr.msk.f32.mxu0 %vm430_vm0, %v14926_v45  ;;  %v14927_v27 = vld [vmem:[%s18749_s9 + $0x3ca] sm:$0xff] }
 0x44a   : > { %24527 = vst [vmem:[#allocation60_spill] sm:$0xff] %v22333_v53  ;;  %v22338_v40 = vadd.f32 %v9164_v14, %v7990_v12  ;;  %v7993_v57 = vadd.f32 %v17436_v44, %v24530_v43  ;;  %17781 = vmatprep.mubr.msk.f32.mxu1 %vm430_vm0, %v14668_v30  ;;  %v9174_v6 = vpop.f32.mrf.mxu0  ;;  %v14928_v53 = vld [vmem:[%s18749_s9 + $0x3d2] sm:$0xff]  ;;  %v24532_v51 = vld [vmem:[#allocation66_spill] sm:$0xff] }
 0x44b   : > { %v7825_v37 = vpop.f32.mrf.mxu1  ;;  %v24534_v30 = vld [vmem:[#allocation68_spill] sm:$0xff] }
 0x44c   : > { %24529 = vst [vmem:[#allocation62_spill] sm:$0xff] %v22338_v40  ;;  %v22347_v35 = vadd.f32 %v17632_v8, %v7993_v57  ;;  %v7992_v14 = vadd.f32 %v7825_v37, %v24532_v51  ;;  %v17635_v44 = vpop.f32.mrf.mxu0  ;;  %17978 = vmatmul.mubr.msk.f32.gmra.mxu0 %vm430_vm0, %v14927_v27  ;;  %v14671_v40 = vld [vmem:[%s18749_s9 + $0x3d9] sm:$0xff]  ;;  %v14672_v51 = vld [vmem:[%s18749_s9 + $0x3e9] sm:$0xff] }
 0x44d   : > { %v17439_v12 = vpop.f32.mrf.mxu1  ;;  %17782 = vmatmul.mubr.msk.f32.gmra.mxu1 %vm430_vm0, %v14669_v31  ;;  %17980 = vmatprep.mubr.msk.f32.mxu0 %vm430_vm0, %v14928_v53  ;;  %v14929_v8 = vld [vmem:[%s18749_s9 + $0x3da] sm:$0xff]  ;;  %v24536_v27 = vld [vmem:[#allocation70_spill] sm:$0xff] }
 0x44e   : > { %24531 = vst [vmem:[#allocation64_spill] sm:$0xff] %v22347_v35  ;;  %v22352_v45 = vadd.f32 %v9174_v6, %v7992_v14  ;;  %v7995_v43 = vadd.f32 %v17439_v12, %v24534_v30  ;;  %17784 = vmatprep.mubr.msk.f32.mxu1 %vm430_vm0, %v14670_v46  ;;  %v9184_v37 = vpop.f32.mrf.mxu0  ;;  %v14930_v35 = vld [vmem:[%s18749_s9 + $0x3ea] sm:$0xff]  ;;  %v24538_v46 = vld [vmem:[#allocation72_spill] sm:$0xff] }
 0x44f   : > { %v7835_v57 = vpop.f32.mrf.mxu1 }
 0x450   : > { %24533 = vst [vmem:[#allocation66_spill] sm:$0xff] %v22352_v45  ;;  %v22361_v31 = vadd.f32 %v17635_v44, %v7995_v43  ;;  %v7994_v6 = vadd.f32 %v7835_v57, %v24536_v27  ;;  %v17638_v12 = vpop.f32.mrf.mxu0  ;;  %17981 = vmatmul.mubr.msk.f32.gmra.mxu0 %vm430_vm0, %v14929_v8  ;;  %v14673_v45 = vld [vmem:[%s18749_s9 + $0x3f1] sm:$0xff]  ;;  %v14674_v27 = vld [vmem:[%s18749_s9 + $0x3f9] sm:$0xff]  ;;  %v24540_v8 = vld [vmem:[#allocation74_spill] sm:$0xff] }
 0x451   : > { %v17442_v14 = vpop.f32.mrf.mxu1  ;;  %17785 = vmatmul.mubr.msk.f32.gmra.mxu1 %vm430_vm0, %v14671_v40  ;;  %17983 = vmatprep.mubr.msk.f32.mxu0 %vm430_vm0, %v14930_v35  ;;  %v14931_v44 = vld [vmem:[%s18749_s9 + $0x3f2] sm:$0xff] }
 0x452   : > { %24535 = vst [vmem:[#allocation68_spill] sm:$0xff] %v22361_v31  ;;  %v22366_v53 = vadd.f32 %v9184_v37, %v7994_v6  ;;  %v7997_v30 = vadd.f32 %v17442_v14, %v24538_v46  ;;  %17787 = vmatprep.mubr.msk.f32.mxu1 %vm430_vm0, %v14672_v51  ;;  %v9194_v57 = vpop.f32.mrf.mxu0  ;;  %v14932_v31 = vld [vmem:[%s18749_s9 + $0x3fa] sm:$0xff] }
 0x453   : > { %v7845_v43 = vpop.f32.mrf.mxu1  ;;  %v24542_v51 = vld [vmem:[#allocation76_spill] sm:$0xff] }
 0x454   : > { %24537 = vst [vmem:[#allocation70_spill] sm:$0xff] %v22366_v53  ;;  %v22375_v40 = vadd.f32 %v17638_v12, %v7997_v30  ;;  %v7996_v37 = vadd.f32 %v7845_v43, %v24540_v8  ;;  %v17641_v14 = vpop.f32.mrf.mxu0  ;;  %17984 = vmatmul.mubr.msk.f32.gmra.mxu0 %vm430_vm0, %v14931_v44  ;;  %v14675_v53 = vld [vmem:[%s18749_s9 + $0x401] sm:$0xff]  ;;  %v14676_v8 = vld [vmem:[%s18749_s9 + $0x411] sm:$0xff] }
 0x455   : > { %v17445_v6 = vpop.f32.mrf.mxu1  ;;  %17788 = vmatmul.mubr.msk.f32.gmra.mxu1 %vm430_vm0, %v14673_v45  ;;  %17986 = vmatprep.mubr.msk.f32.mxu0 %vm430_vm0, %v14932_v31  ;;  %v14933_v12 = vld [vmem:[%s18749_s9 + $0x402] sm:$0xff] }
 0x456   : > { %24539 = vst [vmem:[#allocation72_spill] sm:$0xff] %v22375_v40  ;;  %v22380_v35 = vadd.f32 %v9194_v57, %v7996_v37  ;;  %v7999_v46 = vadd.f32 %v17445_v6, %v24542_v51  ;;  %17790 = vmatprep.mubr.msk.f32.mxu1 %vm430_vm0, %v14674_v27  ;;  %v9204_v43 = vpop.f32.mrf.mxu0  ;;  %v14934_v40 = vld [vmem:[%s18749_s9 + $0x412] sm:$0xff] }
 0x457   : > { %v7855_v30 = vpop.f32.mrf.mxu1  ;;  %v14677_v6 = vld [vmem:[%s18749_s9 + $0x419] sm:$0xff] }
 0x458   : > { %24541 = vst [vmem:[#allocation74_spill] sm:$0xff] %v22380_v35  ;;  %v22389_v45 = vadd.f32 %v17641_v14, %v7999_v46  ;;  %v7998_v44 = vadd.f32 %v7855_v30, %v21498_v16  ;;  %v17644_v37 = vpop.f32.mrf.mxu0  ;;  %17987 = vmatmul.mubr.msk.f32.gmra.mxu0 %vm430_vm0, %v14933_v12  ;;  %v14935_v14 = vld [vmem:[%s18749_s9 + $0x41a] sm:$0xff]  ;;  %v14936_v30 = vld [vmem:[%s18749_s9 + $0x422] sm:$0xff] }
 0x459   : > { %v17448_v57 = vpop.f32.mrf.mxu1  ;;  %17791 = vmatmul.mubr.msk.f32.gmra.mxu1 %vm430_vm0, %v14675_v53  ;;  %17989 = vmatprep.mubr.msk.f32.mxu0 %vm430_vm0, %v14934_v40  ;;  %v14678_v46 = vld [vmem:[%s18749_s9 + $0x421] sm:$0xff] }
 0x45a   : > { %24543 = vst [vmem:[#allocation76_spill] sm:$0xff] %v22389_v45  ;;  %v22394_v31 = vadd.f32 %v9204_v43, %v7998_v44  ;;  %v8001_v27 = vadd.f32 %v17448_v57, %v21507_v1  ;;  %17793 = vmatprep.mubr.msk.f32.mxu1 %vm430_vm0, %v14676_v8  ;;  %v9214_v16 = vpop.f32.mrf.mxu0  ;;  %v14679_v44 = vld [vmem:[%s18749_s9 + $0x429] sm:$0xff] }
 0x45b   : > { %v7865_v51 = vpop.f32.mrf.mxu1  ;;  %v14937_v57 = vld [vmem:[%s18749_s9 + $0x42a] sm:$0xff]  ;;  %v14942_v45 = vld [vmem:[%s18749_s9 + $0x462] sm:$0xff] }
 0x45c   : > { %24544 = vst [vmem:[#allocation89_spill] sm:$0xff] %v22394_v31  ;;  %v22403_v53 = vadd.f32 %v17644_v37, %v8001_v27  ;;  %v8000_v12 = vadd.f32 %v7865_v51, %v21512_v9  ;;  %v17847_v1 = vpop.f32.mrf.mxu0  ;;  %17990 = vmatmul.mubr.msk.f32.gmra.mxu0 %vm430_vm0, %v14935_v14  ;;  %v22418_v9 = vld [vmem:[%s23976_s2] ss:$0 sm:$0xff] }
 0x45d   : > { %v17651_v43 = vpop.f32.mrf.mxu1  ;;  %17794 = vmatmul.mubr.msk.f32.gmra.mxu1 %vm430_vm0, %v14677_v6  ;;  %17992 = vmatprep.mubr.msk.f32.mxu0 %vm430_vm0, %v14936_v30  ;;  %v14680_v6 = vld [vmem:[%s18749_s9 + $0x439] sm:$0xff] }
 0x45e   : > { %24545 = vst [vmem:[#allocation90_spill] sm:$0xff] %v22403_v53  ;;  %v22408_v40 = vadd.f32 %v9214_v16, %v8000_v12  ;;  %v10572_v8 = vadd.f32 %v17651_v43, %v21521_v13  ;;  %17796 = vmatprep.mubr.msk.f32.mxu1 %vm430_vm0, %v14678_v46  ;;  %v11280_v27 = vpop.f32.mrf.mxu0  ;;  %v14938_v14 = vld [vmem:[%s18749_s9 + $0x43a] sm:$0xff] }
 0x45f   : > { %v9932_v37 = vpop.f32.mrf.mxu1 }
 0x460   : > { %24546 = vst [vmem:[#allocation91_spill] sm:$0xff] %v22408_v40  ;;  %v11920_v51 = vadd.f32 %v17847_v1, %v10572_v8  ;;  %v10571_v13 = vadd.f32 %v9932_v37, %v21526_v29  ;;  %v17850_v46 = vpop.f32.mrf.mxu0  ;;  %17993 = vmatmul.mubr.msk.f32.gmra.mxu0 %vm430_vm0, %v14937_v57  ;;  %v14681_v1 = vld [vmem:[%s18749_s9 + $0x441] sm:$0xff]  ;;  %v14682_v37 = vld [vmem:[%s18749_s9 + $0x449] sm:$0xff] }
 0x461   : > { %v17654_v16 = vpop.f32.mrf.mxu1  ;;  %17797 = vmatmul.mubr.msk.f32.gmra.mxu1 %vm430_vm0, %v14679_v44  ;;  %17995 = vmatprep.mubr.msk.f32.mxu0 %vm430_vm0, %v14938_v14  ;;  %v14939_v8 = vld [vmem:[%s18749_s9 + $0x442] sm:$0xff]  ;;  %v14940_v44 = vld [vmem:[%s18749_s9 + $0x44a] sm:$0xff] }
 0x462   : > { %v22426_v30 = vadd.f32 %v22418_v9, %v11920_v51  ;;  %v11919_v12 = vadd.f32 %v11280_v27, %v10571_v13  ;;  %v10574_v43 = vadd.f32 %v17654_v16, %v21535_v5  ;;  %17799 = vmatprep.mubr.msk.f32.mxu1 %vm430_vm0, %v14680_v6  ;;  %v11290_v29 = vpop.f32.mrf.mxu0 }
 0x463   : > { %v9942_v40 = vpop.f32.mrf.mxu1 }
 0x464   : > { %v12183_v57 = vsub.f32 0.0, %v22426_v30  ;;  %v22437_v51 = vadd.f32 %v22418_v9, %v11919_v12  ;;  %v11922_v27 = vadd.f32 %v17850_v46, %v10574_v43  ;;  %v10573_v5 = vadd.f32 %v9942_v40, %v21540_v15  ;;  %v17853_v14 = vpop.f32.mrf.mxu0  ;;  %17996 = vmatmul.mubr.msk.f32.gmra.mxu0 %vm430_vm0, %v14939_v8  ;;  %v14683_v15 = vld [vmem:[%s18749_s9 + $0x451] sm:$0xff] }
 0x465   : > { %v17657_v6 = vpop.f32.mrf.mxu1  ;;  %17800 = vmatmul.mubr.msk.f32.gmra.mxu1 %vm430_vm0, %v14681_v1  ;;  %17998 = vmatprep.mubr.msk.f32.mxu0 %vm430_vm0, %v14940_v44  ;;  %v14941_v40 = vld [vmem:[%s18749_s9 + $0x452] sm:$0xff]  ;;  %v14684_v1 = vld [vmem:[%s18749_s9 + $0x461] sm:$0xff] }
 0x466   : > { %v12312_v13 = vmul.f32 1.442695, %v12183_v57  ;;  %v12182_v16 = vsub.f32 0.0, %v22437_v51  ;;  %v22444_v53 = vadd.f32 %v22418_v9, %v11922_v27  ;;  %v11921_v31 = vadd.f32 %v11290_v29, %v10573_v5  ;;  %17802 = vmatprep.mubr.msk.f32.mxu1 %vm430_vm0, %v14682_v37  ;;  %v11300_v43 = vpop.f32.mrf.mxu0 }
 0x467   : > { %v10576_v46 = vadd.f32 %v17657_v6, %v21549_v22  ;;  %v9952_v12 = vpop.f32.mrf.mxu1 }
 0x468   : > { %18083 = vpow2.f32 %v12312_v13  ;;  %v12310_v8 = vmul.f32 1.442695, %v12182_v16  ;;  %v12185_v57 = vsub.f32 0.0, %v22444_v53  ;;  %v22455_v29 = vadd.f32 %v22418_v9, %v11921_v31  ;;  %v17856_v22 = vpop.f32.mrf.mxu0  ;;  %17999 = vmatmul.mubr.msk.f32.gmra.mxu0 %vm430_vm0, %v14941_v40  ;;  %v14685_v31 = vld [vmem:[%s18749_s9 + $0x469] sm:$0xff]  ;;  %v14944_v40 = vld [vmem:[%s18749_s9 + $0x472] sm:$0xff] }
 0x469   : > { %v11924_v37 = vadd.f32 %v17853_v14, %v10576_v46  ;;  %v10575_v44 = vadd.f32 %v9952_v12, %v21554_v36  ;;  %v17660_v27 = vpop.f32.mrf.mxu1  ;;  %17803 = vmatmul.mubr.msk.f32.gmra.mxu1 %vm430_vm0, %v14683_v15  ;;  %18001 = vmatprep.mubr.msk.f32.mxu0 %vm430_vm0, %v14942_v45  ;;  %v14943_v36 = vld [vmem:[%s18749_s9 + $0x46a] sm:$0xff] }
 0x46a   : > { %18085 = vpow2.f32 %v12310_v8  ;;  %v12316_v5 = vmul.f32 1.442695, %v12185_v57  ;;  %v12184_v6 = vsub.f32 0.0, %v22455_v29  ;;  %v10578_v13 = vadd.f32 %v17660_v27, %v21563_v4  ;;  %17805 = vmatprep.mubr.msk.f32.mxu1 %vm430_vm0, %v14684_v1  ;;  %v11310_v46 = vpop.f32.mrf.mxu0  ;;  %v14686_v12 = vld [vmem:[%s18749_s9 + $0x471] sm:$0xff] }
 0x46b   : > { %v22467_v14 = vadd.f32 %v22418_v9, %v11924_v37  ;;  %v11923_v16 = vadd.f32 %v11300_v43, %v10575_v44  ;;  %v9962_v15 = vpop.f32.mrf.mxu1 }
 0x46c   : > { %18087 = vpow2.f32 %v12316_v5  ;;  %v12314_v8 = vmul.f32 1.442695, %v12184_v6  ;;  %v11926_v57 = vadd.f32 %v17856_v22, %v10578_v13  ;;  %v10577_v4 = vadd.f32 %v9962_v15, %v21568_v61  ;;  %v17859_v43 = vpop.f32.mrf.mxu0  ;;  %18002 = vmatmul.mubr.msk.f32.gmra.mxu0 %vm430_vm0, %v14943_v36  ;;  %v14687_v22 = vld [vmem:[%s18749_s9 + $0x479] sm:$0xff]  ;;  %v14688_v15 = vld [vmem:[%s18749_s9 + $0x489] sm:$0xff] }
 0x46d   : > { %v12187_v1 = vsub.f32 0.0, %v22467_v14  ;;  %v22474_v45 = vadd.f32 %v22418_v9, %v11923_v16  ;;  %v17663_v27 = vpop.f32.mrf.mxu1  ;;  %17806 = vmatmul.mubr.msk.f32.gmra.mxu1 %vm430_vm0, %v14685_v31  ;;  %18004 = vmatprep.mubr.msk.f32.mxu0 %vm430_vm0, %v14944_v40  ;;  %v14945_v5 = vld [vmem:[%s18749_s9 + $0x47a] sm:$0xff]  ;;  %v14946_v36 = vld [vmem:[%s18749_s9 + $0x48a] sm:$0xff] }
 0x46e   : > { %18089 = vpow2.f32 %v12314_v8  ;;  %v22479_v37 = vadd.f32 %v22418_v9, %v11926_v57  ;;  %v11925_v44 = vadd.f32 %v11310_v46, %v10577_v4  ;;  %v10580_v61 = vadd.f32 %v17663_v27, %v21577_v60  ;;  %17808 = vmatprep.mubr.msk.f32.mxu1 %vm430_vm0, %v14686_v12  ;;  %v11320_v16 = vpop.f32.mrf.mxu0 }
 0x46f   : > { %v12320_v6 = vmul.f32 1.442695, %v12187_v1  ;;  %v12186_v13 = vsub.f32 0.0, %v22474_v45  ;;  %v9972_v31 = vpop.f32.mrf.mxu1 }
 0x470   : > { %v12189_v8 = vsub.f32 0.0, %v22479_v37  ;;  %v22491_v46 = vadd.f32 %v22418_v9, %v11925_v44  ;;  %v11928_v60 = vadd.f32 %v17859_v43, %v10580_v61  ;;  %v10579_v12 = vadd.f32 %v9972_v31, %v21582_v52  ;;  %v17862_v4 = vpop.f32.mrf.mxu0  ;;  %18005 = vmatmul.mubr.msk.f32.gmra.mxu0 %vm430_vm0, %v14945_v5  ;;  %v14689_v52 = vld [vmem:[%s18749_s9 + $0x491] sm:$0xff]  ;;  %v14948_v5 = vld [vmem:[%s18749_s9 + $0x49a] sm:$0xff] }
 0x471   : > { %18091 = vpow2.f32 %v12320_v6  ;;  %v12318_v40 = vmul.f32 1.442695, %v12186_v13  ;;  %v17666_v57 = vpop.f32.mrf.mxu1  ;;  %17809 = vmatmul.mubr.msk.f32.gmra.mxu1 %vm430_vm0, %v14687_v22  ;;  %18007 = vmatprep.mubr.msk.f32.mxu0 %vm430_vm0, %v14946_v36  ;;  %v14947_v43 = vld [vmem:[%s18749_s9 + $0x492] sm:$0xff] }
 0x472   : > { %v12324_v1 = vmul.f32 1.442695, %v12189_v8  ;;  %v12188_v27 = vsub.f32 0.0, %v22491_v46  ;;  %v22498_v44 = vadd.f32 %v22418_v9, %v11928_v60  ;;  %v11927_v35 = vadd.f32 %v11320_v16, %v10579_v12  ;;  %17811 = vmatprep.mubr.msk.f32.mxu1 %vm430_vm0, %v14688_v15  ;;  %v11330_v6 = vpop.f32.mrf.mxu0  ;;  %v14690_v13 = vld [vmem:[%s18749_s9 + $0x499] sm:$0xff] }
 0x473   : > { %18093 = vpow2.f32 %v12318_v40  ;;  %v10582_v61 = vadd.f32 %v17666_v57, %v21591_v17  ;;  %v9982_v22 = vpop.f32.mrf.mxu1 }
 0x474   : > { %18095 = vpow2.f32 %v12324_v1  ;;  %v12322_v31 = vmul.f32 1.442695, %v12188_v27  ;;  %v12191_v8 = vsub.f32 0.0, %v22498_v44  ;;  %v22509_v16 = vadd.f32 %v22418_v9, %v11927_v35  ;;  %v17865_v17 = vpop.f32.mrf.mxu0  ;;  %18008 = vmatmul.mubr.msk.f32.gmra.mxu0 %vm430_vm0, %v14947_v43  ;;  %v14691_v35 = vld [vmem:[%s18749_s9 + $0x4a1] sm:$0xff] }
 0x475   : > { %v18084_v15 = vpop.eup %18083  ;;  %v11930_v36 = vadd.f32 %v17862_v4, %v10582_v61  ;;  %v10581_v60 = vadd.f32 %v9982_v22, %v21596_v0  ;;  %v17669_v12 = vpop.f32.mrf.mxu1  ;;  %17812 = vmatmul.mubr.msk.f32.gmra.mxu1 %vm430_vm0, %v14689_v52  ;;  %18010 = vmatprep.mubr.msk.f32.mxu0 %vm430_vm0, %v14948_v5  ;;  %v14949_v4 = vld [vmem:[%s18749_s9 + $0x4a2] sm:$0xff] }
 0x476   : > { %v12567_v40 = vadd.f32 1.0, %v18084_v15  ;;  %18097 = vpow2.f32 %v12322_v31  ;;  %v12328_v57 = vmul.f32 1.442695, %v12191_v8  ;;  %v12190_v1 = vsub.f32 0.0, %v22509_v16  ;;  %17814 = vmatprep.mubr.msk.f32.mxu1 %vm430_vm0, %v14690_v13  ;;  %v11340_v22 = vpop.f32.mrf.mxu0  ;;  %v14692_v15 = vld [vmem:[%s18749_s9 + $0x4b1] sm:$0xff] }
 0x477   : > { %v18086_v0 = vpop.eup %18085  ;;  %v22520_v27 = vadd.f32 %v22418_v9, %v11930_v36  ;;  %v11929_v52 = vadd.f32 %v11330_v6, %v10581_v60  ;;  %v10584_v61 = vadd.f32 %v17669_v12, %v21605_v56  ;;  %v9992_v43 = vpop.f32.mrf.mxu1  ;;  %v14950_v31 = vld [vmem:[%s18749_s9 + $0x4b2] sm:$0xff] }
 0x478   : > { %18099 = vrcp.f32 %v12567_v40  ;;  %v12566_v8 = vadd.f32 1.0, %v18086_v0  ;;  %v12326_v38 = vmul.f32 1.442695, %v12190_v1  ;;  %v10583_v13 = vadd.f32 %v9992_v43, %v21610_v21  ;;  %v17868_v60 = vpop.f32.mrf.mxu0  ;;  %18011 = vmatmul.mubr.msk.f32.gmra.mxu0 %vm430_vm0, %v14949_v4  ;;  %v14951_v1 = vld [vmem:[%s18749_s9 + $0x4ba] sm:$0xff] }
 0x479   : > { %v18088_v5 = vpop.eup %18087  ;;  %18101 = vpow2.f32 %v12328_v57  ;;  %v12193_v42 = vsub.f32 0.0, %v22520_v27  ;;  %v22528_v36 = vadd.f32 %v22418_v9, %v11929_v52  ;;  %v11932_v6 = vadd.f32 %v17865_v17, %v10584_v61  ;;  %v17672_v56 = vpop.f32.mrf.mxu1  ;;  %17815 = vmatmul.mubr.msk.f32.gmra.mxu1 %vm430_vm0, %v14691_v35  ;;  %18013 = vmatprep.mubr.msk.f32.mxu0 %vm430_vm0, %v14950_v31  ;;  %v14693_v57 = vld [vmem:[%s18749_s9 + $0x4b9] sm:$0xff]  ;;  %v14694_v43 = vld [vmem:[%s18749_s9 + $0x4c1] sm:$0xff] }
 0x47a   : > { %18103 = vrcp.f32 %v12566_v8  ;;  %v12569_v21 = vadd.f32 1.0, %v18088_v5  ;;  %v11931_v12 = vadd.f32 %v11340_v22, %v10583_v13  ;;  %v10586_v40 = vadd.f32 %v17672_v56, %v21619_v7  ;;  %17817 = vmatprep.mubr.msk.f32.mxu1 %vm430_vm0, %v14692_v15  ;;  %v11350_v61 = vpop.f32.mrf.mxu0  ;;  %v14952_v22 = vld [vmem:[%s18749_s9 + $0x4c2] sm:$0xff] }
 0x47b   : > { %v18090_v17 = vpop.eup %18089  ;;  %18105 = vpow2.f32 %v12326_v38  ;;  %v12332_v0 = vmul.f32 1.442695, %v12193_v42  ;;  %v12192_v35 = vsub.f32 0.0, %v22528_v36  ;;  %v22539_v4 = vadd.f32 %v22418_v9, %v11932_v6  ;;  %v10002_v52 = vpop.f32.mrf.mxu1 }
 0x47c   : > { %18107 = vrcp.f32 %v12569_v21  ;;  %v12568_v7 = vadd.f32 1.0, %v18090_v17  ;;  %v22544_v15 = vadd.f32 %v22418_v9, %v11931_v12  ;;  %v11934_v31 = vadd.f32 %v17868_v60, %v10586_v40  ;;  %v17871_v5 = vpop.f32.mrf.mxu0  ;;  %18014 = vmatmul.mubr.msk.f32.gmra.mxu0 %vm430_vm0, %v14951_v1  ;;  %v14953_v12 = vld [vmem:[%s18749_s9 + $0x4ca] sm:$0xff] }
 0x47d   : > { %18109 = vpow2.f32 %v12332_v0  ;;  %v12330_v38 = vmul.f32 1.442695, %v12192_v35  ;;  %v12195_v42 = vsub.f32 0.0, %v22539_v4  ;;  %v10585_v8 = vadd.f32 %v10002_v52, %v21624_v23  ;;  %v17675_v13 = vpop.f32.mrf.mxu1  ;;  %17818 = vmatmul.mubr.msk.f32.gmra.mxu1 %vm430_vm0, %v14693_v57  ;;  %18016 = vmatprep.mubr.msk.f32.mxu0 %vm430_vm0, %v14952_v22  ;;  %v14695_v23 = vld [vmem:[%s18749_s9 + $0x4c9] sm:$0xff]  ;;  %v14696_v35 = vld [vmem:[%s18749_s9 + $0x4d9] sm:$0xff] }
 0x47e   : > { %v18092_v6 = vpop.eup %18091  ;;  %18111 = vrcp.f32 %v12568_v7  ;;  %v12194_v56 = vsub.f32 0.0, %v22544_v15  ;;  %v22552_v60 = vadd.f32 %v22418_v9, %v11934_v31  ;;  %v10588_v21 = vadd.f32 %v17675_v13, %v21633_v63  ;;  %17820 = vmatprep.mubr.msk.f32.mxu1 %vm430_vm0, %v14694_v43  ;;  %v11360_v0 = vpop.f32.mrf.mxu0  ;;  %v14954_v52 = vld [vmem:[%s18749_s9 + $0x4da] sm:$0xff] }
 0x47f   : > { %v12571_v40 = vadd.f32 1.0, %v18092_v6  ;;  %18113 = vpow2.f32 %v12330_v38  ;;  %v12336_v57 = vmul.f32 1.442695, %v12195_v42  ;;  %v11933_v1 = vadd.f32 %v11350_v61, %v10585_v8  ;;  %v10012_v17 = vpop.f32.mrf.mxu1 }
 0x480   : > { %v18094_v7 = vpop.eup %18093  ;;  %v12197_v31 = vsub.f32 0.0, %v22552_v60  ;;  %v11936_v63 = vadd.f32 %v17871_v5, %v10588_v21  ;;  %v10587_v43 = vadd.f32 %v10012_v17, %v21638_v39  ;;  %v12334_v6 = vmul.f32 1.442695, %v12194_v56  ;;  %v17874_v42 = vpop.f32.mrf.mxu0  ;;  %18017 = vmatmul.mubr.msk.f32.gmra.mxu0 %vm430_vm0, %v14953_v12  ;;  %v14697_v56 = vld [vmem:[%s18749_s9 + $0x4e1] sm:$0xff] }
 0x481   : > { %v18096_v13 = vpop.eup %18095  ;;  %18115 = vrcp.f32 %v12571_v40  ;;  %v12570_v22 = vadd.f32 1.0, %v18094_v7  ;;  %v22565_v38 = vadd.f32 %v22418_v9, %v11933_v1  ;;  %v17678_v61 = vpop.f32.mrf.mxu1  ;;  %17821 = vmatmul.mubr.msk.f32.gmra.mxu1 %vm430_vm0, %v14695_v23  ;;  %18019 = vmatprep.mubr.msk.f32.mxu0 %vm430_vm0, %v14954_v52  ;;  %v14955_v21 = vld [vmem:[%s18749_s9 + $0x4e2] sm:$0xff] }
 0x482   : > { %v12573_v39 = vadd.f32 1.0, %v18096_v13  ;;  %18117 = vpow2.f32 %v12336_v57  ;;  %v12340_v8 = vmul.f32 1.442695, %v12197_v31  ;;  %v22574_v5 = vadd.f32 %v22418_v9, %v11936_v63  ;;  %17823 = vmatprep.mubr.msk.f32.mxu1 %vm430_vm0, %v14696_v35  ;;  %v11370_v7 = vpop.f32.mrf.mxu0  ;;  %v14698_v57 = vld [vmem:[%s18749_s9 + $0x4e9] sm:$0xff] }
 0x483   : > { %v18098_v23 = vpop.eup %18097  ;;  %18119 = vrcp.f32 %v12570_v22  ;;  %v12196_v12 = vsub.f32 0.0, %v22565_v38  ;;  %v11935_v40 = vadd.f32 %v11360_v0, %v10587_v43  ;;  %v10590_v1 = vadd.f32 %v17678_v61, %v21647_v19  ;;  %v10022_v17 = vpop.f32.mrf.mxu1  ;;  %v14956_v31 = vld [vmem:[%s18749_s9 + $0x4ea] sm:$0xff] }
 0x484   : > { %18121 = vrcp.f32 %v12573_v39  ;;  %v12572_v63 = vadd.f32 1.0, %v18098_v23  ;;  %v12199_v13 = vsub.f32 0.0, %v22574_v5  ;;  %v10589_v35 = vadd.f32 %v10022_v17, %v21652_v24  ;;  %v17877_v43 = vpop.f32.mrf.mxu0  ;;  %18020 = vmatmul.mubr.msk.f32.gmra.mxu0 %vm430_vm0, %v14955_v21  ;;  %v14957_v23 = vld [vmem:[%s18749_s9 + $0x4f2] sm:$0xff]  ;;  %v14700_v17 = vld [vmem:[%s18749_s9 + $0x501] sm:$0xff] }
 0x485   : > { %v18100_v52 = vpop.eup %18099  ;;  %18123 = vpow2.f32 %v12334_v6  ;;  %v12338_v22 = vmul.f32 1.442695, %v12196_v12  ;;  %v22587_v34 = vadd.f32 %v22418_v9, %v11935_v40  ;;  %v11938_v0 = vadd.f32 %v17874_v42, %v10590_v1  ;;  %v17681_v19 = vpop.f32.mrf.mxu1  ;;  %17824 = vmatmul.mubr.msk.f32.gmra.mxu1 %vm430_vm0, %v14697_v56  ;;  %18022 = vmatprep.mubr.msk.f32.mxu0 %vm430_vm0, %v14956_v31  ;;  %v14699_v42 = vld [vmem:[%s18749_s9 + $0x4f1] sm:$0xff] }
 0x486   : > { %v18102_v61 = vpop.eup %18101  ;;  %v12823_v39 = vmul.f32 %v18100_v52, %v22426_v30  ;;  %18125 = vrcp.f32 %v12572_v63  ;;  %v12344_v24 = vmul.f32 1.442695, %v12199_v13  ;;  %v11937_v6 = vadd.f32 %v11370_v7, %v10589_v35  ;;  %17826 = vmatprep.mubr.msk.f32.mxu1 %vm430_vm0, %v14698_v57  ;;  %v11380_v1 = vpop.f32.mrf.mxu0  ;;  %v14958_v63 = vld [vmem:[%s18749_s9 + $0x502] sm:$0xff] }
 0x487   : > { %v18104_v12 = vpop.eup %18103  ;;  %v12575_v56 = vadd.f32 1.0, %v18102_v61  ;;  %18127 = vpow2.f32 %v12340_v8  ;;  %v12198_v21 = vsub.f32 0.0, %v22587_v34  ;;  %v22598_v40 = vadd.f32 %v22418_v9, %v11938_v0  ;;  %v10032_v30 = vpop.f32.mrf.mxu1 }
 0x488   : > { %v18106_v13 = vpop.eup %18105  ;;  %12951 = vst [vmem:[%s22603_s10 + $0x8] sm:$0xff] %v12823_v39  ;;  %v12822_v7 = vmul.f32 %v18104_v12, %v22437_v51  ;;  %18129 = vpow2.f32 %v12338_v22  ;;  %v22608_v8 = vadd.f32 %v22418_v9, %v11937_v6  ;;  %v10592_v57 = vadd.f32 %v17681_v19, %v21661_v25  ;;  %v17880_v39 = vpop.f32.mrf.mxu0  ;;  %18023 = vmatmul.mubr.msk.f32.gmra.mxu0 %vm430_vm0, %v14957_v23  ;;  %v14701_v6 = vld [vmem:[%s18749_s9 + $0x509] sm:$0xff] }
 0x489   : > { %v18108_v31 = vpop.eup %18107  ;;  %18131 = vrcp.f32 %v12575_v56  ;;  %v12574_v35 = vadd.f32 1.0, %v18106_v13  ;;  %v12342_v52 = vmul.f32 1.442695, %v12198_v21  ;;  %v12201_v0 = vsub.f32 0.0, %v22598_v40  ;;  %v17684_v61 = vpop.f32.mrf.mxu1  ;;  %17827 = vmatmul.mubr.msk.f32.gmra.mxu1 %vm430_vm0, %v14699_v42  ;;  %18025 = vmatprep.mubr.msk.f32.mxu0 %vm430_vm0, %v14958_v63  ;;  %v14959_v42 = vld [vmem:[%s18749_s9 + $0x50a] sm:$0xff] }
 0x48a   : > { %v18110_v51 = vpop.eup %18109  ;;  %12950 = vst [vmem:[%s22603_s10] sm:$0xff] %v12822_v7  ;;  %v12825_v22 = vmul.f32 %v18108_v31, %v22444_v53  ;;  %18133 = vpow2.f32 %v12344_v24  ;;  %v12200_v25 = vsub.f32 0.0, %v22608_v8  ;;  %v11940_v19 = vadd.f32 %v17877_v43, %v10592_v57  ;;  %17829 = vmatprep.mubr.msk.f32.mxu1 %vm430_vm0, %v14700_v17  ;;  %v11390_v53 = vpop.f32.mrf.mxu0  ;;  %v14702_v7 = vld [vmem:[%s18749_s9 + $0x511] sm:$0xff] }
 0x48b   : > { %v18112_v12 = vpop.eup %18111  ;;  %18135 = vrcp.f32 %v12574_v35  ;;  %v12577_v23 = vadd.f32 1.0, %v18110_v51  ;;  %v12348_v56 = vmul.f32 1.442695, %v12201_v0  ;;  %v10591_v21 = vadd.f32 %v10032_v30, %v21666_v20  ;;  %v10042_v13 = vpop.f32.mrf.mxu1  ;;  %v14960_v24 = vld [vmem:[%s18749_s9 + $0x512] sm:$0xff] }
 0x48c   : > { %v18114_v31 = vpop.eup %18113  ;;  %12953 = vst [vmem:[%s22603_s10 + $0x18] sm:$0xff] %v12825_v22  ;;  %v12824_v43 = vmul.f32 %v18112_v12, %v22455_v29  ;;  %18137 = vpow2.f32 %v12342_v52  ;;  %v12346_v17 = vmul.f32 1.442695, %v12200_v25  ;;  %v22627_v63 = vadd.f32 %v22418_v9, %v11940_v19  ;;  %v17883_v0 = vpop.f32.mrf.mxu0  ;;  %18026 = vmatmul.mubr.msk.f32.gmra.mxu0 %vm430_vm0, %v14959_v42 }
 0x48d   : > { %18139 = vrcp.f32 %v12577_v23  ;;  %v12576_v57 = vadd.f32 1.0, %v18114_v31  ;;  %v11939_v35 = vadd.f32 %v11380_v1, %v10591_v21  ;;  %v10594_v20 = vadd.f32 %v17684_v61, %v21675_v33  ;;  %v17687_v30 = vpop.f32.mrf.mxu1  ;;  %17830 = vmatmul.mubr.msk.f32.gmra.mxu1 %vm430_vm0, %v14701_v6  ;;  %18028 = vmatprep.mubr.msk.f32.mxu0 %vm430_vm0, %v14960_v24  ;;  %v14703_v33 = vld [vmem:[%s18749_s9 + $0x519] sm:$0xff]  ;;  %v14962_v23 = vld [vmem:[%s18749_s9 + $0x52a] sm:$0xff] }
 0x48e   : > { %v18116_v51 = vpop.eup %18115  ;;  %12952 = vst [vmem:[%s22603_s10 + $0x10] sm:$0xff] %v12824_v43  ;;  %18141 = vpow2.f32 %v12348_v56  ;;  %v12203_v29 = vsub.f32 0.0, %v22627_v63  ;;  %v10593_v52 = vadd.f32 %v10042_v13, %v21680_v3  ;;  %v10596_v22 = vadd.f32 %v17687_v30, %v21689_v41  ;;  %17832 = vmatprep.mubr.msk.f32.mxu1 %vm430_vm0, %v14702_v7  ;;  %v14961_v1 = vld [vmem:[%s18749_s9 + $0x51a] sm:$0xff]  ;;  %v11400_v12 = vpop.f32.mrf.mxu0  ;;  %v14704_v3 = vld [vmem:[%s18749_s9 + $0x529] sm:$0xff]  ;;  %v14963_v30 = vld [vmem:[%s18749_s9 + $0x532] sm:$0xff] }
 0x48f   : > { %v18118_v61 = vpop.eup %18117  ;;  %v12827_v25 = vmul.f32 %v18116_v51, %v22467_v14  ;;  %18143 = vrcp.f32 %v12576_v57  ;;  %v22642_v19 = vadd.f32 %v22418_v9, %v11939_v35  ;;  %v11942_v6 = vadd.f32 %v17880_v39, %v10594_v20  ;;  %v10052_v42 = vpop.f32.mrf.mxu1  ;;  %v14705_v20 = vld [vmem:[%s18749_s9 + $0x531] sm:$0xff] }
 0x490   : > { %v18120_v41 = vpop.eup %18119  ;;  %v12579_v56 = vadd.f32 1.0, %v18118_v61  ;;  %18145 = vpow2.f32 %v12346_v17  ;;  %v12352_v21 = vmul.f32 1.442695, %v12203_v29  ;;  %v11941_v13 = vadd.f32 %v11390_v53, %v10593_v52  ;;  %v17886_v57 = vpop.f32.mrf.mxu0  ;;  %18029 = vmatmul.mubr.msk.f32.gmra.mxu0 %vm430_vm0, %v14961_v1  ;;  %v14964_v1 = vld [vmem:[%s18749_s9 + $0x53a] sm:$0xff] }
 0x491   : > { %v18122_v7 = vpop.eup %18121  ;;  %12955 = vst [vmem:[%s22603_s10 + $0x28] sm:$0xff] %v12827_v25  ;;  %v12826_v24 = vmul.f32 %v18120_v41, %v22474_v45  ;;  %v12202_v14 = vsub.f32 0.0, %v22642_v19  ;;  %v22650_v31 = vadd.f32 %v22418_v9, %v11942_v6  ;;  %v11944_v39 = vadd.f32 %v17883_v0, %v10596_v22  ;;  %v17690_v43 = vpop.f32.mrf.mxu1  ;;  %17833 = vmatmul.mubr.msk.f32.gmra.mxu1 %vm430_vm0, %v14703_v33  ;;  %v14706_v33 = vld [vmem:[%s18749_s9 + $0x539] sm:$0xff] }
 0x492   : > { %v18124_v53 = vpop.eup %18123  ;;  %v12829_v17 = vmul.f32 %v18122_v7, %v22479_v37  ;;  %18147 = vrcp.f32 %v12579_v56  ;;  %v22656_v45 = vadd.f32 %v22418_v9, %v11941_v13  ;;  %v10595_v35 = vadd.f32 %v10052_v42, %v21694_v11  ;;  %17835 = vmatprep.mubr.msk.f32.mxu1 %vm430_vm0, %v14704_v3  ;;  %18031 = vmatprep.mubr.msk.f32.mxu0 %vm430_vm0, %v14962_v23  ;;  %v11410_v22 = vpop.f32.mrf.mxu0 }
 0x493   : > { %v18126_v0 = vpop.eup %18125  ;;  %12954 = vst [vmem:[%s22603_s10 + $0x20] sm:$0xff] %v12826_v24  ;;  %v12578_v51 = vadd.f32 1.0, %v18124_v53  ;;  %18149 = vpow2.f32 %v12352_v21  ;;  %v12350_v37 = vmul.f32 1.442695, %v12202_v14  ;;  %v12205_v29 = vsub.f32 0.0, %v22650_v31  ;;  %v10062_v52 = vpop.f32.mrf.mxu1  ;;  %v14707_v14 = vld [vmem:[%s18749_s9 + $0x541] sm:$0xff] }
 0x494   : > { %v18128_v61 = vpop.eup %18127  ;;  %12957 = vst [vmem:[%s22603_s10 + $0x38] sm:$0xff] %v12829_v17  ;;  %v12828_v11 = vmul.f32 %v18126_v0, %v22491_v46  ;;  %v12204_v25 = vsub.f32 0.0, %v22656_v45  ;;  %v22671_v6 = vadd.f32 %v22418_v9, %v11944_v39  ;;  %v11943_v42 = vadd.f32 %v11400_v12, %v10595_v35  ;;  %v17889_v13 = vpop.f32.mrf.mxu0  ;;  %18032 = vmatmul.mubr.msk.f32.gmra.mxu0 %vm430_vm0, %v14963_v30 }
 0x495   : > { %v18130_v3 = vpop.eup %18129  ;;  %18151 = vrcp.f32 %v12578_v51  ;;  %v12581_v23 = vadd.f32 1.0, %v18128_v61  ;;  %v12356_v41 = vmul.f32 1.442695, %v12205_v29  ;;  %v10598_v56 = vadd.f32 %v17690_v43, %v21703_v49  ;;  %v17693_v21 = vpop.f32.mrf.mxu1  ;;  %17836 = vmatmul.mubr.msk.f32.gmra.mxu1 %vm430_vm0, %v14705_v20  ;;  %18034 = vmatprep.mubr.msk.f32.mxu0 %vm430_vm0, %v14964_v1  ;;  %v14965_v49 = vld [vmem:[%s18749_s9 + $0x542] sm:$0xff] }
 0x496   : > { %v18132_v46 = vpop.eup %18131  ;;  %12956 = vst [vmem:[%s22603_s10 + $0x30] sm:$0xff] %v12828_v11  ;;  %v12580_v7 = vadd.f32 1.0, %v18130_v3  ;;  %18153 = vpow2.f32 %v12350_v37  ;;  %v12354_v24 = vmul.f32 1.442695, %v12204_v25  ;;  %v12207_v12 = vsub.f32 0.0, %v22671_v6  ;;  %17838 = vmatprep.mubr.msk.f32.mxu1 %vm430_vm0, %v14706_v33  ;;  %v11420_v20 = vpop.f32.mrf.mxu0 }
 0x497   : > { %v18134_v39 = vpop.eup %18133  ;;  %v12831_v43 = vmul.f32 %v18132_v46, %v22498_v44  ;;  %18155 = vrcp.f32 %v12581_v23  ;;  %v22684_v53 = vadd.f32 %v22418_v9, %v11943_v42  ;;  %v11946_v17 = vadd.f32 %v17886_v57, %v10598_v56  ;;  %v10072_v35 = vpop.f32.mrf.mxu1 }
 0x498   : > { %v18136_v30 = vpop.eup %18135  ;;  %18157 = vrcp.f32 %v12580_v7  ;;  %v12583_v0 = vadd.f32 1.0, %v18134_v39  ;;  %v12360_v51 = vmul.f32 1.442695, %v12207_v12  ;;  %v10597_v37 = vadd.f32 %v10062_v52, %v21708_v55  ;;  %v17892_v61 = vpop.f32.mrf.mxu0  ;;  %18035 = vmatmul.mubr.msk.f32.gmra.mxu0 %vm430_vm0, %v14965_v49 }
 0x499   : > { %v18138_v29 = vpop.eup %18137  ;;  %12959 = vst [vmem:[%s22603_s10 + $0x48] sm:$0xff] %v12831_v43  ;;  %v12830_v33 = vmul.f32 %v18136_v30, %v22509_v16  ;;  %18159 = vpow2.f32 %v12356_v41  ;;  %v12206_v44 = vsub.f32 0.0, %v22684_v53  ;;  %v22691_v1 = vadd.f32 %v22418_v9, %v11946_v17  ;;  %v17696_v57 = vpop.f32.mrf.mxu1  ;;  %17839 = vmatmul.mubr.msk.f32.gmra.mxu1 %vm430_vm0, %v14707_v14 }
 0x49a   : > { %v18140_v11 = vpop.eup %18139  ;;  %18161 = vrcp.f32 %v12583_v0  ;;  %v12582_v55 = vadd.f32 1.0, %v18138_v29  ;;  %v11945_v52 = vadd.f32 %v11410_v22, %v10597_v37  ;;  %v10600_v25 = vadd.f32 %v17693_v21, %v21717_v58  ;;  %v11430_v56 = vpop.f32.mrf.mxu0  ;;  %v24547_v0 = vld [vmem:[#allocation78_spill] sm:$0xff] }
 0x49b   : > { %v18142_v16 = vpop.eup %18141  ;;  %12958 = vst [vmem:[%s22603_s10 + $0x40] sm:$0xff] %v12830_v33  ;;  %v12833_v42 = vmul.f32 %v18140_v11, %v22520_v27  ;;  %18163 = vpow2.f32 %v12354_v24  ;;  %v12358_v3 = vmul.f32 1.442695, %v12206_v44  ;;  %v12209_v23 = vsub.f32 0.0, %v22691_v1  ;;  %v10082_v41 = vpop.f32.mrf.mxu1 }
 0x49c   : > { %v18144_v46 = vpop.eup %18143  ;;  %18165 = vrcp.f32 %v12582_v55  ;;  %v12585_v7 = vadd.f32 1.0, %v18142_v16  ;;  %v22700_v12 = vadd.f32 %v22418_v9, %v11945_v52  ;;  %v11948_v22 = vadd.f32 %v17889_v13, %v10600_v25  ;;  %v17895_v49 = vpop.f32.mrf.mxu0 }
 0x49d   : > { %v18146_v14 = vpop.eup %18145  ;;  %12961 = vst [vmem:[%s22603_s10 + $0x58] sm:$0xff] %v12833_v42  ;;  %v12832_v58 = vmul.f32 %v18144_v46, %v22528_v36  ;;  %18167 = vpow2.f32 %v12360_v51  ;;  %v12364_v27 = vmul.f32 1.442695, %v12209_v23  ;;  %v10599_v21 = vadd.f32 %v10072_v35, %v21722_v48  ;;  %v17699_v24 = vpop.f32.mrf.mxu1 }
 0x49e   : > { %18169 = vrcp.f32 %v12585_v7  ;;  %v12584_v39 = vadd.f32 1.0, %v18146_v14  ;;  %v12208_v43 = vsub.f32 0.0, %v22700_v12  ;;  %v22707_v17 = vadd.f32 %v22418_v9, %v11948_v22  ;;  %v11440_v48 = vpop.f32.mrf.mxu0 }
 0x49f   : > { %v18148_v30 = vpop.eup %18147  ;;  %12960 = vst [vmem:[%s22603_s10 + $0x50] sm:$0xff] %v12832_v58  ;;  %18171 = vpow2.f32 %v12358_v3  ;;  %v11947_v13 = vadd.f32 %v11420_v20, %v10599_v21  ;;  %v10602_v37 = vadd.f32 %v17696_v57, %v24547_v0  ;;  %v10601_v36 = vadd.f32 %v10082_v41, %v21736_v32  ;;  %v10092_v51 = vpop.f32.mrf.mxu1 }
 0x4a0   : > { %v18150_v35 = vpop.eup %18149  ;;  %v12835_v29 = vmul.f32 %v18148_v30, %v22539_v4  ;;  %18173 = vrcp.f32 %v12584_v39  ;;  %v12362_v33 = vmul.f32 1.442695, %v12208_v43  ;;  %v12211_v44 = vsub.f32 0.0, %v22707_v17  ;;  %v17898_v57 = vpop.f32.mrf.mxu0 }
 0x4a1   : > { %v12587_v11 = vadd.f32 1.0, %v18150_v35  ;;  %18175 = vpow2.f32 %v12364_v27  ;;  %v22715_v55 = vadd.f32 %v22418_v9, %v11947_v13  ;;  %v11950_v20 = vadd.f32 %v17892_v61, %v10602_v37  ;;  %v17702_v52 = vpop.f32.mrf.mxu1 }
 0x4a2   : > { %v18152_v25 = vpop.eup %18151  ;;  %12963 = vst [vmem:[%s22603_s10 + $0x68] sm:$0xff] %v12835_v29  ;;  %18177 = vpow2.f32 %v12362_v33  ;;  %v12368_v32 = vmul.f32 1.442695, %v12211_v44  ;;  %v11949_v16 = vadd.f32 %v11430_v56, %v10601_v36  ;;  %v10604_v4 = vadd.f32 %v17699_v24, %v21745_v59  ;;  %v11450_v46 = vpop.f32.mrf.mxu0 }
 0x4a3   : > { %v18154_v42 = vpop.eup %18153  ;;  %v12834_v3 = vmul.f32 %v18152_v25, %v22544_v15  ;;  %18179 = vrcp.f32 %v12587_v11  ;;  %v12210_v23 = vsub.f32 0.0, %v22715_v55  ;;  %v22722_v41 = vadd.f32 %v22418_v9, %v11950_v20  ;;  %v10102_v61 = vpop.f32.mrf.mxu1 }
 0x4a4   : > { %v18156_v7 = vpop.eup %18155  ;;  %v12586_v22 = vadd.f32 1.0, %v18154_v42  ;;  %18181 = vpow2.f32 %v12368_v32  ;;  %v22725_v14 = vadd.f32 %v22418_v9, %v11949_v16  ;;  %v11952_v56 = vadd.f32 %v17895_v49, %v10604_v4  ;;  %v17901_v39 = vpop.f32.mrf.mxu0 }
 0x4a5   : > { %v18158_v59 = vpop.eup %18157  ;;  %12962 = vst [vmem:[%s22603_s10 + $0x60] sm:$0xff] %v12834_v3  ;;  %v12837_v15 = vmul.f32 %v18156_v7, %v22552_v60  ;;  %v12366_v58 = vmul.f32 1.442695, %v12210_v23  ;;  %v12213_v27 = vsub.f32 0.0, %v22722_v41  ;;  %v10603_v21 = vadd.f32 %v10092_v51, %v21750_v47  ;;  %v17705_v24 = vpop.f32.mrf.mxu1 }
 0x4a6   : > { %v18160_v43 = vpop.eup %18159  ;;  %v12836_v30 = vmul.f32 %v18158_v59, %v22565_v38  ;;  %18183 = vrcp.f32 %v12586_v22  ;;  %v12212_v13 = vsub.f32 0.0, %v22725_v14  ;;  %v22734_v49 = vadd.f32 %v22418_v9, %v11952_v56  ;;  %v22737_v47 = vpop.f32.mrf.mxu0 }
 0x4a7   : > { %v18162_v0 = vpop.eup %18161  ;;  %12965 = vst [vmem:[%s22603_s10 + $0x78] sm:$0xff] %v12837_v15  ;;  %v12589_v60 = vadd.f32 1.0, %v18160_v43  ;;  %18185 = vpow2.f32 %v12366_v58  ;;  %v12372_v37 = vmul.f32 1.442695, %v12213_v27  ;;  %v11951_v36 = vadd.f32 %v11440_v48, %v10603_v21  ;;  %v10112_v35 = vpop.f32.mrf.mxu1 }
 0x4a8   : > { %v18164_v51 = vpop.eup %18163  ;;  %12964 = vst [vmem:[%s22603_s10 + $0x70] sm:$0xff] %v12836_v30  ;;  %v12839_v38 = vmul.f32 %v18162_v0, %v22574_v5  ;;  %v12370_v29 = vmul.f32 1.442695, %v12212_v13  ;;  %v12215_v33 = vsub.f32 0.0, %v22734_v49  ;;  %v10606_v44 = vadd.f32 %v17702_v52, %v21759_v54  ;;  %v22747_v16 = vpop.f32.mrf.mxu0 }
 0x4a9   : > { %v18166_v11 = vpop.eup %18165  ;;  %18187 = vrcp.f32 %v12589_v60  ;;  %v12588_v20 = vadd.f32 1.0, %v18164_v51  ;;  %v22744_v25 = vadd.f32 %v22418_v9, %v11951_v36  ;;  %v10605_v48 = vadd.f32 %v10102_v61, %v21764_v2  ;;  %v17708_v32 = vpop.f32.mrf.mxu1 }
 0x4aa   : > { %v18168_v4 = vpop.eup %18167  ;;  %12967 = vst [vmem:[%s22603_s10 + $0x88] sm:$0xff] %v12839_v38  ;;  %v12838_v5 = vmul.f32 %v18166_v11, %v22587_v34  ;;  %18189 = vpow2.f32 %v12372_v37  ;;  %v12376_v42 = vmul.f32 1.442695, %v12215_v33  ;;  %v11954_v3 = vadd.f32 %v17898_v57, %v10606_v44  ;;  %v11470_v22 = vpop.f32.mrf.mxu0  ;;  %v22757_v34 = vld [vmem:[%s23976_s2] ss:$0 sm:$0xff] }
 0x4ab   : > { %v18170_v54 = vpop.eup %18169  ;;  %18191 = vrcp.f32 %v12588_v20  ;;  %v12591_v52 = vadd.f32 1.0, %v18168_v4  ;;  %v12214_v23 = vsub.f32 0.0, %v22744_v25  ;;  %v11953_v9 = vadd.f32 %v11450_v46, %v10605_v48  ;;  %v10122_v7 = vpop.f32.mrf.mxu1 }
 0x4ac   : > { %v18172_v2 = vpop.eup %18171  ;;  %12966 = vst [vmem:[%s22603_s10 + $0x80] sm:$0xff] %v12838_v5  ;;  %v12841_v61 = vmul.f32 %v18170_v54, %v22598_v40  ;;  %18193 = vpow2.f32 %v12370_v29  ;;  %v22760_v57 = vadd.f32 %v22757_v34, %v11954_v3  ;;  %v10608_v56 = vadd.f32 %v17705_v24, %v21773_v26  ;;  %v17907_v40 = vpop.f32.mrf.mxu0 }
 0x4ad   : > { %v18174_v59 = vpop.eup %18173  ;;  %18195 = vrcp.f32 %v12591_v52  ;;  %v12590_v46 = vadd.f32 1.0, %v18172_v2  ;;  %v12374_v15 = vmul.f32 1.442695, %v12214_v23  ;;  %v22764_v58 = vadd.f32 %v22757_v34, %v11953_v9  ;;  %v17711_v27 = vpop.f32.mrf.mxu1 }
 0x4ae   : > { %v18176_v21 = vpop.eup %18175  ;;  %12969 = vst [vmem:[%s22603_s10 + $0x98] sm:$0xff] %v12841_v61  ;;  %v12840_v43 = vmul.f32 %v18174_v59, %v22608_v8  ;;  %18197 = vpow2.f32 %v12376_v42  ;;  %v12217_v30 = vsub.f32 0.0, %v22760_v57  ;;  %v11956_v13 = vadd.f32 %v17901_v39, %v10608_v56  ;;  %v11480_v36 = vpop.f32.mrf.mxu0 }
 0x4af   : > { %v18178_v0 = vpop.eup %18177  ;;  %18199 = vrcp.f32 %v12590_v46  ;;  %v12593_v26 = vadd.f32 1.0, %v18176_v21  ;;  %v12216_v24 = vsub.f32 0.0, %v22764_v58  ;;  %v10607_v60 = vadd.f32 %v10112_v35, %v21778_v18  ;;  %v10132_v37 = vpop.f32.mrf.mxu1 }
 0x4b0   : > { %v18180_v51 = vpop.eup %18179  ;;  %12968 = vst [vmem:[%s22603_s10 + $0x90] sm:$0xff] %v12840_v43  ;;  %v12592_v38 = vadd.f32 1.0, %v18178_v0  ;;  %18201 = vpow2.f32 %v12374_v15  ;;  %v12380_v29 = vmul.f32 1.442695, %v12217_v30  ;;  %v22773_v8 = vadd.f32 %v22757_v34, %v11956_v13  ;;  %v17910_v18 = vpop.f32.mrf.mxu0 }
 0x4b1   : > { %v18182_v33 = vpop.eup %18181  ;;  %v12843_v39 = vmul.f32 %v18180_v51, %v22627_v63  ;;  %18203 = vrcp.f32 %v12593_v26  ;;  %v12378_v44 = vmul.f32 1.442695, %v12216_v24  ;;  %v11955_v11 = vadd.f32 %v22737_v47, %v10607_v60  ;;  %v17714_v20 = vpop.f32.mrf.mxu1  ;;  %v24548_v24 = vld [vmem:[#allocation80_spill] sm:$0xff] }
 0x4b2   : > { %18205 = vrcp.f32 %v12592_v38  ;;  %v12595_v35 = vadd.f32 1.0, %v18182_v33  ;;  %v12219_v48 = vsub.f32 0.0, %v22773_v8  ;;  %v10610_v4 = vadd.f32 %v17708_v32, %v21787_v62  ;;  %v22785_v54 = vpop.f32.mrf.mxu0 }
 0x4b3   : > { %v18184_v5 = vpop.eup %18183  ;;  %12971 = vst [vmem:[%s22603_s10 + $0xa8] sm:$0xff] %v12843_v39  ;;  %18207 = vpow2.f32 %v12380_v29  ;;  %v22781_v42 = vadd.f32 %v22757_v34, %v11955_v11  ;;  %v10609_v63 = vadd.f32 %v10122_v7, %v21792_v50  ;;  %v10612_v3 = vadd.f32 %v17711_v27, %v21801_v28  ;;  %v10142_v47 = vpop.f32.mrf.mxu1 }
 0x4b4   : > { %v18186_v52 = vpop.eup %18185  ;;  %v12842_v23 = vmul.f32 %v18184_v5, %v22642_v19  ;;  %18209 = vrcp.f32 %v12595_v35  ;;  %v12384_v9 = vmul.f32 1.442695, %v12219_v48  ;;  %v11958_v62 = vadd.f32 %v22747_v16, %v10610_v4  ;;  %v22790_v50 = vpop.f32.mrf.mxu0 }
 0x4b5   : > { %v12594_v32 = vadd.f32 1.0, %v18186_v52  ;;  %18211 = vpow2.f32 %v12378_v44  ;;  %v12218_v2 = vsub.f32 0.0, %v22781_v42  ;;  %v11957_v61 = vadd.f32 %v11470_v22, %v10609_v63  ;;  %v17717_v56 = vpop.f32.mrf.mxu1 }
 0x4b6   : > { %v18188_v7 = vpop.eup %18187  ;;  %12970 = vst [vmem:[%s22603_s10 + $0xa0] sm:$0xff] %v12842_v23  ;;  %18213 = vpow2.f32 %v12384_v9  ;;  %v22794_v28 = vadd.f32 %v22757_v34, %v11958_v62  ;;  %v11960_v19 = vadd.f32 %v17907_v40, %v10612_v3  ;;  %v10611_v59 = vadd.f32 %v10132_v37, %v21806_v10  ;;  %v22803_v21 = vpop.f32.mrf.mxu0  ;;  %v24549_v3 = vld [vmem:[#allocation82_spill] sm:$0xff] }
 0x4b7   : > { %v18190_v46 = vpop.eup %18189  ;;  %v12845_v16 = vmul.f32 %v18188_v7, %v22650_v31  ;;  %18215 = vrcp.f32 %v12594_v32  ;;  %v12382_v15 = vmul.f32 1.442695, %v12218_v2  ;;  %v22799_v22 = vadd.f32 %v22757_v34, %v11957_v61  ;;  %v22801_v27 = vpop.f32.mrf.mxu1 }
 0x4b8   : > { %v18192_v43 = vpop.eup %18191  ;;  %v12597_v30 = vadd.f32 1.0, %v18190_v46  ;;  %v12221_v13 = vsub.f32 0.0, %v22794_v28  ;;  %v22807_v40 = vadd.f32 %v22757_v34, %v11960_v19  ;;  %v11959_v10 = vadd.f32 %v11480_v36, %v10611_v59  ;;  %v22815_v51 = vpop.f32.mrf.mxu0  ;;  %v24550_v19 = vld [vmem:[#allocation84_spill] sm:$0xff] }
 0x4b9   : > { %v18194_v0 = vpop.eup %18193  ;;  %12973 = vst [vmem:[%s22603_s10 + $0xb8] sm:$0xff] %v12845_v16  ;;  %v12844_v31 = vmul.f32 %v18192_v43, %v22656_v45  ;;  %18217 = vpow2.f32 %v12382_v15  ;;  %v12220_v26 = vsub.f32 0.0, %v22799_v22  ;;  %v10614_v60 = vadd.f32 %v17714_v20, %v24548_v24  ;;  %v22813_v37 = vpop.f32.mrf.mxu1 }
 0x4ba   : > { %v18196_v38 = vpop.eup %18195  ;;  %18219 = vrcp.f32 %v12597_v30  ;;  %v12596_v29 = vadd.f32 1.0, %v18194_v0  ;;  %v12388_v33 = vmul.f32 1.442695, %v12221_v13  ;;  %v12223_v36 = vsub.f32 0.0, %v22807_v40  ;;  %v22825_v48 = vpop.f32.mrf.mxu0 }
 0x4bb   : > { %v18198_v39 = vpop.eup %18197  ;;  %12972 = vst [vmem:[%s22603_s10 + $0xb0] sm:$0xff] %v12844_v31  ;;  %v12847_v45 = vmul.f32 %v18196_v38, %v22671_v6  ;;  %v12386_v44 = vmul.f32 1.442695, %v12220_v26  ;;  %v22821_v11 = vadd.f32 %v22757_v34, %v11959_v10  ;;  %v11962_v20 = vadd.f32 %v17910_v18, %v10614_v60  ;;  %v22823_v35 = vpop.f32.mrf.mxu1  ;;  %v24551_v31 = vld [vmem:[#allocation87_spill] sm:$0xff] }
 0x4bc   : > { %v18200_v4 = vpop.eup %18199  ;;  %18221 = vrcp.f32 %v12596_v29  ;;  %v12599_v5 = vadd.f32 1.0, %v18198_v39  ;;  %v12392_v63 = vmul.f32 1.442695, %v12223_v36  ;;  %v10613_v52 = vadd.f32 %v10142_v47, %v24549_v3  ;;  %v22834_v32 = vpop.f32.mrf.mxu0 }
 0x4bd   : > { %v18202_v23 = vpop.eup %18201  ;;  %12975 = vst [vmem:[%s22603_s10 + $0xc8] sm:$0xff] %v12847_v45  ;;  %v12846_v6 = vmul.f32 %v18200_v4, %v22684_v53  ;;  %18223 = vpow2.f32 %v12388_v33  ;;  %v12222_v9 = vsub.f32 0.0, %v22821_v11  ;;  %v22832_v18 = vadd.f32 %v22757_v34, %v11962_v20  ;;  %v17723_v62 = vpop.f32.mrf.mxu1 }
 0x4be   : > { %v18204_v2 = vpop.eup %18203  ;;  %18225 = vrcp.f32 %v12599_v5  ;;  %v12598_v61 = vadd.f32 1.0, %v18202_v23  ;;  %v11961_v7 = vadd.f32 %v22785_v54, %v10613_v52  ;;  %v10616_v47 = vadd.f32 %v17717_v56, %v24550_v19  ;;  %v22841_v43 = vpop.f32.mrf.mxu0 }
 0x4bf   : > { %v18206_v59 = vpop.eup %18205  ;;  %12974 = vst [vmem:[%s22603_s10 + $0xc0] sm:$0xff] %v12846_v6  ;;  %v12849_v53 = vmul.f32 %v18204_v2, %v22691_v1  ;;  %18227 = vpow2.f32 %v12386_v44  ;;  %v12390_v46 = vmul.f32 1.442695, %v12222_v9  ;;  %v12225_v16 = vsub.f32 0.0, %v22832_v18  ;;  %v10172_v15 = vpop.f32.mrf.mxu1  ;;  %v24553_v2 = vld [vmem:[#allocation85_spill] sm:$0xff] }
 0x4c0   : > { %v18208_v30 = vpop.eup %18207  ;;  %v12848_v13 = vmul.f32 %v18206_v59, %v22700_v12  ;;  %18229 = vrcp.f32 %v12598_v61  ;;  %v22845_v54 = vadd.f32 %v22757_v34, %v11961_v7  ;;  %v11964_v56 = vadd.f32 %v22790_v50, %v10616_v47  ;;  %v22851_v60 = vpop.f32.mrf.mxu0  ;;  %v24554_v7 = vld [vmem:[#allocation86_spill] sm:$0xff] }
 0x4c1   : > { %v18210_v10 = vpop.eup %18209  ;;  %12977 = vst [vmem:[%s22603_s10 + $0xd8] sm:$0xff] %v12849_v53  ;;  %v12601_v1 = vadd.f32 1.0, %v18208_v30  ;;  %18231 = vpow2.f32 %v12392_v63  ;;  %v12396_v0 = vmul.f32 1.442695, %v12225_v16  ;;  %v10615_v26 = vadd.f32 %v22801_v27, %v24551_v31  ;;  %v17726_v24 = vpop.f32.mrf.mxu1  ;;  %v24552_v27 = vld [vmem:[#allocation88_spill] sm:$0xff] }
 0x4c2   : > { %v18212_v38 = vpop.eup %18211  ;;  %12976 = vst [vmem:[%s22603_s10 + $0xd0] sm:$0xff] %v12848_v13  ;;  %v12851_v12 = vmul.f32 %v18210_v10, %v22707_v17  ;;  %18233 = vpow2.f32 %v12390_v46  ;;  %v12224_v29 = vsub.f32 0.0, %v22845_v54  ;;  %v22857_v50 = vadd.f32 %v22757_v34, %v11964_v56  ;;  %v22862_v20 = vpop.f32.mrf.mxu0  ;;  %v24555_v10 = vld [vmem:[#allocation53_spill] sm:$0xff] }
 0x4c3   : > { %v18214_v33 = vpop.eup %18213  ;;  %18235 = vrcp.f32 %v12601_v1  ;;  %v12600_v36 = vadd.f32 1.0, %v18212_v38  ;;  %v11963_v39 = vadd.f32 %v22803_v21, %v10615_v26  ;;  %v10618_v45 = vadd.f32 %v22813_v37, %v24552_v27  ;;  %v10182_v44 = vpop.f32.mrf.mxu1  ;;  %v24556_v38 = vld [vmem:[#allocation55_spill] sm:$0xff] }
 0x4c4   : > { %v18216_v4 = vpop.eup %18215  ;;  %12979 = vst [vmem:[%s22603_s10 + $0xe8] sm:$0xff] %v12851_v12  ;;  %v12603_v17 = vadd.f32 1.0, %v18214_v33  ;;  %18237 = vpow2.f32 %v12396_v0  ;;  %v12394_v5 = vmul.f32 1.442695, %v12224_v29  ;;  %v12227_v63 = vsub.f32 0.0, %v22857_v50  ;;  %v22873_v23 = vpop.f32.mrf.mxu0 }
 0x4c5   : > { %v12850_v3 = vmul.f32 %v18216_v4, %v22715_v55  ;;  %18239 = vrcp.f32 %v12600_v36  ;;  %v22868_v52 = vadd.f32 %v22757_v34, %v11963_v39  ;;  %v11966_v21 = vadd.f32 %v22815_v51, %v10618_v45  ;;  %v22871_v37 = vpop.f32.mrf.mxu1 }
 0x4c6   : > { %v18218_v6 = vpop.eup %18217  ;;  %18241 = vrcp.f32 %v12603_v17  ;;  %v12400_v9 = vmul.f32 1.442695, %v12227_v63  ;;  %v10617_v61 = vadd.f32 %v22823_v35, %v24553_v2  ;;  %v10620_v19 = vadd.f32 %v17723_v62, %v24554_v7  ;;  %v22885_v46 = vpop.f32.mrf.mxu0 }
 0x4c7   : > { %v18220_v47 = vpop.eup %18219  ;;  %12978 = vst [vmem:[%s22603_s10 + $0xe0] sm:$0xff] %v12850_v3  ;;  %v12602_v55 = vadd.f32 1.0, %v18218_v6  ;;  %18243 = vpow2.f32 %v12394_v5  ;;  %v12226_v59 = vsub.f32 0.0, %v22868_v52  ;;  %v22881_v51 = vadd.f32 %v22757_v34, %v11966_v21  ;;  %v22883_v53 = vpop.f32.mrf.mxu1  ;;  %v24557_v3 = vld [vmem:[#allocation57_spill] sm:$0xff] }
 0x4c8   : > { %v12853_v16 = vmul.f32 %v18220_v47, %v22722_v41  ;;  %18245 = vpow2.f32 %v12400_v9  ;;  %v11965_v35 = vadd.f32 %v22825_v48, %v10617_v61  ;;  %v11968_v62 = vadd.f32 %v22834_v32, %v10620_v19  ;;  %v22894_v31 = vpop.f32.mrf.mxu0 }
 0x4c9   : > { %v18222_v30 = vpop.eup %18221  ;;  %18247 = vrcp.f32 %v12602_v55  ;;  %v12398_v13 = vmul.f32 1.442695, %v12226_v59  ;;  %v12229_v56 = vsub.f32 0.0, %v22881_v51  ;;  %v10619_v1 = vadd.f32 %v10172_v15, %v24555_v10  ;;  %v22892_v0 = vpop.f32.mrf.mxu1 }
 0x4ca   : > { %v18224_v26 = vpop.eup %18223  ;;  %12981 = vst [vmem:[%s22603_s10 + $0xf8] sm:$0xff] %v12853_v16  ;;  %v12852_v41 = vmul.f32 %v18222_v30, %v22725_v14  ;;  %v22899_v48 = vadd.f32 %v22757_v34, %v11965_v35  ;;  %v22902_v32 = vadd.f32 %v22757_v34, %v11968_v62  ;;  %v10622_v12 = vadd.f32 %v17726_v24, %v24556_v38  ;;  %v22908_v27 = vpop.f32.mrf.mxu0  ;;  %v24558_v62 = vld [vmem:[#allocation59_spill] sm:$0xff] }
 0x4cb   : > { %v18226_v29 = vpop.eup %18225  ;;  %v12605_v33 = vadd.f32 1.0, %v18224_v26  ;;  %18249 = vpow2.f32 %v12398_v13  ;;  %v12404_v15 = vmul.f32 1.442695, %v12229_v56  ;;  %v11967_v36 = vadd.f32 %v22841_v43, %v10619_v1  ;;  %v22906_v39 = vpop.f32.mrf.mxu1 }
 0x4cc   : > { %v18228_v14 = vpop.eup %18227  ;;  %12980 = vst [vmem:[%s22603_s10 + $0xf0] sm:$0xff] %v12852_v41  ;;  %v12855_v45 = vmul.f32 %v18226_v29, %v22734_v49  ;;  %v12228_v4 = vsub.f32 0.0, %v22899_v48  ;;  %v12231_v17 = vsub.f32 0.0, %v22902_v32  ;;  %v11970_v24 = vadd.f32 %v22851_v60, %v10622_v12  ;;  %v22921_v9 = vpop.f32.mrf.mxu0 }
 0x4cd   : > { %v18230_v5 = vpop.eup %18229  ;;  %18251 = vrcp.f32 %v12605_v33  ;;  %v12604_v63 = vadd.f32 1.0, %v18228_v14  ;;  %v22916_v43 = vadd.f32 %v22757_v34, %v11967_v36  ;;  %v10621_v21 = vadd.f32 %v10182_v44, %v24557_v3  ;;  %v22919_v6 = vpop.f32.mrf.mxu1 }
 0x4ce   : > { %v18232_v49 = vpop.eup %18231  ;;  %12983 = vst [vmem:[%s22603_s10 + $0x108] sm:$0xff] %v12855_v45  ;;  %v12854_v2 = vmul.f32 %v18230_v5, %v22744_v25  ;;  %18253 = vpow2.f32 %v12404_v15  ;;  %v12402_v61 = vmul.f32 1.442695, %v12228_v4  ;;  %v12408_v60 = vmul.f32 1.442695, %v12231_v17  ;;  %v22931_v59 = vpop.f32.mrf.mxu0  ;;  %v24559_v15 = vld [vmem:[#allocation61_spill] sm:$0xff] }
 0x4cf   : > { %v18234_v7 = vpop.eup %18233  ;;  %18255 = vrcp.f32 %v12604_v63  ;;  %v12607_v19 = vadd.f32 1.0, %v18232_v49  ;;  %v12230_v47 = vsub.f32 0.0, %v22916_v43  ;;  %v22927_v55 = vadd.f32 %v22757_v34, %v11970_v24  ;;  %v22929_v44 = vpop.f32.mrf.mxu1  ;;  %v24560_v63 = vld [vmem:[#allocation63_spill] sm:$0xff] }
 0x4d0   : > { %v18236_v16 = vpop.eup %18235  ;;  %12982 = vst [vmem:[%s22603_s10 + $0x100] sm:$0xff] %v12854_v2  ;;  %v12606_v35 = vadd.f32 1.0, %v18234_v7  ;;  %18257 = vpow2.f32 %v12402_v61  ;;  %v11969_v25 = vadd.f32 %v22862_v20, %v10621_v21  ;;  %v10624_v30 = vadd.f32 %v22871_v37, %v24558_v62  ;;  %v22941_v41 = vpop.f32.mrf.mxu0 }
 0x4d1   : > { %v18238_v13 = vpop.eup %18237  ;;  %v12857_v56 = vmul.f32 %v18236_v16, %v22760_v57  ;;  %18259 = vrcp.f32 %v12607_v19  ;;  %v12406_v10 = vmul.f32 1.442695, %v12230_v47  ;;  %v12233_v1 = vsub.f32 0.0, %v22927_v55  ;;  %v22939_v26 = vpop.f32.mrf.mxu1 }
 0x4d2   : > { %v18240_v38 = vpop.eup %18239  ;;  %18261 = vrcp.f32 %v12606_v35  ;;  %v12609_v12 = vadd.f32 1.0, %v18238_v13  ;;  %v22944_v29 = vadd.f32 %v22757_v34, %v11969_v25  ;;  %v11972_v20 = vadd.f32 %v22873_v23, %v10624_v30  ;;  %v22953_v45 = vpop.f32.mrf.mxu0  ;;  %v24561_v25 = vld [vmem:[#allocation65_spill] sm:$0xff]  ;;  %v24562_v30 = vld [vmem:[#allocation67_spill] sm:$0xff] }
 0x4d3   : > { %v18242_v37 = vpop.eup %18241  ;;  %12985 = vst [vmem:[%s22603_s10 + $0x118] sm:$0xff] %v12857_v56  ;;  %v12856_v57 = vmul.f32 %v18240_v38, %v22764_v58  ;;  %18263 = vpow2.f32 %v12408_v60  ;;  %v12412_v33 = vmul.f32 1.442695, %v12233_v1  ;;  %v10623_v36 = vadd.f32 %v22883_v53, %v24559_v15  ;;  %v22951_v14 = vpop.f32.mrf.mxu1 }
 0x4d4   : > { %v18244_v4 = vpop.eup %18243  ;;  %v12859_v17 = vmul.f32 %v18242_v37, %v22773_v8  ;;  %18265 = vrcp.f32 %v12609_v12  ;;  %v12232_v23 = vsub.f32 0.0, %v22944_v29  ;;  %v22958_v24 = vadd.f32 %v22757_v34, %v11972_v20  ;;  %v22966_v49 = vpop.f32.mrf.mxu0 }
 0x4d5   : > { %v18246_v58 = vpop.eup %18245  ;;  %12984 = vst [vmem:[%s22603_s10 + $0x110] sm:$0xff] %v12856_v57  ;;  %v12608_v5 = vadd.f32 1.0, %v18244_v4  ;;  %18267 = vpow2.f32 %v12406_v10  ;;  %v11971_v53 = vadd.f32 %v22885_v46, %v10623_v36  ;;  %v10626_v3 = vadd.f32 %v22892_v0, %v24560_v63  ;;  %v22964_v21 = vpop.f32.mrf.mxu1 }
 0x4d6   : > { %v18248_v8 = vpop.eup %18247  ;;  %12987 = vst [vmem:[%s22603_s10 + $0x128] sm:$0xff] %v12859_v17  ;;  %v12611_v2 = vadd.f32 1.0, %v18246_v58  ;;  %18269 = vpow2.f32 %v12412_v33  ;;  %v12410_v61 = vmul.f32 1.442695, %v12232_v23  ;;  %v12235_v60 = vsub.f32 0.0, %v22958_v24  ;;  %v22977_v47 = vpop.f32.mrf.mxu0 }
 0x4d7   : > { %v12858_v7 = vmul.f32 %v18248_v8, %v22781_v42  ;;  %18271 = vrcp.f32 %v12608_v5  ;;  %v22972_v46 = vadd.f32 %v22757_v34, %v11971_v53  ;;  %v11974_v0 = vadd.f32 %v22894_v31, %v10626_v3  ;;  %v22975_v19 = vpop.f32.mrf.mxu1  ;;  %v24564_v53 = vld [vmem:[#allocation71_spill] sm:$0xff] }
 0x4d8   : > { %v18250_v16 = vpop.eup %18249  ;;  %18273 = vrcp.f32 %v12611_v2  ;;  %v12416_v35 = vmul.f32 1.442695, %v12235_v60  ;;  %v10625_v62 = vadd.f32 %v22906_v39, %v24561_v25  ;;  %v10628_v13 = vadd.f32 %v22919_v6, %v24562_v30  ;;  %v22990_v1 = vpop.f32.mrf.mxu0  ;;  %v24563_v6 = vld [vmem:[#allocation69_spill] sm:$0xff] }
 0x4d9   : > { %12986 = vst [vmem:[%s22603_s10 + $0x120] sm:$0xff] %v12858_v7  ;;  %v12610_v42 = vadd.f32 1.0, %v18250_v16  ;;  %18275 = vpow2.f32 %v12410_v61  ;;  %v12234_v56 = vsub.f32 0.0, %v22972_v46  ;;  %v22986_v31 = vadd.f32 %v22757_v34, %v11974_v0  ;;  %v22988_v10 = vpop.f32.mrf.mxu1 }
 0x4da   : > { %v18252_v38 = vpop.eup %18251  ;;  %18277 = vpow2.f32 %v12416_v35  ;;  %v11973_v12 = vadd.f32 %v22908_v27, %v10625_v62  ;;  %v11976_v39 = vadd.f32 %v22921_v9, %v10628_v13  ;;  %v10627_v20 = vadd.f32 %v22929_v44, %v24563_v6  ;;  %v23000_v4 = vpop.f32.mrf.mxu0 }
 0x4db   : > { %v18254_v37 = vpop.eup %18253  ;;  %v12861_v57 = vmul.f32 %v18252_v38, %v22794_v28  ;;  %18279 = vrcp.f32 %v12610_v42  ;;  %v12414_v33 = vmul.f32 1.442695, %v12234_v56  ;;  %v12237_v15 = vsub.f32 0.0, %v22986_v31  ;;  %v22998_v36 = vpop.f32.mrf.mxu1 }
 0x4dc   : > { %v18256_v17 = vpop.eup %18255  ;;  %v12613_v23 = vadd.f32 1.0, %v18254_v37  ;;  %v23003_v27 = vadd.f32 %v22757_v34, %v11973_v12  ;;  %v23006_v9 = vadd.f32 %v22757_v34, %v11976_v39  ;;  %v11975_v44 = vadd.f32 %v22931_v59, %v10627_v20  ;;  %v23015_v8 = vpop.f32.mrf.mxu0  ;;  %v24566_v37 = vld [vmem:[#allocation75_spill] sm:$0xff] }
 0x4dd   : > { %v18258_v28 = vpop.eup %18257  ;;  %12989 = vst [vmem:[%s22603_s10 + $0x138] sm:$0xff] %v12861_v57  ;;  %v12860_v58 = vmul.f32 %v18256_v17, %v22799_v22  ;;  %18281 = vpow2.f32 %v12414_v33  ;;  %v12420_v5 = vmul.f32 1.442695, %v12237_v15  ;;  %v10630_v63 = vadd.f32 %v22939_v26, %v24564_v53  ;;  %v23013_v3 = vpop.f32.mrf.mxu1  ;;  %v24567_v33 = vld [vmem:[#allocation77_spill] sm:$0xff] }
 0x4de   : > { %v18260_v2 = vpop.eup %18259  ;;  %18283 = vrcp.f32 %v12613_v23  ;;  %v12612_v61 = vadd.f32 1.0, %v18258_v28  ;;  %v12236_v60 = vsub.f32 0.0, %v23003_v27  ;;  %v12239_v59 = vsub.f32 0.0, %v23006_v9  ;;  %v23027_v35 = vpop.f32.mrf.mxu0 }
 0x4df   : > { %v18262_v7 = vpop.eup %18261  ;;  %12988 = vst [vmem:[%s22603_s10 + $0x130] sm:$0xff] %v12860_v58  ;;  %v12863_v22 = vmul.f32 %v18260_v2, %v22807_v40  ;;  %18285 = vpow2.f32 %v12420_v5  ;;  %v23022_v0 = vadd.f32 %v22757_v34, %v11975_v44  ;;  %v11978_v26 = vadd.f32 %v22941_v41, %v10630_v63  ;;  %v23025_v16 = vpop.f32.mrf.mxu1  ;;  %v24565_v41 = vld [vmem:[#allocation73_spill] sm:$0xff] }
 0x4e0   : > { %v18264_v25 = vpop.eup %18263  ;;  %v12862_v62 = vmul.f32 %v18262_v7, %v22821_v11  ;;  %18287 = vrcp.f32 %v12612_v61  ;;  %v12418_v30 = vmul.f32 1.442695, %v12236_v60  ;;  %v12424_v13 = vmul.f32 1.442695, %v12239_v59  ;;  %v23039_v6 = vpop.f32.mrf.mxu0 }
 0x4e1   : > { %v18266_v42 = vpop.eup %18265  ;;  %12991 = vst [vmem:[%s22603_s10 + $0x148] sm:$0xff] %v12863_v22  ;;  %v12615_v40 = vadd.f32 1.0, %v18264_v25  ;;  %v12238_v56 = vsub.f32 0.0, %v23022_v0  ;;  %v23033_v38 = vadd.f32 %v22757_v34, %v11978_v26  ;;  %v10629_v12 = vadd.f32 %v22951_v14, %v24565_v41  ;;  %v23037_v39 = vpop.f32.mrf.mxu1  ;;  %v24568_v25 = vld [vmem:[#allocation79_spill] sm:$0xff] }
 0x4e2   : > { %v18268_v11 = vpop.eup %18267  ;;  %12990 = vst [vmem:[%s22603_s10 + $0x140] sm:$0xff] %v12862_v62  ;;  %v12865_v20 = vmul.f32 %v18266_v42, %v22832_v18  ;;  %18289 = vpow2.f32 %v12418_v30  ;;  %v10632_v57 = vadd.f32 %v22964_v21, %v24566_v37  ;;  %v10631_v15 = vadd.f32 %v22975_v19, %v24567_v33  ;;  %v23050_v58 = vpop.f32.mrf.mxu0 }
 0x4e3   : > { %v18270_v17 = vpop.eup %18269  ;;  %18291 = vrcp.f32 %v12615_v40  ;;  %v12614_v23 = vadd.f32 1.0, %v18268_v11  ;;  %v12422_v14 = vmul.f32 1.442695, %v12238_v56  ;;  %v12241_v44 = vsub.f32 0.0, %v23033_v38  ;;  %v23048_v28 = vpop.f32.mrf.mxu1 }
 0x4e4   : > { %v18272_v5 = vpop.eup %18271  ;;  %12993 = vst [vmem:[%s22603_s10 + $0x158] sm:$0xff] %v12865_v20  ;;  %v12617_v18 = vadd.f32 1.0, %v18270_v17  ;;  %18293 = vpow2.f32 %v12424_v13  ;;  %v11977_v21 = vadd.f32 %v22953_v45, %v10629_v12  ;;  %v11980_v53 = vadd.f32 %v22966_v49, %v10632_v57  ;;  %v23059_v59 = vpop.f32.mrf.mxu0 }
 0x4e5   : > { %v18274_v19 = vpop.eup %18273  ;;  %v12864_v63 = vmul.f32 %v18272_v5, %v22845_v54  ;;  %18295 = vrcp.f32 %v12614_v23  ;;  %v12428_v2 = vmul.f32 1.442695, %v12241_v44  ;;  %v11979_v61 = vadd.f32 %v22977_v47, %v10631_v15  ;;  %v23057_v60 = vpop.f32.mrf.mxu1  ;;  %v24569_v15 = vld [vmem:[#allocation81_spill] sm:$0xff]  ;;  %v24570_v5 = vld [vmem:[#allocation83_spill] sm:$0xff] }
 0x4e6   : > { %v18276_v7 = vpop.eup %18275  ;;  %v12867_v22 = vmul.f32 %v18274_v19, %v22857_v50  ;;  %18297 = vrcp.f32 %v12617_v18  ;;  %v23063_v45 = vadd.f32 %v22757_v34, %v11977_v21  ;;  %v23066_v49 = vadd.f32 %v22757_v34, %v11980_v53  ;;  %v23076_v50 = vpop.f32.mrf.mxu0 }
 0x4e7   : > { %v18278_v54 = vpop.eup %18277  ;;  %12992 = vst [vmem:[%s22603_s10 + $0x150] sm:$0xff] %v12864_v63  ;;  %v12616_v26 = vadd.f32 1.0, %v18276_v7  ;;  %18299 = vpow2.f32 %v12422_v14  ;;  %v23070_v47 = vadd.f32 %v22757_v34, %v11979_v61  ;;  %v10634_v62 = vadd.f32 %v22988_v10, %v24568_v25  ;;  %v23074_v30 = vpop.f32.mrf.mxu1  ;;  %v24571_v63 = vld [vmem:[#allocation5_spill] sm:$0xff] }
 0x4e8   : > { %v18280_v13 = vpop.eup %18279  ;;  %12995 = vst [vmem:[%s22603_s10 + $0x168] sm:$0xff] %v12867_v22  ;;  %v12619_v42 = vadd.f32 1.0, %v18278_v54  ;;  %18301 = vpow2.f32 %v12428_v2  ;;  %v12240_v40 = vsub.f32 0.0, %v23063_v45  ;;  %v12243_v56 = vsub.f32 0.0, %v23066_v49  ;;  %v23086_v20 = vpop.f32.mrf.mxu0 }
 0x4e9   : > { %v12866_v41 = vmul.f32 %v18280_v13, %v22868_v52  ;;  %18303 = vrcp.f32 %v12616_v26  ;;  %v12242_v12 = vsub.f32 0.0, %v23070_v47  ;;  %v11982_v10 = vadd.f32 %v22990_v1, %v10634_v62  ;;  %v23084_v11 = vpop.f32.mrf.mxu1 }
 0x4ea   : > { %v18282_v37 = vpop.eup %18281  ;;  %18305 = vrcp.f32 %v12619_v42  ;;  %v12426_v57 = vmul.f32 1.442695, %v12240_v40  ;;  %v12432_v33 = vmul.f32 1.442695, %v12243_v56  ;;  %v10633_v17 = vadd.f32 %v22998_v36, %v24569_v15  ;;  %v23098_v21 = vpop.f32.mrf.mxu0 }
 0x4eb   : > { %v18284_v23 = vpop.eup %18283  ;;  %12994 = vst [vmem:[%s22603_s10 + $0x160] sm:$0xff] %v12866_v41  ;;  %v12618_v14 = vadd.f32 1.0, %v18282_v37  ;;  %v12430_v52 = vmul.f32 1.442695, %v12242_v12  ;;  %v23092_v44 = vadd.f32 %v22757_v34, %v11982_v10  ;;  %v10636_v1 = vadd.f32 %v23013_v3, %v24570_v5  ;;  %v23096_v18 = vpop.f32.mrf.mxu1 }
 0x4ec   : > { %v18286_v53 = vpop.eup %18285  ;;  %v12869_v19 = vmul.f32 %v18284_v23, %v22881_v51  ;;  %18307 = vpow2.f32 %v12426_v57  ;;  %v11981_v36 = vadd.f32 %v23000_v4, %v10633_v17  ;;  %v10635_v2 = vadd.f32 %v23025_v16, %v24571_v63  ;;  %v23108_v26 = vpop.f32.mrf.mxu0 }
 0x4ed   : > { %v18288_v61 = vpop.eup %18287  ;;  %18309 = vrcp.f32 %v12618_v14  ;;  %v12621_v7 = vadd.f32 1.0, %v18286_v53  ;;  %v12245_v22 = vsub.f32 0.0, %v23092_v44  ;;  %v11984_v3 = vadd.f32 %v23015_v8, %v10636_v1  ;;  %v23106_v54 = vpop.f32.mrf.mxu1  ;;  %v24572_v8 = vld [vmem:[#allocation6_spill] sm:$0xff] }
 0x4ee   : > { %12997 = vst [vmem:[%s22603_s10 + $0x178] sm:$0xff] %v12869_v19  ;;  %v12868_v51 = vmul.f32 %v18288_v61, %v22899_v48  ;;  %18311 = vpow2.f32 %v12432_v33  ;;  %v23113_v4 = vadd.f32 %v22757_v34, %v11981_v36  ;;  %v11983_v16 = vadd.f32 %v23027_v35, %v10635_v2  ;;  %v23123_v56 = vpop.f32.mrf.mxu0 }
 0x4ef   : > { %v18290_v25 = vpop.eup %18289  ;;  %18313 = vrcp.f32 %v12621_v7  ;;  %v12436_v62 = vmul.f32 1.442695, %v12245_v22  ;;  %v23117_v13 = vadd.f32 %v22757_v34, %v11984_v3  ;;  %v10638_v42 = vadd.f32 %v23037_v39, %v24572_v8  ;;  %v23121_v40 = vpop.f32.mrf.mxu1  ;;  %v24574_v22 = vld [vmem:[#allocation8_spill] sm:$0xff] }
 0x4f0   : > { %v18292_v48 = vpop.eup %18291  ;;  %12996 = vst [vmem:[%s22603_s10 + $0x170] sm:$0xff] %v12868_v51  ;;  %v12620_v41 = vadd.f32 1.0, %v18290_v25  ;;  %18315 = vpow2.f32 %v12430_v52  ;;  %v12244_v35 = vsub.f32 0.0, %v23113_v4  ;;  %v23128_v12 = vadd.f32 %v22757_v34, %v11983_v16  ;;  %v23135_v15 = vpop.f32.mrf.mxu0 }
 0x4f1   : > { %v18294_v10 = vpop.eup %18293  ;;  %v12871_v37 = vmul.f32 %v18292_v48, %v22902_v32  ;;  %18317 = vpow2.f32 %v12436_v62  ;;  %v12247_v39 = vsub.f32 0.0, %v23117_v13  ;;  %v11986_v57 = vadd.f32 %v23039_v6, %v10638_v42  ;;  %v23133_v33 = vpop.f32.mrf.mxu1  ;;  %v24573_v6 = vld [vmem:[#allocation7_spill] sm:$0xff] }
 0x4f2   : > { %v18296_v17 = vpop.eup %18295  ;;  %18319 = vrcp.f32 %v12620_v41  ;;  %v12623_v23 = vadd.f32 1.0, %v18294_v10  ;;  %v12434_v14 = vmul.f32 1.442695, %v12244_v35  ;;  %v12246_v52 = vsub.f32 0.0, %v23128_v12  ;;  %v23147_v63 = vpop.f32.mrf.mxu0 }
 0x4f3   : > { %v18298_v5 = vpop.eup %18297  ;;  %12999 = vst [vmem:[%s22603_s10 + $0x188] sm:$0xff] %v12871_v37  ;;  %v12870_v32 = vmul.f32 %v18296_v17, %v22916_v43  ;;  %v12440_v1 = vmul.f32 1.442695, %v12247_v39  ;;  %v23141_v53 = vadd.f32 %v22757_v34, %v11986_v57  ;;  %v10637_v19 = vadd.f32 %v23048_v28, %v24573_v6  ;;  %v23145_v36 = vpop.f32.mrf.mxu1 }
 0x4f4   : > { %v18300_v2 = vpop.eup %18299  ;;  %v12873_v61 = vmul.f32 %v18298_v5, %v22927_v55  ;;  %18321 = vrcp.f32 %v12623_v23  ;;  %v12438_v7 = vmul.f32 1.442695, %v12246_v52  ;;  %v10640_v43 = vadd.f32 %v23057_v60, %v24574_v22  ;;  %v23157_v62 = vpop.f32.mrf.mxu0  ;;  %v24575_v60 = vld [vmem:[#allocation9_spill] sm:$0xff]  ;;  %v24576_v23 = vld [vmem:[#allocation10_spill] sm:$0xff]  ;;  %v24577_v52 = vld [vmem:[#allocation11_spill] sm:$0xff] }
 0x4f5   : > { %v18302_v3 = vpop.eup %18301  ;;  %12998 = vst [vmem:[%s22603_s10 + $0x180] sm:$0xff] %v12870_v32  ;;  %v12622_v51 = vadd.f32 1.0, %v18300_v2  ;;  %18323 = vpow2.f32 %v12434_v14  ;;  %v12249_v16 = vsub.f32 0.0, %v23141_v53  ;;  %v11985_v28 = vadd.f32 %v23050_v58, %v10637_v19  ;;  %v23155_v25 = vpop.f32.mrf.mxu1 }
 0x4f6   : > { %v18304_v8 = vpop.eup %18303  ;;  %13001 = vst [vmem:[%s22603_s10 + $0x198] sm:$0xff] %v12873_v61  ;;  %v12625_v55 = vadd.f32 1.0, %v18302_v3  ;;  %18325 = vpow2.f32 %v12440_v1  ;;  %v11988_v42 = vadd.f32 %v23059_v59, %v10640_v43  ;;  %v10639_v48 = vadd.f32 %v23074_v30, %v24575_v60  ;;  %v23169_v39 = vpop.f32.mrf.mxu0 }
 0x4f7   : > { %v18306_v41 = vpop.eup %18305  ;;  %v12872_v35 = vmul.f32 %v18304_v8, %v22944_v29  ;;  %18327 = vrcp.f32 %v12622_v51  ;;  %v12444_v10 = vmul.f32 1.442695, %v12249_v16  ;;  %v23165_v58 = vadd.f32 %v22757_v34, %v11985_v28  ;;  %v23167_v37 = vpop.f32.mrf.mxu1 }
 0x4f8   : > { %v12875_v57 = vmul.f32 %v18306_v41, %v22958_v24  ;;  %18329 = vrcp.f32 %v12625_v55  ;;  %v23173_v59 = vadd.f32 %v22757_v34, %v11988_v42  ;;  %v11987_v30 = vadd.f32 %v23076_v50, %v10639_v48  ;;  %v23184_v24 = vpop.f32.mrf.mxu0  ;;  %v24578_v41 = vld [vmem:[#allocation12_spill] sm:$0xff] }
 0x4f9   : > { %v18308_v17 = vpop.eup %18307  ;;  %13000 = vst [vmem:[%s22603_s10 + $0x190] sm:$0xff] %v12872_v35  ;;  %18331 = vpow2.f32 %v12438_v7  ;;  %v12248_v29 = vsub.f32 0.0, %v23165_v58  ;;  %v10642_v14 = vadd.f32 %v23084_v11, %v24576_v23  ;;  %v10641_v5 = vadd.f32 %v23096_v18, %v24577_v52  ;;  %v23182_v32 = vpop.f32.mrf.mxu1 }
 0x4fa   : > { %v18310_v1 = vpop.eup %18309  ;;  %13003 = vst [vmem:[%s22603_s10 + $0x1a8] sm:$0xff] %v12875_v57  ;;  %v12624_v6 = vadd.f32 1.0, %v18308_v17  ;;  %18333 = vpow2.f32 %v12444_v10  ;;  %v12251_v50 = vsub.f32 0.0, %v23173_v59  ;;  %v23189_v19 = vadd.f32 %v22757_v34, %v11987_v30  ;;  %v23196_v43 = vpop.f32.mrf.mxu0 }
 0x4fb   : > { %v18312_v2 = vpop.eup %18311  ;;  %v12874_v11 = vmul.f32 %v18310_v1, %v22972_v46  ;;  %v12442_v61 = vmul.f32 1.442695, %v12248_v29  ;;  %v11990_v18 = vadd.f32 %v23086_v20, %v10642_v14  ;;  %v11989_v7 = vadd.f32 %v23098_v21, %v10641_v5  ;;  %v23194_v22 = vpop.f32.mrf.mxu1  ;;  %v23204_v20 = vld [vmem:[%s23976_s2] ss:$0 sm:$0xff] }
 0x4fc   : > { %v18314_v3 = vpop.eup %18313  ;;  %18335 = vrcp.f32 %v12624_v6  ;;  %v12627_v51 = vadd.f32 1.0, %v18312_v2  ;;  %v12448_v16 = vmul.f32 1.442695, %v12251_v50  ;;  %v12250_v28 = vsub.f32 0.0, %v23189_v19  ;;  %v23214_v42 = vpop.f32.mrf.mxu0  ;;  %v24579_v5 = vld [vmem:[#allocation13_spill] sm:$0xff]  ;;  %v24580_v2 = vld [vmem:[#allocation14_spill] sm:$0xff] }
 0x4fd   : > { %v18316_v34 = vpop.eup %18315  ;;  %13002 = vst [vmem:[%s22603_s10 + $0x1a0] sm:$0xff] %v12874_v11  ;;  %v12877_v46 = vmul.f32 %v18314_v3, %v22986_v31  ;;  %18337 = vpow2.f32 %v12442_v61  ;;  %v23207_v21 = vadd.f32 %v23204_v20, %v11990_v18  ;;  %v23210_v8 = vadd.f32 %v23204_v20, %v11989_v7  ;;  %v23212_v55 = vpop.f32.mrf.mxu1 }
 0x4fe   : > { %v18318_v60 = vpop.eup %18317  ;;  %18339 = vrcp.f32 %v12627_v51  ;;  %v12626_v48 = vadd.f32 1.0, %v18316_v34  ;;  %v12446_v31 = vmul.f32 1.442695, %v12250_v28  ;;  %v10644_v35 = vadd.f32 %v23106_v54, %v24578_v41  ;;  %v23223_v23 = vpop.f32.mrf.mxu0 }
 0x4ff   : > { %v18320_v10 = vpop.eup %18319  ;;  %13005 = vst [vmem:[%s22603_s10 + $0x1b8] sm:$0xff] %v12877_v46  ;;  %v12629_v57 = vadd.f32 1.0, %v18318_v60  ;;  %18341 = vpow2.f32 %v12448_v16  ;;  %v12253_v30 = vsub.f32 0.0, %v23207_v21  ;;  %v12252_v17 = vsub.f32 0.0, %v23210_v8  ;;  %v23221_v29 = vpop.f32.mrf.mxu1  ;;  %v24581_v16 = vld [vmem:[#allocation15_spill] sm:$0xff] }
 0x500   : > { %v12876_v14 = vmul.f32 %v18320_v10, %v23003_v27  ;;  %18343 = vrcp.f32 %v12626_v48  ;;  %v11992_v52 = vadd.f32 %v23108_v26, %v10644_v35  ;;  %v10643_v54 = vadd.f32 %v23121_v40, %v24579_v5  ;;  %v23233_v18 = vpop.f32.mrf.mxu0 }
 0x501   : > { %v18322_v1 = vpop.eup %18321  ;;  %18345 = vrcp.f32 %v12629_v57  ;;  %v12452_v6 = vmul.f32 1.442695, %v12253_v30  ;;  %v12450_v50 = vmul.f32 1.442695, %v12252_v17  ;;  %v10646_v11 = vadd.f32 %v23133_v33, %v24580_v2  ;;  %v23231_v61 = vpop.f32.mrf.mxu1 }
 0x502   : > { %v18324_v7 = vpop.eup %18323  ;;  %13004 = vst [vmem:[%s22603_s10 + $0x1b0] sm:$0xff] %v12876_v14  ;;  %v12879_v27 = vmul.f32 %v18322_v1, %v23006_v9  ;;  %18347 = vpow2.f32 %v12446_v31  ;;  %v23238_v26 = vadd.f32 %v23204_v20, %v11992_v52  ;;  %v11991_v40 = vadd.f32 %v23123_v56, %v10643_v54  ;;  %v23246_v46 = vpop.f32.mrf.mxu0 }
 0x503   : > { %v18326_v3 = vpop.eup %18325  ;;  %v12628_v51 = vadd.f32 1.0, %v18324_v7  ;;  %18349 = vpow2.f32 %v12452_v6  ;;  %v11994_v33 = vadd.f32 %v23135_v15, %v10646_v11  ;;  %v10645_v28 = vadd.f32 %v23145_v36, %v24581_v16  ;;  %v23244_v34 = vpop.f32.mrf.mxu1  ;;  %v24583_v11 = vld [vmem:[#allocation17_spill] sm:$0xff] }
 0x504   : > { %v18328_v60 = vpop.eup %18327  ;;  %13007 = vst [vmem:[%s22603_s10 + $0x1c8] sm:$0xff] %v12879_v27  ;;  %v12631_v9 = vadd.f32 1.0, %v18326_v3  ;;  %18351 = vpow2.f32 %v12450_v50  ;;  %v12255_v48 = vsub.f32 0.0, %v23238_v26  ;;  %v23251_v56 = vadd.f32 %v23204_v20, %v11991_v40  ;;  %v23260_v10 = vpop.f32.mrf.mxu0 }
 0x505   : > { %v18330_v31 = vpop.eup %18329  ;;  %v12878_v15 = vmul.f32 %v18328_v60, %v23022_v0  ;;  %18353 = vrcp.f32 %v12628_v51  ;;  %v23255_v36 = vadd.f32 %v23204_v20, %v11994_v33  ;;  %v11993_v41 = vadd.f32 %v23147_v63, %v10645_v28  ;;  %v23258_v35 = vpop.f32.mrf.mxu1  ;;  %v24582_v63 = vld [vmem:[#allocation16_spill] sm:$0xff] }
 0x506   : > { %v18332_v57 = vpop.eup %18331  ;;  %v12881_v30 = vmul.f32 %v18330_v31, %v23033_v38  ;;  %18355 = vrcp.f32 %v12631_v9  ;;  %v12456_v17 = vmul.f32 1.442695, %v12255_v48  ;;  %v12254_v14 = vsub.f32 0.0, %v23251_v56  ;;  %v23273_v50 = vpop.f32.mrf.mxu0  ;;  %v24584_v9 = vld [vmem:[#allocation18_spill] sm:$0xff] }
 0x507   : > { %v18334_v52 = vpop.eup %18333  ;;  %13006 = vst [vmem:[%s22603_s10 + $0x1c0] sm:$0xff] %v12878_v15  ;;  %v12630_v0 = vadd.f32 1.0, %v18332_v57  ;;  %v12257_v5 = vsub.f32 0.0, %v23255_v36  ;;  %v23267_v54 = vadd.f32 %v23204_v20, %v11993_v41  ;;  %v10648_v1 = vadd.f32 %v23155_v25, %v24582_v63  ;;  %v23271_v6 = vpop.f32.mrf.mxu1 }
 0x508   : > { %13009 = vst [vmem:[%s22603_s10 + $0x1d8] sm:$0xff] %v12881_v30  ;;  %v12633_v38 = vadd.f32 1.0, %v18334_v52  ;;  %18357 = vpow2.f32 %v12456_v17  ;;  %v12454_v2 = vmul.f32 1.442695, %v12254_v14  ;;  %v10647_v7 = vadd.f32 %v23167_v37, %v24583_v11  ;;  %v23282_v33 = vpop.f32.mrf.mxu0 }
 0x509   : > { %v18336_v27 = vpop.eup %18335  ;;  %18359 = vrcp.f32 %v12630_v0  ;;  %v12460_v40 = vmul.f32 1.442695, %v12257_v5  ;;  %v12256_v3 = vsub.f32 0.0, %v23267_v54  ;;  %v11996_v51 = vadd.f32 %v23157_v62, %v10648_v1  ;;  %v23280_v25 = vpop.f32.mrf.mxu1  ;;  %v24585_v0 = vld [vmem:[#allocation19_spill] sm:$0xff] }
 0x50a   : > { %v18338_v16 = vpop.eup %18337  ;;  %v12880_v28 = vmul.f32 %v18336_v27, %v23063_v45  ;;  %18361 = vrcp.f32 %v12633_v38  ;;  %v11995_v60 = vadd.f32 %v23169_v39, %v10647_v7  ;;  %v10650_v37 = vadd.f32 %v23182_v32, %v24584_v9  ;;  %v23293_v57 = vpop.f32.mrf.mxu0 }
 0x50b   : > { %v18340_v48 = vpop.eup %18339  ;;  %v12632_v31 = vadd.f32 1.0, %v18338_v16  ;;  %18363 = vpow2.f32 %v12454_v2  ;;  %v12458_v15 = vmul.f32 1.442695, %v12256_v3  ;;  %v23289_v62 = vadd.f32 %v23204_v20, %v11996_v51  ;;  %v23291_v41 = vpop.f32.mrf.mxu1 }
 0x50c   : > { %v18342_v30 = vpop.eup %18341  ;;  %13008 = vst [vmem:[%s22603_s10 + $0x1d0] sm:$0xff] %v12880_v28  ;;  %v12883_v45 = vmul.f32 %v18340_v48, %v23066_v49  ;;  %18365 = vpow2.f32 %v12460_v40  ;;  %v23298_v39 = vadd.f32 %v23204_v20, %v11995_v60  ;;  %v11998_v32 = vadd.f32 %v23184_v24, %v10650_v37  ;;  %v23306_v1 = vpop.f32.mrf.mxu0  ;;  %v24586_v60 = vld [vmem:[#allocation20_spill] sm:$0xff] }
 0x50d   : > { %v18344_v17 = vpop.eup %18343  ;;  %18367 = vrcp.f32 %v12632_v31  ;;  %v12635_v14 = vadd.f32 1.0, %v18342_v30  ;;  %v12259_v52 = vsub.f32 0.0, %v23289_v62  ;;  %v10649_v5 = vadd.f32 %v23194_v22, %v24585_v0  ;;  %v23304_v63 = vpop.f32.mrf.mxu1 }
 0x50e   : > { %v18346_v49 = vpop.eup %18345  ;;  %13011 = vst [vmem:[%s22603_s10 + $0x1e8] sm:$0xff] %v12883_v45  ;;  %v12882_v38 = vmul.f32 %v18344_v17, %v23070_v47  ;;  %18369 = vpow2.f32 %v12458_v15  ;;  %v12258_v24 = vsub.f32 0.0, %v23298_v39  ;;  %v23312_v2 = vadd.f32 %v23204_v20, %v11998_v32  ;;  %v23318_v3 = vpop.f32.mrf.mxu0 }
 0x50f   : > { %v18348_v11 = vpop.eup %18347  ;;  %v12885_v7 = vmul.f32 %v18346_v49, %v23092_v44  ;;  %18371 = vrcp.f32 %v12635_v14  ;;  %v12464_v22 = vmul.f32 1.442695, %v12259_v52  ;;  %v11997_v27 = vadd.f32 %v23196_v43, %v10649_v5  ;;  %v23316_v40 = vpop.f32.mrf.mxu1  ;;  %v24587_v43 = vld [vmem:[#allocation21_spill] sm:$0xff] }
 0x510   : > { %v18350_v51 = vpop.eup %18349  ;;  %13010 = vst [vmem:[%s22603_s10 + $0x1e0] sm:$0xff] %v12882_v38  ;;  %v12634_v47 = vadd.f32 1.0, %v18348_v11  ;;  %v12462_v16 = vmul.f32 1.442695, %v12258_v24  ;;  %v12261_v28 = vsub.f32 0.0, %v23312_v2  ;;  %v10652_v9 = vadd.f32 %v23212_v55, %v24586_v60  ;;  %v23332_v30 = vpop.f32.mrf.mxu0 }
 0x511   : > { %v18352_v37 = vpop.eup %18351  ;;  %13013 = vst [vmem:[%s22603_s10 + $0x1f8] sm:$0xff] %v12885_v7  ;;  %v12637_v44 = vadd.f32 1.0, %v18350_v51  ;;  %18373 = vpow2.f32 %v12464_v22  ;;  %v23326_v48 = vadd.f32 %v23204_v20, %v11997_v27  ;;  %v10651_v31 = vadd.f32 %v23221_v29, %v24587_v43  ;;  %v23330_v15 = vpop.f32.mrf.mxu1  ;;  %v24589_v22 = vld [vmem:[#allocation23_spill] sm:$0xff] }
 0x512   : > { %v18354_v45 = vpop.eup %18353  ;;  %18375 = vrcp.f32 %v12634_v47  ;;  %v12636_v32 = vadd.f32 1.0, %v18352_v37  ;;  %v12468_v17 = vmul.f32 1.442695, %v12261_v28  ;;  %v12000_v55 = vadd.f32 %v23214_v42, %v10652_v9  ;;  %v23340_v49 = vpop.f32.mrf.mxu0  ;;  %v24588_v42 = vld [vmem:[#allocation22_spill] sm:$0xff] }
 0x513   : > { %v18356_v14 = vpop.eup %18355  ;;  %v12884_v52 = vmul.f32 %v18354_v45, %v23113_v4  ;;  %18377 = vrcp.f32 %v12637_v44  ;;  %v12260_v0 = vsub.f32 0.0, %v23326_v48  ;;  %v11999_v5 = vadd.f32 %v23223_v23, %v10651_v31  ;;  %v23338_v29 = vpop.f32.mrf.mxu1 }
 0x514   : > { %v12887_v38 = vmul.f32 %v18356_v14, %v23117_v13  ;;  %18379 = vrcp.f32 %v12636_v32  ;;  %v23344_v24 = vadd.f32 %v23204_v20, %v12000_v55  ;;  %v10654_v11 = vadd.f32 %v23231_v61, %v24588_v42  ;;  %v23356_v13 = vpop.f32.mrf.mxu0 }
 0x515   : > { %v18358_v4 = vpop.eup %18357  ;;  %13012 = vst [vmem:[%s22603_s10 + $0x1f0] sm:$0xff] %v12884_v52  ;;  %18381 = vpow2.f32 %v12462_v16  ;;  %v12466_v7 = vmul.f32 1.442695, %v12260_v0  ;;  %v23350_v23 = vadd.f32 %v23204_v20, %v11999_v5  ;;  %v10653_v27 = vadd.f32 %v23244_v34, %v24589_v22  ;;  %v23354_v51 = vpop.f32.mrf.mxu1 }
 0x516   : > { %v18360_v47 = vpop.eup %18359  ;;  %13015 = vst [vmem:[%s22603_s10 + $0x208] sm:$0xff] %v12887_v38  ;;  %v12639_v28 = vadd.f32 1.0, %v18358_v4  ;;  %18383 = vpow2.f32 %v12468_v17  ;;  %v12263_v61 = vsub.f32 0.0, %v23344_v24  ;;  %v12002_v16 = vadd.f32 %v23233_v18, %v10654_v11  ;;  %v23366_v43 = vpop.f32.mrf.mxu0  ;;  %v24591_v11 = vld [vmem:[#allocation25_spill] sm:$0xff] }
 0x517   : > { %v18362_v60 = vpop.eup %18361  ;;  %v12886_v9 = vmul.f32 %v18360_v47, %v23128_v12  ;;  %18385 = vpow2.f32 %v12466_v7  ;;  %v12262_v37 = vsub.f32 0.0, %v23350_v23  ;;  %v12001_v34 = vadd.f32 %v23246_v46, %v10653_v27  ;;  %v23364_v44 = vpop.f32.mrf.mxu1  ;;  %v24590_v46 = vld [vmem:[#allocation24_spill] sm:$0xff] }
 0x518   : > { %v18364_v31 = vpop.eup %18363  ;;  %v12889_v45 = vmul.f32 %v18362_v60, %v23141_v53  ;;  %18387 = vrcp.f32 %v12639_v28  ;;  %v12472_v32 = vmul.f32 1.442695, %v12263_v61  ;;  %v23370_v18 = vadd.f32 %v23204_v20, %v12002_v16  ;;  %v23380_v5 = vpop.f32.mrf.mxu0 }
 0x519   : > { %v18366_v17 = vpop.eup %18365  ;;  %13014 = vst [vmem:[%s22603_s10 + $0x200] sm:$0xff] %v12886_v9  ;;  %v12638_v12 = vadd.f32 1.0, %v18364_v31  ;;  %v12470_v55 = vmul.f32 1.442695, %v12262_v37  ;;  %v23374_v14 = vadd.f32 %v23204_v20, %v12001_v34  ;;  %v10656_v52 = vadd.f32 %v23258_v35, %v24590_v46  ;;  %v23378_v0 = vpop.f32.mrf.mxu1 }
 0x51a   : > { %v18368_v53 = vpop.eup %18367  ;;  %13017 = vst [vmem:[%s22603_s10 + $0x218] sm:$0xff] %v12889_v45  ;;  %v12641_v38 = vadd.f32 1.0, %v18366_v17  ;;  %18389 = vpow2.f32 %v12472_v32  ;;  %v12265_v42 = vsub.f32 0.0, %v23370_v18  ;;  %v10655_v4 = vadd.f32 %v23271_v6, %v24591_v11  ;;  %v23391_v28 = vpop.f32.mrf.mxu0  ;;  %v24592_v32 = vld [vmem:[#allocation26_spill] sm:$0xff]  ;;  %v24593_v17 = vld [vmem:[#allocation27_spill] sm:$0xff] }
 0x51b   : > { %v18370_v7 = vpop.eup %18369  ;;  %v12888_v22 = vmul.f32 %v18368_v53, %v23165_v58  ;;  %18391 = vrcp.f32 %v12638_v12  ;;  %v12264_v35 = vsub.f32 0.0, %v23374_v14  ;;  %v12004_v27 = vadd.f32 %v23260_v10, %v10656_v52  ;;  %v23389_v47 = vpop.f32.mrf.mxu1  ;;  %v24594_v52 = vld [vmem:[#allocation28_spill] sm:$0xff] }
 0x51c   : > { %v18372_v61 = vpop.eup %18371  ;;  %18393 = vrcp.f32 %v12641_v38  ;;  %v12640_v16 = vadd.f32 1.0, %v18370_v7  ;;  %v12476_v60 = vmul.f32 1.442695, %v12265_v42  ;;  %v12003_v9 = vadd.f32 %v23273_v50, %v10655_v4  ;;  %v23401_v34 = vpop.f32.mrf.mxu0 }
 0x51d   : > { %13016 = vst [vmem:[%s22603_s10 + $0x210] sm:$0xff] %v12888_v22  ;;  %v12891_v6 = vmul.f32 %v18372_v61, %v23173_v59  ;;  %18395 = vpow2.f32 %v12470_v55  ;;  %v12474_v58 = vmul.f32 1.442695, %v12264_v35  ;;  %v23397_v37 = vadd.f32 %v23204_v20, %v12004_v27  ;;  %v23399_v10 = vpop.f32.mrf.mxu1 }
 0x51e   : > { %v18374_v31 = vpop.eup %18373  ;;  %18397 = vrcp.f32 %v12640_v16  ;;  %v23404_v45 = vadd.f32 %v23204_v20, %v12003_v9  ;;  %v10658_v50 = vadd.f32 %v23280_v25, %v24592_v32  ;;  %v10657_v59 = vadd.f32 %v23291_v41, %v24593_v17  ;;  %v23416_v42 = vpop.f32.mrf.mxu0 }
 0x51f   : > { %v18376_v12 = vpop.eup %18375  ;;  %13019 = vst [vmem:[%s22603_s10 + $0x228] sm:$0xff] %v12891_v6  ;;  %v12643_v55 = vadd.f32 1.0, %v18374_v31  ;;  %18399 = vpow2.f32 %v12476_v60  ;;  %v12267_v46 = vsub.f32 0.0, %v23397_v37  ;;  %v10660_v53 = vadd.f32 %v23304_v63, %v24594_v52  ;;  %v23414_v38 = vpop.f32.mrf.mxu1 }
 0x520   : > { %v18378_v11 = vpop.eup %18377  ;;  %v12890_v25 = vmul.f32 %v18376_v12, %v23189_v19  ;;  %18401 = vpow2.f32 %v12474_v58  ;;  %v12266_v41 = vsub.f32 0.0, %v23404_v45  ;;  %v12006_v4 = vadd.f32 %v23282_v33, %v10658_v50  ;;  %v23425_v61 = vpop.f32.mrf.mxu0  ;;  %v24595_v58 = vld [vmem:[#allocation29_spill] sm:$0xff] }
 0x521   : > { %v18380_v7 = vpop.eup %18379  ;;  %v12893_v22 = vmul.f32 %v18378_v11, %v23207_v21  ;;  %18403 = vrcp.f32 %v12643_v55  ;;  %v12480_v35 = vmul.f32 1.442695, %v12267_v46  ;;  %v12005_v63 = vadd.f32 %v23293_v57, %v10657_v59  ;;  %v23423_v27 = vpop.f32.mrf.mxu1 }
 0x522   : > { %v18382_v16 = vpop.eup %18381  ;;  %13018 = vst [vmem:[%s22603_s10 + $0x220] sm:$0xff] %v12890_v25  ;;  %v12892_v19 = vmul.f32 %v18380_v7, %v23210_v8  ;;  %v12478_v60 = vmul.f32 1.442695, %v12266_v41  ;;  %v23430_v9 = vadd.f32 %v23204_v20, %v12006_v4  ;;  %v12008_v33 = vadd.f32 %v23306_v1, %v10660_v53  ;;  %v23441_v50 = vpop.f32.mrf.mxu0 }
 0x523   : > { %v18384_v21 = vpop.eup %18383  ;;  %13021 = vst [vmem:[%s22603_s10 + $0x238] sm:$0xff] %v12893_v22  ;;  %v12642_v6 = vadd.f32 1.0, %v18382_v16  ;;  %18405 = vpow2.f32 %v12480_v35  ;;  %v23435_v57 = vadd.f32 %v23204_v20, %v12005_v63  ;;  %v10659_v31 = vadd.f32 %v23316_v40, %v24595_v58  ;;  %v23439_v32 = vpop.f32.mrf.mxu1  ;;  %v24596_v35 = vld [vmem:[#allocation30_spill] sm:$0xff] }
 0x524   : > { %v18386_v8 = vpop.eup %18385  ;;  %13020 = vst [vmem:[%s22603_s10 + $0x230] sm:$0xff] %v12892_v19  ;;  %v12645_v17 = vadd.f32 1.0, %v18384_v21  ;;  %18407 = vpow2.f32 %v12478_v60  ;;  %v12269_v1 = vsub.f32 0.0, %v23430_v9  ;;  %v23446_v59 = vadd.f32 %v23204_v20, %v12008_v33  ;;  %v23452_v53 = vpop.f32.mrf.mxu0  ;;  %v24597_v33 = vld [vmem:[#allocation31_spill] sm:$0xff] }
 0x525   : > { %v18388_v12 = vpop.eup %18387  ;;  %18409 = vrcp.f32 %v12642_v6  ;;  %v12644_v55 = vadd.f32 1.0, %v18386_v8  ;;  %v12268_v46 = vsub.f32 0.0, %v23435_v57  ;;  %v12007_v40 = vadd.f32 %v23318_v3, %v10659_v31  ;;  %v23450_v52 = vpop.f32.mrf.mxu1 }
 0x526   : > { %v12895_v11 = vmul.f32 %v18388_v12, %v23238_v26  ;;  %18411 = vrcp.f32 %v12645_v17  ;;  %v12484_v25 = vmul.f32 1.442695, %v12269_v1  ;;  %v12271_v41 = vsub.f32 0.0, %v23446_v59  ;;  %v23463_v16 = vpop.f32.mrf.mxu0 }
 0x527   : > { %v18390_v4 = vpop.eup %18389  ;;  %18413 = vrcp.f32 %v12644_v55  ;;  %v12482_v7 = vmul.f32 1.442695, %v12268_v46  ;;  %v23457_v22 = vadd.f32 %v23204_v20, %v12007_v40  ;;  %v10662_v63 = vadd.f32 %v23330_v15, %v24596_v35  ;;  %v23461_v3 = vpop.f32.mrf.mxu1 }
 0x528   : > { %v18392_v19 = vpop.eup %18391  ;;  %13023 = vst [vmem:[%s22603_s10 + $0x248] sm:$0xff] %v12895_v11  ;;  %v12647_v26 = vadd.f32 1.0, %v18390_v4  ;;  %18415 = vpow2.f32 %v12484_v25  ;;  %v12488_v60 = vmul.f32 1.442695, %v12271_v41  ;;  %v10661_v21 = vadd.f32 %v23338_v29, %v24597_v33  ;;  %v23473_v17 = vpop.f32.mrf.mxu0  ;;  %v24598_v29 = vld [vmem:[#allocation32_spill] sm:$0xff] }
 0x529   : > { %v18394_v6 = vpop.eup %18393  ;;  %v12894_v58 = vmul.f32 %v18392_v19, %v23251_v56  ;;  %18417 = vpow2.f32 %v12482_v7  ;;  %v12270_v31 = vsub.f32 0.0, %v23457_v22  ;;  %v12010_v15 = vadd.f32 %v23332_v30, %v10662_v63  ;;  %v23471_v8 = vpop.f32.mrf.mxu1  ;;  %v24599_v7 = vld [vmem:[#allocation33_spill] sm:$0xff] }
 0x52a   : > { %v18396_v1 = vpop.eup %18395  ;;  %v12897_v12 = vmul.f32 %v18394_v6, %v23255_v36  ;;  %18419 = vrcp.f32 %v12647_v26  ;;  %v12009_v55 = vadd.f32 %v23340_v49, %v10661_v21  ;;  %v10664_v46 = vadd.f32 %v23354_v51, %v24598_v29  ;;  %v23485_v41 = vpop.f32.mrf.mxu0 }
 0x52b   : > { %v18398_v56 = vpop.eup %18397  ;;  %13022 = vst [vmem:[%s22603_s10 + $0x240] sm:$0xff] %v12894_v58  ;;  %v12646_v40 = vadd.f32 1.0, %v18396_v1  ;;  %18421 = vpow2.f32 %v12488_v60  ;;  %v12486_v11 = vmul.f32 1.442695, %v12270_v31  ;;  %v23481_v30 = vadd.f32 %v23204_v20, %v12010_v15  ;;  %v23483_v25 = vpop.f32.mrf.mxu1  ;;  %v24600_v60 = vld [vmem:[#allocation34_spill] sm:$0xff] }
 0x52c   : > { %v18400_v36 = vpop.eup %18399  ;;  %13025 = vst [vmem:[%s22603_s10 + $0x258] sm:$0xff] %v12897_v12  ;;  %v12896_v49 = vmul.f32 %v18398_v56, %v23267_v54  ;;  %v23490_v4 = vadd.f32 %v23204_v20, %v12009_v55  ;;  %v12012_v51 = vadd.f32 %v23356_v13, %v10664_v46  ;;  %v10663_v35 = vadd.f32 %v23364_v44, %v24599_v7  ;;  %v23500_v6 = vpop.f32.mrf.mxu0 }
 0x52d   : > { %v18402_v63 = vpop.eup %18401  ;;  %18423 = vrcp.f32 %v12646_v40  ;;  %v12649_v19 = vadd.f32 1.0, %v18400_v36  ;;  %v12273_v26 = vsub.f32 0.0, %v23481_v30  ;;  %v10666_v33 = vadd.f32 %v23378_v0, %v24600_v60  ;;  %v23498_v21 = vpop.f32.mrf.mxu1  ;;  %v24601_v36 = vld [vmem:[#allocation35_spill] sm:$0xff] }
 0x52e   : > { %v18404_v54 = vpop.eup %18403  ;;  %13024 = vst [vmem:[%s22603_s10 + $0x250] sm:$0xff] %v12896_v49  ;;  %v12648_v58 = vadd.f32 1.0, %v18402_v63  ;;  %18425 = vpow2.f32 %v12486_v11  ;;  %v12272_v13 = vsub.f32 0.0, %v23490_v4  ;;  %v23505_v44 = vadd.f32 %v23204_v20, %v12012_v51  ;;  %v23511_v12 = vpop.f32.mrf.mxu0 }
 0x52f   : > { %v12899_v31 = vmul.f32 %v18404_v54, %v23289_v62  ;;  %18427 = vrcp.f32 %v12649_v19  ;;  %v12492_v15 = vmul.f32 1.442695, %v12273_v26  ;;  %v12011_v0 = vadd.f32 %v23366_v43, %v10663_v35  ;;  %v23509_v1 = vpop.f32.mrf.mxu1 }
 0x530   : > { %v18406_v55 = vpop.eup %18405  ;;  %18429 = vrcp.f32 %v12648_v58  ;;  %v12490_v29 = vmul.f32 1.442695, %v12272_v13  ;;  %v12275_v46 = vsub.f32 0.0, %v23505_v44  ;;  %v12014_v56 = vadd.f32 %v23380_v5, %v10666_v33  ;;  %v23523_v51 = vpop.f32.mrf.mxu0 }
 0x531   : > { %v18408_v40 = vpop.eup %18407  ;;  %13027 = vst [vmem:[%s22603_s10 + $0x268] sm:$0xff] %v12899_v31  ;;  %v12651_v11 = vadd.f32 1.0, %v18406_v55  ;;  %18431 = vpow2.f32 %v12492_v15  ;;  %v23517_v62 = vadd.f32 %v23204_v20, %v12011_v0  ;;  %v10665_v43 = vadd.f32 %v23389_v47, %v24601_v36  ;;  %v23521_v49 = vpop.f32.mrf.mxu1  ;;  %v24602_v15 = vld [vmem:[#allocation36_spill] sm:$0xff]  ;;  %v24603_v36 = vld [vmem:[#allocation37_spill] sm:$0xff] }
 0x532   : > { %v18410_v7 = vpop.eup %18409  ;;  %v12650_v35 = vadd.f32 1.0, %v18408_v40  ;;  %18433 = vpow2.f32 %v12490_v29  ;;  %v12496_v63 = vmul.f32 1.442695, %v12275_v46  ;;  %v23526_v5 = vadd.f32 %v23204_v20, %v12014_v56  ;;  %v23533_v54 = vpop.f32.mrf.mxu0 }
 0x533   : > { %v18412_v19 = vpop.eup %18411  ;;  %v12898_v26 = vmul.f32 %v18410_v7, %v23298_v39  ;;  %18435 = vrcp.f32 %v12651_v11  ;;  %v12274_v60 = vsub.f32 0.0, %v23517_v62  ;;  %v12013_v47 = vadd.f32 %v23391_v28, %v10665_v43  ;;  %v23531_v33 = vpop.f32.mrf.mxu1 }
 0x534   : > { %v18414_v58 = vpop.eup %18413  ;;  %v12901_v13 = vmul.f32 %v18412_v19, %v23312_v2  ;;  %18437 = vrcp.f32 %v12650_v35  ;;  %v12277_v31 = vsub.f32 0.0, %v23526_v5  ;;  %v10668_v0 = vadd.f32 %v23399_v10, %v24602_v15  ;;  %v23546_v56 = vpop.f32.mrf.mxu0 }
 0x535   : > { %v18416_v39 = vpop.eup %18415  ;;  %13026 = vst [vmem:[%s22603_s10 + $0x260] sm:$0xff] %v12898_v26  ;;  %v12900_v55 = vmul.f32 %v18414_v58, %v23326_v48  ;;  %18439 = vpow2.f32 %v12496_v63  ;;  %v12494_v28 = vmul.f32 1.442695, %v12274_v60  ;;  %v23542_v29 = vadd.f32 %v23204_v20, %v12013_v47  ;;  %v23544_v46 = vpop.f32.mrf.mxu1  ;;  %v24604_v63 = vld [vmem:[#allocation38_spill] sm:$0xff] }
 0x536   : > { %v18418_v2 = vpop.eup %18417  ;;  %13029 = vst [vmem:[%s22603_s10 + $0x278] sm:$0xff] %v12901_v13  ;;  %v12653_v40 = vadd.f32 1.0, %v18416_v39  ;;  %v12500_v11 = vmul.f32 1.442695, %v12277_v31  ;;  %v12016_v10 = vadd.f32 %v23401_v34, %v10668_v0  ;;  %v10667_v43 = vadd.f32 %v23414_v38, %v24603_v36  ;;  %v23558_v60 = vpop.f32.mrf.mxu0 }
 0x537   : > { %v18420_v7 = vpop.eup %18419  ;;  %13028 = vst [vmem:[%s22603_s10 + $0x270] sm:$0xff] %v12900_v55  ;;  %v12652_v48 = vadd.f32 1.0, %v18418_v2  ;;  %18441 = vpow2.f32 %v12494_v28  ;;  %v12276_v35 = vsub.f32 0.0, %v23542_v29  ;;  %v10670_v19 = vadd.f32 %v23423_v27, %v24604_v63  ;;  %v23556_v26 = vpop.f32.mrf.mxu1  ;;  %v24605_v28 = vld [vmem:[#allocation39_spill] sm:$0xff] }
 0x538   : > { %v18422_v47 = vpop.eup %18421  ;;  %v12903_v34 = vmul.f32 %v18420_v7, %v23344_v24  ;;  %18443 = vrcp.f32 %v12653_v40  ;;  %v23562_v38 = vadd.f32 %v23204_v20, %v12016_v10  ;;  %v12015_v58 = vadd.f32 %v23416_v42, %v10667_v43  ;;  %v23568_v27 = vpop.f32.mrf.mxu0  ;;  %v24606_v10 = vld [vmem:[#allocation40_spill] sm:$0xff] }
 0x539   : > { %18445 = vrcp.f32 %v12652_v48  ;;  %v12655_v13 = vadd.f32 1.0, %v18422_v47  ;;  %v12498_v31 = vmul.f32 1.442695, %v12276_v35  ;;  %v12018_v15 = vadd.f32 %v23425_v61, %v10670_v19  ;;  %v23566_v0 = vpop.f32.mrf.mxu1 }
 0x53a   : > { %v18424_v39 = vpop.eup %18423  ;;  %13031 = vst [vmem:[%s22603_s10 + $0x288] sm:$0xff] %v12903_v34  ;;  %18447 = vpow2.f32 %v12500_v11  ;;  %v12279_v24 = vsub.f32 0.0, %v23562_v38  ;;  %v23573_v55 = vadd.f32 %v23204_v20, %v12015_v58  ;;  %v10669_v42 = vadd.f32 %v23439_v32, %v24605_v28  ;;  %v23585_v43 = vpop.f32.mrf.mxu0 }
 0x53b   : > { %v18426_v2 = vpop.eup %18425  ;;  %v12902_v40 = vmul.f32 %v18424_v39, %v23350_v23  ;;  %18449 = vrcp.f32 %v12655_v13  ;;  %v23579_v61 = vadd.f32 %v23204_v20, %v12018_v15  ;;  %v10672_v36 = vadd.f32 %v23450_v52, %v24606_v10  ;;  %v23583_v11 = vpop.f32.mrf.mxu1  ;;  %v24607_v39 = vld [vmem:[#allocation41_spill] sm:$0xff] }
 0x53c   : > { %v18428_v7 = vpop.eup %18427  ;;  %v12654_v48 = vadd.f32 1.0, %v18426_v2  ;;  %18451 = vpow2.f32 %v12498_v31  ;;  %v12504_v35 = vmul.f32 1.442695, %v12279_v24  ;;  %v12278_v32 = vsub.f32 0.0, %v23573_v55  ;;  %v23595_v58 = vpop.f32.mrf.mxu0 }
 0x53d   : > { %v18430_v63 = vpop.eup %18429  ;;  %13030 = vst [vmem:[%s22603_s10 + $0x280] sm:$0xff] %v12902_v40  ;;  %v12905_v23 = vmul.f32 %v18428_v7, %v23370_v18  ;;  %v12281_v19 = vsub.f32 0.0, %v23579_v61  ;;  %v12017_v47 = vadd.f32 %v23441_v50, %v10669_v42  ;;  %v12020_v52 = vadd.f32 %v23452_v53, %v10672_v36  ;;  %v23593_v34 = vpop.f32.mrf.mxu1 }
 0x53e   : > { %v18432_v13 = vpop.eup %18431  ;;  %v12904_v31 = vmul.f32 %v18430_v63, %v23374_v14  ;;  %18453 = vrcp.f32 %v12654_v48  ;;  %v12502_v15 = vmul.f32 1.442695, %v12278_v32  ;;  %v10671_v24 = vadd.f32 %v23461_v3, %v24607_v39  ;;  %v24608_v48 = vld [vmem:[#allocation42_spill] sm:$0xff]  ;;  %v23615_v32 = vpop.f32.mrf.mxu0 }
 0x53f   : > { %v18434_v18 = vpop.eup %18433  ;;  %13033 = vst [vmem:[%s22603_s10 + $0x298] sm:$0xff] %v12905_v23  ;;  %v12657_v28 = vadd.f32 1.0, %v18432_v13  ;;  %18455 = vpow2.f32 %v12504_v35  ;;  %v12508_v50 = vmul.f32 1.442695, %v12281_v19  ;;  %v23602_v53 = vadd.f32 %v23204_v20, %v12017_v47  ;;  %v23604_v42 = vpop.f32.mrf.mxu1 }
 0x540   : > { %v18436_v2 = vpop.eup %18435  ;;  %13032 = vst [vmem:[%s22603_s10 + $0x290] sm:$0xff] %v12904_v31  ;;  %v12656_v40 = vadd.f32 1.0, %v18434_v18  ;;  %18457 = vpow2.f32 %v12502_v15  ;;  %v23608_v14 = vadd.f32 %v23204_v20, %v12020_v52  ;;  %v12019_v3 = vadd.f32 %v23463_v16, %v10671_v24  ;;  %v24610_v18 = vld [vmem:[#allocation44_spill] sm:$0xff] }
 0x541   : > { %v18438_v10 = vpop.eup %18437  ;;  %v12907_v36 = vmul.f32 %v18436_v2, %v23397_v37  ;;  %18459 = vrcp.f32 %v12657_v28  ;;  %v12280_v7 = vsub.f32 0.0, %v23602_v53  ;;  %v10674_v35 = vadd.f32 %v23471_v8, %v24608_v48  ;;  %v23617_v63 = vpop.f32.mrf.mxu1 }
 0x542   : > { %v18440_v23 = vpop.eup %18439  ;;  %v12906_v19 = vmul.f32 %v18438_v10, %v23404_v45  ;;  %18461 = vrcp.f32 %v12656_v40  ;;  %v12283_v16 = vsub.f32 0.0, %v23608_v14  ;;  %v23622_v47 = vadd.f32 %v23204_v20, %v12019_v3  ;;  %v24609_v45 = vld [vmem:[#allocation43_spill] sm:$0xff]  ;;  %v23639_v10 = vpop.f32.mrf.mxu0 }
 0x543   : > { %13035 = vst [vmem:[%s22603_s10 + $0x2a8] sm:$0xff] %v12907_v36  ;;  %v12659_v37 = vadd.f32 1.0, %v18440_v23  ;;  %18463 = vpow2.f32 %v12508_v50  ;;  %v12506_v52 = vmul.f32 1.442695, %v12280_v7  ;;  %v12022_v13 = vadd.f32 %v23473_v17, %v10674_v35  ;;  %v23626_v8 = vpop.f32.mrf.mxu1  ;;  %v24611_v17 = vld [vmem:[#allocation45_spill] sm:$0xff] }
 0x544   : > { %v18442_v31 = vpop.eup %18441  ;;  %13034 = vst [vmem:[%s22603_s10 + $0x2a0] sm:$0xff] %v12906_v19  ;;  %v12512_v15 = vmul.f32 1.442695, %v12283_v16  ;;  %v12282_v39 = vsub.f32 0.0, %v23622_v47  ;;  %v10673_v24 = vadd.f32 %v23483_v25, %v24609_v45  ;;  %v10676_v28 = vadd.f32 %v23498_v21, %v24610_v18 }
 0x545   : > { %v18444_v2 = vpop.eup %18443  ;;  %18465 = vrcp.f32 %v12659_v37  ;;  %v12658_v40 = vadd.f32 1.0, %v18442_v31  ;;  %v23635_v50 = vadd.f32 %v23204_v20, %v12022_v13  ;;  %v10675_v3 = vadd.f32 %v23509_v1, %v24611_v17  ;;  %v23646_v16 = vpop.f32.mrf.mxu1 }
 0x546   : > { %v18446_v36 = vpop.eup %18445  ;;  %v12909_v7 = vmul.f32 %v18444_v2, %v23430_v9  ;;  %18467 = vpow2.f32 %v12506_v52  ;;  %v12510_v25 = vmul.f32 1.442695, %v12282_v39  ;;  %v12021_v21 = vadd.f32 %v23485_v41, %v10673_v24  ;;  %v23658_v31 = vpop.f32.mrf.mxu0 }
 0x547   : > { %v18448_v48 = vpop.eup %18447  ;;  %v12908_v35 = vmul.f32 %v18446_v36, %v23435_v57  ;;  %18469 = vrcp.f32 %v12658_v40  ;;  %v12285_v23 = vsub.f32 0.0, %v23635_v50  ;;  %v12024_v19 = vadd.f32 %v23500_v6, %v10676_v28  ;;  %v24613_v28 = vld [vmem:[#allocation47_spill] sm:$0xff]  ;;  %v23670_v40 = vpop.f32.mrf.mxu1 }
 0x548   : > { %v18450_v1 = vpop.eup %18449  ;;  %13037 = vst [vmem:[%s22603_s10 + $0x2b8] sm:$0xff] %v12909_v7  ;;  %v12661_v37 = vadd.f32 1.0, %v18448_v48  ;;  %18471 = vpow2.f32 %v12512_v15  ;;  %v23650_v9 = vadd.f32 %v23204_v20, %v12021_v21  ;;  %v12023_v41 = vadd.f32 %v23511_v12, %v10675_v3 }
 0x549   : > { %v18452_v52 = vpop.eup %18451  ;;  %13036 = vst [vmem:[%s22603_s10 + $0x2b0] sm:$0xff] %v12908_v35  ;;  %v12911_v57 = vmul.f32 %v18450_v1, %v23446_v59  ;;  %18473 = vpow2.f32 %v12510_v25  ;;  %v12516_v13 = vmul.f32 1.442695, %v12285_v23  ;;  %v23656_v6 = vadd.f32 %v23204_v20, %v12024_v19  ;;  %v24612_v59 = vld [vmem:[#allocation46_spill] sm:$0xff] }
 0x54a   : > { %18475 = vrcp.f32 %v12661_v37  ;;  %v12660_v39 = vadd.f32 1.0, %v18452_v52  ;;  %v12284_v15 = vsub.f32 0.0, %v23650_v9  ;;  %v23662_v45 = vadd.f32 %v23204_v20, %v12023_v41 }
 0x54b   : > { %v18454_v24 = vpop.eup %18453  ;;  %13039 = vst [vmem:[%s22603_s10 + $0x2c8] sm:$0xff] %v12911_v57  ;;  %18477 = vpow2.f32 %v12516_v13  ;;  %v12287_v12 = vsub.f32 0.0, %v23656_v6  ;;  %v10678_v18 = vadd.f32 %v23521_v49, %v24612_v59  ;;  %v10677_v2 = vadd.f32 %v23531_v33, %v24613_v28  ;;  %v23676_v49 = vpop.f32.mrf.mxu0 }
 0x54c   : > { %v18456_v17 = vpop.eup %18455  ;;  %v12910_v3 = vmul.f32 %v18454_v24, %v23457_v22  ;;  %18479 = vrcp.f32 %v12660_v39  ;;  %v12514_v20 = vmul.f32 1.442695, %v12284_v15  ;;  %v12286_v36 = vsub.f32 0.0, %v23662_v45  ;;  %v24614_v22 = vld [vmem:[#allocation48_spill] sm:$0xff]  ;;  %v23693_v57 = vpop.f32.mrf.mxu1  ;;  %v24615_v39 = vld [vmem:[#allocation49_spill] sm:$0xff] }
 0x54d   : > { %v18458_v7 = vpop.eup %18457  ;;  %v12663_v25 = vadd.f32 1.0, %v18456_v17  ;;  %v12520_v21 = vmul.f32 1.442695, %v12287_v12  ;;  %v12026_v48 = vadd.f32 %v23523_v51, %v10678_v18  ;;  %v12025_v35 = vadd.f32 %v23533_v54, %v10677_v2  ;;  %v23685_v51 = vld [vmem:[%s23976_s2] ss:$0 sm:$0xff]  ;;  %v23702_v18 = vpop.f32.mrf.mxu0  ;;  %v24616_v2 = vld [vmem:[#allocation50_spill] sm:$0xff] }
 0x54e   : > { %v18460_v23 = vpop.eup %18459  ;;  %13038 = vst [vmem:[%s22603_s10 + $0x2c0] sm:$0xff] %v12910_v3  ;;  %v12662_v33 = vadd.f32 1.0, %v18458_v7  ;;  %18481 = vpow2.f32 %v12514_v20  ;;  %v12518_v19 = vmul.f32 1.442695, %v12286_v36  ;;  %v10680_v1 = vadd.f32 %v23544_v46, %v24614_v22  ;;  %v23712_v7 = vpop.f32.mrf.mxu1 }
 0x54f   : > { %v18462_v37 = vpop.eup %18461  ;;  %v12913_v41 = vmul.f32 %v18460_v23, %v23481_v30  ;;  %18483 = vrcp.f32 %v12663_v25  ;;  %v23688_v54 = vadd.f32 %v23685_v51, %v12026_v48  ;;  %v23691_v52 = vadd.f32 %v23685_v51, %v12025_v35 }
 0x550   : > { %v18464_v13 = vpop.eup %18463  ;;  %v12912_v46 = vmul.f32 %v18462_v37, %v23490_v4  ;;  %18485 = vrcp.f32 %v12662_v33  ;;  %v12028_v30 = vadd.f32 %v23546_v56, %v10680_v1  ;;  %v10679_v15 = vadd.f32 %v23556_v26, %v24615_v39  ;;  %v23725_v1 = vpop.f32.mrf.mxu0 }
 0x551   : > { %13041 = vst [vmem:[%s22603_s10 + $0x2d8] sm:$0xff] %v12913_v41  ;;  %v12665_v24 = vadd.f32 1.0, %v18464_v13  ;;  %18487 = vpow2.f32 %v12520_v21  ;;  %v12289_v12 = vsub.f32 0.0, %v23688_v54  ;;  %v12288_v59 = vsub.f32 0.0, %v23691_v52  ;;  %v23733_v39 = vpop.f32.mrf.mxu1 }
 0x552   : > { %v18466_v28 = vpop.eup %18465  ;;  %13040 = vst [vmem:[%s22603_s10 + $0x2d0] sm:$0xff] %v12912_v46  ;;  %18489 = vpow2.f32 %v12518_v19  ;;  %v23706_v4 = vadd.f32 %v23685_v51, %v12028_v30  ;;  %v12027_v56 = vadd.f32 %v23558_v60, %v10679_v15  ;;  %v10682_v26 = vadd.f32 %v23566_v0, %v24616_v2  ;;  %v24618_v19 = vld [vmem:[#allocation52_spill] sm:$0xff] }
 0x553   : > { %v18468_v17 = vpop.eup %18467  ;;  %v12915_v3 = vmul.f32 %v18466_v28, %v23505_v44  ;;  %18491 = vrcp.f32 %v12665_v24  ;;  %v12524_v20 = vmul.f32 1.442695, %v12289_v12  ;;  %v12522_v36 = vmul.f32 1.442695, %v12288_v59  ;;  %v24617_v44 = vld [vmem:[#allocation51_spill] sm:$0xff] }
 0x554   : > { %v18470_v25 = vpop.eup %18469  ;;  %v12664_v21 = vadd.f32 1.0, %v18468_v17  ;;  %v12291_v48 = vsub.f32 0.0, %v23706_v4  ;;  %v23716_v35 = vadd.f32 %v23685_v51, %v12027_v56  ;;  %v12030_v60 = vadd.f32 %v23568_v27, %v10682_v26  ;;  %v23741_v26 = vpop.f32.mrf.mxu0  ;;  %v24619_v17 = vld [vmem:[#allocation54_spill] sm:$0xff] }
 0x555   : > { %v18472_v23 = vpop.eup %18471  ;;  %13043 = vst [vmem:[%s22603_s10 + $0x2e8] sm:$0xff] %v12915_v3  ;;  %v12914_v0 = vmul.f32 %v18470_v25, %v23517_v62  ;;  %18493 = vpow2.f32 %v12524_v20  ;;  %v10681_v33 = vadd.f32 %v23583_v11, %v24617_v44  ;;  %v10684_v22 = vadd.f32 %v23593_v34, %v24618_v19  ;;  %v24620_v25 = vld [vmem:[#allocation56_spill] sm:$0xff] }
 0x556   : > { %v18474_v37 = vpop.eup %18473  ;;  %18495 = vrcp.f32 %v12664_v21  ;;  %v12667_v41 = vadd.f32 1.0, %v18472_v23  ;;  %v12528_v13 = vmul.f32 1.442695, %v12291_v48  ;;  %v12290_v46 = vsub.f32 0.0, %v23716_v35  ;;  %v23753_v48 = vpop.f32.mrf.mxu1 }
 0x557   : > { %v18476_v27 = vpop.eup %18475  ;;  %13042 = vst [vmem:[%s22603_s10 + $0x2e0] sm:$0xff] %v12914_v0  ;;  %v12666_v30 = vadd.f32 1.0, %v18474_v37  ;;  %18497 = vpow2.f32 %v12522_v36  ;;  %v23730_v62 = vadd.f32 %v23685_v51, %v12030_v60  ;;  %v12029_v11 = vadd.f32 %v23585_v43, %v10681_v33 }
 0x558   : > { %v18478_v34 = vpop.eup %18477  ;;  %v12917_v15 = vmul.f32 %v18476_v27, %v23526_v5  ;;  %18499 = vrcp.f32 %v12667_v41  ;;  %v12526_v24 = vmul.f32 1.442695, %v12290_v46  ;;  %v12032_v12 = vadd.f32 %v23595_v58, %v10684_v22  ;;  %v24621_v27 = vld [vmem:[#allocation58_spill] sm:$0xff] }
 0x559   : > { %v18480_v59 = vpop.eup %18479  ;;  %18501 = vrcp.f32 %v12666_v30  ;;  %v12669_v28 = vadd.f32 1.0, %v18478_v34  ;;  %v12293_v56 = vsub.f32 0.0, %v23730_v62  ;;  %v23739_v2 = vadd.f32 %v23685_v51, %v12029_v11  ;;  %v23772_v30 = vpop.f32.mrf.mxu1 }
 0x55a   : > { %13045 = vst [vmem:[%s22603_s10 + $0x2f8] sm:$0xff] %v12917_v15  ;;  %v12916_v43 = vmul.f32 %v18480_v59, %v23542_v29  ;;  %18503 = vpow2.f32 %v12528_v13  ;;  %v23746_v5 = vadd.f32 %v23685_v51, %v12032_v12  ;;  %v10683_v58 = vadd.f32 %v23604_v42, %v24619_v17  ;;  %v24622_v15 = vld [vmem:[#allocation60_spill] sm:$0xff] }
 0x55b   : > { %v18482_v3 = vpop.eup %18481  ;;  %18505 = vrcp.f32 %v12669_v28  ;;  %v12532_v20 = vmul.f32 1.442695, %v12293_v56  ;;  %v12292_v36 = vsub.f32 0.0, %v23739_v2  ;;  %v10686_v21 = vadd.f32 %v23617_v63, %v24620_v25  ;;  %v23760_v63 = vpop.f32.mrf.mxu0  ;;  %v24624_v25 = vld [vmem:[#allocation64_spill] sm:$0xff] }
 0x55c   : > { %v18484_v60 = vpop.eup %18483  ;;  %13044 = vst [vmem:[%s22603_s10 + $0x2f0] sm:$0xff] %v12916_v43  ;;  %v12668_v29 = vadd.f32 1.0, %v18482_v3  ;;  %18507 = vpow2.f32 %v12526_v24  ;;  %v12295_v23 = vsub.f32 0.0, %v23746_v5  ;;  %v12031_v0 = vadd.f32 %v23615_v32, %v10683_v58  ;;  %v24623_v58 = vld [vmem:[#allocation62_spill] sm:$0xff] }
 0x55d   : > { %v18486_v42 = vpop.eup %18485  ;;  %v12919_v44 = vmul.f32 %v18484_v60, %v23562_v38  ;;  %18509 = vpow2.f32 %v12532_v20  ;;  %v12530_v33 = vmul.f32 1.442695, %v12292_v36  ;;  %v12034_v19 = vadd.f32 %v23639_v10, %v10686_v21  ;;  %v23792_v21 = vpop.f32.mrf.mxu1 }
 0x55e   : > { %v18488_v22 = vpop.eup %18487  ;;  %v12918_v37 = vmul.f32 %v18486_v42, %v23573_v55  ;;  %18511 = vrcp.f32 %v12668_v29  ;;  %v12536_v41 = vmul.f32 1.442695, %v12295_v23  ;;  %v23764_v13 = vadd.f32 %v23685_v51, %v12031_v0 }
 0x55f   : > { %v18490_v46 = vpop.eup %18489  ;;  %13047 = vst [vmem:[%s22603_s10 + $0x308] sm:$0xff] %v12919_v44  ;;  %v12671_v32 = vadd.f32 1.0, %v18488_v22  ;;  %18513 = vpow2.f32 %v12530_v33  ;;  %v23768_v38 = vadd.f32 %v23685_v51, %v12034_v19  ;;  %v10685_v10 = vadd.f32 %v23626_v8, %v24621_v27  ;;  %v23781_v8 = vpop.f32.mrf.mxu0 }
 0x560   : > { %v18492_v11 = vpop.eup %18491  ;;  %13046 = vst [vmem:[%s22603_s10 + $0x300] sm:$0xff] %v12918_v37  ;;  %v12670_v55 = vadd.f32 1.0, %v18490_v46  ;;  %18515 = vpow2.f32 %v12536_v41  ;;  %v12294_v34 = vsub.f32 0.0, %v23764_v13  ;;  %v10688_v24 = vadd.f32 %v23646_v16, %v24622_v15 }
 0x561   : > { %v12921_v12 = vmul.f32 %v18492_v11, %v23579_v61  ;;  %18517 = vrcp.f32 %v12671_v32  ;;  %v12297_v59 = vsub.f32 0.0, %v23768_v38  ;;  %v12033_v28 = vadd.f32 %v23658_v31, %v10685_v10  ;;  %v24625_v11 = vld [vmem:[#allocation66_spill] sm:$0xff] }
 0x562   : > { %v18494_v56 = vpop.eup %18493  ;;  %18519 = vrcp.f32 %v12670_v55  ;;  %v12534_v43 = vmul.f32 1.442695, %v12294_v34  ;;  %v12036_v17 = vadd.f32 %v23676_v49, %v10688_v24  ;;  %v10687_v3 = vadd.f32 %v23670_v40, %v24623_v58  ;;  %v24626_v24 = vld [vmem:[#allocation68_spill] sm:$0xff] }
 0x563   : > { %v18496_v20 = vpop.eup %18495  ;;  %13049 = vst [vmem:[%s22603_s10 + $0x318] sm:$0xff] %v12921_v12  ;;  %v12673_v16 = vadd.f32 1.0, %v18494_v56  ;;  %v12540_v36 = vmul.f32 1.442695, %v12297_v59  ;;  %v23788_v61 = vadd.f32 %v23685_v51, %v12033_v28  ;;  %v10690_v31 = vadd.f32 %v23693_v57, %v24624_v25  ;;  %v18030_v57 = vpop.f32.mrf.mxu0  ;;  %v24627_v25 = vld [vmem:[#allocation70_spill] sm:$0xff] }
 0x564   : > { %v18498_v60 = vpop.eup %18497  ;;  %v12920_v29 = vmul.f32 %v18496_v20, %v23602_v53  ;;  %18521 = vpow2.f32 %v12534_v43  ;;  %v23796_v49 = vadd.f32 %v23685_v51, %v12036_v17  ;;  %v12035_v40 = vadd.f32 %v23702_v18, %v10687_v3 }
 0x565   : > { %v18500_v23 = vpop.eup %18499  ;;  %18523 = vrcp.f32 %v12673_v16  ;;  %v12672_v0 = vadd.f32 1.0, %v18498_v60  ;;  %v12296_v42 = vsub.f32 0.0, %v23788_v61  ;;  %v12038_v44 = vadd.f32 %v23725_v1, %v10690_v31  ;;  %v23811_v1 = vpop.f32.mrf.mxu1 }
 0x566   : > { %v18502_v33 = vpop.eup %18501  ;;  %13048 = vst [vmem:[%s22603_s10 + $0x310] sm:$0xff] %v12920_v29  ;;  %v12923_v19 = vmul.f32 %v18500_v23, %v23608_v14  ;;  %18525 = vpow2.f32 %v12540_v36  ;;  %v12299_v53 = vsub.f32 0.0, %v23796_v49  ;;  %v23805_v22 = vadd.f32 %v23685_v51, %v12035_v40  ;;  %v11890_v59 = vpop.f32.mrf.mxu0  ;;  %v24628_v40 = vld [vmem:[#allocation72_spill] sm:$0xff] }
 0x567   : > { %v18504_v18 = vpop.eup %18503  ;;  %v12922_v37 = vmul.f32 %v18502_v33, %v23622_v47  ;;  %18527 = vrcp.f32 %v12672_v0  ;;  %v12538_v41 = vmul.f32 1.442695, %v12296_v42  ;;  %v23809_v46 = vadd.f32 %v23685_v51, %v12038_v44  ;;  %v10552_v20 = vpop.f32.mrf.mxu1 }
 0x568   : > { %v18506_v32 = vpop.eup %18505  ;;  %13051 = vst [vmem:[%s22603_s10 + $0x328] sm:$0xff] %v12923_v19  ;;  %v12675_v14 = vadd.f32 1.0, %v18504_v18  ;;  %v12544_v27 = vmul.f32 1.442695, %v12299_v53  ;;  %v12298_v10 = vsub.f32 0.0, %v23805_v22  ;;  %v10689_v55 = vadd.f32 %v23712_v7, %v24625_v11  ;;  %v18033_v23 = vpop.f32.mrf.mxu0 }
 0x569   : > { %v18508_v34 = vpop.eup %18507  ;;  %13050 = vst [vmem:[%s22603_s10 + $0x320] sm:$0xff] %v12922_v37  ;;  %v12925_v47 = vmul.f32 %v18506_v32, %v23635_v50  ;;  %18529 = vpow2.f32 %v12538_v41  ;;  %v12301_v15 = vsub.f32 0.0, %v23809_v46  ;;  %v10692_v12 = vadd.f32 %v23733_v39, %v24626_v24  ;;  %v17840_v18 = vpop.f32.mrf.mxu1 }
 0x56a   : > { %v18510_v28 = vpop.eup %18509  ;;  %18531 = vrcp.f32 %v12675_v14  ;;  %v12674_v56 = vadd.f32 1.0, %v18508_v34  ;;  %v12542_v43 = vmul.f32 1.442695, %v12298_v10  ;;  %v12037_v17 = vadd.f32 %v23741_v26, %v10689_v55  ;;  %v11900_v10 = vpop.f32.mrf.mxu0  ;;  %v24630_v55 = vld [vmem:[#allocation76_spill] sm:$0xff] }
 0x56b   : > { %v18512_v58 = vpop.eup %18511  ;;  %13053 = vst [vmem:[%s22603_s10 + $0x338] sm:$0xff] %v12925_v47  ;;  %v12677_v7 = vadd.f32 1.0, %v18510_v28  ;;  %18533 = vpow2.f32 %v12544_v27  ;;  %v12548_v3 = vmul.f32 1.442695, %v12301_v15  ;;  %v12040_v50 = vadd.f32 %v23760_v63, %v10692_v12  ;;  %v10562_v28 = vpop.f32.mrf.mxu1 }
 0x56c   : > { %v18514_v16 = vpop.eup %18513  ;;  %v12924_v36 = vmul.f32 %v18512_v58, %v23650_v9  ;;  %18535 = vrcp.f32 %v12674_v56  ;;  %v23827_v39 = vadd.f32 %v23685_v51, %v12037_v17  ;;  %v10691_v31 = vadd.f32 %v23753_v48, %v24627_v25 }
 0x56d   : > { %v18516_v26 = vpop.eup %18515  ;;  %18537 = vrcp.f32 %v12677_v7  ;;  %v12676_v60 = vadd.f32 1.0, %v18514_v16  ;;  %v23832_v29 = vadd.f32 %v23685_v51, %v12040_v50  ;;  %v10694_v63 = vadd.f32 %v23772_v30, %v24628_v40  ;;  %v18036_v50 = vpop.f32.mrf.mxu0 }
 0x56e   : > { %v18518_v0 = vpop.eup %18517  ;;  %13052 = vst [vmem:[%s22603_s10 + $0x330] sm:$0xff] %v12924_v36  ;;  %v12679_v9 = vadd.f32 1.0, %v18516_v26  ;;  %18539 = vpow2.f32 %v12542_v43  ;;  %v12300_v42 = vsub.f32 0.0, %v23827_v39  ;;  %v12039_v44 = vadd.f32 %v23781_v8, %v10691_v31  ;;  %v24632_v36 = vld [vmem:[#allocation90_spill] sm:$0xff]  ;;  %v24633_v31 = vld [vmem:[#allocation91_spill] sm:$0xff] }
 0x56f   : > { %v18520_v48 = vpop.eup %18519  ;;  %v12927_v33 = vmul.f32 %v18518_v0, %v23656_v6  ;;  %18541 = vrcp.f32 %v12676_v60  ;;  %v12303_v19 = vsub.f32 0.0, %v23832_v29  ;;  %v12042_v53 = vadd.f32 %v18030_v57, %v10694_v63  ;;  %v24629_v6 = vld [vmem:[#allocation74_spill] sm:$0xff] }
 0x570   : > { %v12926_v30 = vmul.f32 %v18520_v48, %v23662_v45  ;;  %18543 = vrcp.f32 %v12679_v9  ;;  %v12546_v37 = vmul.f32 1.442695, %v12300_v42  ;;  %v23843_v41 = vadd.f32 %v23685_v51, %v12039_v44 }
 0x571   : > { %v18522_v32 = vpop.eup %18521  ;;  %13055 = vst [vmem:[%s22603_s10 + $0x348] sm:$0xff] %v12927_v33  ;;  %18545 = vpow2.f32 %v12548_v3  ;;  %v12552_v8 = vmul.f32 1.442695, %v12303_v19  ;;  %v23847_v14 = vadd.f32 %v23685_v51, %v12042_v53  ;;  %v10693_v27 = vadd.f32 %v23792_v21, %v24629_v6  ;;  %v24631_v3 = vld [vmem:[#allocation89_spill] sm:$0xff]  ;;  %v11910_v19 = vpop.f32.mrf.mxu0 }
 0x572   : > { %v18524_v57 = vpop.eup %18523  ;;  %13054 = vst [vmem:[%s22603_s10 + $0x340] sm:$0xff] %v12926_v30  ;;  %v12678_v45 = vadd.f32 1.0, %v18522_v32  ;;  %18547 = vpow2.f32 %v12546_v37  ;;  %v12302_v11 = vsub.f32 0.0, %v23843_v41  ;;  %v10696_v34 = vadd.f32 %v23811_v1, %v24630_v55 }
 0x573   : > { %v18526_v47 = vpop.eup %18525  ;;  %v12929_v15 = vmul.f32 %v18524_v57, %v23688_v54  ;;  %18549 = vpow2.f32 %v12552_v8  ;;  %v12305_v24 = vsub.f32 0.0, %v23847_v14  ;;  %v12041_v12 = vadd.f32 %v11890_v59, %v10693_v27 }
 0x574   : > { %v18528_v21 = vpop.eup %18527  ;;  %18551 = vrcp.f32 %v12678_v45  ;;  %v12681_v56 = vadd.f32 1.0, %v18526_v47  ;;  %v12550_v43 = vmul.f32 1.442695, %v12302_v11  ;;  %v12044_v17 = vadd.f32 %v18033_v23, %v10696_v34 }
 0x575   : > { %13057 = vst [vmem:[%s22603_s10 + $0x358] sm:$0xff] %v12929_v15  ;;  %v12928_v58 = vmul.f32 %v18528_v21, %v23691_v52  ;;  %v12556_v7 = vmul.f32 1.442695, %v12305_v24  ;;  %v23860_v1 = vadd.f32 %v23685_v51, %v12041_v12  ;;  %v10695_v54 = vadd.f32 %v10552_v20, %v24631_v3 }
 0x576   : > { %v18530_v16 = vpop.eup %18529  ;;  %18553 = vrcp.f32 %v12681_v56  ;;  %v23864_v59 = vadd.f32 %v23685_v51, %v12044_v17  ;;  %v10698_v25 = vadd.f32 %v17840_v18, %v24632_v36  ;;  %v10697_v26 = vadd.f32 %v10562_v28, %v24633_v31 }
 0x577   : > { %v18532_v60 = vpop.eup %18531  ;;  %13056 = vst [vmem:[%s22603_s10 + $0x350] sm:$0xff] %v12928_v58  ;;  %v12680_v40 = vadd.f32 1.0, %v18530_v16  ;;  %18555 = vpow2.f32 %v12550_v43  ;;  %v12304_v52 = vsub.f32 0.0, %v23860_v1  ;;  %v12043_v63 = vadd.f32 %v11900_v10, %v10695_v54 }
 0x578   : > { %v18534_v23 = vpop.eup %18533  ;;  %v12931_v20 = vmul.f32 %v18532_v60, %v23706_v4  ;;  %18557 = vpow2.f32 %v12556_v7  ;;  %v12307_v0 = vsub.f32 0.0, %v23864_v59  ;;  %v12046_v9 = vadd.f32 %v18036_v50, %v10698_v25 }
 0x579   : > { %v18536_v42 = vpop.eup %18535  ;;  %18559 = vrcp.f32 %v12680_v40  ;;  %v12683_v44 = vadd.f32 1.0, %v18534_v23  ;;  %v12554_v48 = vmul.f32 1.442695, %v12304_v52  ;;  %v23873_v33 = vadd.f32 %v23685_v51, %v12043_v63 }
 0x57a   : > { %v18538_v53 = vpop.eup %18537  ;;  %13059 = vst [vmem:[%s22603_s10 + $0x368] sm:$0xff] %v12931_v20  ;;  %v12930_v18 = vmul.f32 %v18536_v42, %v23716_v35  ;;  %v12560_v30 = vmul.f32 1.442695, %v12307_v0  ;;  %v23878_v4 = vadd.f32 %v23685_v51, %v12046_v9  ;;  %v12045_v37 = vadd.f32 %v11910_v19, %v10697_v26 }
 0x57b   : > { %v18540_v32 = vpop.eup %18539  ;;  %v12933_v8 = vmul.f32 %v18538_v53, %v23730_v62  ;;  %18561 = vrcp.f32 %v12683_v44  ;;  %v12306_v6 = vsub.f32 0.0, %v23873_v33 }
 0x57c   : > { %v18542_v27 = vpop.eup %18541  ;;  %13058 = vst [vmem:[%s22603_s10 + $0x360] sm:$0xff] %v12930_v18  ;;  %v12682_v10 = vadd.f32 1.0, %v18540_v32  ;;  %18563 = vpow2.f32 %v12554_v48  ;;  %v12309_v57 = vsub.f32 0.0, %v23878_v4  ;;  %v23885_v35 = vadd.f32 %v23685_v51, %v12045_v37 }
 0x57d   : > { %v18544_v45 = vpop.eup %18543  ;;  %13061 = vst [vmem:[%s22603_s10 + $0x378] sm:$0xff] %v12933_v8  ;;  %v12932_v11 = vmul.f32 %v18542_v27, %v23739_v2  ;;  %18565 = vpow2.f32 %v12560_v30  ;;  %v12558_v62 = vmul.f32 1.442695, %v12306_v6 }
 0x57e   : > { %v18546_v55 = vpop.eup %18545  ;;  %v12935_v34 = vmul.f32 %v18544_v45, %v23746_v5  ;;  %18567 = vrcp.f32 %v12682_v10  ;;  %v12564_v47 = vmul.f32 1.442695, %v12309_v57  ;;  %v12308_v15 = vsub.f32 0.0, %v23885_v35 }
 0x57f   : > { %v18548_v24 = vpop.eup %18547  ;;  %13060 = vst [vmem:[%s22603_s10 + $0x370] sm:$0xff] %v12932_v11  ;;  %v12685_v12 = vadd.f32 1.0, %v18546_v55  ;;  %18569 = vpow2.f32 %v12558_v62 }
 0x580   : > { %v18550_v51 = vpop.eup %18549  ;;  %13063 = vst [vmem:[%s22603_s10 + $0x388] sm:$0xff] %v12935_v34  ;;  %v12684_v28 = vadd.f32 1.0, %v18548_v24  ;;  %18571 = vpow2.f32 %v12564_v47  ;;  %v12562_v2 = vmul.f32 1.442695, %v12308_v15 }
 0x581   : > { %v18552_v21 = vpop.eup %18551  ;;  %18573 = vrcp.f32 %v12685_v12  ;;  %v12687_v56 = vadd.f32 1.0, %v18550_v51 }
 0x582   : > { %v12934_v5 = vmul.f32 %v18552_v21, %v23764_v13  ;;  %18575 = vrcp.f32 %v12684_v28 }
 0x583   : > { %v18554_v43 = vpop.eup %18553  ;;  %18577 = vrcp.f32 %v12687_v56 }
 0x584   : > { %v18556_v17 = vpop.eup %18555  ;;  %13062 = vst [vmem:[%s22603_s10 + $0x380] sm:$0xff] %v12934_v5  ;;  %v12937_v58 = vmul.f32 %v18554_v43, %v23768_v38  ;;  %18579 = vpow2.f32 %v12562_v2 }
 0x585   : > { %v18558_v7 = vpop.eup %18557  ;;  %v12686_v3 = vadd.f32 1.0, %v18556_v17 }
 0x586   : > { %v18560_v54 = vpop.eup %18559  ;;  %13065 = vst [vmem:[%s22603_s10 + $0x398] sm:$0xff] %v12937_v58  ;;  %v12689_v50 = vadd.f32 1.0, %v18558_v7 }
 0x587   : > { %v12936_v16 = vmul.f32 %v18560_v54, %v23788_v61  ;;  %18581 = vrcp.f32 %v12686_v3 }
 0x588   : > { %v18562_v36 = vpop.eup %18561  ;;  %18583 = vrcp.f32 %v12689_v50 }
 0x589   : > { %v18564_v13 = vpop.eup %18563  ;;  %13064 = vst [vmem:[%s22603_s10 + $0x390] sm:$0xff] %v12936_v16  ;;  %v12939_v25 = vmul.f32 %v18562_v36, %v23796_v49 }
 0x58a   : > { %v18566_v31 = vpop.eup %18565  ;;  %v12688_v26 = vadd.f32 1.0, %v18564_v13 }
 0x58b   : > { %v18568_v38 = vpop.eup %18567  ;;  %13067 = vst [vmem:[%s22603_s10 + $0x3a8] sm:$0xff] %v12939_v25  ;;  %v12691_v60 = vadd.f32 1.0, %v18566_v31 }
 0x58c   : > { %v18570_v40 = vpop.eup %18569  ;;  %v12938_v52 = vmul.f32 %v18568_v38, %v23805_v22  ;;  %18585 = vrcp.f32 %v12688_v26 }
 0x58d   : > { %v18572_v61 = vpop.eup %18571  ;;  %18587 = vrcp.f32 %v12691_v60  ;;  %v12690_v63 = vadd.f32 1.0, %v18570_v40 }
 0x58e   : > { %v18574_v23 = vpop.eup %18573  ;;  %13066 = vst [vmem:[%s22603_s10 + $0x3a0] sm:$0xff] %v12938_v52  ;;  %v12693_v20 = vadd.f32 1.0, %v18572_v61 }
 0x58f   : > { %v18576_v0 = vpop.eup %18575  ;;  %v12941_v49 = vmul.f32 %v18574_v23, %v23809_v46  ;;  %18589 = vrcp.f32 %v12690_v63 }
 0x590   : > { %v18578_v9 = vpop.eup %18577  ;;  %v12940_v42 = vmul.f32 %v18576_v0, %v23827_v39  ;;  %18591 = vrcp.f32 %v12693_v20 }
 0x591   : > { %v18580_v22 = vpop.eup %18579  ;;  %13069 = vst [vmem:[%s22603_s10 + $0x3b8] sm:$0xff] %v12941_v49  ;;  %v12943_v44 = vmul.f32 %v18578_v9, %v23832_v29 }
 0x592   : > { %13068 = vst [vmem:[%s22603_s10 + $0x3b0] sm:$0xff] %v12940_v42  ;;  %v12692_v48 = vadd.f32 1.0, %v18580_v22 }
 0x593   : > { %13071 = vst [vmem:[%s22603_s10 + $0x3c8] sm:$0xff] %v12943_v44 }
 0x594   : > { %v18582_v19 = vpop.eup %18581  ;;  %18593 = vrcp.f32 %v12692_v48 }
 0x595   : > { %v18584_v46 = vpop.eup %18583  ;;  %v12942_v53 = vmul.f32 %v18582_v19, %v23843_v41 }
 0x596   : > { %v12945_v39 = vmul.f32 %v18584_v46, %v23847_v14 }
 0x597   : > { %13070 = vst [vmem:[%s22603_s10 + $0x3c0] sm:$0xff] %v12942_v53 }
 0x598   : > { %13073 = vst [vmem:[%s22603_s10 + $0x3d8] sm:$0xff] %v12945_v39 }
 0x599   : > { %v18586_v18 = vpop.eup %18585 }
 0x59a   : > { %v18588_v29 = vpop.eup %18587  ;;  %v12944_v30 = vmul.f32 %v18586_v18, %v23860_v1 }
 0x59b   : > { %v12947_v37 = vmul.f32 %v18588_v29, %v23864_v59 }
 0x59c   : > { %v18590_v32 = vpop.eup %18589  ;;  %13072 = vst [vmem:[%s22603_s10 + $0x3d0] sm:$0xff] %v12944_v30 }
 0x59d   : > { %v18592_v8 = vpop.eup %18591  ;;  %13075 = vst [vmem:[%s22603_s10 + $0x3e8] sm:$0xff] %v12947_v37  ;;  %v12946_v41 = vmul.f32 %v18590_v32, %v23873_v33 }
 0x59e   : > { %v12949_v14 = vmul.f32 %v18592_v8, %v23878_v4 }
 0x59f   : > { %13074 = vst [vmem:[%s22603_s10 + $0x3e0] sm:$0xff] %v12946_v41 }
 0x5a0   : > { %13077 = vst [vmem:[%s22603_s10 + $0x3f8] sm:$0xff] %v12949_v14 }
 0x5a1   : > { %v18594_v6 = vpop.eup %18593 }
 0x5a2   : > { %v12948_v1 = vmul.f32 %v18594_v6, %v23885_v35 }
 0x5a4   : > { %13076 = vst [vmem:[%s22603_s10 + $0x3f0] sm:$0xff] %v12948_v1 }
 0x5a5   : > { %18612 = shalt.err (!%p18609_p3)
}
 0x5a6   : > { %s18613_s7 = scalar_lea.hbm %s23926_s29, 16384  ;;  %s18617_s9 = scalar_lea.hbm %s23977_s3, 32768 }
 0x5a7   : > { %p18614_p4 = scmp.ne.s32.totalorder %s23926_s29, %s18613_s7  ;;  %p18618_p9 = scmp.lt.s32.totalorder %s23926_s29, %s23977_s3 }
 0x5a8   : > { %p18619_p10 = scmp.lt.s32.totalorder %s18617_s9, %s18613_s7 }
 0x5a9   : > { %p18615_p7 = pnand %p18614_p4, %p18722_p5 }
 0x5aa   : > { %p18620_p11 = por %p18619_p10, %p18618_p9 }
 0x5ab   : > { %p18616_p8 = pneg %p18615_p7 }
 0x5ad   : > { %p18621_p12 = pnand %p18620_p11, %p18616_p8 }
 0x5af   : > { %18624 = shalt.err (!%p18621_p12)
}
 0x5b0   : > { %s18662_s19 = smov 128   ;;  %s18663_s20 = smov 8  }
 0x5b1   : > { %18042 = dma.vmem_to_hbm [thread:$0]  (%p18722_p5), %s23928_s26, 16384, %s23926_s29, %s23934_s30, %s18662_s19, %s18662_s19, %s18663_s20  }
 0x5b2 PF: > { %p18048_p13 = scmp.ge.s32.totalorder %s18659_s15, 2  ;;  %s13107_s24 = sand.u32 1, %s18647_s12  }
 0x5b3   : > { %s13108_s25 = scalar_lea.sflag [#allocation3], %s13107_s24 }
 0x5b4   : > { %p18045_p0 = pnand %p18048_p13, %p18726_p6 }
 0x5b6   : > { %p18046_p1 = pneg %p18045_p0 }
 0x5b8   : > { %18642 = dma.done.wait (%p18046_p1), %s13108_s25, 16384  }
 0x5b9   : > { %18644 = vsyncadd (%p18046_p1), %s13108_s25, 4294950912  ;;  %p13_p2 = scmp.ge.s32.totalorder %s18709_s18, 4   ;;  %s24634_s12 = smov %s18651_s13 }
 0x5ba   : > { %s24635_s13 = smov %s18655_s14  ;;  %s24636_s14 = smov %s18720_s21 }
 0x5bb   : > { %s24637_s15 = smov %s18709_s18  ;;  %15 = sbr.rel (!%p13_p2) target bundleno = 3 (0x3), region = 77 }
 0x5c0   :  { %13113 = vsyncpa [#allocation3], 1 }
 0x5c1   :  { %13115 = vsyncpa [#allocation3 + $0x1], 1 }

</bundles_post_ra>
